<compile_context>
chip_gen: v7x
topology: tpu7x:2x2x1
jax: 0.10.0
libtpu: 0.0.40
codegen_flags: <defaults>
</compile_context>

<pallas_src>
import functools

import jax
import jax.numpy as jnp
from jax.experimental import pallas as pl
from jax.experimental.pallas import tpu as pltpu


# ----------------------------------------------------------------------------
# Kernel 1: detection post-processing
# ----------------------------------------------------------------------------
def _detect_kernel(x_ref, det_ref, *, nc):
    """x_ref: (1, tb, C) raw preds; det_ref: (1, tb, 6) = [x1,y1,x2,y2,score,cls]."""
    x = x_ref[0]                                   # (tb, C)
    cx, cy = x[:, 0:1], x[:, 1:2]
    w, h = x[:, 2:3], x[:, 3:4]
    conf = x[:, 4:5]
    cls = x[:, 5:5 + nc] * conf                    # scores *= conf

    # boxes @ convert_matrix  (xywh -> xyxy), written elementwise (same math).
    det_ref[0, :, 0:1] = cx - 0.5 * w
    det_ref[0, :, 1:2] = cy - 0.5 * h
    det_ref[0, :, 2:3] = cx + 0.5 * w
    det_ref[0, :, 3:4] = cy + 0.5 * h

    max_s = jnp.max(cls, axis=-1, keepdims=True)   # scores.max(2, keepdim=True)
    lane = jax.lax.broadcasted_iota(jnp.int32, cls.shape, 1)
    cat = jnp.min(jnp.where(cls == max_s, lane, nc), axis=-1, keepdims=True)
    det_ref[0, :, 4:5] = max_s
    det_ref[0, :, 5:6] = cat.astype(jnp.float32)


def _pick_tile(n, candidates=(1024, 512, 256, 128, 64, 32, 16, 8)):
    for c in candidates:
        if n % c == 0:
            return c
    return n


def detect_postprocess(pred, *, nc):
    """pred: (B, N, 5+nc+nm) -> det (B, N, 6) = [x1, y1, x2, y2, max_score, class]."""
    B, N, C = pred.shape
    n_pad = pl.cdiv(N, 8) * 8
    if n_pad != N:
        pred = jnp.pad(pred, ((0, 0), (0, n_pad - N), (0, 0)))
    tb = _pick_tile(n_pad)
    det = pl.pallas_call(
        functools.partial(_detect_kernel, nc=nc),
        out_shape=jax.ShapeDtypeStruct((B, n_pad, 6), jnp.float32),
        grid=(B, n_pad // tb),
        in_specs=[pl.BlockSpec((1, tb, C), lambda b, i: (b, i, 0))],
        out_specs=pl.BlockSpec((1, tb, 6), lambda b, i: (b, i, 0)),
        compiler_params=pltpu.CompilerParams(
            dimension_semantics=("parallel", "parallel")),
    )(pred)
    return det[:, :N] if n_pad != N else det


# ----------------------------------------------------------------------------
# Kernel 2: fused mask head (matmul + sigmoid + box crop), lane-dense output
# ----------------------------------------------------------------------------
def _mask_kernel(mask_ref, proto_ref, box_ref, coord_ref, out_ref):
    """mask_ref: (1, P, nm); proto_ref: (1, nm, HW); box_ref: (1, P, 4) pooled
    xyxy boxes; coord_ref: (2, HW) = [col; row] pixel coords; out_ref: (1, P, HW)."""
    logits = jnp.dot(mask_ref[0], proto_ref[0],
                     preferred_element_type=jnp.float32)           # (P, HW) on MXU
    m = 1.0 / (1.0 + jnp.exp(-logits))                             # sigmoid
    b = box_ref[0]
    x1, y1, x2, y2 = b[:, 0:1], b[:, 1:2], b[:, 2:3], b[:, 3:4]    # (P, 1)
    col = coord_ref[0:1, :]                                        # (1, HW)
    row = coord_ref[1:2, :]
    keep = (col >= x1) & (col < x2) & (row >= y1) & (row < y2)     # (P, HW)
    out_ref[0] = jnp.where(keep, m, 0.0).astype(out_ref.dtype)


def mask_head(sel_mask, proto_flat, boxes_ds, coords):
    """sel_mask: (B, P, nm); proto_flat: (B, nm, HW); boxes_ds: (B, P, 4);
    coords: (2, HW). Returns cropped sigmoid masks (B, P, HW)."""
    B, P, nm = sel_mask.shape
    HW = proto_flat.shape[-1]
    return pl.pallas_call(
        _mask_kernel,
        out_shape=jax.ShapeDtypeStruct((B, P, HW), jnp.float32),
        grid=(B,),
        in_specs=[
            pl.BlockSpec((1, P, nm), lambda b: (b, 0, 0)),
            pl.BlockSpec((1, nm, HW), lambda b: (b, 0, 0)),
            pl.BlockSpec((1, P, 4), lambda b: (b, 0, 0)),
            pl.BlockSpec((2, HW), lambda b: (0, 0)),
        ],
        out_specs=pl.BlockSpec((1, P, HW), lambda b: (b, 0, 0)),
        compiler_params=pltpu.CompilerParams(dimension_semantics=("parallel",)),
    )(sel_mask, proto_flat, boxes_ds, coords)


# ----------------------------------------------------------------------------
# Deterministic stand-in for the random ORT_NMS placeholder
# ----------------------------------------------------------------------------
def _fake_nms_indices(batch, n_boxes, max_obj, tile=8):
    # TODO(synk): reference ORT_NMS is a random stub (random num_det / random
    # sorted batch ids, idxs = arange(100, 100+num_det)) used only for ONNX export;
    # replaced by a deterministic, static-shape selection (num_det = max_obj).
    per_batch = (-(-max_obj // batch) + tile - 1) // tile * tile   # multiple of 8
    t_pad = batch * per_batch
    X = jnp.repeat(jnp.arange(batch, dtype=jnp.int32), per_batch)  # sorted batches
    Y = jnp.clip(100 + jnp.arange(t_pad, dtype=jnp.int32), 0, n_boxes - 1)
    return X, Y, per_batch, t_pad


# ----------------------------------------------------------------------------
# End2End (ORT path) forward
# ----------------------------------------------------------------------------
def end2end_forward(pred, proto, *, nc=80, max_obj=100, max_wh=640,
                    pooler_scale=0.25):
    """ONNX_ORT head. pred: (B, N, 5+nc+nm), proto: (B, nm, H, W).
    Returns (max_obj, 7 + H*W): [batch_idx, x1, y1, x2, y2, class, score, mask...]."""
    # TODO(synk): End2End.model (the detection backbone) is an arbitrary external
    # nn.Module constructor argument; not translated — this consumes (pred, proto).
    del max_wh  # only feeds the random NMS placeholder in the reference
    B, N, C = pred.shape
    _, nm, ph, pw = proto.shape
    assert C >= 5 + nc + nm

    det = detect_postprocess(pred, nc=nc)                       # (B, N, 6)

    X, Y, per_batch, t_pad = _fake_nms_indices(B, N, max_obj)

    sel = det[X, Y]                                             # (T, 6) gather
    sel_boxes, sel_score, sel_cat = sel[:, 0:4], sel[:, 4:5], sel[:, 5:6]
    sel_mask = pred[X, Y, 5 + nc:5 + nc + nm]                   # (T, nm)

    hw = ph * pw
    coords = jnp.stack(
        [jnp.tile(jnp.arange(pw, dtype=jnp.float32), ph),        # column index (r)
         jnp.repeat(jnp.arange(ph, dtype=jnp.float32), pw)], 0)  # row index (c)

    masks = mask_head(
        sel_mask.reshape(B, per_batch, nm),
        proto.reshape(B, nm, hw).astype(jnp.float32),
        (sel_boxes * pooler_scale).reshape(B, per_batch, 4),
        coords,
    ).reshape(t_pad, hw)

    out = jnp.concatenate(
        [X[:, None].astype(jnp.float32), sel_boxes, sel_cat, sel_score, masks], 1)
    return out[:max_obj]


# ----------------------------------------------------------------------------
# Pure-JAX reference (mirrors ONNX_ORT.forward with the same index selection)
# ----------------------------------------------------------------------------
def reference_forward(pred, proto, X, Y, *, nc=80, pooler_scale=0.25):
    boxes = pred[:, :, :4]
    conf = pred[:, :, 4:5]
    scores = pred[:, :, 5:5 + nc] * conf
    B, nm, ph, pw = proto.shape
    maskf = pred[:, :, 5 + nc:5 + nc + nm]
    cx, cy, w, h = boxes[..., 0], boxes[..., 1], boxes[..., 2], boxes[..., 3]
    boxes = jnp.stack([cx - 0.5 * w, cy - 0.5 * h, cx + 0.5 * w, cy + 0.5 * h], -1)
    max_score = scores.max(2, keepdims=True)
    cat = jnp.argmax(scores, 2)[..., None].astype(jnp.float32)
    sel_boxes, sel_cat, sel_score = boxes[X, Y], cat[X, Y], max_score[X, Y]
    sel_mask = maskf[X, Y]
    T = X.shape[0]
    proto_g = proto[X].reshape(T, nm, ph * pw)
    m = jax.nn.sigmoid(
        jnp.einsum("tn,tnk->tk", sel_mask, proto_g,
                   precision=jax.lax.Precision.HIGHEST)).reshape(T, ph, pw)
    db = sel_boxes * pooler_scale
    x1, y1, x2, y2 = [db[:, i][:, None, None] for i in range(4)]
    r = jnp.arange(pw, dtype=jnp.float32)[None, None, :]
    c = jnp.arange(ph, dtype=jnp.float32)[None, :, None]
    m = m * ((r >= x1) & (r < x2) & (c >= y1) & (c < y2)).astype(jnp.float32)
    return jnp.concatenate(
        [X[:, None].astype(jnp.float32), sel_boxes, sel_cat, sel_score,
         m.reshape(T, ph * pw)], 1)


if __name__ == "__main__":
    key = jax.random.PRNGKey(0)
    B, N = 2, 512
    nc, nm = 80, 32
    ph = pw = 32
    max_obj = 100
    pooler_scale = 0.25

    kxy, kwh, kconf, kcls, kmsk, kproto = jax.random.split(key, 6)
    xy = jax.random.uniform(kxy, (B, N, 2), jnp.float32, 16.0, 112.0)
    wh = jax.random.uniform(kwh, (B, N, 2), jnp.float32, 8.0, 64.0)
    conf = jax.random.uniform(kconf, (B, N, 1), jnp.float32)
    cls = jax.random.uniform(kcls, (B, N, nc), jnp.float32)
    maskf = jax.random.normal(kmsk, (B, N, nm), jnp.float32)
    pred = jnp.concatenate([xy, wh, conf, cls, maskf], axis=2)   # (B, N, 5+nc+nm)
    proto = jax.random.normal(kproto, (B, nm, ph, pw), jnp.float32) * 0.5

    fwd = jax.jit(functools.partial(end2end_forward, nc=nc, max_obj=max_obj,
                                    pooler_scale=pooler_scale))
    out = jax.block_until_ready(fwd(pred, proto))
    assert out.shape == (max_obj, 7 + ph * pw), out.shape

    X, Y, _, _ = _fake_nms_indices(B, N, max_obj)
    ref = reference_forward(pred, proto, X, Y, nc=nc,
                            pooler_scale=pooler_scale)[:max_obj]
    err = float(jnp.max(jnp.abs(out - ref)))
    assert jnp.allclose(out, ref, atol=5e-3, rtol=5e-3), err

    print("KERNEL_OK")
</pallas_src>

<mosaic_0001>
module attributes {stable_mosaic.version = 11 : i64} {
  func.func @_detect_kernel(%arg0: i32, %arg1: i32, %arg2: memref<1x512x117xf32, #tpu.memory_space<vmem>>, %arg3: memref<1x512x6xf32, #tpu.memory_space<vmem>>) attributes {dimension_semantics = [#tpu.dimension_semantics<parallel>, #tpu.dimension_semantics<parallel>], iteration_bounds = array<i64: 2, 1>, scalar_prefetch = 0 : i64, scratch_operands = 0 : i64, tpu.core_type = #tpu.core_type<tc>, window_params = [{transform_indices = @transform_0, window_bounds = array<i64: 1, 512, 117>}, {transform_indices = @transform_1, window_bounds = array<i64: 1, 512, 6>}]} {
    %c0 = arith.constant 0 : index
    %c0_0 = arith.constant 0 : index
    %c0_1 = arith.constant 0 : index
    %0 = vector.load %arg2[%c0, %c0_0, %c0_1] : memref<1x512x117xf32, #tpu.memory_space<vmem>>, vector<1x512x117xf32>
    %1 = vector.shape_cast %0 : vector<1x512x117xf32> to vector<512x117xf32>
    %2 = vector.extract_strided_slice %1 {offsets = [0, 0], sizes = [512, 1], strides = [1, 1]} : vector<512x117xf32> to vector<512x1xf32>
    %3 = vector.extract_strided_slice %1 {offsets = [0, 1], sizes = [512, 1], strides = [1, 1]} : vector<512x117xf32> to vector<512x1xf32>
    %4 = vector.extract_strided_slice %1 {offsets = [0, 2], sizes = [512, 1], strides = [1, 1]} : vector<512x117xf32> to vector<512x1xf32>
    %5 = vector.extract_strided_slice %1 {offsets = [0, 3], sizes = [512, 1], strides = [1, 1]} : vector<512x117xf32> to vector<512x1xf32>
    %6 = vector.extract_strided_slice %1 {offsets = [0, 4], sizes = [512, 1], strides = [1, 1]} : vector<512x117xf32> to vector<512x1xf32>
    %7 = vector.extract_strided_slice %1 {offsets = [0, 5], sizes = [512, 80], strides = [1, 1]} : vector<512x117xf32> to vector<512x80xf32>
    %8 = vector.broadcast %6 : vector<512x1xf32> to vector<512x80xf32>
    %9 = arith.mulf %7, %8 : vector<512x80xf32>
    %cst = arith.constant 5.000000e-01 : f32
    %10 = vector.broadcast %cst : f32 to vector<512x1xf32>
    %11 = arith.mulf %10, %4 : vector<512x1xf32>
    %12 = arith.subf %2, %11 : vector<512x1xf32>
    %c0_2 = arith.constant 0 : index
    %c0_3 = arith.constant 0 : index
    %c0_4 = arith.constant 0 : index
    %13 = vector.load %arg3[%c0_2, %c0_3, %c0_4] : memref<1x512x6xf32, #tpu.memory_space<vmem>>, vector<1x512x1xf32>
    %14 = vector.shape_cast %13 : vector<1x512x1xf32> to vector<512x1xf32>
    %15 = vector.shape_cast %12 : vector<512x1xf32> to vector<1x512x1xf32>
    tpu.vector_store %arg3[%c0_2, %c0_3, %c0_4], %15 {strides = array<i32>} : memref<1x512x6xf32, #tpu.memory_space<vmem>>, vector<1x512x1xf32>,
    %cst_5 = arith.constant 5.000000e-01 : f32
    %16 = vector.broadcast %cst_5 : f32 to vector<512x1xf32>
    %17 = arith.mulf %16, %5 : vector<512x1xf32>
    %18 = arith.subf %3, %17 : vector<512x1xf32>
    %c0_6 = arith.constant 0 : index
    %c0_7 = arith.constant 0 : index
    %c1 = arith.constant 1 : index
    %19 = vector.load %arg3[%c0_6, %c0_7, %c1] : memref<1x512x6xf32, #tpu.memory_space<vmem>>, vector<1x512x1xf32>
    %20 = vector.shape_cast %19 : vector<1x512x1xf32> to vector<512x1xf32>
    %21 = vector.shape_cast %18 : vector<512x1xf32> to vector<1x512x1xf32>
    tpu.vector_store %arg3[%c0_6, %c0_7, %c1], %21 {strides = array<i32>} : memref<1x512x6xf32, #tpu.memory_space<vmem>>, vector<1x512x1xf32>,
    %cst_8 = arith.constant 5.000000e-01 : f32
    %22 = vector.broadcast %cst_8 : f32 to vector<512x1xf32>
    %23 = arith.mulf %22, %4 : vector<512x1xf32>
    %24 = arith.addf %2, %23 : vector<512x1xf32>
    %c0_9 = arith.constant 0 : index
    %c0_10 = arith.constant 0 : index
    %c2 = arith.constant 2 : index
    %25 = vector.load %arg3[%c0_9, %c0_10, %c2] : memref<1x512x6xf32, #tpu.memory_space<vmem>>, vector<1x512x1xf32>
    %26 = vector.shape_cast %25 : vector<1x512x1xf32> to vector<512x1xf32>
    %27 = vector.shape_cast %24 : vector<512x1xf32> to vector<1x512x1xf32>
    tpu.vector_store %arg3[%c0_9, %c0_10, %c2], %27 {strides = array<i32>} : memref<1x512x6xf32, #tpu.memory_space<vmem>>, vector<1x512x1xf32>,
    %cst_11 = arith.constant 5.000000e-01 : f32
    %28 = vector.broadcast %cst_11 : f32 to vector<512x1xf32>
    %29 = arith.mulf %28, %5 : vector<512x1xf32>
    %30 = arith.addf %3, %29 : vector<512x1xf32>
    %c0_12 = arith.constant 0 : index
    %c0_13 = arith.constant 0 : index
    %c3 = arith.constant 3 : index
    %31 = vector.load %arg3[%c0_12, %c0_13, %c3] : memref<1x512x6xf32, #tpu.memory_space<vmem>>, vector<1x512x1xf32>
    %32 = vector.shape_cast %31 : vector<1x512x1xf32> to vector<512x1xf32>
    %33 = vector.shape_cast %30 : vector<512x1xf32> to vector<1x512x1xf32>
    tpu.vector_store %arg3[%c0_12, %c0_13, %c3], %33 {strides = array<i32>} : memref<1x512x6xf32, #tpu.memory_space<vmem>>, vector<1x512x1xf32>,
    %cst_14 = arith.constant dense<0xFF800000> : vector<512xf32>
    %34 = vector.multi_reduction <maximumf>, %9, %cst_14 [1] : vector<512x80xf32> to vector<512xf32>
    %35 = vector.shape_cast %34 : vector<512xf32> to vector<512x1xf32>
    %36 = tpu.iota {dimensions = array<i32: 1>} : vector<512x80xi32>
    %37 = vector.broadcast %35 : vector<512x1xf32> to vector<512x80xf32>
    %38 = arith.cmpf oeq, %9, %37 : vector<512x80xf32>
    %c80_i32 = arith.constant 80 : i32
    %39 = vector.broadcast %c80_i32 : i32 to vector<512x80xi32>
    %40 = arith.select %38, %36, %39 : vector<512x80xi1>, vector<512x80xi32>
    %cst_15 = arith.constant dense<2147483647> : vector<512xi32>
    %41 = vector.multi_reduction <minsi>, %40, %cst_15 [1] : vector<512x80xi32> to vector<512xi32>
    %42 = vector.shape_cast %41 : vector<512xi32> to vector<512x1xi32>
    %c0_16 = arith.constant 0 : index
    %c0_17 = arith.constant 0 : index
    %c4 = arith.constant 4 : index
    %43 = vector.load %arg3[%c0_16, %c0_17, %c4] : memref<1x512x6xf32, #tpu.memory_space<vmem>>, vector<1x512x1xf32>
    %44 = vector.shape_cast %43 : vector<1x512x1xf32> to vector<512x1xf32>
    %45 = vector.shape_cast %35 : vector<512x1xf32> to vector<1x512x1xf32>
    tpu.vector_store %arg3[%c0_16, %c0_17, %c4], %45 {strides = array<i32>} : memref<1x512x6xf32, #tpu.memory_space<vmem>>, vector<1x512x1xf32>,
    %46 = arith.sitofp %42 : vector<512x1xi32> to vector<512x1xf32>
    %c0_18 = arith.constant 0 : index
    %c0_19 = arith.constant 0 : index
    %c5 = arith.constant 5 : index
    %47 = vector.load %arg3[%c0_18, %c0_19, %c5] : memref<1x512x6xf32, #tpu.memory_space<vmem>>, vector<1x512x1xf32>
    %48 = vector.shape_cast %47 : vector<1x512x1xf32> to vector<512x1xf32>
    %49 = vector.shape_cast %46 : vector<512x1xf32> to vector<1x512x1xf32>
    tpu.vector_store %arg3[%c0_18, %c0_19, %c5], %49 {strides = array<i32>} : memref<1x512x6xf32, #tpu.memory_space<vmem>>, vector<1x512x1xf32>,
    return
  }
  func.func @transform_0(%arg0: i32, %arg1: i32) -> (i32, i32, i32) {
    %c0_i32 = arith.constant 0 : i32
    %c0_i32_0 = arith.constant 0 : i32
    return %arg0, %arg1, %c0_i32 : i32, i32, i32
  }
  func.func @transform_1(%arg0: i32, %arg1: i32) -> (i32, i32, i32) {
    %c0_i32 = arith.constant 0 : i32
    %c0_i32_0 = arith.constant 0 : i32
    return %arg0, %arg1, %c0_i32 : i32, i32, i32
  }
}

module attributes {stable_mosaic.version = 11 : i64} {
  func.func @_mask_kernel(%arg0: i32, %arg1: memref<1x56x32xf32, #tpu.memory_space<vmem>>, %arg2: memref<1x32x1024xf32, #tpu.memory_space<vmem>>, %arg3: memref<1x56x4xf32, #tpu.memory_space<vmem>>, %arg4: memref<2x1024xf32, #tpu.memory_space<vmem>>, %arg5: memref<1x56x1024xf32, #tpu.memory_space<vmem>>) attributes {dimension_semantics = [#tpu.dimension_semantics<parallel>], iteration_bounds = array<i64: 2>, scalar_prefetch = 0 : i64, scratch_operands = 0 : i64, tpu.core_type = #tpu.core_type<tc>, window_params = [{transform_indices = @transform_0, window_bounds = array<i64: 1, 56, 32>}, {transform_indices = @transform_1, window_bounds = array<i64: 1, 32, 1024>}, {transform_indices = @transform_2, window_bounds = array<i64: 1, 56, 4>}, {pipeline_mode = #tpu.pipeline_mode<synchronous>, transform_indices = @transform_3, window_bounds = array<i64: 2, 1024>}, {transform_indices = @transform_4, window_bounds = array<i64: 1, 56, 1024>}]} {
    %c0 = arith.constant 0 : index
    %c0_0 = arith.constant 0 : index
    %c0_1 = arith.constant 0 : index
    %0 = vector.load %arg1[%c0, %c0_0, %c0_1] : memref<1x56x32xf32, #tpu.memory_space<vmem>>, vector<1x56x32xf32>
    %1 = vector.shape_cast %0 : vector<1x56x32xf32> to vector<56x32xf32>
    %c0_2 = arith.constant 0 : index
    %c0_3 = arith.constant 0 : index
    %c0_4 = arith.constant 0 : index
    %2 = vector.load %arg2[%c0_2, %c0_3, %c0_4] : memref<1x32x1024xf32, #tpu.memory_space<vmem>>, vector<1x32x1024xf32>
    %3 = vector.shape_cast %2 : vector<1x32x1024xf32> to vector<32x1024xf32>
    %cst = arith.constant dense<0.000000e+00> : vector<56x1024xf32>
    %4 = tpu.matmul %1, %3, %cst {dimension_numbers = #tpu.dot_dimension_numbers<[1], [0], [0], [1], [0, 0, 1, 1], [], []>} : vector<56x32xf32>, vector<32x1024xf32>, vector<56x1024xf32> -> vector<56x1024xf32>
    %cst_5 = arith.constant 0.000000e+00 : f32
    %5 = vector.broadcast %cst_5 : f32 to vector<56x1024xf32>
    %6 = arith.subf %5, %4 : vector<56x1024xf32>
    %7 = math.exp %6 : vector<56x1024xf32>
    %cst_6 = arith.constant 1.000000e+00 : f32
    %8 = vector.broadcast %cst_6 : f32 to vector<56x1024xf32>
    %9 = arith.addf %8, %7 : vector<56x1024xf32>
    %cst_7 = arith.constant 1.000000e+00 : f32
    %10 = vector.broadcast %cst_7 : f32 to vector<56x1024xf32>
    %11 = arith.divf %10, %9 : vector<56x1024xf32>
    %c0_8 = arith.constant 0 : index
    %c0_9 = arith.constant 0 : index
    %c0_10 = arith.constant 0 : index
    %12 = vector.load %arg3[%c0_8, %c0_9, %c0_10] : memref<1x56x4xf32, #tpu.memory_space<vmem>>, vector<1x56x4xf32>
    %13 = vector.shape_cast %12 : vector<1x56x4xf32> to vector<56x4xf32>
    %14 = vector.extract_strided_slice %13 {offsets = [0, 0], sizes = [56, 1], strides = [1, 1]} : vector<56x4xf32> to vector<56x1xf32>
    %15 = vector.extract_strided_slice %13 {offsets = [0, 1], sizes = [56, 1], strides = [1, 1]} : vector<56x4xf32> to vector<56x1xf32>
    %16 = vector.extract_strided_slice %13 {offsets = [0, 2], sizes = [56, 1], strides = [1, 1]} : vector<56x4xf32> to vector<56x1xf32>
    %17 = vector.extract_strided_slice %13 {offsets = [0, 3], sizes = [56, 1], strides = [1, 1]} : vector<56x4xf32> to vector<56x1xf32>
    %c0_11 = arith.constant 0 : index
    %c0_12 = arith.constant 0 : index
    %18 = vector.load %arg4[%c0_11, %c0_12] : memref<2x1024xf32, #tpu.memory_space<vmem>>, vector<1x1024xf32>
    %c1 = arith.constant 1 : index
    %c0_13 = arith.constant 0 : index
    %19 = vector.load %arg4[%c1, %c0_13] : memref<2x1024xf32, #tpu.memory_space<vmem>>, vector<1x1024xf32>
    %20 = vector.broadcast %18 : vector<1x1024xf32> to vector<56x1024xf32>
    %21 = vector.broadcast %14 : vector<56x1xf32> to vector<56x1024xf32>
    %22 = arith.cmpf oge, %20, %21 : vector<56x1024xf32>
    %23 = vector.broadcast %18 : vector<1x1024xf32> to vector<56x1024xf32>
    %24 = vector.broadcast %16 : vector<56x1xf32> to vector<56x1024xf32>
    %25 = arith.cmpf olt, %23, %24 : vector<56x1024xf32>
    %26 = arith.andi %22, %25 : vector<56x1024xi1>
    %27 = vector.broadcast %19 : vector<1x1024xf32> to vector<56x1024xf32>
    %28 = vector.broadcast %15 : vector<56x1xf32> to vector<56x1024xf32>
    %29 = arith.cmpf oge, %27, %28 : vector<56x1024xf32>
    %30 = arith.andi %26, %29 : vector<56x1024xi1>
    %31 = vector.broadcast %19 : vector<1x1024xf32> to vector<56x1024xf32>
    %32 = vector.broadcast %17 : vector<56x1xf32> to vector<56x1024xf32>
    %33 = arith.cmpf olt, %31, %32 : vector<56x1024xf32>
    %34 = arith.andi %30, %33 : vector<56x1024xi1>
    %cst_14 = arith.constant 0.000000e+00 : f32
    %35 = vector.broadcast %cst_14 : f32 to vector<56x1024xf32>
    %36 = arith.select %34, %11, %35 : vector<56x1024xi1>, vector<56x1024xf32>
    %c0_15 = arith.constant 0 : index
    %c0_16 = arith.constant 0 : index
    %c0_17 = arith.constant 0 : index
    %37 = vector.load %arg5[%c0_15, %c0_16, %c0_17] : memref<1x56x1024xf32, #tpu.memory_space<vmem>>, vector<1x56x1024xf32>
    %38 = vector.shape_cast %37 : vector<1x56x1024xf32> to vector<56x1024xf32>
    %39 = vector.shape_cast %36 : vector<56x1024xf32> to vector<1x56x1024xf32>
    tpu.vector_store %arg5[%c0_15, %c0_16, %c0_17], %39 {strides = array<i32>} : memref<1x56x1024xf32, #tpu.memory_space<vmem>>, vector<1x56x1024xf32>,
    return
  }
  func.func @transform_0(%arg0: i32) -> (i32, i32, i32) {
    %c0_i32 = arith.constant 0 : i32
    %c0_i32_0 = arith.constant 0 : i32
    %c0_i32_1 = arith.constant 0 : i32
    return %arg0, %c0_i32, %c0_i32_0 : i32, i32, i32
  }
  func.func @transform_1(%arg0: i32) -> (i32, i32, i32) {
    %c0_i32 = arith.constant 0 : i32
    %c0_i32_0 = arith.constant 0 : i32
    %c0_i32_1 = arith.constant 0 : i32
    return %arg0, %c0_i32, %c0_i32_0 : i32, i32, i32
  }
  func.func @transform_2(%arg0: i32) -> (i32, i32, i32) {
    %c0_i32 = arith.constant 0 : i32
    %c0_i32_0 = arith.constant 0 : i32
    %c0_i32_1 = arith.constant 0 : i32
    return %arg0, %c0_i32, %c0_i32_0 : i32, i32, i32
  }
  func.func @transform_3(%arg0: i32) -> (i32, i32) {
    %c0_i32 = arith.constant 0 : i32
    %c0_i32_0 = arith.constant 0 : i32
    %c0_i32_1 = arith.constant 0 : i32
    return %c0_i32, %c0_i32_0 : i32, i32
  }
  func.func @transform_4(%arg0: i32) -> (i32, i32, i32) {
    %c0_i32 = arith.constant 0 : i32
    %c0_i32_0 = arith.constant 0 : i32
    %c0_i32_1 = arith.constant 0 : i32
    return %arg0, %c0_i32, %c0_i32_0 : i32, i32, i32
  }
}

</mosaic_0001>

<bundles_post_ra>
// kernel: custom-call.2
= control target key start
LH: loop header
LB: loop body
LE: loop exit
PB: predicated region body
PF: predicated region fallthrough
CT: control target
= control target key end

     0   :  { %s6_s0 = inlined_call_operand.vmem [shape: f32[112,32], index: 0, kind: output, shape index: {}]  }

// kernel: end2end_forward.2
= control target key start
LH: loop header
LB: loop body
LE: loop exit
PB: predicated region body
PF: predicated region fallthrough
CT: control target
= control target key end

     0   :  { %s3279_s6 = smov 0   ;;  %s3281_s7 = smov 0   ;;  %s6448_s0 = inlined_call_operand.vmem [shape: f32[2,512,117], index: 0, kind: input, shape index: {}]   ;;  %s6449_s1 = inlined_call_operand.vmem [shape: f32[2,512,6], index: 1, kind: output, shape index: {}]  }
   0x1   :  { %s3283_s8 = smov 0  }
   0x2 LB: > { %s23_s9 = sadd.s32 1, %s3259_s7  ;;  %p3138_p0 = scmp.ge.s32.totalorder %s3263_s8, 1  ;;  %s3263_s8 = sphi %s3283_s8, %s11_s8   ;;  %s3259_s7 = sphi %s3281_s7, %s6926_s7   ;;  %s3255_s6 = sphi %s3279_s6, %s6925_s6  }
   0x3   : > { %p25_p1 = scmp.ge.s32.totalorder %s23_s9, 2  ;;  %p108_p2 = scmp.lt.s32.totalorder %s3263_s8, 3 }
   0x5   : > { %s6928_s9 = smov (%p25_p1, %s23_s9), 0  ;;  %p109_p3 = pnand %p3138_p0, %p108_p2 }
   0x7   : > { %112 = sbr.rel (%p109_p3) target bundleno = 2043 (0x7fb), region = 24 }
   0xe   : > { %p137_p4 = scmp.lt.s32.totalorder %s3255_s6, 1  ;;  %v3265_v0 = vmov 4   ;;  %s3266_s14 = smov 126   ;;  %vm988_vm0 = vcmask 7168   ;;  %vm1053_vm1 = vcmask 15368   ;;  %vm1438_vm2 = vcmask 23568  }
   0xf   : > { %3176 = vset.pattern.permute.xlu1 %v3265_v0  ;;  %3175 = vset.pattern.permute.xlu0 %v3265_v0  ;;  %s3267_s18 = smov 2   ;;  %vm1503_vm3 = vcmask 31768   ;;  %vm1568_vm4 = vcmask 695336   ;;  %vm2853_vm5 = vcmask 39968   ;;  %s3268_s19 = smov 5  }
  0x10   : > { %s6930_s6 = smov (!%p137_p4, %s3255_s6), 1 }
  0x11   : > { %s3145_s10 = sshll.u32 %s6930_s6, 9 }
  0x12   : > { %s3305_s13 = scalar_lea.vmem %s6448_s0, %s3145_s10  ;;  %s3824_s17 = scalar_lea.vmem %s6449_s1, %s3145_s10 }
  0x13   : > { %v3308_v1 = vld [vmem:[%s3305_s13 + $0x10] sm:$0xff]  ;;  %v3311_v2 = vld [vmem:[%s3305_s13] sm:$0xff]  ;;  %v3316_v3 = vld [vmem:[%s3305_s13 + $0x18] sm:$0xff] }
  0x14   : > { %6573 = vst [vmem:[#allocation2_spill] sm:$0xff] %v3311_v2  ;;  %232 = vperm.xlu1 %3176, %v3308_v1   ;;  %222 = vperm.xlu0 %3175, %v3311_v2   ;;  %v3319_v4 = vld [vmem:[%s3305_s13 + $0x8] sm:$0xff]  ;;  %v3327_v6 = vld [vmem:[%s3305_s13 + $0x20] sm:$0xff]  ;;  %v3332_v7 = vld [vmem:[%s3305_s13 + $0x38] sm:$0xff] }
  0x15   : > { %v3324_v5 = vld [vmem:[%s3305_s13 + $0x28] sm:$0xff]  ;;  %v3335_v8 = vld [vmem:[%s3305_s13 + $0x30] sm:$0xff]  ;;  %v3343_v10 = vld [vmem:[%s3305_s13 + $0x40] sm:$0xff] }
  0x16   : > { %v3340_v9 = vld [vmem:[%s3305_s13 + $0x48] sm:$0xff]  ;;  %v3348_v11 = vld [vmem:[%s3305_s13 + $0x58] sm:$0xff]  ;;  %v3351_v12 = vld [vmem:[%s3305_s13 + $0x50] sm:$0xff] }
  0x17   : > { %v3356_v13 = vld [vmem:[%s3305_s13 + $0x68] sm:$0xff]  ;;  %v3359_v14 = vld [vmem:[%s3305_s13 + $0x60] sm:$0xff]  ;;  %v3364_v15 = vld [vmem:[%s3305_s13 + $0x78] sm:$0xff] }
  0x18   : > { %237 = vperm.xlu1 %3176, %v3316_v3   ;;  %227 = vperm.xlu0 %3175, %v3319_v4   ;;  %v3367_v16 = vld [vmem:[%s3305_s13 + $0x70] sm:$0xff]  ;;  %v3372_v17 = vld [vmem:[%s3305_s13 + $0x88] sm:$0xff]  ;;  %v3375_v18 = vld [vmem:[%s3305_s13 + $0x80] sm:$0xff] }
  0x19   : > { %v3380_v19 = vld [vmem:[%s3305_s13 + $0x98] sm:$0xff]  ;;  %v3383_v20 = vld [vmem:[%s3305_s13 + $0x90] sm:$0xff]  ;;  %v3388_v21 = vld [vmem:[%s3305_s13 + $0xa8] sm:$0xff] }
  0x1a   : > { %v3391_v22 = vld [vmem:[%s3305_s13 + $0xa0] sm:$0xff]  ;;  %v3396_v23 = vld [vmem:[%s3305_s13 + $0xb8] sm:$0xff]  ;;  %v3399_v24 = vld [vmem:[%s3305_s13 + $0xb0] sm:$0xff] }
  0x1b   : > { %v3404_v25 = vld [vmem:[%s3305_s13 + $0xc8] sm:$0xff]  ;;  %v3407_v26 = vld [vmem:[%s3305_s13 + $0xc0] sm:$0xff]  ;;  %v3412_v27 = vld [vmem:[%s3305_s13 + $0xd8] sm:$0xff] }
  0x1c   : > { %247 = vperm.xlu1 %3176, %v3324_v5   ;;  %242 = vperm.xlu0 %3175, %v3327_v6   ;;  %v3415_v28 = vld [vmem:[%s3305_s13 + $0xd0] sm:$0xff]  ;;  %v3420_v29 = vld [vmem:[%s3305_s13 + $0xe8] sm:$0xff]  ;;  %v3423_v30 = vld [vmem:[%s3305_s13 + $0xe0] sm:$0xff] }
  0x1d   : > { %v3428_v31 = vld [vmem:[%s3305_s13 + $0xf8] sm:$0xff]  ;;  %v3431_v32 = vld [vmem:[%s3305_s13 + $0xf0] sm:$0xff]  ;;  %v3436_v33 = vld [vmem:[%s3305_s13 + $0x108] sm:$0xff] }
  0x1e   : > { %v3439_v34 = vld [vmem:[%s3305_s13 + $0x100] sm:$0xff]  ;;  %v3444_v35 = vld [vmem:[%s3305_s13 + $0x118] sm:$0xff]  ;;  %v3447_v36 = vld [vmem:[%s3305_s13 + $0x110] sm:$0xff] }
  0x1f   : > { %v3452_v37 = vld [vmem:[%s3305_s13 + $0x128] sm:$0xff]  ;;  %v3455_v38 = vld [vmem:[%s3305_s13 + $0x120] sm:$0xff]  ;;  %v3460_v39 = vld [vmem:[%s3305_s13 + $0x138] sm:$0xff] }
  0x20   : > { %257 = vperm.xlu1 %3176, %v3332_v7   ;;  %252 = vperm.xlu0 %3175, %v3335_v8   ;;  %v3463_v40 = vld [vmem:[%s3305_s13 + $0x130] sm:$0xff]  ;;  %v3468_v41 = vld [vmem:[%s3305_s13 + $0x148] sm:$0xff]  ;;  %v3471_v42 = vld [vmem:[%s3305_s13 + $0x140] sm:$0xff] }
  0x21   : > { %v3476_v43 = vld [vmem:[%s3305_s13 + $0x158] sm:$0xff]  ;;  %v3479_v44 = vld [vmem:[%s3305_s13 + $0x150] sm:$0xff]  ;;  %v3484_v45 = vld [vmem:[%s3305_s13 + $0x168] sm:$0xff] }
  0x22   : > { %v3487_v46 = vld [vmem:[%s3305_s13 + $0x160] sm:$0xff]  ;;  %v3492_v47 = vld [vmem:[%s3305_s13 + $0x178] sm:$0xff]  ;;  %v3495_v48 = vld [vmem:[%s3305_s13 + $0x170] sm:$0xff] }
  0x23   : > { %v3500_v49 = vld [vmem:[%s3305_s13 + $0x188] sm:$0xff]  ;;  %v3503_v50 = vld [vmem:[%s3305_s13 + $0x180] sm:$0xff]  ;;  %v3508_v51 = vld [vmem:[%s3305_s13 + $0x198] sm:$0xff] }
  0x24   : > { %267 = vperm.xlu1 %3176, %v3340_v9   ;;  %262 = vperm.xlu0 %3175, %v3343_v10   ;;  %v3511_v52 = vld [vmem:[%s3305_s13 + $0x190] sm:$0xff]  ;;  %v3516_v53 = vld [vmem:[%s3305_s13 + $0x1a8] sm:$0xff]  ;;  %v3519_v54 = vld [vmem:[%s3305_s13 + $0x1a0] sm:$0xff] }
  0x25   : > { %v3524_v55 = vld [vmem:[%s3305_s13 + $0x1b8] sm:$0xff]  ;;  %v3527_v56 = vld [vmem:[%s3305_s13 + $0x1b0] sm:$0xff]  ;;  %v3532_v57 = vld [vmem:[%s3305_s13 + $0x1c8] sm:$0xff] }
  0x26   : > { %6574 = vst [vmem:[#allocation3_spill] sm:$0xff] %v3532_v57  ;;  %v3535_v58 = vld [vmem:[%s3305_s13 + $0x1c0] sm:$0xff]  ;;  %v3540_v59 = vld [vmem:[%s3305_s13 + $0x1d8] sm:$0xff]  ;;  %v3543_v60 = vld [vmem:[%s3305_s13 + $0x1d0] sm:$0xff] }
  0x27   : > { %6575 = vst [vmem:[#allocation4_spill] sm:$0xff] %v3535_v58  ;;  %6576 = vst [vmem:[#allocation5_spill] sm:$0xff] %v3540_v59  ;;  %v3548_v61 = vld [vmem:[%s3305_s13 + $0x1e8] sm:$0xff]  ;;  %v3551_v62 = vld [vmem:[%s3305_s13 + $0x1e0] sm:$0xff] }
  0x28   : > { %277 = vperm.xlu1 %3176, %v3348_v11   ;;  %272 = vperm.xlu0 %3175, %v3351_v12   ;;  %6577 = vst [vmem:[#allocation6_spill] sm:$0xff] %v3543_v60  ;;  %6578 = vst [vmem:[#allocation7_spill] sm:$0xff] %v3548_v61  ;;  %v3556_v63 = vld [vmem:[%s3305_s13 + $0x1f8] sm:$0xff]  ;;  %v3559_v0 = vld [vmem:[%s3305_s13 + $0x1f0] sm:$0xff] }
  0x29   : > { %6579 = vst [vmem:[#allocation8_spill] sm:$0xff] %v3551_v62  ;;  %6580 = vst [vmem:[#allocation9_spill] sm:$0xff] %v3556_v63 }
  0x2a   : > { %6581 = vst [vmem:[#allocation10_spill] sm:$0xff] %v3559_v0 }
  0x2c   : > { %287 = vperm.xlu1 %3176, %v3356_v13   ;;  %282 = vperm.xlu0 %3175, %v3359_v14  }
  0x30   : > { %297 = vperm.xlu1 %3176, %v3364_v15   ;;  %292 = vperm.xlu0 %3175, %v3367_v16  }
  0x34   : > { %307 = vperm.xlu1 %3176, %v3372_v17   ;;  %302 = vperm.xlu0 %3175, %v3375_v18  }
  0x38   : > { %317 = vperm.xlu1 %3176, %v3380_v19   ;;  %312 = vperm.xlu0 %3175, %v3383_v20  }
  0x3c   : > { %327 = vperm.xlu1 %3176, %v3388_v21   ;;  %322 = vperm.xlu0 %3175, %v3391_v22  }
  0x40   : > { %337 = vperm.xlu1 %3176, %v3396_v23   ;;  %332 = vperm.xlu0 %3175, %v3399_v24  }
  0x44   : > { %347 = vperm.xlu1 %3176, %v3404_v25   ;;  %342 = vperm.xlu0 %3175, %v3407_v26  }
  0x48   : > { %357 = vperm.xlu1 %3176, %v3412_v27   ;;  %352 = vperm.xlu0 %3175, %v3415_v28  }
  0x4c   : > { %367 = vperm.xlu1 %3176, %v3420_v29   ;;  %362 = vperm.xlu0 %3175, %v3423_v30  }
  0x50   : > { %377 = vperm.xlu1 %3176, %v3428_v31   ;;  %372 = vperm.xlu0 %3175, %v3431_v32  }
  0x54   : > { %387 = vperm.xlu1 %3176, %v3436_v33   ;;  %382 = vperm.xlu0 %3175, %v3439_v34  }
  0x58   : > { %397 = vperm.xlu1 %3176, %v3444_v35   ;;  %392 = vperm.xlu0 %3175, %v3447_v36  }
  0x5c   : > { %407 = vperm.xlu1 %3176, %v3452_v37   ;;  %402 = vperm.xlu0 %3175, %v3455_v38  }
  0x60   : > { %417 = vperm.xlu1 %3176, %v3460_v39   ;;  %412 = vperm.xlu0 %3175, %v3463_v40  }
  0x64   : > { %427 = vperm.xlu1 %3176, %v3468_v41   ;;  %422 = vperm.xlu0 %3175, %v3471_v42  }
  0x68   : > { %437 = vperm.xlu1 %3176, %v3476_v43   ;;  %432 = vperm.xlu0 %3175, %v3479_v44  }
  0x6c   : > { %447 = vperm.xlu1 %3176, %v3484_v45   ;;  %442 = vperm.xlu0 %3175, %v3487_v46  }
  0x70   : > { %457 = vperm.xlu1 %3176, %v3492_v47   ;;  %452 = vperm.xlu0 %3175, %v3495_v48  }
  0x74   : > { %467 = vperm.xlu1 %3176, %v3500_v49   ;;  %462 = vperm.xlu0 %3175, %v3503_v50  }
  0x78   : > { %477 = vperm.xlu1 %3176, %v3508_v51   ;;  %472 = vperm.xlu0 %3175, %v3511_v52  }
  0x7c   : > { %487 = vperm.xlu1 %3176, %v3516_v53   ;;  %482 = vperm.xlu0 %3175, %v3519_v54  }
  0x80   : > { %497 = vperm.xlu1 %3176, %v3524_v55   ;;  %492 = vperm.xlu0 %3175, %v3527_v56  }
  0x84   : > { %507 = vperm.xlu1 %3176, %v3532_v57   ;;  %502 = vperm.xlu0 %3175, %v3535_v58  }
  0x88   : > { %517 = vperm.xlu1 %3176, %v3540_v59   ;;  %512 = vperm.xlu0 %3175, %v3543_v60   ;;  %v605_v59 = vmul.f32 0.5, %v3319_v4  ;;  %v604_v60 = vmul.f32 0.5, %v3311_v2 }
  0x8c   : > { %527 = vperm.xlu1 %3176, %v3548_v61   ;;  %522 = vperm.xlu0 %3175, %v3551_v62   ;;  %v607_v62 = vmul.f32 0.5, %v3316_v3  ;;  %v606_v61 = vmul.f32 0.5, %v3308_v1 }
  0x90   : > { %537 = vperm.xlu1 %3176, %v3556_v63   ;;  %532 = vperm.xlu0 %3175, %v3559_v0  }
  0x93   : > { %v3565_v58 = vpop.permute.xlu1 %232  ;;  %v3567_v57 = vpop.permute.xlu0 %222 }
  0x94   : > { %6582 = vst [vmem:[#allocation11_spill] sm:$0xff] %v3565_v58  ;;  %6583 = vst [vmem:[#allocation12_spill] sm:$0xff] %v3567_v57  ;;  %734 = vrot.lane.b32.xlu1 %v605_v59, %s3266_s14  ;;  %732 = vrot.lane.b32.xlu0 %v604_v60, %s3266_s14  ;;  %v609_v58 = vmul.f32 0.5, %v3324_v5  ;;  %v608_v57 = vmul.f32 0.5, %v3327_v6  ;;  %v611_v60 = vmul.f32 0.5, %v3332_v7 }
  0x97   : > { %v3573_v63 = vpop.permute.xlu1 %237  ;;  %v3575_v0 = vpop.permute.xlu0 %227 }
  0x98   : > { %6584 = vst [vmem:[#allocation13_spill] sm:$0xff] %v3573_v63  ;;  %6585 = vst [vmem:[#allocation14_spill] sm:$0xff] %v3575_v0  ;;  %738 = vrot.lane.b32.xlu1 %v607_v62, %s3266_s14  ;;  %736 = vrot.lane.b32.xlu0 %v606_v61, %s3266_s14  ;;  %v610_v63 = vmul.f32 0.5, %v3335_v8  ;;  %v613_v61 = vmul.f32 0.5, %v3340_v9 }
  0x9b   : > { %v3581_v2 = vpop.permute.xlu1 %247  ;;  %v3583_v59 = vpop.permute.xlu0 %242 }
  0x9c   : > { %6586 = vst [vmem:[#allocation15_spill] sm:$0xff] %v3581_v2  ;;  %6587 = vst [vmem:[#allocation16_spill] sm:$0xff] %v3583_v59  ;;  %742 = vrot.lane.b32.xlu1 %v609_v58, %s3266_s14  ;;  %740 = vrot.lane.b32.xlu0 %v608_v57, %s3266_s14  ;;  %v612_v2 = vmul.f32 0.5, %v3343_v10  ;;  %v615_v57 = vmul.f32 0.5, %v3348_v11 }
  0x9f   : > { %v3589_v0 = vpop.permute.xlu1 %257  ;;  %v3591_v62 = vpop.permute.xlu0 %252 }
  0xa0   : > { %6588 = vst [vmem:[#allocation17_spill] sm:$0xff] %v3589_v0  ;;  %6589 = vst [vmem:[#allocation18_spill] sm:$0xff] %v3591_v62  ;;  %746 = vrot.lane.b32.xlu1 %v611_v60, %s3266_s14  ;;  %744 = vrot.lane.b32.xlu0 %v610_v63, %s3266_s14  ;;  %v614_v0 = vmul.f32 0.5, %v3351_v12  ;;  %v617_v63 = vmul.f32 0.5, %v3356_v13 }
  0xa3   : > { %v3597_v59 = vpop.permute.xlu1 %267  ;;  %v3599_v58 = vpop.permute.xlu0 %262 }
  0xa4   : > { %6590 = vst [vmem:[#allocation19_spill] sm:$0xff] %v3597_v59  ;;  %6591 = vst [vmem:[#allocation20_spill] sm:$0xff] %v3599_v58  ;;  %750 = vrot.lane.b32.xlu1 %v613_v61, %s3266_s14  ;;  %748 = vrot.lane.b32.xlu0 %v612_v2, %s3266_s14  ;;  %v616_v59 = vmul.f32 0.5, %v3359_v14  ;;  %v619_v2 = vmul.f32 0.5, %v3364_v15 }
  0xa7   : > { %v3605_v62 = vpop.permute.xlu1 %277  ;;  %v3607_v60 = vpop.permute.xlu0 %272 }
  0xa8   : > { %6592 = vst [vmem:[#allocation21_spill] sm:$0xff] %v3605_v62  ;;  %6593 = vst [vmem:[#allocation22_spill] sm:$0xff] %v3607_v60  ;;  %754 = vrot.lane.b32.xlu1 %v615_v57, %s3266_s14  ;;  %752 = vrot.lane.b32.xlu0 %v614_v0, %s3266_s14  ;;  %v618_v62 = vmul.f32 0.5, %v3367_v16  ;;  %v621_v0 = vmul.f32 0.5, %v3372_v17 }
  0xab   : > { %v3613_v58 = vpop.permute.xlu1 %287  ;;  %v3615_v61 = vpop.permute.xlu0 %282 }
  0xac   : > { %6594 = vst [vmem:[#allocation23_spill] sm:$0xff] %v3613_v58  ;;  %6595 = vst [vmem:[#allocation24_spill] sm:$0xff] %v3615_v61  ;;  %758 = vrot.lane.b32.xlu1 %v617_v63, %s3266_s14  ;;  %756 = vrot.lane.b32.xlu0 %v616_v59, %s3266_s14  ;;  %v620_v58 = vmul.f32 0.5, %v3375_v18  ;;  %v623_v59 = vmul.f32 0.5, %v3380_v19 }
  0xaf   : > { %v3621_v60 = vpop.permute.xlu1 %297  ;;  %v3623_v57 = vpop.permute.xlu0 %292 }
  0xb0   : > { %6596 = vst [vmem:[#allocation25_spill] sm:$0xff] %v3621_v60  ;;  %6597 = vst [vmem:[#allocation26_spill] sm:$0xff] %v3623_v57  ;;  %762 = vrot.lane.b32.xlu1 %v619_v2, %s3266_s14  ;;  %760 = vrot.lane.b32.xlu0 %v618_v62, %s3266_s14  ;;  %v622_v60 = vmul.f32 0.5, %v3383_v20  ;;  %v625_v62 = vmul.f32 0.5, %v3388_v21 }
  0xb3   : > { %v3629_v61 = vpop.permute.xlu1 %307  ;;  %v3631_v63 = vpop.permute.xlu0 %302 }
  0xb4   : > { %6598 = vst [vmem:[#allocation27_spill] sm:$0xff] %v3629_v61  ;;  %6599 = vst [vmem:[#allocation28_spill] sm:$0xff] %v3631_v63  ;;  %766 = vrot.lane.b32.xlu1 %v621_v0, %s3266_s14  ;;  %764 = vrot.lane.b32.xlu0 %v620_v58, %s3266_s14  ;;  %v624_v61 = vmul.f32 0.5, %v3391_v22  ;;  %v627_v58 = vmul.f32 0.5, %v3396_v23 }
  0xb7   : > { %v3637_v57 = vpop.permute.xlu1 %317  ;;  %v3639_v2 = vpop.permute.xlu0 %312 }
  0xb8   : > { %6600 = vst [vmem:[#allocation29_spill] sm:$0xff] %v3637_v57  ;;  %6601 = vst [vmem:[#allocation30_spill] sm:$0xff] %v3639_v2  ;;  %770 = vrot.lane.b32.xlu1 %v623_v59, %s3266_s14  ;;  %768 = vrot.lane.b32.xlu0 %v622_v60, %s3266_s14  ;;  %v626_v57 = vmul.f32 0.5, %v3399_v24  ;;  %v629_v60 = vmul.f32 0.5, %v3404_v25 }
  0xbb   : > { %v3645_v63 = vpop.permute.xlu1 %327  ;;  %v3647_v0 = vpop.permute.xlu0 %322 }
  0xbc   : > { %6602 = vst [vmem:[#allocation31_spill] sm:$0xff] %v3645_v63  ;;  %6603 = vst [vmem:[#allocation32_spill] sm:$0xff] %v3647_v0  ;;  %774 = vrot.lane.b32.xlu1 %v625_v62, %s3266_s14  ;;  %772 = vrot.lane.b32.xlu0 %v624_v61, %s3266_s14  ;;  %v628_v63 = vmul.f32 0.5, %v3407_v26  ;;  %v631_v61 = vmul.f32 0.5, %v3412_v27 }
  0xbf   : > { %v3653_v2 = vpop.permute.xlu1 %337  ;;  %v3655_v59 = vpop.permute.xlu0 %332 }
  0xc0   : > { %6604 = vst [vmem:[#allocation33_spill] sm:$0xff] %v3653_v2  ;;  %6605 = vst [vmem:[#allocation34_spill] sm:$0xff] %v3655_v59  ;;  %778 = vrot.lane.b32.xlu1 %v627_v58, %s3266_s14  ;;  %776 = vrot.lane.b32.xlu0 %v626_v57, %s3266_s14  ;;  %v630_v2 = vmul.f32 0.5, %v3415_v28  ;;  %v633_v57 = vmul.f32 0.5, %v3420_v29 }
  0xc3   : > { %v3661_v0 = vpop.permute.xlu1 %347  ;;  %v3663_v62 = vpop.permute.xlu0 %342 }
  0xc4   : > { %6606 = vst [vmem:[#allocation35_spill] sm:$0xff] %v3661_v0  ;;  %6607 = vst [vmem:[#allocation36_spill] sm:$0xff] %v3663_v62  ;;  %782 = vrot.lane.b32.xlu1 %v629_v60, %s3266_s14  ;;  %780 = vrot.lane.b32.xlu0 %v628_v63, %s3266_s14  ;;  %v632_v0 = vmul.f32 0.5, %v3423_v30  ;;  %v635_v63 = vmul.f32 0.5, %v3428_v31 }
  0xc7   : > { %v3669_v59 = vpop.permute.xlu1 %357  ;;  %v3671_v58 = vpop.permute.xlu0 %352 }
  0xc8   : > { %6608 = vst [vmem:[#allocation37_spill] sm:$0xff] %v3669_v59  ;;  %6609 = vst [vmem:[#allocation38_spill] sm:$0xff] %v3671_v58  ;;  %786 = vrot.lane.b32.xlu1 %v631_v61, %s3266_s14  ;;  %784 = vrot.lane.b32.xlu0 %v630_v2, %s3266_s14  ;;  %v634_v59 = vmul.f32 0.5, %v3431_v32  ;;  %v637_v2 = vmul.f32 0.5, %v3436_v33 }
  0xcb   : > { %v3677_v62 = vpop.permute.xlu1 %367  ;;  %v3679_v60 = vpop.permute.xlu0 %362 }
  0xcc   : > { %6610 = vst [vmem:[#allocation39_spill] sm:$0xff] %v3677_v62  ;;  %6611 = vst [vmem:[#allocation40_spill] sm:$0xff] %v3679_v60  ;;  %790 = vrot.lane.b32.xlu1 %v633_v57, %s3266_s14  ;;  %788 = vrot.lane.b32.xlu0 %v632_v0, %s3266_s14  ;;  %v636_v62 = vmul.f32 0.5, %v3439_v34  ;;  %v639_v0 = vmul.f32 0.5, %v3444_v35 }
  0xcf   : > { %v3685_v58 = vpop.permute.xlu1 %377  ;;  %v3687_v61 = vpop.permute.xlu0 %372 }
  0xd0   : > { %6612 = vst [vmem:[#allocation41_spill] sm:$0xff] %v3685_v58  ;;  %6613 = vst [vmem:[#allocation42_spill] sm:$0xff] %v3687_v61  ;;  %794 = vrot.lane.b32.xlu1 %v635_v63, %s3266_s14  ;;  %792 = vrot.lane.b32.xlu0 %v634_v59, %s3266_s14  ;;  %v638_v58 = vmul.f32 0.5, %v3447_v36  ;;  %v641_v59 = vmul.f32 0.5, %v3452_v37 }
  0xd3   : > { %v3693_v60 = vpop.permute.xlu1 %387  ;;  %v3695_v57 = vpop.permute.xlu0 %382 }
  0xd4   : > { %6614 = vst [vmem:[#allocation43_spill] sm:$0xff] %v3693_v60  ;;  %6615 = vst [vmem:[#allocation44_spill] sm:$0xff] %v3695_v57  ;;  %798 = vrot.lane.b32.xlu1 %v637_v2, %s3266_s14  ;;  %796 = vrot.lane.b32.xlu0 %v636_v62, %s3266_s14  ;;  %v640_v60 = vmul.f32 0.5, %v3455_v38  ;;  %v643_v62 = vmul.f32 0.5, %v3460_v39 }
  0xd7   : > { %v3701_v61 = vpop.permute.xlu1 %397  ;;  %v3703_v63 = vpop.permute.xlu0 %392 }
  0xd8   : > { %6616 = vst [vmem:[#allocation45_spill] sm:$0xff] %v3701_v61  ;;  %6617 = vst [vmem:[#allocation46_spill] sm:$0xff] %v3703_v63  ;;  %802 = vrot.lane.b32.xlu1 %v639_v0, %s3266_s14  ;;  %800 = vrot.lane.b32.xlu0 %v638_v58, %s3266_s14  ;;  %v642_v61 = vmul.f32 0.5, %v3463_v40  ;;  %v645_v58 = vmul.f32 0.5, %v3468_v41 }
  0xdb   : > { %v3709_v57 = vpop.permute.xlu1 %407  ;;  %v3711_v2 = vpop.permute.xlu0 %402 }
  0xdc   : > { %6618 = vst [vmem:[#allocation47_spill] sm:$0xff] %v3709_v57  ;;  %6619 = vst [vmem:[#allocation48_spill] sm:$0xff] %v3711_v2  ;;  %806 = vrot.lane.b32.xlu1 %v641_v59, %s3266_s14  ;;  %804 = vrot.lane.b32.xlu0 %v640_v60, %s3266_s14  ;;  %v644_v57 = vmul.f32 0.5, %v3471_v42  ;;  %v647_v60 = vmul.f32 0.5, %v3476_v43 }
  0xdf   : > { %v3717_v63 = vpop.permute.xlu1 %417  ;;  %v3719_v0 = vpop.permute.xlu0 %412 }
  0xe0   : > { %6620 = vst [vmem:[#allocation49_spill] sm:$0xff] %v3717_v63  ;;  %6621 = vst [vmem:[#allocation50_spill] sm:$0xff] %v3719_v0  ;;  %810 = vrot.lane.b32.xlu1 %v643_v62, %s3266_s14  ;;  %808 = vrot.lane.b32.xlu0 %v642_v61, %s3266_s14  ;;  %v646_v63 = vmul.f32 0.5, %v3479_v44  ;;  %v649_v61 = vmul.f32 0.5, %v3484_v45 }
  0xe3   : > { %v3725_v2 = vpop.permute.xlu1 %427  ;;  %v3727_v59 = vpop.permute.xlu0 %422 }
  0xe4   : > { %6622 = vst [vmem:[#allocation51_spill] sm:$0xff] %v3725_v2  ;;  %6623 = vst [vmem:[#allocation52_spill] sm:$0xff] %v3727_v59  ;;  %814 = vrot.lane.b32.xlu1 %v645_v58, %s3266_s14  ;;  %812 = vrot.lane.b32.xlu0 %v644_v57, %s3266_s14  ;;  %v648_v2 = vmul.f32 0.5, %v3487_v46  ;;  %v651_v57 = vmul.f32 0.5, %v3492_v47 }
  0xe7   : > { %v3733_v0 = vpop.permute.xlu1 %437  ;;  %v3735_v62 = vpop.permute.xlu0 %432 }
  0xe8   : > { %6624 = vst [vmem:[#allocation53_spill] sm:$0xff] %v3733_v0  ;;  %6625 = vst [vmem:[#allocation54_spill] sm:$0xff] %v3735_v62  ;;  %818 = vrot.lane.b32.xlu1 %v647_v60, %s3266_s14  ;;  %816 = vrot.lane.b32.xlu0 %v646_v63, %s3266_s14  ;;  %v650_v0 = vmul.f32 0.5, %v3495_v48  ;;  %v653_v63 = vmul.f32 0.5, %v3500_v49  ;;  %v655_v48 = vmul.f32 0.5, %v3508_v51  ;;  %v657_v49 = vmul.f32 0.5, %v3516_v53 }
  0xe9   : > { %v659_v51 = vmul.f32 0.5, %v3524_v55  ;;  %v6633_v53 = vld [vmem:[#allocation3_spill] sm:$0xff]  ;;  %v6637_v55 = vld [vmem:[#allocation5_spill] sm:$0xff] }
  0xeb   : > { %v3741_v59 = vpop.permute.xlu1 %447  ;;  %v3743_v58 = vpop.permute.xlu0 %442 }
  0xec   : > { %6626 = vst [vmem:[#allocation55_spill] sm:$0xff] %v3741_v59  ;;  %6627 = vst [vmem:[#allocation56_spill] sm:$0xff] %v3743_v58  ;;  %822 = vrot.lane.b32.xlu1 %v649_v61, %s3266_s14  ;;  %820 = vrot.lane.b32.xlu0 %v648_v2, %s3266_s14  ;;  %v652_v59 = vmul.f32 0.5, %v3503_v50  ;;  %v654_v2 = vmul.f32 0.5, %v3511_v52  ;;  %v656_v50 = vmul.f32 0.5, %v3519_v54  ;;  %v658_v52 = vmul.f32 0.5, %v3527_v56 }
  0xed   : > { %v661_v54 = vmul.f32 0.5, %v6633_v53  ;;  %v663_v56 = vmul.f32 0.5, %v6637_v55  ;;  %v6643_v55 = vld [vmem:[#allocation9_spill] sm:$0xff] }
  0xef   : > { %v3749_v62 = vpop.permute.xlu1 %457  ;;  %v3751_v60 = vpop.permute.xlu0 %452 }
  0xf0   : > { %6628 = vst [vmem:[#allocation57_spill] sm:$0xff] %v3749_v62  ;;  %826 = vrot.lane.b32.xlu1 %v651_v57, %s3266_s14  ;;  %824 = vrot.lane.b32.xlu0 %v650_v0, %s3266_s14 }
  0xf3   : > { %v3757_v58 = vpop.permute.xlu1 %467  ;;  %v3759_v61 = vpop.permute.xlu0 %462 }
  0xf4   : > { %830 = vrot.lane.b32.xlu1 %v653_v63, %s3266_s14  ;;  %828 = vrot.lane.b32.xlu0 %v652_v59, %s3266_s14 }
  0xf7   : > { %v3765_v62 = vpop.permute.xlu1 %477  ;;  %v3767_v57 = vpop.permute.xlu0 %472 }
  0xf8   : > { %834 = vrot.lane.b32.xlu1 %v655_v48, %s3266_s14  ;;  %832 = vrot.lane.b32.xlu0 %v654_v2, %s3266_s14  ;;  %v6634_v2 = vld [vmem:[#allocation4_spill] sm:$0xff] }
  0xfb   : > { %v3773_v0 = vpop.permute.xlu1 %487  ;;  %v3775_v63 = vpop.permute.xlu0 %482 }
  0xfc   : > { %6629 = vst [vmem:[#allocation58_spill] sm:$0xff] %v3773_v0  ;;  %6630 = vst [vmem:[#allocation59_spill] sm:$0xff] %v3775_v63  ;;  %838 = vrot.lane.b32.xlu1 %v657_v49, %s3266_s14  ;;  %836 = vrot.lane.b32.xlu0 %v656_v50, %s3266_s14  ;;  %v660_v0 = vmul.f32 0.5, %v6634_v2  ;;  %v6638_v50 = vld [vmem:[#allocation6_spill] sm:$0xff]  ;;  %v6642_v2 = vld [vmem:[#allocation8_spill] sm:$0xff] }
  0xff   : > { %v3781_v59 = vpop.permute.xlu1 %497  ;;  %v3783_v48 = vpop.permute.xlu0 %492 }
 0x100   : > { %6631 = vst [vmem:[#allocation60_spill] sm:$0xff] %v3781_v59  ;;  %6632 = vst [vmem:[#allocation61_spill] sm:$0xff] %v3783_v48  ;;  %842 = vrot.lane.b32.xlu1 %v659_v51, %s3266_s14  ;;  %840 = vrot.lane.b32.xlu0 %v658_v52, %s3266_s14  ;;  %v662_v59 = vmul.f32 0.5, %v6638_v50  ;;  %v6641_v52 = vld [vmem:[#allocation7_spill] sm:$0xff]  ;;  %v667_v50 = vmul.f32 0.5, %v6643_v55 }
 0x101   : > { %v665_v53 = vmul.f32 0.5, %v6641_v52 }
 0x103   : > { %v3789_v63 = vpop.permute.xlu1 %507  ;;  %v3791_v49 = vpop.permute.xlu0 %502 }
 0x104   : > { %6635 = vst [vmem:[#allocation3_spill] sm:$0xff] %v3789_v63  ;;  %6636 = vst [vmem:[#allocation4_spill] sm:$0xff] %v3791_v49  ;;  %846 = vrot.lane.b32.xlu1 %v661_v54, %s3266_s14  ;;  %844 = vrot.lane.b32.xlu0 %v660_v0, %s3266_s14  ;;  %v664_v63 = vmul.f32 0.5, %v6642_v2 }
 0x107   : > { %v3797_v48 = vpop.permute.xlu1 %517  ;;  %v3799_v51 = vpop.permute.xlu0 %512 }
 0x108   : > { %6639 = vst [vmem:[#allocation5_spill] sm:$0xff] %v3797_v48  ;;  %6640 = vst [vmem:[#allocation6_spill] sm:$0xff] %v3799_v51  ;;  %850 = vrot.lane.b32.xlu1 %v663_v56, %s3266_s14  ;;  %848 = vrot.lane.b32.xlu0 %v662_v59, %s3266_s14  ;;  %v6644_v48 = vld [vmem:[#allocation10_spill] sm:$0xff] }
 0x109   : > { %v666_v51 = vmul.f32 0.5, %v6644_v48 }
 0x10b   : > { %v3805_v54 = vpop.permute.xlu1 %527  ;;  %v3807_v0 = vpop.permute.xlu0 %522 }
 0x10c   : > { %854 = vrot.lane.b32.xlu1 %v665_v53, %s3266_s14  ;;  %852 = vrot.lane.b32.xlu0 %v664_v63, %s3266_s14  ;;  %v6645_v53 = vld [vmem:[#allocation2_spill] sm:$0xff] }
 0x10f   : > { %v3813_v49 = vpop.permute.xlu1 %537  ;;  %v3815_v56 = vpop.permute.xlu0 %532 }
 0x110   : > { %858 = vrot.lane.b32.xlu1 %v667_v50, %s3266_s14  ;;  %856 = vrot.lane.b32.xlu0 %v666_v51, %s3266_s14 }
 0x113   : > { %v735_v63 = vpop.permute.xlu1 %734  ;;  %v733_v59 = vpop.permute.xlu0 %732 }
 0x114   : > { %v925_v48 = vsub.f32 %v3319_v4, %v735_v63  ;;  %v1119_v52 = vadd.f32 %v735_v63, %v3319_v4  ;;  %v924_v51 = vsub.f32 %v6645_v53, %v733_v59  ;;  %v1118_v2 = vadd.f32 %v733_v59, %v6645_v53 }
 0x116   : > { %990 = vst.msk [vmem:[%s3824_s17 + $0x8] sm:$0xff] %vm988_vm0, %v925_v48  ;;  %989 = vst.msk [vmem:[%s3824_s17] sm:$0xff] %vm988_vm0, %v924_v51  ;;  %1248 = vrot.lane.b32.xlu1 %v1119_v52, %s3267_s18  ;;  %1246 = vrot.lane.b32.xlu0 %v1118_v2, %s3267_s18 }
 0x117   : > { %v739_v55 = vpop.permute.xlu1 %738  ;;  %v737_v50 = vpop.permute.xlu0 %736  ;;  %1055 = vst.msk [vmem:[%s3824_s17 + $0x8] sm:$0xff] %vm1053_vm1, %v925_v48  ;;  %1054 = vst.msk [vmem:[%s3824_s17] sm:$0xff] %vm1053_vm1, %v924_v51 }
 0x118   : > { %v927_v4 = vsub.f32 %v3316_v3, %v739_v55  ;;  %v1121_v63 = vadd.f32 %v739_v55, %v3316_v3  ;;  %v926_v59 = vsub.f32 %v3308_v1, %v737_v50  ;;  %v1120_v52 = vadd.f32 %v737_v50, %v3308_v1 }
 0x11a   : > { %992 = vst.msk [vmem:[%s3824_s17 + $0x18] sm:$0xff] %vm988_vm0, %v927_v4  ;;  %991 = vst.msk [vmem:[%s3824_s17 + $0x10] sm:$0xff] %vm988_vm0, %v926_v59  ;;  %1252 = vrot.lane.b32.xlu1 %v1121_v63, %s3267_s18  ;;  %1250 = vrot.lane.b32.xlu0 %v1120_v52, %s3267_s18 }
 0x11b   : > { %v743_v48 = vpop.permute.xlu1 %742  ;;  %v741_v53 = vpop.permute.xlu0 %740  ;;  %1056 = vst.msk [vmem:[%s3824_s17 + $0x10] sm:$0xff] %vm1053_vm1, %v926_v59  ;;  %1057 = vst.msk [vmem:[%s3824_s17 + $0x18] sm:$0xff] %vm1053_vm1, %v927_v4 }
 0x11c   : > { %v929_v3 = vsub.f32 %v3324_v5, %v743_v48  ;;  %v1123_v1 = vadd.f32 %v743_v48, %v3324_v5  ;;  %v928_v51 = vsub.f32 %v3327_v6, %v741_v53  ;;  %v1122_v2 = vadd.f32 %v741_v53, %v3327_v6 }
 0x11e   : > { %994 = vst.msk [vmem:[%s3824_s17 + $0x28] sm:$0xff] %vm988_vm0, %v929_v3  ;;  %993 = vst.msk [vmem:[%s3824_s17 + $0x20] sm:$0xff] %vm988_vm0, %v928_v51  ;;  %1256 = vrot.lane.b32.xlu1 %v1123_v1, %s3267_s18  ;;  %1254 = vrot.lane.b32.xlu0 %v1122_v2, %s3267_s18 }
 0x11f   : > { %v747_v55 = vpop.permute.xlu1 %746  ;;  %v745_v50 = vpop.permute.xlu0 %744  ;;  %1058 = vst.msk [vmem:[%s3824_s17 + $0x20] sm:$0xff] %vm1053_vm1, %v928_v51  ;;  %1059 = vst.msk [vmem:[%s3824_s17 + $0x28] sm:$0xff] %vm1053_vm1, %v929_v3 }
 0x120   : > { %v931_v5 = vsub.f32 %v3332_v7, %v747_v55  ;;  %v1125_v6 = vadd.f32 %v747_v55, %v3332_v7  ;;  %v930_v4 = vsub.f32 %v3335_v8, %v745_v50  ;;  %v1124_v63 = vadd.f32 %v745_v50, %v3335_v8 }
 0x122   : > { %996 = vst.msk [vmem:[%s3824_s17 + $0x38] sm:$0xff] %vm988_vm0, %v931_v5  ;;  %995 = vst.msk [vmem:[%s3824_s17 + $0x30] sm:$0xff] %vm988_vm0, %v930_v4  ;;  %1260 = vrot.lane.b32.xlu1 %v1125_v6, %s3267_s18  ;;  %1258 = vrot.lane.b32.xlu0 %v1124_v63, %s3267_s18 }
 0x123   : > { %v751_v59 = vpop.permute.xlu1 %750  ;;  %v749_v52 = vpop.permute.xlu0 %748  ;;  %1060 = vst.msk [vmem:[%s3824_s17 + $0x30] sm:$0xff] %vm1053_vm1, %v930_v4  ;;  %1061 = vst.msk [vmem:[%s3824_s17 + $0x38] sm:$0xff] %vm1053_vm1, %v931_v5 }
 0x124   : > { %v933_v7 = vsub.f32 %v3340_v9, %v751_v59  ;;  %v1127_v8 = vadd.f32 %v751_v59, %v3340_v9  ;;  %v932_v48 = vsub.f32 %v3343_v10, %v749_v52  ;;  %v1126_v53 = vadd.f32 %v749_v52, %v3343_v10 }
 0x126   : > { %998 = vst.msk [vmem:[%s3824_s17 + $0x48] sm:$0xff] %vm988_vm0, %v933_v7  ;;  %997 = vst.msk [vmem:[%s3824_s17 + $0x40] sm:$0xff] %vm988_vm0, %v932_v48  ;;  %1264 = vrot.lane.b32.xlu1 %v1127_v8, %s3267_s18  ;;  %1262 = vrot.lane.b32.xlu0 %v1126_v53, %s3267_s18 }
 0x127   : > { %v755_v3 = vpop.permute.xlu1 %754  ;;  %v753_v1 = vpop.permute.xlu0 %752  ;;  %1062 = vst.msk [vmem:[%s3824_s17 + $0x40] sm:$0xff] %vm1053_vm1, %v932_v48  ;;  %1063 = vst.msk [vmem:[%s3824_s17 + $0x48] sm:$0xff] %vm1053_vm1, %v933_v7 }
 0x128   : > { %v935_v9 = vsub.f32 %v3348_v11, %v755_v3  ;;  %v1129_v10 = vadd.f32 %v755_v3, %v3348_v11  ;;  %v934_v51 = vsub.f32 %v3351_v12, %v753_v1  ;;  %v1128_v2 = vadd.f32 %v753_v1, %v3351_v12 }
 0x12a   : > { %1000 = vst.msk [vmem:[%s3824_s17 + $0x58] sm:$0xff] %vm988_vm0, %v935_v9  ;;  %999 = vst.msk [vmem:[%s3824_s17 + $0x50] sm:$0xff] %vm988_vm0, %v934_v51  ;;  %1268 = vrot.lane.b32.xlu1 %v1129_v10, %s3267_s18  ;;  %1266 = vrot.lane.b32.xlu0 %v1128_v2, %s3267_s18 }
 0x12b   : > { %v759_v55 = vpop.permute.xlu1 %758  ;;  %v757_v50 = vpop.permute.xlu0 %756  ;;  %1064 = vst.msk [vmem:[%s3824_s17 + $0x50] sm:$0xff] %vm1053_vm1, %v934_v51  ;;  %1065 = vst.msk [vmem:[%s3824_s17 + $0x58] sm:$0xff] %vm1053_vm1, %v935_v9 }
 0x12c   : > { %v937_v11 = vsub.f32 %v3356_v13, %v759_v55  ;;  %v1131_v12 = vadd.f32 %v759_v55, %v3356_v13  ;;  %v936_v5 = vsub.f32 %v3359_v14, %v757_v50  ;;  %v1130_v6 = vadd.f32 %v757_v50, %v3359_v14 }
 0x12e   : > { %1002 = vst.msk [vmem:[%s3824_s17 + $0x68] sm:$0xff] %vm988_vm0, %v937_v11  ;;  %1001 = vst.msk [vmem:[%s3824_s17 + $0x60] sm:$0xff] %vm988_vm0, %v936_v5  ;;  %1272 = vrot.lane.b32.xlu1 %v1131_v12, %s3267_s18  ;;  %1270 = vrot.lane.b32.xlu0 %v1130_v6, %s3267_s18 }
 0x12f   : > { %v763_v4 = vpop.permute.xlu1 %762  ;;  %v761_v63 = vpop.permute.xlu0 %760  ;;  %1066 = vst.msk [vmem:[%s3824_s17 + $0x60] sm:$0xff] %vm1053_vm1, %v936_v5  ;;  %1067 = vst.msk [vmem:[%s3824_s17 + $0x68] sm:$0xff] %vm1053_vm1, %v937_v11 }
 0x130   : > { %v939_v13 = vsub.f32 %v3364_v15, %v763_v4  ;;  %v1133_v14 = vadd.f32 %v763_v4, %v3364_v15  ;;  %v938_v59 = vsub.f32 %v3367_v16, %v761_v63  ;;  %v1132_v52 = vadd.f32 %v761_v63, %v3367_v16 }
 0x132   : > { %1004 = vst.msk [vmem:[%s3824_s17 + $0x78] sm:$0xff] %vm988_vm0, %v939_v13  ;;  %1003 = vst.msk [vmem:[%s3824_s17 + $0x70] sm:$0xff] %vm988_vm0, %v938_v59  ;;  %1276 = vrot.lane.b32.xlu1 %v1133_v14, %s3267_s18  ;;  %1274 = vrot.lane.b32.xlu0 %v1132_v52, %s3267_s18 }
 0x133   : > { %v767_v7 = vpop.permute.xlu1 %766  ;;  %v765_v8 = vpop.permute.xlu0 %764  ;;  %1068 = vst.msk [vmem:[%s3824_s17 + $0x70] sm:$0xff] %vm1053_vm1, %v938_v59  ;;  %1069 = vst.msk [vmem:[%s3824_s17 + $0x78] sm:$0xff] %vm1053_vm1, %v939_v13 }
 0x134   : > { %v941_v15 = vsub.f32 %v3372_v17, %v767_v7  ;;  %v1135_v16 = vadd.f32 %v767_v7, %v3372_v17  ;;  %v940_v48 = vsub.f32 %v3375_v18, %v765_v8  ;;  %v1134_v53 = vadd.f32 %v765_v8, %v3375_v18 }
 0x136   : > { %1006 = vst.msk [vmem:[%s3824_s17 + $0x88] sm:$0xff] %vm988_vm0, %v941_v15  ;;  %1005 = vst.msk [vmem:[%s3824_s17 + $0x80] sm:$0xff] %vm988_vm0, %v940_v48  ;;  %1280 = vrot.lane.b32.xlu1 %v1135_v16, %s3267_s18  ;;  %1278 = vrot.lane.b32.xlu0 %v1134_v53, %s3267_s18 }
 0x137   : > { %v771_v3 = vpop.permute.xlu1 %770  ;;  %v769_v1 = vpop.permute.xlu0 %768  ;;  %1070 = vst.msk [vmem:[%s3824_s17 + $0x80] sm:$0xff] %vm1053_vm1, %v940_v48  ;;  %1071 = vst.msk [vmem:[%s3824_s17 + $0x88] sm:$0xff] %vm1053_vm1, %v941_v15 }
 0x138   : > { %v943_v17 = vsub.f32 %v3380_v19, %v771_v3  ;;  %v1137_v18 = vadd.f32 %v771_v3, %v3380_v19  ;;  %v942_v9 = vsub.f32 %v3383_v20, %v769_v1  ;;  %v1136_v10 = vadd.f32 %v769_v1, %v3383_v20 }
 0x13a   : > { %1008 = vst.msk [vmem:[%s3824_s17 + $0x98] sm:$0xff] %vm988_vm0, %v943_v17  ;;  %1007 = vst.msk [vmem:[%s3824_s17 + $0x90] sm:$0xff] %vm988_vm0, %v942_v9  ;;  %1284 = vrot.lane.b32.xlu1 %v1137_v18, %s3267_s18  ;;  %1282 = vrot.lane.b32.xlu0 %v1136_v10, %s3267_s18 }
 0x13b   : > { %v775_v51 = vpop.permute.xlu1 %774  ;;  %v773_v2 = vpop.permute.xlu0 %772  ;;  %1072 = vst.msk [vmem:[%s3824_s17 + $0x90] sm:$0xff] %vm1053_vm1, %v942_v9  ;;  %1073 = vst.msk [vmem:[%s3824_s17 + $0x98] sm:$0xff] %vm1053_vm1, %v943_v17 }
 0x13c   : > { %v945_v19 = vsub.f32 %v3388_v21, %v775_v51  ;;  %v1139_v20 = vadd.f32 %v775_v51, %v3388_v21  ;;  %v944_v55 = vsub.f32 %v3391_v22, %v773_v2  ;;  %v1138_v50 = vadd.f32 %v773_v2, %v3391_v22 }
 0x13e   : > { %1010 = vst.msk [vmem:[%s3824_s17 + $0xa8] sm:$0xff] %vm988_vm0, %v945_v19  ;;  %1009 = vst.msk [vmem:[%s3824_s17 + $0xa0] sm:$0xff] %vm988_vm0, %v944_v55  ;;  %1288 = vrot.lane.b32.xlu1 %v1139_v20, %s3267_s18  ;;  %1286 = vrot.lane.b32.xlu0 %v1138_v50, %s3267_s18 }
 0x13f   : > { %v779_v11 = vpop.permute.xlu1 %778  ;;  %v777_v12 = vpop.permute.xlu0 %776  ;;  %1074 = vst.msk [vmem:[%s3824_s17 + $0xa0] sm:$0xff] %vm1053_vm1, %v944_v55  ;;  %1075 = vst.msk [vmem:[%s3824_s17 + $0xa8] sm:$0xff] %vm1053_vm1, %v945_v19 }
 0x140   : > { %v947_v21 = vsub.f32 %v3396_v23, %v779_v11  ;;  %v1141_v22 = vadd.f32 %v779_v11, %v3396_v23  ;;  %v946_v5 = vsub.f32 %v3399_v24, %v777_v12  ;;  %v1140_v6 = vadd.f32 %v777_v12, %v3399_v24 }
 0x142   : > { %1012 = vst.msk [vmem:[%s3824_s17 + $0xb8] sm:$0xff] %vm988_vm0, %v947_v21  ;;  %1011 = vst.msk [vmem:[%s3824_s17 + $0xb0] sm:$0xff] %vm988_vm0, %v946_v5  ;;  %1292 = vrot.lane.b32.xlu1 %v1141_v22, %s3267_s18  ;;  %1290 = vrot.lane.b32.xlu0 %v1140_v6, %s3267_s18 }
 0x143   : > { %v783_v4 = vpop.permute.xlu1 %782  ;;  %v781_v63 = vpop.permute.xlu0 %780  ;;  %1076 = vst.msk [vmem:[%s3824_s17 + $0xb0] sm:$0xff] %vm1053_vm1, %v946_v5  ;;  %1077 = vst.msk [vmem:[%s3824_s17 + $0xb8] sm:$0xff] %vm1053_vm1, %v947_v21 }
 0x144   : > { %v949_v23 = vsub.f32 %v3404_v25, %v783_v4  ;;  %v1143_v24 = vadd.f32 %v783_v4, %v3404_v25  ;;  %v948_v13 = vsub.f32 %v3407_v26, %v781_v63  ;;  %v1142_v14 = vadd.f32 %v781_v63, %v3407_v26 }
 0x146   : > { %1014 = vst.msk [vmem:[%s3824_s17 + $0xc8] sm:$0xff] %vm988_vm0, %v949_v23  ;;  %1013 = vst.msk [vmem:[%s3824_s17 + $0xc0] sm:$0xff] %vm988_vm0, %v948_v13  ;;  %1296 = vrot.lane.b32.xlu1 %v1143_v24, %s3267_s18  ;;  %1294 = vrot.lane.b32.xlu0 %v1142_v14, %s3267_s18 }
 0x147   : > { %v787_v59 = vpop.permute.xlu1 %786  ;;  %v785_v52 = vpop.permute.xlu0 %784  ;;  %1078 = vst.msk [vmem:[%s3824_s17 + $0xc0] sm:$0xff] %vm1053_vm1, %v948_v13  ;;  %1079 = vst.msk [vmem:[%s3824_s17 + $0xc8] sm:$0xff] %vm1053_vm1, %v949_v23 }
 0x148   : > { %v951_v25 = vsub.f32 %v3412_v27, %v787_v59  ;;  %v1145_v26 = vadd.f32 %v787_v59, %v3412_v27  ;;  %v950_v7 = vsub.f32 %v3415_v28, %v785_v52  ;;  %v1144_v8 = vadd.f32 %v785_v52, %v3415_v28 }
 0x14a   : > { %1016 = vst.msk [vmem:[%s3824_s17 + $0xd8] sm:$0xff] %vm988_vm0, %v951_v25  ;;  %1015 = vst.msk [vmem:[%s3824_s17 + $0xd0] sm:$0xff] %vm988_vm0, %v950_v7  ;;  %1300 = vrot.lane.b32.xlu1 %v1145_v26, %s3267_s18  ;;  %1298 = vrot.lane.b32.xlu0 %v1144_v8, %s3267_s18 }
 0x14b   : > { %v791_v15 = vpop.permute.xlu1 %790  ;;  %v789_v16 = vpop.permute.xlu0 %788  ;;  %1080 = vst.msk [vmem:[%s3824_s17 + $0xd0] sm:$0xff] %vm1053_vm1, %v950_v7  ;;  %1081 = vst.msk [vmem:[%s3824_s17 + $0xd8] sm:$0xff] %vm1053_vm1, %v951_v25 }
 0x14c   : > { %v953_v27 = vsub.f32 %v3420_v29, %v791_v15  ;;  %v1147_v28 = vadd.f32 %v791_v15, %v3420_v29  ;;  %v952_v48 = vsub.f32 %v3423_v30, %v789_v16  ;;  %v1146_v53 = vadd.f32 %v789_v16, %v3423_v30 }
 0x14e   : > { %1018 = vst.msk [vmem:[%s3824_s17 + $0xe8] sm:$0xff] %vm988_vm0, %v953_v27  ;;  %1017 = vst.msk [vmem:[%s3824_s17 + $0xe0] sm:$0xff] %vm988_vm0, %v952_v48  ;;  %1304 = vrot.lane.b32.xlu1 %v1147_v28, %s3267_s18  ;;  %1302 = vrot.lane.b32.xlu0 %v1146_v53, %s3267_s18 }
 0x14f   : > { %v795_v3 = vpop.permute.xlu1 %794  ;;  %v793_v1 = vpop.permute.xlu0 %792  ;;  %1082 = vst.msk [vmem:[%s3824_s17 + $0xe0] sm:$0xff] %vm1053_vm1, %v952_v48  ;;  %1083 = vst.msk [vmem:[%s3824_s17 + $0xe8] sm:$0xff] %vm1053_vm1, %v953_v27  ;;  %v4154_v53 = vld [vmem:[%s3305_s13 + $0x170] sm:$0xff] }
 0x150   : > { %v955_v29 = vsub.f32 %v3428_v31, %v795_v3  ;;  %v1149_v30 = vadd.f32 %v795_v3, %v3428_v31  ;;  %v954_v17 = vsub.f32 %v3431_v32, %v793_v1  ;;  %v1148_v18 = vadd.f32 %v793_v1, %v3431_v32 }
 0x152   : > { %1020 = vst.msk [vmem:[%s3824_s17 + $0xf8] sm:$0xff] %vm988_vm0, %v955_v29  ;;  %1019 = vst.msk [vmem:[%s3824_s17 + $0xf0] sm:$0xff] %vm988_vm0, %v954_v17  ;;  %1308 = vrot.lane.b32.xlu1 %v1149_v30, %s3267_s18  ;;  %1306 = vrot.lane.b32.xlu0 %v1148_v18, %s3267_s18 }
 0x153   : > { %v799_v9 = vpop.permute.xlu1 %798  ;;  %v797_v10 = vpop.permute.xlu0 %796  ;;  %1084 = vst.msk [vmem:[%s3824_s17 + $0xf0] sm:$0xff] %vm1053_vm1, %v954_v17  ;;  %1085 = vst.msk [vmem:[%s3824_s17 + $0xf8] sm:$0xff] %vm1053_vm1, %v955_v29  ;;  %v4169_v30 = vld [vmem:[%s3305_s13 + $0x188] sm:$0xff] }
 0x154   : > { %v957_v31 = vsub.f32 %v3436_v33, %v799_v9  ;;  %v1151_v32 = vadd.f32 %v799_v9, %v3436_v33  ;;  %v956_v51 = vsub.f32 %v3439_v34, %v797_v10  ;;  %v1150_v2 = vadd.f32 %v797_v10, %v3439_v34  ;;  %v4174_v9 = vld [vmem:[%s3305_s13 + $0x180] sm:$0xff] }
 0x156   : > { %1022 = vst.msk [vmem:[%s3824_s17 + $0x108] sm:$0xff] %vm988_vm0, %v957_v31  ;;  %1021 = vst.msk [vmem:[%s3824_s17 + $0x100] sm:$0xff] %vm988_vm0, %v956_v51  ;;  %1312 = vrot.lane.b32.xlu1 %v1151_v32, %s3267_s18  ;;  %1310 = vrot.lane.b32.xlu0 %v1150_v2, %s3267_s18 }
 0x157   : > { %v803_v19 = vpop.permute.xlu1 %802  ;;  %v801_v20 = vpop.permute.xlu0 %800  ;;  %1086 = vst.msk [vmem:[%s3824_s17 + $0x100] sm:$0xff] %vm1053_vm1, %v956_v51  ;;  %1087 = vst.msk [vmem:[%s3824_s17 + $0x108] sm:$0xff] %vm1053_vm1, %v957_v31  ;;  %v4189_v2 = vld [vmem:[%s3305_s13 + $0x198] sm:$0xff] }
 0x158   : > { %v959_v33 = vsub.f32 %v3444_v35, %v803_v19  ;;  %v1153_v34 = vadd.f32 %v803_v19, %v3444_v35  ;;  %v958_v55 = vsub.f32 %v3447_v36, %v801_v20  ;;  %v1152_v50 = vadd.f32 %v801_v20, %v3447_v36 }
 0x15a   : > { %1024 = vst.msk [vmem:[%s3824_s17 + $0x118] sm:$0xff] %vm988_vm0, %v959_v33  ;;  %1023 = vst.msk [vmem:[%s3824_s17 + $0x110] sm:$0xff] %vm988_vm0, %v958_v55  ;;  %1316 = vrot.lane.b32.xlu1 %v1153_v34, %s3267_s18  ;;  %1314 = vrot.lane.b32.xlu0 %v1152_v50, %s3267_s18 }
 0x15b   : > { %v807_v11 = vpop.permute.xlu1 %806  ;;  %v805_v12 = vpop.permute.xlu0 %804  ;;  %1088 = vst.msk [vmem:[%s3824_s17 + $0x110] sm:$0xff] %vm1053_vm1, %v958_v55  ;;  %1089 = vst.msk [vmem:[%s3824_s17 + $0x118] sm:$0xff] %vm1053_vm1, %v959_v33  ;;  %v4194_v33 = vld [vmem:[%s3305_s13 + $0x190] sm:$0xff] }
 0x15c   : > { %v961_v35 = vsub.f32 %v3452_v37, %v807_v11  ;;  %v1155_v36 = vadd.f32 %v807_v11, %v3452_v37  ;;  %v960_v21 = vsub.f32 %v3455_v38, %v805_v12  ;;  %v1154_v22 = vadd.f32 %v805_v12, %v3455_v38  ;;  %v4209_v12 = vld [vmem:[%s3305_s13 + $0x1a8] sm:$0xff] }
 0x15e   : > { %1026 = vst.msk [vmem:[%s3824_s17 + $0x128] sm:$0xff] %vm988_vm0, %v961_v35  ;;  %1025 = vst.msk [vmem:[%s3824_s17 + $0x120] sm:$0xff] %vm988_vm0, %v960_v21  ;;  %1320 = vrot.lane.b32.xlu1 %v1155_v36, %s3267_s18  ;;  %1318 = vrot.lane.b32.xlu0 %v1154_v22, %s3267_s18 }
 0x15f   : > { %v811_v5 = vpop.permute.xlu1 %810  ;;  %v809_v6 = vpop.permute.xlu0 %808  ;;  %1090 = vst.msk [vmem:[%s3824_s17 + $0x120] sm:$0xff] %vm1053_vm1, %v960_v21  ;;  %1091 = vst.msk [vmem:[%s3824_s17 + $0x128] sm:$0xff] %vm1053_vm1, %v961_v35  ;;  %v4214_v21 = vld [vmem:[%s3305_s13 + $0x1a0] sm:$0xff] }
 0x160   : > { %v963_v37 = vsub.f32 %v3460_v39, %v811_v5  ;;  %v1157_v38 = vadd.f32 %v811_v5, %v3460_v39  ;;  %v962_v4 = vsub.f32 %v3463_v40, %v809_v6  ;;  %v1156_v63 = vadd.f32 %v809_v6, %v3463_v40 }
 0x162   : > { %1028 = vst.msk [vmem:[%s3824_s17 + $0x138] sm:$0xff] %vm988_vm0, %v963_v37  ;;  %1027 = vst.msk [vmem:[%s3824_s17 + $0x130] sm:$0xff] %vm988_vm0, %v962_v4  ;;  %1324 = vrot.lane.b32.xlu1 %v1157_v38, %s3267_s18  ;;  %1322 = vrot.lane.b32.xlu0 %v1156_v63, %s3267_s18 }
 0x163   : > { %v815_v23 = vpop.permute.xlu1 %814  ;;  %v813_v24 = vpop.permute.xlu0 %812  ;;  %1092 = vst.msk [vmem:[%s3824_s17 + $0x130] sm:$0xff] %vm1053_vm1, %v962_v4  ;;  %1093 = vst.msk [vmem:[%s3824_s17 + $0x138] sm:$0xff] %vm1053_vm1, %v963_v37  ;;  %v4229_v38 = vld [vmem:[%s3305_s13 + $0x1b8] sm:$0xff] }
 0x164   : > { %v965_v39 = vsub.f32 %v3468_v41, %v815_v23  ;;  %v1159_v40 = vadd.f32 %v815_v23, %v3468_v41  ;;  %v964_v13 = vsub.f32 %v3471_v42, %v813_v24  ;;  %v1158_v14 = vadd.f32 %v813_v24, %v3471_v42  ;;  %v4234_v23 = vld [vmem:[%s3305_s13 + $0x1b0] sm:$0xff] }
 0x166   : > { %1030 = vst.msk [vmem:[%s3824_s17 + $0x148] sm:$0xff] %vm988_vm0, %v965_v39  ;;  %1029 = vst.msk [vmem:[%s3824_s17 + $0x140] sm:$0xff] %vm988_vm0, %v964_v13  ;;  %1328 = vrot.lane.b32.xlu1 %v1159_v40, %s3267_s18  ;;  %1326 = vrot.lane.b32.xlu0 %v1158_v14, %s3267_s18 }
 0x167   : > { %v819_v59 = vpop.permute.xlu1 %818  ;;  %v817_v52 = vpop.permute.xlu0 %816  ;;  %1094 = vst.msk [vmem:[%s3824_s17 + $0x140] sm:$0xff] %vm1053_vm1, %v964_v13  ;;  %1095 = vst.msk [vmem:[%s3824_s17 + $0x148] sm:$0xff] %vm1053_vm1, %v965_v39  ;;  %v4249_v14 = vld [vmem:[%s3305_s13 + $0x1c8] sm:$0xff] }
 0x168   : > { %v967_v41 = vsub.f32 %v3476_v43, %v819_v59  ;;  %v1161_v42 = vadd.f32 %v819_v59, %v3476_v43  ;;  %v966_v25 = vsub.f32 %v3479_v44, %v817_v52  ;;  %v1160_v26 = vadd.f32 %v817_v52, %v3479_v44 }
 0x16a   : > { %1032 = vst.msk [vmem:[%s3824_s17 + $0x158] sm:$0xff] %vm988_vm0, %v967_v41  ;;  %1031 = vst.msk [vmem:[%s3824_s17 + $0x150] sm:$0xff] %vm988_vm0, %v966_v25  ;;  %1332 = vrot.lane.b32.xlu1 %v1161_v42, %s3267_s18  ;;  %1330 = vrot.lane.b32.xlu0 %v1160_v26, %s3267_s18 }
 0x16b   : > { %v823_v7 = vpop.permute.xlu1 %822  ;;  %v821_v8 = vpop.permute.xlu0 %820  ;;  %1096 = vst.msk [vmem:[%s3824_s17 + $0x150] sm:$0xff] %vm1053_vm1, %v966_v25  ;;  %1097 = vst.msk [vmem:[%s3824_s17 + $0x158] sm:$0xff] %vm1053_vm1, %v967_v41  ;;  %v4254_v41 = vld [vmem:[%s3305_s13 + $0x1c0] sm:$0xff] }
 0x16c   : > { %v969_v43 = vsub.f32 %v3484_v45, %v823_v7  ;;  %v1163_v44 = vadd.f32 %v823_v7, %v3484_v45  ;;  %v968_v15 = vsub.f32 %v3487_v46, %v821_v8  ;;  %v1162_v16 = vadd.f32 %v821_v8, %v3487_v46  ;;  %v4150_v46 = vld [vmem:[%s3305_s13 + $0x178] sm:$0xff] }
 0x16d   : > { %v4269_v8 = vld [vmem:[%s3305_s13 + $0x1d8] sm:$0xff] }
 0x16e   : > { %1034 = vst.msk [vmem:[%s3824_s17 + $0x168] sm:$0xff] %vm988_vm0, %v969_v43  ;;  %1033 = vst.msk [vmem:[%s3824_s17 + $0x160] sm:$0xff] %vm988_vm0, %v968_v15  ;;  %1336 = vrot.lane.b32.xlu1 %v1163_v44, %s3267_s18  ;;  %1334 = vrot.lane.b32.xlu0 %v1162_v16, %s3267_s18 }
 0x16f   : > { %v827_v27 = vpop.permute.xlu1 %826  ;;  %v825_v28 = vpop.permute.xlu0 %824  ;;  %1098 = vst.msk [vmem:[%s3824_s17 + $0x160] sm:$0xff] %vm1053_vm1, %v968_v15  ;;  %1099 = vst.msk [vmem:[%s3824_s17 + $0x168] sm:$0xff] %vm1053_vm1, %v969_v43  ;;  %v4274_v15 = vld [vmem:[%s3305_s13 + $0x1d0] sm:$0xff] }
 0x170   : > { %v971_v45 = vsub.f32 %v3492_v47, %v827_v27  ;;  %v1165_v48 = vadd.f32 %v4150_v46, %v827_v27  ;;  %v970_v3 = vsub.f32 %v4154_v53, %v825_v28  ;;  %v1164_v1 = vadd.f32 %v4154_v53, %v825_v28 }
 0x172   : > { %1036 = vst.msk [vmem:[%s3824_s17 + $0x178] sm:$0xff] %vm988_vm0, %v971_v45  ;;  %1035 = vst.msk [vmem:[%s3824_s17 + $0x170] sm:$0xff] %vm988_vm0, %v970_v3  ;;  %1340 = vrot.lane.b32.xlu1 %v1165_v48, %s3267_s18  ;;  %1338 = vrot.lane.b32.xlu0 %v1164_v1, %s3267_s18 }
 0x173   : > { %v831_v47 = vpop.permute.xlu1 %830  ;;  %v829_v29 = vpop.permute.xlu0 %828  ;;  %1100 = vst.msk [vmem:[%s3824_s17 + $0x170] sm:$0xff] %vm1053_vm1, %v970_v3  ;;  %1101 = vst.msk [vmem:[%s3824_s17 + $0x178] sm:$0xff] %vm1053_vm1, %v971_v45  ;;  %v4289_v48 = vld [vmem:[%s3305_s13 + $0x1e8] sm:$0xff] }
 0x174   : > { %v973_v17 = vsub.f32 %v4169_v30, %v831_v47  ;;  %v1167_v18 = vadd.f32 %v4169_v30, %v831_v47  ;;  %v972_v10 = vsub.f32 %v4174_v9, %v829_v29  ;;  %v1166_v31 = vadd.f32 %v4174_v9, %v829_v29  ;;  %v4294_v47 = vld [vmem:[%s3305_s13 + $0x1e0] sm:$0xff] }
 0x176   : > { %1038 = vst.msk [vmem:[%s3824_s17 + $0x188] sm:$0xff] %vm988_vm0, %v973_v17  ;;  %1037 = vst.msk [vmem:[%s3824_s17 + $0x180] sm:$0xff] %vm988_vm0, %v972_v10  ;;  %1344 = vrot.lane.b32.xlu1 %v1167_v18, %s3267_s18  ;;  %1342 = vrot.lane.b32.xlu0 %v1166_v31, %s3267_s18 }
 0x177   : > { %v835_v32 = vpop.permute.xlu1 %834  ;;  %v833_v51 = vpop.permute.xlu0 %832  ;;  %1102 = vst.msk [vmem:[%s3824_s17 + $0x180] sm:$0xff] %vm1053_vm1, %v972_v10  ;;  %1103 = vst.msk [vmem:[%s3824_s17 + $0x188] sm:$0xff] %vm1053_vm1, %v973_v17  ;;  %v4309_v31 = vld [vmem:[%s3305_s13 + $0x1f8] sm:$0xff] }
 0x178   : > { %v975_v19 = vsub.f32 %v4189_v2, %v835_v32  ;;  %v1169_v20 = vadd.f32 %v4189_v2, %v835_v32  ;;  %v974_v34 = vsub.f32 %v4194_v33, %v833_v51  ;;  %v1168_v55 = vadd.f32 %v4194_v33, %v833_v51 }
 0x17a   : > { %1040 = vst.msk [vmem:[%s3824_s17 + $0x198] sm:$0xff] %vm988_vm0, %v975_v19  ;;  %1039 = vst.msk [vmem:[%s3824_s17 + $0x190] sm:$0xff] %vm988_vm0, %v974_v34  ;;  %1348 = vrot.lane.b32.xlu1 %v1169_v20, %s3267_s18  ;;  %1346 = vrot.lane.b32.xlu0 %v1168_v55, %s3267_s18 }
 0x17b   : > { %v839_v50 = vpop.permute.xlu1 %838  ;;  %v837_v11 = vpop.permute.xlu0 %836  ;;  %1104 = vst.msk [vmem:[%s3824_s17 + $0x190] sm:$0xff] %vm1053_vm1, %v974_v34  ;;  %1105 = vst.msk [vmem:[%s3824_s17 + $0x198] sm:$0xff] %vm1053_vm1, %v975_v19  ;;  %v4314_v19 = vld [vmem:[%s3305_s13 + $0x1f0] sm:$0xff] }
 0x17c   : > { %v977_v35 = vsub.f32 %v4209_v12, %v839_v50  ;;  %v1171_v36 = vadd.f32 %v4209_v12, %v839_v50  ;;  %v976_v22 = vsub.f32 %v4214_v21, %v837_v11  ;;  %v1170_v5 = vadd.f32 %v4214_v21, %v837_v11 }
 0x17e   : > { %1042 = vst.msk [vmem:[%s3824_s17 + $0x1a8] sm:$0xff] %vm988_vm0, %v977_v35  ;;  %1041 = vst.msk [vmem:[%s3824_s17 + $0x1a0] sm:$0xff] %vm988_vm0, %v976_v22  ;;  %1352 = vrot.lane.b32.xlu1 %v1171_v36, %s3267_s18  ;;  %1350 = vrot.lane.b32.xlu0 %v1170_v5, %s3267_s18 }
 0x17f   : > { %v843_v6 = vpop.permute.xlu1 %842  ;;  %v841_v37 = vpop.permute.xlu0 %840  ;;  %1106 = vst.msk [vmem:[%s3824_s17 + $0x1a0] sm:$0xff] %vm1053_vm1, %v976_v22  ;;  %1107 = vst.msk [vmem:[%s3824_s17 + $0x1a8] sm:$0xff] %vm1053_vm1, %v977_v35 }
 0x180   : > { %v979_v4 = vsub.f32 %v4229_v38, %v843_v6  ;;  %v1173_v63 = vadd.f32 %v4229_v38, %v843_v6  ;;  %v978_v24 = vsub.f32 %v4234_v23, %v841_v37  ;;  %v1172_v39 = vadd.f32 %v4234_v23, %v841_v37 }
 0x182   : > { %1044 = vst.msk [vmem:[%s3824_s17 + $0x1b8] sm:$0xff] %vm988_vm0, %v979_v4  ;;  %1043 = vst.msk [vmem:[%s3824_s17 + $0x1b0] sm:$0xff] %vm988_vm0, %v978_v24  ;;  %1356 = vrot.lane.b32.xlu1 %v1173_v63, %s3267_s18  ;;  %1354 = vrot.lane.b32.xlu0 %v1172_v39, %s3267_s18 }
 0x183   : > { %v847_v40 = vpop.permute.xlu1 %846  ;;  %v845_v13 = vpop.permute.xlu0 %844  ;;  %1108 = vst.msk [vmem:[%s3824_s17 + $0x1b0] sm:$0xff] %vm1053_vm1, %v978_v24  ;;  %1109 = vst.msk [vmem:[%s3824_s17 + $0x1b8] sm:$0xff] %vm1053_vm1, %v979_v4 }
 0x184   : > { %v981_v59 = vsub.f32 %v4249_v14, %v847_v40  ;;  %v1175_v52 = vadd.f32 %v4249_v14, %v847_v40  ;;  %v980_v42 = vsub.f32 %v4254_v41, %v845_v13  ;;  %v1174_v25 = vadd.f32 %v4254_v41, %v845_v13  ;;  %v3195_v13 = vld [vmem:[%s3305_s13] sm:$0xff] }
 0x186   : > { %1046 = vst.msk [vmem:[%s3824_s17 + $0x1c8] sm:$0xff] %vm988_vm0, %v981_v59  ;;  %1045 = vst.msk [vmem:[%s3824_s17 + $0x1c0] sm:$0xff] %vm988_vm0, %v980_v42  ;;  %1360 = vrot.lane.b32.xlu1 %v1175_v52, %s3267_s18  ;;  %1358 = vrot.lane.b32.xlu0 %v1174_v25, %s3267_s18 }
 0x187   : > { %v851_v26 = vpop.permute.xlu1 %850  ;;  %v849_v7 = vpop.permute.xlu0 %848  ;;  %1110 = vst.msk [vmem:[%s3824_s17 + $0x1c0] sm:$0xff] %vm1053_vm1, %v980_v42  ;;  %1111 = vst.msk [vmem:[%s3824_s17 + $0x1c8] sm:$0xff] %vm1053_vm1, %v981_v59  ;;  %v6646_v59 = vld [vmem:[#allocation12_spill] sm:$0xff] }
 0x188   : > { %v983_v43 = vsub.f32 %v4269_v8, %v851_v26  ;;  %v1177_v44 = vadd.f32 %v4269_v8, %v851_v26  ;;  %v982_v16 = vsub.f32 %v4274_v15, %v849_v7  ;;  %v1176_v27 = vadd.f32 %v4274_v15, %v849_v7  ;;  %v3196_v26 = vld [vmem:[%s3305_s13 + $0x10] sm:$0xff]  ;;  %v6647_v7 = vld [vmem:[#allocation11_spill] sm:$0xff] }
 0x189   : > { %v4378_v52 = vmul.f32 %v3195_v13, %v6646_v59  ;;  %v3203_v59 = vld [vmem:[%s3305_s13 + $0x40] sm:$0xff] }
 0x18a   : > { %1048 = vst.msk [vmem:[%s3824_s17 + $0x1d8] sm:$0xff] %vm988_vm0, %v983_v43  ;;  %1047 = vst.msk [vmem:[%s3824_s17 + $0x1d0] sm:$0xff] %vm988_vm0, %v982_v16  ;;  %1364 = vrot.lane.b32.xlu1 %v1177_v44, %s3267_s18  ;;  %1362 = vrot.lane.b32.xlu0 %v1176_v27, %s3267_s18  ;;  %v6648_v27 = vld [vmem:[#allocation14_spill] sm:$0xff] }
 0x18b   : > { %v855_v28 = vpop.permute.xlu1 %854  ;;  %v853_v45 = vpop.permute.xlu0 %852  ;;  %1112 = vst.msk [vmem:[%s3824_s17 + $0x1d0] sm:$0xff] %vm1053_vm1, %v982_v16  ;;  %1113 = vst.msk [vmem:[%s3824_s17 + $0x1d8] sm:$0xff] %vm1053_vm1, %v983_v43  ;;  %v4390_v43 = vmul.f32 %v3196_v26, %v6647_v7  ;;  %v1569_v44 = vsel %vm1568_vm4, %v4378_v52, -inf  ;;  %v3197_v16 = vld [vmem:[%s3305_s13 + $0x8] sm:$0xff] }
 0x18c   : > { %v985_v3 = vsub.f32 %v4289_v48, %v855_v28  ;;  %v1179_v1 = vadd.f32 %v4289_v48, %v855_v28  ;;  %v984_v29 = vsub.f32 %v4294_v47, %v853_v45  ;;  %v1178_v17 = vadd.f32 %v4294_v47, %v853_v45 }
 0x18d   : > { %v4400_v28 = vmul.f32 %v3197_v16, %v6648_v27  ;;  %v3204_v16 = vld [vmem:[%s3305_s13 + $0x48] sm:$0xff] }
 0x18e   : > { %1050 = vst.msk [vmem:[%s3824_s17 + $0x1e8] sm:$0xff] %vm988_vm0, %v985_v3  ;;  %1049 = vst.msk [vmem:[%s3824_s17 + $0x1e0] sm:$0xff] %vm988_vm0, %v984_v29  ;;  %1368 = vrot.lane.b32.xlu1 %v1179_v1, %s3267_s18  ;;  %1366 = vrot.lane.b32.xlu0 %v1178_v17, %s3267_s18  ;;  %v6660_v27 = vld [vmem:[#allocation19_spill] sm:$0xff] }
 0x18f   : > { %v859_v18 = vpop.permute.xlu1 %858  ;;  %v857_v10 = vpop.permute.xlu0 %856  ;;  %1114 = vst.msk [vmem:[%s3824_s17 + $0x1e0] sm:$0xff] %vm1053_vm1, %v984_v29  ;;  %1115 = vst.msk [vmem:[%s3824_s17 + $0x1e8] sm:$0xff] %vm1053_vm1, %v985_v3  ;;  %v3198_v1 = vld [vmem:[%s3305_s13 + $0x18] sm:$0xff] }
 0x190   : > { %v987_v32 = vsub.f32 %v4309_v31, %v859_v18  ;;  %v1181_v51 = vadd.f32 %v4309_v31, %v859_v18  ;;  %v986_v20 = vsub.f32 %v4314_v19, %v857_v10  ;;  %v1180_v34 = vadd.f32 %v4314_v19, %v857_v10  ;;  %6649 = vst [vmem:[#allocation7_spill] sm:$0xff] %v4400_v28  ;;  %v6650_v29 = vld [vmem:[#allocation13_spill] sm:$0xff]  ;;  %v3199_v10 = vld [vmem:[%s3305_s13 + $0x20] sm:$0xff] }
 0x191   : > { %v4408_v17 = vmul.f32 %v3198_v1, %v6650_v29  ;;  %v1575_v18 = vsel %vm1568_vm4, %v4390_v43, -inf  ;;  %v3205_v1 = vld [vmem:[%s3305_s13 + $0x50] sm:$0xff]  ;;  %v6661_v29 = vld [vmem:[#allocation22_spill] sm:$0xff] }
 0x192   : > { %1052 = vst.msk [vmem:[%s3824_s17 + $0x1f8] sm:$0xff] %vm988_vm0, %v987_v32  ;;  %1051 = vst.msk [vmem:[%s3824_s17 + $0x1f0] sm:$0xff] %vm988_vm0, %v986_v20  ;;  %1372 = vrot.lane.b32.xlu1 %v1181_v51, %s3267_s18  ;;  %1370 = vrot.lane.b32.xlu0 %v1180_v34, %s3267_s18 }
 0x193   : > { %v1249_v55 = vpop.permute.xlu1 %1248  ;;  %1116 = vst.msk [vmem:[%s3824_s17 + $0x1f0] sm:$0xff] %vm1053_vm1, %v986_v20  ;;  %1117 = vst.msk [vmem:[%s3824_s17 + $0x1f8] sm:$0xff] %vm1053_vm1, %v987_v32  ;;  %v1247_v50 = vpop.permute.xlu0 %1246  ;;  %v6652_v32 = vld [vmem:[#allocation16_spill] sm:$0xff]  ;;  %v1572_v20 = vsel %vm1568_vm4, %v4400_v28, -inf }
 0x194   : > { %1440 = vst.msk [vmem:[%s3824_s17 + $0x8] sm:$0xff] %vm1438_vm2, %v1249_v55  ;;  %1439 = vst.msk [vmem:[%s3824_s17] sm:$0xff] %vm1438_vm2, %v1247_v50  ;;  %v4418_v51 = vmul.f32 %v3199_v10, %v6652_v32 }
 0x195   : > { %1505 = vst.msk [vmem:[%s3824_s17 + $0x8] sm:$0xff] %vm1503_vm3, %v1249_v55  ;;  %1504 = vst.msk [vmem:[%s3824_s17] sm:$0xff] %vm1503_vm3, %v1247_v50  ;;  %v3200_v50 = vld [vmem:[%s3305_s13 + $0x28] sm:$0xff] }
 0x196   : > { %6651 = vst [vmem:[#allocation8_spill] sm:$0xff] %v4408_v17  ;;  %6653 = vst [vmem:[#allocation9_spill] sm:$0xff] %v4418_v51 }
 0x197   : > { %v1253_v11 = vpop.permute.xlu1 %1252  ;;  %v1251_v35 = vpop.permute.xlu0 %1250 }
 0x198   : > { %1442 = vst.msk [vmem:[%s3824_s17 + $0x18] sm:$0xff] %vm1438_vm2, %v1253_v11  ;;  %1441 = vst.msk [vmem:[%s3824_s17 + $0x10] sm:$0xff] %vm1438_vm2, %v1251_v35 }
 0x199   : > { %1507 = vst.msk [vmem:[%s3824_s17 + $0x18] sm:$0xff] %vm1503_vm3, %v1253_v11  ;;  %1506 = vst.msk [vmem:[%s3824_s17 + $0x10] sm:$0xff] %vm1503_vm3, %v1251_v35  ;;  %v6654_v11 = vld [vmem:[#allocation15_spill] sm:$0xff] }
 0x19a   : > { %v4428_v35 = vmul.f32 %v3200_v50, %v6654_v11 }
 0x19b   : > { %v1257_v36 = vpop.permute.xlu1 %1256  ;;  %v1255_v22 = vpop.permute.xlu0 %1254 }
 0x19c   : > { %1444 = vst.msk [vmem:[%s3824_s17 + $0x28] sm:$0xff] %vm1438_vm2, %v1257_v36  ;;  %1443 = vst.msk [vmem:[%s3824_s17 + $0x20] sm:$0xff] %vm1438_vm2, %v1255_v22  ;;  %v1584_v13 = vsel %vm1568_vm4, %v4428_v35, -inf }
 0x19d   : > { %1509 = vst.msk [vmem:[%s3824_s17 + $0x28] sm:$0xff] %vm1503_vm3, %v1257_v36  ;;  %1508 = vst.msk [vmem:[%s3824_s17 + $0x20] sm:$0xff] %vm1503_vm3, %v1255_v22  ;;  %v1578_v36 = vsel %vm1568_vm4, %v4408_v17, -inf  ;;  %v3201_v22 = vld [vmem:[%s3305_s13 + $0x30] sm:$0xff] }
 0x19e   : > { %6655 = vst [vmem:[#allocation10_spill] sm:$0xff] %v4428_v35  ;;  %v6681_v35 = vld [vmem:[#allocation39_spill] sm:$0xff] }
 0x19f   : > { %v1261_v5 = vpop.permute.xlu1 %1260  ;;  %v1259_v6 = vpop.permute.xlu0 %1258 }
 0x1a0   : > { %1446 = vst.msk [vmem:[%s3824_s17 + $0x38] sm:$0xff] %vm1438_vm2, %v1261_v5  ;;  %1445 = vst.msk [vmem:[%s3824_s17 + $0x30] sm:$0xff] %vm1438_vm2, %v1259_v6 }
 0x1a1   : > { %1511 = vst.msk [vmem:[%s3824_s17 + $0x38] sm:$0xff] %vm1503_vm3, %v1261_v5  ;;  %1510 = vst.msk [vmem:[%s3824_s17 + $0x30] sm:$0xff] %vm1503_vm3, %v1259_v6  ;;  %v6656_v5 = vld [vmem:[#allocation18_spill] sm:$0xff] }
 0x1a2   : > { %v4438_v6 = vmul.f32 %v3201_v22, %v6656_v5  ;;  %v6663_v22 = vld [vmem:[#allocation24_spill] sm:$0xff] }
 0x1a3   : > { %v1265_v37 = vpop.permute.xlu1 %1264  ;;  %v1263_v4 = vpop.permute.xlu0 %1262 }
 0x1a4   : > { %1448 = vst.msk [vmem:[%s3824_s17 + $0x48] sm:$0xff] %vm1438_vm2, %v1265_v37  ;;  %1447 = vst.msk [vmem:[%s3824_s17 + $0x40] sm:$0xff] %vm1438_vm2, %v1263_v4  ;;  %v1587_v26 = vsel %vm1568_vm4, %v4438_v6, -inf }
 0x1a5   : > { %1513 = vst.msk [vmem:[%s3824_s17 + $0x48] sm:$0xff] %vm1503_vm3, %v1265_v37  ;;  %1512 = vst.msk [vmem:[%s3824_s17 + $0x40] sm:$0xff] %vm1503_vm3, %v1263_v4  ;;  %v1581_v37 = vsel %vm1568_vm4, %v4418_v51, -inf }
 0x1a6   : > { %6657 = vst [vmem:[#allocation2_spill] sm:$0xff] %v4438_v6 }
 0x1a7   : > { %v1269_v63 = vpop.permute.xlu1 %1268  ;;  %v1267_v24 = vpop.permute.xlu0 %1266 }
 0x1a8   : > { %1450 = vst.msk [vmem:[%s3824_s17 + $0x58] sm:$0xff] %vm1438_vm2, %v1269_v63  ;;  %1449 = vst.msk [vmem:[%s3824_s17 + $0x50] sm:$0xff] %vm1438_vm2, %v1267_v24 }
 0x1a9   : > { %1515 = vst.msk [vmem:[%s3824_s17 + $0x58] sm:$0xff] %vm1503_vm3, %v1269_v63  ;;  %1514 = vst.msk [vmem:[%s3824_s17 + $0x50] sm:$0xff] %vm1503_vm3, %v1267_v24  ;;  %v3202_v24 = vld [vmem:[%s3305_s13 + $0x38] sm:$0xff] }
 0x1ab   : > { %v1273_v39 = vpop.permute.xlu1 %1272  ;;  %v1271_v40 = vpop.permute.xlu0 %1270 }
 0x1ac   : > { %1452 = vst.msk [vmem:[%s3824_s17 + $0x68] sm:$0xff] %vm1438_vm2, %v1273_v39  ;;  %1451 = vst.msk [vmem:[%s3824_s17 + $0x60] sm:$0xff] %vm1438_vm2, %v1271_v40 }
 0x1ad   : > { %1517 = vst.msk [vmem:[%s3824_s17 + $0x68] sm:$0xff] %vm1503_vm3, %v1273_v39  ;;  %1516 = vst.msk [vmem:[%s3824_s17 + $0x60] sm:$0xff] %vm1503_vm3, %v1271_v40  ;;  %v6658_v39 = vld [vmem:[#allocation17_spill] sm:$0xff] }
 0x1ae   : > { %v4448_v40 = vmul.f32 %v3202_v24, %v6658_v39  ;;  %v3208_v24 = vld [vmem:[%s3305_s13 + $0x68] sm:$0xff] }
 0x1af   : > { %v1277_v42 = vpop.permute.xlu1 %1276  ;;  %v1275_v25 = vpop.permute.xlu0 %1274  ;;  %v6664_v39 = vld [vmem:[#allocation23_spill] sm:$0xff] }
 0x1b0   : > { %1454 = vst.msk [vmem:[%s3824_s17 + $0x78] sm:$0xff] %vm1438_vm2, %v1277_v42  ;;  %1453 = vst.msk [vmem:[%s3824_s17 + $0x70] sm:$0xff] %vm1438_vm2, %v1275_v25 }
 0x1b1   : > { %1519 = vst.msk [vmem:[%s3824_s17 + $0x78] sm:$0xff] %vm1503_vm3, %v1277_v42  ;;  %1570 = vmax.xlane.f32.xlu0 %v1569_v44  ;;  %1518 = vst.msk [vmem:[%s3824_s17 + $0x70] sm:$0xff] %vm1503_vm3, %v1275_v25  ;;  %v6659_v42 = vld [vmem:[#allocation20_spill] sm:$0xff] }
 0x1b2   : > { %v4458_v25 = vmul.f32 %v3203_v59, %v6659_v42  ;;  %v3209_v42 = vld [vmem:[%s3305_s13 + $0x70] sm:$0xff] }
 0x1b3   : > { %v1281_v45 = vpop.permute.xlu1 %1280  ;;  %v1279_v3 = vpop.permute.xlu0 %1278 }
 0x1b4   : > { %1456 = vst.msk [vmem:[%s3824_s17 + $0x88] sm:$0xff] %vm1438_vm2, %v1281_v45  ;;  %1455 = vst.msk [vmem:[%s3824_s17 + $0x80] sm:$0xff] %vm1438_vm2, %v1279_v3  ;;  %v1593_v10 = vsel %vm1568_vm4, %v4458_v25, -inf }
 0x1b5   : > { %1521 = vst.msk [vmem:[%s3824_s17 + $0x88] sm:$0xff] %vm1503_vm3, %v1281_v45  ;;  %1576 = vmax.xlane.f32.xlu0 %v1575_v18  ;;  %1520 = vst.msk [vmem:[%s3824_s17 + $0x80] sm:$0xff] %vm1503_vm3, %v1279_v3  ;;  %v4468_v45 = vmul.f32 %v3204_v16, %v6660_v27  ;;  %v1590_v3 = vsel %vm1568_vm4, %v4448_v40, -inf  ;;  %v4478_v18 = vmul.f32 %v3205_v1, %v6661_v29  ;;  %v6666_v1 = vld [vmem:[#allocation25_spill] sm:$0xff] }
 0x1b6   : > { %1573 = vmax.xlane.f32.xlu1 %v1572_v20 }
 0x1b7   : > { %v1285_v34 = vpop.permute.xlu1 %1284  ;;  %v1283_v55 = vpop.permute.xlu0 %1282  ;;  %v1596_v11 = vsel %vm1568_vm4, %v4468_v45, -inf }
 0x1b8   : > { %1458 = vst.msk [vmem:[%s3824_s17 + $0x98] sm:$0xff] %vm1438_vm2, %v1285_v34  ;;  %1457 = vst.msk [vmem:[%s3824_s17 + $0x90] sm:$0xff] %vm1438_vm2, %v1283_v55 }
 0x1b9   : > { %1523 = vst.msk [vmem:[%s3824_s17 + $0x98] sm:$0xff] %vm1503_vm3, %v1285_v34  ;;  %1579 = vmax.xlane.f32.xlu0 %v1578_v36  ;;  %1522 = vst.msk [vmem:[%s3824_s17 + $0x90] sm:$0xff] %vm1503_vm3, %v1283_v55  ;;  %v3206_v34 = vld [vmem:[%s3305_s13 + $0x58] sm:$0xff]  ;;  %v3207_v36 = vld [vmem:[%s3305_s13 + $0x60] sm:$0xff] }
 0x1ba   : > { %1582 = vmax.xlane.f32.xlu1 %v1581_v37  ;;  %v6662_v55 = vld [vmem:[#allocation21_spill] sm:$0xff]  ;;  %v4498_v5 = vmul.f32 %v3207_v36, %v6663_v22  ;;  %v1599_v37 = vsel %vm1568_vm4, %v4478_v18, -inf  ;;  %v3212_v22 = vld [vmem:[%s3305_s13 + $0x88] sm:$0xff] }
 0x1bb   : > { %v1289_v4 = vpop.permute.xlu1 %1288  ;;  %v1287_v63 = vpop.permute.xlu0 %1286  ;;  %v4488_v50 = vmul.f32 %v3206_v34, %v6662_v55 }
 0x1bc   : > { %1460 = vst.msk [vmem:[%s3824_s17 + $0xa8] sm:$0xff] %vm1438_vm2, %v1289_v4  ;;  %1459 = vst.msk [vmem:[%s3824_s17 + $0xa0] sm:$0xff] %vm1438_vm2, %v1287_v63 }
 0x1bd   : > { %1525 = vst.msk [vmem:[%s3824_s17 + $0xa8] sm:$0xff] %vm1503_vm3, %v1289_v4  ;;  %1585 = vmax.xlane.f32.xlu0 %v1584_v13  ;;  %1524 = vst.msk [vmem:[%s3824_s17 + $0xa0] sm:$0xff] %vm1503_vm3, %v1287_v63  ;;  %v4508_v13 = vmul.f32 %v3208_v24, %v6664_v39  ;;  %v1602_v59 = vsel %vm1568_vm4, %v4488_v50, -inf  ;;  %v3213_v24 = vld [vmem:[%s3305_s13 + $0x90] sm:$0xff]  ;;  %v6669_v39 = vld [vmem:[#allocation30_spill] sm:$0xff] }
 0x1be   : > { %1588 = vmax.xlane.f32.xlu1 %v1587_v26  ;;  %v6665_v26 = vld [vmem:[#allocation26_spill] sm:$0xff] }
 0x1bf   : > { %v1293_v7 = vpop.permute.xlu1 %1292  ;;  %v1291_v44 = vpop.permute.xlu0 %1290 }
 0x1c0   : > { %1462 = vst.msk [vmem:[%s3824_s17 + $0xb8] sm:$0xff] %vm1438_vm2, %v1293_v7  ;;  %1461 = vst.msk [vmem:[%s3824_s17 + $0xb0] sm:$0xff] %vm1438_vm2, %v1291_v44 }
 0x1c1   : > { %1527 = vst.msk [vmem:[%s3824_s17 + $0xb8] sm:$0xff] %vm1503_vm3, %v1293_v7  ;;  %1591 = vmax.xlane.f32.xlu0 %v1590_v3  ;;  %1526 = vst.msk [vmem:[%s3824_s17 + $0xb0] sm:$0xff] %vm1503_vm3, %v1291_v44  ;;  %v4518_v7 = vmul.f32 %v3209_v42, %v6665_v26  ;;  %v1605_v44 = vsel %vm1568_vm4, %v4498_v5, -inf  ;;  %v3210_v3 = vld [vmem:[%s3305_s13 + $0x78] sm:$0xff] }
 0x1c2   : > { %1594 = vmax.xlane.f32.xlu1 %v1593_v10  ;;  %v4528_v29 = vmul.f32 %v3210_v3, %v6666_v1  ;;  %v1608_v10 = vsel %vm1568_vm4, %v4508_v13, -inf }
 0x1c3   : > { %v1297_v32 = vpop.permute.xlu1 %1296  ;;  %v1295_v20 = vpop.permute.xlu0 %1294  ;;  %v1611_v55 = vsel %vm1568_vm4, %v4518_v7, -inf }
 0x1c4   : > { %1464 = vst.msk [vmem:[%s3824_s17 + $0xc8] sm:$0xff] %vm1438_vm2, %v1297_v32  ;;  %1463 = vst.msk [vmem:[%s3824_s17 + $0xc0] sm:$0xff] %vm1438_vm2, %v1295_v20 }
 0x1c5   : > { %1529 = vst.msk [vmem:[%s3824_s17 + $0xc8] sm:$0xff] %vm1503_vm3, %v1297_v32  ;;  %1597 = vmax.xlane.f32.xlu0 %v1596_v11  ;;  %1528 = vst.msk [vmem:[%s3824_s17 + $0xc0] sm:$0xff] %vm1503_vm3, %v1295_v20  ;;  %v3211_v32 = vld [vmem:[%s3305_s13 + $0x80] sm:$0xff]  ;;  %v6667_v20 = vld [vmem:[#allocation28_spill] sm:$0xff] }
 0x1c6   : > { %1600 = vmax.xlane.f32.xlu1 %v1599_v37  ;;  %v4538_v34 = vmul.f32 %v3211_v32, %v6667_v20  ;;  %v6668_v37 = vld [vmem:[#allocation27_spill] sm:$0xff]  ;;  %v6671_v32 = vld [vmem:[#allocation32_spill] sm:$0xff] }
 0x1c7   : > { %v1301_v4 = vpop.permute.xlu1 %1300  ;;  %v1299_v63 = vpop.permute.xlu0 %1298 }
 0x1c8   : > { %1466 = vst.msk [vmem:[%s3824_s17 + $0xd8] sm:$0xff] %vm1438_vm2, %v1301_v4  ;;  %1465 = vst.msk [vmem:[%s3824_s17 + $0xd0] sm:$0xff] %vm1438_vm2, %v1299_v63  ;;  %v1617_v42 = vsel %vm1568_vm4, %v4538_v34, -inf }
 0x1c9   : > { %1531 = vst.msk [vmem:[%s3824_s17 + $0xd8] sm:$0xff] %vm1503_vm3, %v1301_v4  ;;  %1603 = vmax.xlane.f32.xlu0 %v1602_v59  ;;  %1530 = vst.msk [vmem:[%s3824_s17 + $0xd0] sm:$0xff] %vm1503_vm3, %v1299_v63  ;;  %v4548_v4 = vmul.f32 %v3212_v22, %v6668_v37  ;;  %v1614_v63 = vsel %vm1568_vm4, %v4528_v29, -inf  ;;  %v4558_v59 = vmul.f32 %v3213_v24, %v6669_v39  ;;  %v3216_v22 = vld [vmem:[%s3305_s13 + $0xa8] sm:$0xff]  ;;  %v3217_v39 = vld [vmem:[%s3305_s13 + $0xb0] sm:$0xff] }
 0x1ca   : > { %1606 = vmax.xlane.f32.xlu1 %v1605_v44  ;;  %v6672_v37 = vld [vmem:[#allocation31_spill] sm:$0xff] }
 0x1cb   : > { %v1305_v16 = vpop.permute.xlu1 %1304  ;;  %v1303_v27 = vpop.permute.xlu0 %1302  ;;  %v1620_v1 = vsel %vm1568_vm4, %v4548_v4, -inf }
 0x1cc   : > { %1468 = vst.msk [vmem:[%s3824_s17 + $0xe8] sm:$0xff] %vm1438_vm2, %v1305_v16  ;;  %1467 = vst.msk [vmem:[%s3824_s17 + $0xe0] sm:$0xff] %vm1438_vm2, %v1303_v27 }
 0x1cd   : > { %1533 = vst.msk [vmem:[%s3824_s17 + $0xe8] sm:$0xff] %vm1503_vm3, %v1305_v16  ;;  %1609 = vmax.xlane.f32.xlu0 %v1608_v10  ;;  %1532 = vst.msk [vmem:[%s3824_s17 + $0xe0] sm:$0xff] %vm1503_vm3, %v1303_v27  ;;  %v3214_v16 = vld [vmem:[%s3305_s13 + $0x98] sm:$0xff]  ;;  %v3215_v10 = vld [vmem:[%s3305_s13 + $0xa0] sm:$0xff] }
 0x1ce   : > { %1612 = vmax.xlane.f32.xlu1 %v1611_v55  ;;  %v6670_v27 = vld [vmem:[#allocation29_spill] sm:$0xff]  ;;  %v4578_v20 = vmul.f32 %v3215_v10, %v6671_v32  ;;  %v1623_v55 = vsel %vm1568_vm4, %v4558_v59, -inf }
 0x1cf   : > { %v1309_v11 = vpop.permute.xlu1 %1308  ;;  %v1307_v36 = vpop.permute.xlu0 %1306  ;;  %v4568_v3 = vmul.f32 %v3214_v16, %v6670_v27  ;;  %v6674_v10 = vld [vmem:[#allocation33_spill] sm:$0xff] }
 0x1d0   : > { %1470 = vst.msk [vmem:[%s3824_s17 + $0xf8] sm:$0xff] %vm1438_vm2, %v1309_v11  ;;  %1469 = vst.msk [vmem:[%s3824_s17 + $0xf0] sm:$0xff] %vm1438_vm2, %v1307_v36 }
 0x1d1   : > { %1535 = vst.msk [vmem:[%s3824_s17 + $0xf8] sm:$0xff] %vm1503_vm3, %v1309_v11  ;;  %1615 = vmax.xlane.f32.xlu0 %v1614_v63  ;;  %1534 = vst.msk [vmem:[%s3824_s17 + $0xf0] sm:$0xff] %vm1503_vm3, %v1307_v36  ;;  %v4588_v63 = vmul.f32 %v3216_v22, %v6672_v37  ;;  %v1626_v24 = vsel %vm1568_vm4, %v4568_v3, -inf }
 0x1d2   : > { %1618 = vmax.xlane.f32.xlu1 %v1617_v42  ;;  %v6673_v42 = vld [vmem:[#allocation34_spill] sm:$0xff] }
 0x1d3   : > { %v1313_v26 = vpop.permute.xlu1 %1312  ;;  %v1311_v44 = vpop.permute.xlu0 %1310 }
 0x1d4   : > { %1472 = vst.msk [vmem:[%s3824_s17 + $0x108] sm:$0xff] %vm1438_vm2, %v1313_v26  ;;  %1471 = vst.msk [vmem:[%s3824_s17 + $0x100] sm:$0xff] %vm1438_vm2, %v1311_v44 }
 0x1d5   : > { %1537 = vst.msk [vmem:[%s3824_s17 + $0x108] sm:$0xff] %vm1503_vm3, %v1313_v26  ;;  %1621 = vmax.xlane.f32.xlu0 %v1620_v1  ;;  %1536 = vst.msk [vmem:[%s3824_s17 + $0x100] sm:$0xff] %vm1503_vm3, %v1311_v44  ;;  %v4598_v26 = vmul.f32 %v3217_v39, %v6673_v42  ;;  %v1629_v44 = vsel %vm1568_vm4, %v4578_v20, -inf  ;;  %v3218_v1 = vld [vmem:[%s3305_s13 + $0xb8] sm:$0xff]  ;;  %v3220_v42 = vld [vmem:[%s3305_s13 + $0xc8] sm:$0xff] }
 0x1d6   : > { %1624 = vmax.xlane.f32.xlu1 %v1623_v55  ;;  %v4608_v32 = vmul.f32 %v3218_v1, %v6674_v10  ;;  %v1632_v55 = vsel %vm1568_vm4, %v4588_v63, -inf  ;;  %v3221_v10 = vld [vmem:[%s3305_s13 + $0xd0] sm:$0xff] }
 0x1d7   : > { %v1317_v11 = vpop.permute.xlu1 %1316  ;;  %v1315_v36 = vpop.permute.xlu0 %1314  ;;  %v1635_v37 = vsel %vm1568_vm4, %v4598_v26, -inf }
 0x1d8   : > { %1474 = vst.msk [vmem:[%s3824_s17 + $0x118] sm:$0xff] %vm1438_vm2, %v1317_v11  ;;  %1473 = vst.msk [vmem:[%s3824_s17 + $0x110] sm:$0xff] %vm1438_vm2, %v1315_v36 }
 0x1d9   : > { %1539 = vst.msk [vmem:[%s3824_s17 + $0x118] sm:$0xff] %vm1503_vm3, %v1317_v11  ;;  %1627 = vmax.xlane.f32.xlu0 %v1626_v24  ;;  %1538 = vst.msk [vmem:[%s3824_s17 + $0x110] sm:$0xff] %vm1503_vm3, %v1315_v36  ;;  %v3219_v11 = vld [vmem:[%s3305_s13 + $0xc0] sm:$0xff]  ;;  %v6675_v36 = vld [vmem:[#allocation36_spill] sm:$0xff] }
 0x1da   : > { %1630 = vmax.xlane.f32.xlu1 %v1629_v44  ;;  %v4618_v22 = vmul.f32 %v3219_v11, %v6675_v36  ;;  %v6676_v44 = vld [vmem:[#allocation35_spill] sm:$0xff] }
 0x1db   : > { %v1321_v16 = vpop.permute.xlu1 %1320  ;;  %v1319_v27 = vpop.permute.xlu0 %1318  ;;  %v4628_v1 = vmul.f32 %v3220_v42, %v6676_v44  ;;  %v3222_v42 = vld [vmem:[%s3305_s13 + $0xd8] sm:$0xff] }
 0x1dc   : > { %1476 = vst.msk [vmem:[%s3824_s17 + $0x128] sm:$0xff] %vm1438_vm2, %v1321_v16  ;;  %1475 = vst.msk [vmem:[%s3824_s17 + $0x120] sm:$0xff] %vm1438_vm2, %v1319_v27  ;;  %v1641_v11 = vsel %vm1568_vm4, %v4618_v22, -inf  ;;  %v6678_v44 = vld [vmem:[#allocation37_spill] sm:$0xff] }
 0x1dd   : > { %1541 = vst.msk [vmem:[%s3824_s17 + $0x128] sm:$0xff] %vm1503_vm3, %v1321_v16  ;;  %1633 = vmax.xlane.f32.xlu0 %v1632_v55  ;;  %1540 = vst.msk [vmem:[%s3824_s17 + $0x120] sm:$0xff] %vm1503_vm3, %v1319_v27  ;;  %v1638_v16 = vsel %vm1568_vm4, %v4608_v32, -inf  ;;  %v6677_v27 = vld [vmem:[#allocation38_spill] sm:$0xff]  ;;  %v4648_v6 = vmul.f32 %v3222_v42, %v6678_v44  ;;  %v3224_v44 = vld [vmem:[%s3305_s13 + $0xe8] sm:$0xff] }
 0x1de   : > { %1636 = vmax.xlane.f32.xlu1 %v1635_v37  ;;  %v4638_v55 = vmul.f32 %v3221_v10, %v6677_v27  ;;  %v4668_v51 = vmul.f32 %v3224_v44, %v6681_v35  ;;  %v3226_v44 = vld [vmem:[%s3305_s13 + $0xf8] sm:$0xff] }
 0x1df   : > { %v1325_v24 = vpop.permute.xlu1 %1324  ;;  %v1323_v39 = vpop.permute.xlu0 %1322  ;;  %6679 = vst [vmem:[#allocation12_spill] sm:$0xff] %v4648_v6 }
 0x1e0   : > { %1478 = vst.msk [vmem:[%s3824_s17 + $0x138] sm:$0xff] %vm1438_vm2, %v1325_v24  ;;  %1477 = vst.msk [vmem:[%s3824_s17 + $0x130] sm:$0xff] %vm1438_vm2, %v1323_v39  ;;  %v1647_v27 = vsel %vm1568_vm4, %v4638_v55, -inf }
 0x1e1   : > { %1543 = vst.msk [vmem:[%s3824_s17 + $0x138] sm:$0xff] %vm1503_vm3, %v1325_v24  ;;  %1639 = vmax.xlane.f32.xlu0 %v1638_v16  ;;  %1542 = vst.msk [vmem:[%s3824_s17 + $0x130] sm:$0xff] %vm1503_vm3, %v1323_v39  ;;  %v1644_v24 = vsel %vm1568_vm4, %v4628_v1, -inf  ;;  %v3223_v16 = vld [vmem:[%s3305_s13 + $0xe0] sm:$0xff]  ;;  %v6680_v39 = vld [vmem:[#allocation40_spill] sm:$0xff] }
 0x1e2   : > { %1642 = vmax.xlane.f32.xlu1 %v1641_v11  ;;  %v4658_v10 = vmul.f32 %v3223_v16, %v6680_v39  ;;  %6682 = vst [vmem:[#allocation11_spill] sm:$0xff] %v4668_v51 }
 0x1e3   : > { %v1329_v36 = vpop.permute.xlu1 %1328  ;;  %v1327_v37 = vpop.permute.xlu0 %1326 }
 0x1e4   : > { %1480 = vst.msk [vmem:[%s3824_s17 + $0x148] sm:$0xff] %vm1438_vm2, %v1329_v36  ;;  %1479 = vst.msk [vmem:[%s3824_s17 + $0x140] sm:$0xff] %vm1438_vm2, %v1327_v37  ;;  %v1653_v35 = vsel %vm1568_vm4, %v4658_v10, -inf }
 0x1e5   : > { %1545 = vst.msk [vmem:[%s3824_s17 + $0x148] sm:$0xff] %vm1503_vm3, %v1329_v36  ;;  %1645 = vmax.xlane.f32.xlu0 %v1644_v24  ;;  %1544 = vst.msk [vmem:[%s3824_s17 + $0x140] sm:$0xff] %vm1503_vm3, %v1327_v37  ;;  %v1650_v36 = vsel %vm1568_vm4, %v4648_v6, -inf  ;;  %v3225_v24 = vld [vmem:[%s3305_s13 + $0xf0] sm:$0xff]  ;;  %v6683_v37 = vld [vmem:[#allocation42_spill] sm:$0xff] }
 0x1e6   : > { %1648 = vmax.xlane.f32.xlu1 %v1647_v27  ;;  %v4678_v16 = vmul.f32 %v3225_v24, %v6683_v37  ;;  %v6685_v6 = vld [vmem:[#allocation41_spill] sm:$0xff] }
 0x1e7   : > { %v1333_v11 = vpop.permute.xlu1 %1332  ;;  %v1331_v42 = vpop.permute.xlu0 %1330  ;;  %v4688_v17 = vmul.f32 %v3226_v44, %v6685_v6  ;;  %v3228_v44 = vld [vmem:[%s3305_s13 + $0x108] sm:$0xff] }
 0x1e8   : > { %1482 = vst.msk [vmem:[%s3824_s17 + $0x158] sm:$0xff] %vm1438_vm2, %v1333_v11  ;;  %1481 = vst.msk [vmem:[%s3824_s17 + $0x150] sm:$0xff] %vm1438_vm2, %v1331_v42  ;;  %v1659_v6 = vsel %vm1568_vm4, %v4678_v16, -inf }
 0x1e9   : > { %6684 = vst [vmem:[#allocation14_spill] sm:$0xff] %v4678_v16  ;;  %1547 = vst.msk [vmem:[%s3824_s17 + $0x158] sm:$0xff] %vm1503_vm3, %v1333_v11  ;;  %1651 = vmax.xlane.f32.xlu0 %v1650_v36  ;;  %v1656_v11 = vsel %vm1568_vm4, %v4668_v51, -inf  ;;  %v3227_v36 = vld [vmem:[%s3305_s13 + $0x100] sm:$0xff]  ;;  %v6689_v51 = vld [vmem:[#allocation43_spill] sm:$0xff] }
 0x1ea   : > { %1546 = vst.msk [vmem:[%s3824_s17 + $0x150] sm:$0xff] %vm1503_vm3, %v1331_v42  ;;  %1654 = vmax.xlane.f32.xlu1 %v1653_v35  ;;  %6686 = vst [vmem:[#allocation13_spill] sm:$0xff] %v4688_v17  ;;  %v6687_v42 = vld [vmem:[#allocation44_spill] sm:$0xff]  ;;  %v4708_v28 = vmul.f32 %v3228_v44, %v6689_v51  ;;  %v3230_v44 = vld [vmem:[%s3305_s13 + $0x118] sm:$0xff] }
 0x1eb   : > { %v1337_v39 = vpop.permute.xlu1 %1336  ;;  %v1335_v27 = vpop.permute.xlu0 %1334  ;;  %v4698_v24 = vmul.f32 %v3227_v36, %v6687_v42 }
 0x1ec   : > { %1484 = vst.msk [vmem:[%s3824_s17 + $0x168] sm:$0xff] %vm1438_vm2, %v1337_v39  ;;  %1483 = vst.msk [vmem:[%s3824_s17 + $0x160] sm:$0xff] %vm1438_vm2, %v1335_v27 }
 0x1ed   : > { %6688 = vst [vmem:[#allocation16_spill] sm:$0xff] %v4698_v24  ;;  %1549 = vst.msk [vmem:[%s3824_s17 + $0x168] sm:$0xff] %vm1503_vm3, %v1337_v39  ;;  %1657 = vmax.xlane.f32.xlu0 %v1656_v11  ;;  %v1662_v39 = vsel %vm1568_vm4, %v4688_v17, -inf  ;;  %v3229_v11 = vld [vmem:[%s3305_s13 + $0x110] sm:$0xff]  ;;  %v1665_v51 = vsel %vm1568_vm4, %v4698_v24, -inf  ;;  %v6693_v17 = vld [vmem:[#allocation45_spill] sm:$0xff] }
 0x1ee   : > { %1548 = vst.msk [vmem:[%s3824_s17 + $0x160] sm:$0xff] %vm1503_vm3, %v1335_v27  ;;  %1660 = vmax.xlane.f32.xlu1 %v1659_v6  ;;  %6690 = vst [vmem:[#allocation15_spill] sm:$0xff] %v4708_v28  ;;  %v6691_v27 = vld [vmem:[#allocation46_spill] sm:$0xff]  ;;  %v4728_v16 = vmul.f32 %v3230_v44, %v6693_v17  ;;  %v3232_v44 = vld [vmem:[%s3305_s13 + $0x128] sm:$0xff] }
 0x1ef   : > { %v1341_v37 = vpop.permute.xlu1 %1340  ;;  %v1339_v35 = vpop.permute.xlu0 %1338  ;;  %v4718_v36 = vmul.f32 %v3229_v11, %v6691_v27 }
 0x1f0   : > { %1486 = vst.msk [vmem:[%s3824_s17 + $0x178] sm:$0xff] %vm1438_vm2, %v1341_v37  ;;  %1485 = vst.msk [vmem:[%s3824_s17 + $0x170] sm:$0xff] %vm1438_vm2, %v1339_v35 }
 0x1f1   : > { %6692 = vst [vmem:[#allocation18_spill] sm:$0xff] %v4718_v36  ;;  %1551 = vst.msk [vmem:[%s3824_s17 + $0x178] sm:$0xff] %vm1503_vm3, %v1341_v37  ;;  %1663 = vmax.xlane.f32.xlu0 %v1662_v39  ;;  %v1668_v37 = vsel %vm1568_vm4, %v4708_v28, -inf  ;;  %v3231_v39 = vld [vmem:[%s3305_s13 + $0x120] sm:$0xff]  ;;  %v1671_v17 = vsel %vm1568_vm4, %v4718_v36, -inf  ;;  %v6697_v28 = vld [vmem:[#allocation47_spill] sm:$0xff] }
 0x1f2   : > { %1550 = vst.msk [vmem:[%s3824_s17 + $0x170] sm:$0xff] %vm1503_vm3, %v1339_v35  ;;  %1666 = vmax.xlane.f32.xlu1 %v1665_v51  ;;  %6694 = vst [vmem:[#allocation17_spill] sm:$0xff] %v4728_v16  ;;  %v6695_v35 = vld [vmem:[#allocation48_spill] sm:$0xff]  ;;  %v4748_v24 = vmul.f32 %v3232_v44, %v6697_v28  ;;  %v3234_v44 = vld [vmem:[%s3305_s13 + $0x138] sm:$0xff] }
 0x1f3   : > { %v1345_v42 = vpop.permute.xlu1 %1344  ;;  %v1343_v6 = vpop.permute.xlu0 %1342  ;;  %v4738_v11 = vmul.f32 %v3231_v39, %v6695_v35 }
 0x1f4   : > { %1488 = vst.msk [vmem:[%s3824_s17 + $0x188] sm:$0xff] %vm1438_vm2, %v1345_v42  ;;  %1487 = vst.msk [vmem:[%s3824_s17 + $0x180] sm:$0xff] %vm1438_vm2, %v1343_v6 }
 0x1f5   : > { %6696 = vst [vmem:[#allocation20_spill] sm:$0xff] %v4738_v11  ;;  %1553 = vst.msk [vmem:[%s3824_s17 + $0x188] sm:$0xff] %vm1503_vm3, %v1345_v42  ;;  %1669 = vmax.xlane.f32.xlu0 %v1668_v37  ;;  %v1674_v42 = vsel %vm1568_vm4, %v4728_v16, -inf  ;;  %v3233_v37 = vld [vmem:[%s3305_s13 + $0x130] sm:$0xff]  ;;  %v1677_v28 = vsel %vm1568_vm4, %v4738_v11, -inf  ;;  %v6701_v16 = vld [vmem:[#allocation49_spill] sm:$0xff] }
 0x1f6   : > { %1552 = vst.msk [vmem:[%s3824_s17 + $0x180] sm:$0xff] %vm1503_vm3, %v1343_v6  ;;  %1672 = vmax.xlane.f32.xlu1 %v1671_v17  ;;  %6698 = vst [vmem:[#allocation19_spill] sm:$0xff] %v4748_v24  ;;  %v6699_v6 = vld [vmem:[#allocation50_spill] sm:$0xff]  ;;  %v4768_v36 = vmul.f32 %v3234_v44, %v6701_v16  ;;  %v3236_v44 = vld [vmem:[%s3305_s13 + $0x148] sm:$0xff] }
 0x1f7   : > { %v1349_v27 = vpop.permute.xlu1 %1348  ;;  %v1347_v51 = vpop.permute.xlu0 %1346  ;;  %v4758_v39 = vmul.f32 %v3233_v37, %v6699_v6 }
 0x1f8   : > { %1490 = vst.msk [vmem:[%s3824_s17 + $0x198] sm:$0xff] %vm1438_vm2, %v1349_v27  ;;  %1489 = vst.msk [vmem:[%s3824_s17 + $0x190] sm:$0xff] %vm1438_vm2, %v1347_v51 }
 0x1f9   : > { %6700 = vst [vmem:[#allocation22_spill] sm:$0xff] %v4758_v39  ;;  %1555 = vst.msk [vmem:[%s3824_s17 + $0x198] sm:$0xff] %vm1503_vm3, %v1349_v27  ;;  %1675 = vmax.xlane.f32.xlu0 %v1674_v42  ;;  %v1680_v27 = vsel %vm1568_vm4, %v4748_v24, -inf  ;;  %v3235_v42 = vld [vmem:[%s3305_s13 + $0x140] sm:$0xff]  ;;  %v1683_v16 = vsel %vm1568_vm4, %v4758_v39, -inf  ;;  %v6705_v24 = vld [vmem:[#allocation51_spill] sm:$0xff] }
 0x1fa   : > { %1554 = vst.msk [vmem:[%s3824_s17 + $0x190] sm:$0xff] %vm1503_vm3, %v1347_v51  ;;  %1678 = vmax.xlane.f32.xlu1 %v1677_v28  ;;  %6702 = vst [vmem:[#allocation21_spill] sm:$0xff] %v4768_v36  ;;  %v6703_v51 = vld [vmem:[#allocation52_spill] sm:$0xff]  ;;  %v4788_v11 = vmul.f32 %v3236_v44, %v6705_v24  ;;  %v3238_v44 = vld [vmem:[%s3305_s13 + $0x158] sm:$0xff] }
 0x1fb   : > { %v1353_v35 = vpop.permute.xlu1 %1352  ;;  %v1351_v17 = vpop.permute.xlu0 %1350  ;;  %v4778_v37 = vmul.f32 %v3235_v42, %v6703_v51 }
 0x1fc   : > { %1492 = vst.msk [vmem:[%s3824_s17 + $0x1a8] sm:$0xff] %vm1438_vm2, %v1353_v35  ;;  %1491 = vst.msk [vmem:[%s3824_s17 + $0x1a0] sm:$0xff] %vm1438_vm2, %v1351_v17 }
 0x1fd   : > { %6704 = vst [vmem:[#allocation24_spill] sm:$0xff] %v4778_v37  ;;  %1557 = vst.msk [vmem:[%s3824_s17 + $0x1a8] sm:$0xff] %vm1503_vm3, %v1353_v35  ;;  %1681 = vmax.xlane.f32.xlu0 %v1680_v27  ;;  %v1686_v35 = vsel %vm1568_vm4, %v4768_v36, -inf  ;;  %v3237_v27 = vld [vmem:[%s3305_s13 + $0x150] sm:$0xff]  ;;  %v1689_v24 = vsel %vm1568_vm4, %v4778_v37, -inf  ;;  %v6708_v36 = vld [vmem:[#allocation53_spill] sm:$0xff] }
 0x1fe   : > { %1556 = vst.msk [vmem:[%s3824_s17 + $0x1a0] sm:$0xff] %vm1503_vm3, %v1351_v17  ;;  %1684 = vmax.xlane.f32.xlu1 %v1683_v16  ;;  %6706 = vst [vmem:[#allocation23_spill] sm:$0xff] %v4788_v11  ;;  %v6707_v17 = vld [vmem:[#allocation54_spill] sm:$0xff]  ;;  %v4808_v39 = vmul.f32 %v3238_v44, %v6708_v36  ;;  %v3240_v44 = vld [vmem:[%s3305_s13 + $0x168] sm:$0xff] }
 0x1ff   : > { %v1357_v6 = vpop.permute.xlu1 %1356  ;;  %v1355_v28 = vpop.permute.xlu0 %1354  ;;  %v4798_v42 = vmul.f32 %v3237_v27, %v6707_v17 }
 0x200   : > { %1494 = vst.msk [vmem:[%s3824_s17 + $0x1b8] sm:$0xff] %vm1438_vm2, %v1357_v6  ;;  %1493 = vst.msk [vmem:[%s3824_s17 + $0x1b0] sm:$0xff] %vm1438_vm2, %v1355_v28 }
 0x201   : > { %1559 = vst.msk [vmem:[%s3824_s17 + $0x1b8] sm:$0xff] %vm1503_vm3, %v1357_v6  ;;  %1687 = vmax.xlane.f32.xlu0 %v1686_v35  ;;  %1558 = vst.msk [vmem:[%s3824_s17 + $0x1b0] sm:$0xff] %vm1503_vm3, %v1355_v28  ;;  %v1692_v6 = vsel %vm1568_vm4, %v4788_v11, -inf  ;;  %v3239_v35 = vld [vmem:[%s3305_s13 + $0x160] sm:$0xff]  ;;  %v6710_v28 = vld [vmem:[#allocation56_spill] sm:$0xff]  ;;  %v1695_v36 = vsel %vm1568_vm4, %v4798_v42, -inf }
 0x202   : > { %1690 = vmax.xlane.f32.xlu1 %v1689_v24  ;;  %6709 = vst [vmem:[#allocation26_spill] sm:$0xff] %v4808_v39  ;;  %v4818_v27 = vmul.f32 %v3239_v35, %v6710_v28  ;;  %v6711_v11 = vld [vmem:[#allocation55_spill] sm:$0xff]  ;;  %v6713_v28 = vld [vmem:[#allocation57_spill] sm:$0xff] }
 0x203   : > { %v1361_v51 = vpop.permute.xlu1 %1360  ;;  %v1359_v16 = vpop.permute.xlu0 %1358  ;;  %v4828_v37 = vmul.f32 %v3240_v44, %v6711_v11  ;;  %v4868_v44 = vmul.f32 %v4169_v30, %v3757_v58  ;;  %v4888_v58 = vmul.f32 %v4189_v2, %v3765_v62  ;;  %v6723_v2 = vld [vmem:[#allocation61_spill] sm:$0xff] }
 0x204   : > { %1496 = vst.msk [vmem:[%s3824_s17 + $0x1c8] sm:$0xff] %vm1438_vm2, %v1361_v51  ;;  %1495 = vst.msk [vmem:[%s3824_s17 + $0x1c0] sm:$0xff] %vm1438_vm2, %v1359_v16  ;;  %v1701_v11 = vsel %vm1568_vm4, %v4818_v27, -inf }
 0x205   : > { %1561 = vst.msk [vmem:[%s3824_s17 + $0x1c8] sm:$0xff] %vm1503_vm3, %v1361_v51  ;;  %1693 = vmax.xlane.f32.xlu0 %v1692_v6  ;;  %1560 = vst.msk [vmem:[%s3824_s17 + $0x1c0] sm:$0xff] %vm1503_vm3, %v1359_v16  ;;  %v1698_v51 = vsel %vm1568_vm4, %v4808_v39, -inf  ;;  %v4838_v16 = vmul.f32 %v4154_v53, %v3751_v60  ;;  %v1704_v60 = vsel %vm1568_vm4, %v4828_v37, -inf  ;;  %v4858_v53 = vmul.f32 %v4174_v9, %v3759_v61 }
 0x206   : > { %1696 = vmax.xlane.f32.xlu1 %v1695_v36  ;;  %6712 = vst [vmem:[#allocation25_spill] sm:$0xff] %v4828_v37  ;;  %v4848_v36 = vmul.f32 %v4150_v46, %v6713_v28  ;;  %6716 = vst [vmem:[#allocation30_spill] sm:$0xff] %v4868_v44  ;;  %v4878_v9 = vmul.f32 %v4194_v33, %v3767_v57  ;;  %v1716_v30 = vsel %vm1568_vm4, %v4868_v44, -inf  ;;  %v1722_v62 = vsel %vm1568_vm4, %v4888_v58, -inf }
 0x207   : > { %v1365_v17 = vpop.permute.xlu1 %1364  ;;  %v1363_v24 = vpop.permute.xlu0 %1362  ;;  %6715 = vst [vmem:[#allocation27_spill] sm:$0xff] %v4858_v53  ;;  %v1707_v46 = vsel %vm1568_vm4, %v4838_v16, -inf  ;;  %6718 = vst [vmem:[#allocation32_spill] sm:$0xff] %v4888_v58  ;;  %v4906_v28 = vmul.f32 %v4234_v23, %v6723_v2  ;;  %v4948_v2 = vmul.f32 %v4289_v48, %v3805_v54 }
 0x208   : > { %1498 = vst.msk [vmem:[%s3824_s17 + $0x1d8] sm:$0xff] %vm1438_vm2, %v1365_v17  ;;  %1497 = vst.msk [vmem:[%s3824_s17 + $0x1d0] sm:$0xff] %vm1438_vm2, %v1363_v24  ;;  %v1710_v61 = vsel %vm1568_vm4, %v4848_v36, -inf  ;;  %v1719_v33 = vsel %vm1568_vm4, %v4878_v9, -inf }
 0x209   : > { %1563 = vst.msk [vmem:[%s3824_s17 + $0x1d8] sm:$0xff] %vm1503_vm3, %v1365_v17  ;;  %1699 = vmax.xlane.f32.xlu0 %v1698_v51  ;;  %1562 = vst.msk [vmem:[%s3824_s17 + $0x1d0] sm:$0xff] %vm1503_vm3, %v1363_v24  ;;  %v1713_v51 = vsel %vm1568_vm4, %v4858_v53, -inf  ;;  %v1731_v23 = vsel %vm1568_vm4, %v4906_v28, -inf  ;;  %v1752_v54 = vsel %vm1568_vm4, %v4948_v2, -inf }
 0x20a   : > { %1702 = vmax.xlane.f32.xlu1 %v1701_v11  ;;  %6714 = vst [vmem:[#allocation28_spill] sm:$0xff] %v4848_v36  ;;  %6717 = vst [vmem:[#allocation29_spill] sm:$0xff] %v4878_v9  ;;  %v6719_v11 = vld [vmem:[#allocation59_spill] sm:$0xff] }
 0x20b   : > { %v1369_v6 = vpop.permute.xlu1 %1368  ;;  %v1367_v35 = vpop.permute.xlu0 %1366  ;;  %v4894_v57 = vmul.f32 %v4214_v21, %v6719_v11  ;;  %6724 = vst [vmem:[#allocation33_spill] sm:$0xff] %v4906_v28  ;;  %6736 = vst [vmem:[#allocation42_spill] sm:$0xff] %v4948_v2 }
 0x20c   : > { %1500 = vst.msk [vmem:[%s3824_s17 + $0x1e8] sm:$0xff] %vm1438_vm2, %v1369_v6  ;;  %1499 = vst.msk [vmem:[%s3824_s17 + $0x1e0] sm:$0xff] %vm1438_vm2, %v1367_v35 }
 0x20d   : > { %1565 = vst.msk [vmem:[%s3824_s17 + $0x1e8] sm:$0xff] %vm1503_vm3, %v1369_v6  ;;  %1705 = vmax.xlane.f32.xlu0 %v1704_v60  ;;  %1564 = vst.msk [vmem:[%s3824_s17 + $0x1e0] sm:$0xff] %vm1503_vm3, %v1367_v35  ;;  %v6721_v6 = vld [vmem:[#allocation58_spill] sm:$0xff]  ;;  %v1725_v21 = vsel %vm1568_vm4, %v4894_v57, -inf  ;;  %v6725_v60 = vld [vmem:[#allocation60_spill] sm:$0xff] }
 0x20e   : > { %1708 = vmax.xlane.f32.xlu1 %v1707_v46  ;;  %6720 = vst [vmem:[#allocation31_spill] sm:$0xff] %v4894_v57  ;;  %v4900_v35 = vmul.f32 %v4209_v12, %v6721_v6  ;;  %v4912_v46 = vmul.f32 %v4229_v38, %v6725_v60 }
 0x20f   : > { %v1373_v17 = vpop.permute.xlu1 %1372  ;;  %v1371_v24 = vpop.permute.xlu0 %1370 }
 0x210   : > { %1502 = vst.msk [vmem:[%s3824_s17 + $0x1f8] sm:$0xff] %vm1438_vm2, %v1373_v17  ;;  %1501 = vst.msk [vmem:[%s3824_s17 + $0x1f0] sm:$0xff] %vm1438_vm2, %v1371_v24  ;;  %v1728_v12 = vsel %vm1568_vm4, %v4900_v35, -inf  ;;  %v1734_v38 = vsel %vm1568_vm4, %v4912_v46, -inf }
 0x211   : > { %1567 = vst.msk [vmem:[%s3824_s17 + $0x1f8] sm:$0xff] %vm1503_vm3, %v1373_v17  ;;  %1711 = vmax.xlane.f32.xlu0 %v1710_v61  ;;  %1566 = vst.msk [vmem:[%s3824_s17 + $0x1f0] sm:$0xff] %vm1503_vm3, %v1371_v24  ;;  %v6727_v17 = vld [vmem:[#allocation4_spill] sm:$0xff]  ;;  %v6729_v61 = vld [vmem:[#allocation3_spill] sm:$0xff] }
 0x212   : > { %1714 = vmax.xlane.f32.xlu1 %v1713_v51  ;;  %6722 = vst [vmem:[#allocation34_spill] sm:$0xff] %v4900_v35  ;;  %6726 = vst [vmem:[#allocation36_spill] sm:$0xff] %v4912_v46  ;;  %v4918_v24 = vmul.f32 %v4254_v41, %v6727_v17  ;;  %v4924_v51 = vmul.f32 %v4249_v14, %v6729_v61 }
 0x214   : > { %6728 = vst [vmem:[#allocation35_spill] sm:$0xff] %v4918_v24  ;;  %6730 = vst [vmem:[#allocation38_spill] sm:$0xff] %v4924_v51  ;;  %v1737_v41 = vsel %vm1568_vm4, %v4918_v24, -inf  ;;  %v1740_v14 = vsel %vm1568_vm4, %v4924_v51, -inf }
 0x215   : > { %1717 = vmax.xlane.f32.xlu0 %v1716_v30  ;;  %v6731_v30 = vld [vmem:[#allocation6_spill] sm:$0xff] }
 0x216   : > { %1720 = vmax.xlane.f32.xlu1 %v1719_v33  ;;  %v4930_v11 = vmul.f32 %v4274_v15, %v6731_v30  ;;  %v6733_v33 = vld [vmem:[#allocation5_spill] sm:$0xff] }
 0x217   : > { %v4936_v6 = vmul.f32 %v4269_v8, %v6733_v33 }
 0x218   : > { %6732 = vst [vmem:[#allocation37_spill] sm:$0xff] %v4930_v11  ;;  %v1743_v15 = vsel %vm1568_vm4, %v4930_v11, -inf }
 0x219   : > { %1723 = vmax.xlane.f32.xlu0 %v1722_v62  ;;  %6734 = vst [vmem:[#allocation40_spill] sm:$0xff] %v4936_v6  ;;  %v4942_v62 = vmul.f32 %v4294_v47, %v3807_v0  ;;  %v1746_v8 = vsel %vm1568_vm4, %v4936_v6, -inf  ;;  %v4960_v47 = vmul.f32 %v4309_v31, %v3813_v49 }
 0x21a   : > { %1726 = vmax.xlane.f32.xlu1 %v1725_v21  ;;  %v4954_v21 = vmul.f32 %v4314_v19, %v3815_v56  ;;  %v1761_v19 = vlaneseq }
 0x21b   : > { %6735 = vst [vmem:[#allocation39_spill] sm:$0xff] %v4942_v62  ;;  %v1749_v0 = vsel %vm1568_vm4, %v4942_v62, -inf  ;;  %6738 = vst [vmem:[#allocation44_spill] sm:$0xff] %v4960_v47  ;;  %v1758_v56 = vsel %vm1568_vm4, %v4960_v47, -inf }
 0x21c   : > { %6737 = vst [vmem:[#allocation41_spill] sm:$0xff] %v4954_v21  ;;  %v1755_v48 = vsel %vm1568_vm4, %v4954_v21, -inf  ;;  %v1762_v60 = vand.u32 127, %v1761_v19 }
 0x21d   : > { %1729 = vmax.xlane.f32.xlu0 %v1728_v12 }
 0x21e   : > { %1732 = vmax.xlane.f32.xlu1 %v1731_v23 }
 0x221   : > { %1735 = vmax.xlane.f32.xlu0 %v1734_v38 }
 0x222   : > { %1738 = vmax.xlane.f32.xlu1 %v1737_v41 }
 0x225   : > { %1741 = vmax.xlane.f32.xlu0 %v1740_v14 }
 0x226   : > { %1744 = vmax.xlane.f32.xlu1 %v1743_v15 }
 0x229   : > { %1747 = vmax.xlane.f32.xlu0 %v1746_v8 }
 0x22a   : > { %1750 = vmax.xlane.f32.xlu1 %v1749_v0 }
 0x22d   : > { %1753 = vmax.xlane.f32.xlu0 %v1752_v54 }
 0x22e   : > { %1756 = vmax.xlane.f32.xlu1 %v1755_v48 }
 0x231   : > { %1759 = vmax.xlane.f32.xlu0 %v1758_v56 }
 0x23e   : > { %v4968_v49 = vpop.xlane.xlu0 %1570 }
 0x23f   : > { %2854 = vst.msk [vmem:[%s3824_s17] sm:$0xff] %vm2853_vm5, %v4968_v49  ;;  %1827 = vrot.lane.b32.xlu1 %v1762_v60, %s3268_s19  ;;  %vm1763_vm6 = vcmp.eq.f32.partialorder %v4378_v52, %v4968_v49 }
 0x242   : > { %v4973_v31 = vpop.xlane.xlu0 %1576 }
 0x243   : > { %2856 = vst.msk [vmem:[%s3824_s17 + $0x10] sm:$0xff] %vm2853_vm5, %v4973_v31  ;;  %v4978_v12 = vpop.xlane.xlu1 %1573  ;;  %vm1765_vm7 = vcmp.eq.f32.partialorder %v4390_v43, %v4973_v31 }
 0x244   : > { %6739 = vst [vmem:[#allocation43_spill] sm:$0xff] %v4978_v12  ;;  %2855 = vst.msk [vmem:[%s3824_s17 + $0x8] sm:$0xff] %vm2853_vm5, %v4978_v12 }
 0x246   : > { %v4983_v17 = vpop.xlane.xlu0 %1579 }
 0x247   : > { %6740 = vst [vmem:[#allocation46_spill] sm:$0xff] %v4983_v17  ;;  %2857 = vst.msk [vmem:[%s3824_s17 + $0x18] sm:$0xff] %vm2853_vm5, %v4983_v17  ;;  %v4988_v23 = vpop.xlane.xlu1 %1582 }
 0x248   : > { %6741 = vst [vmem:[#allocation45_spill] sm:$0xff] %v4988_v23  ;;  %2858 = vst.msk [vmem:[%s3824_s17 + $0x20] sm:$0xff] %vm2853_vm5, %v4988_v23 }
 0x24a   : > { %v4993_v61 = vpop.xlane.xlu0 %1585 }
 0x24b   : > { %6742 = vst [vmem:[#allocation48_spill] sm:$0xff] %v4993_v61  ;;  %2859 = vst.msk [vmem:[%s3824_s17 + $0x28] sm:$0xff] %vm2853_vm5, %v4993_v61  ;;  %v4998_v38 = vpop.xlane.xlu1 %1588 }
 0x24c   : > { %6743 = vst [vmem:[#allocation47_spill] sm:$0xff] %v4998_v38  ;;  %2860 = vst.msk [vmem:[%s3824_s17 + $0x30] sm:$0xff] %vm2853_vm5, %v4998_v38 }
 0x24e   : > { %v5003_v30 = vpop.xlane.xlu0 %1591 }
 0x24f   : > { %2861 = vst.msk [vmem:[%s3824_s17 + $0x38] sm:$0xff] %vm2853_vm5, %v5003_v30  ;;  %v5008_v41 = vpop.xlane.xlu1 %1594  ;;  %vm1770_vm8 = vcmp.eq.f32.partialorder %v4448_v40, %v5003_v30 }
 0x250   : > { %2862 = vst.msk [vmem:[%s3824_s17 + $0x40] sm:$0xff] %vm2853_vm5, %v5008_v41  ;;  %vm1771_vm9 = vcmp.eq.f32.partialorder %v4458_v25, %v5008_v41 }
 0x252   : > { %v5013_v33 = vpop.xlane.xlu0 %1597 }
 0x253   : > { %2863 = vst.msk [vmem:[%s3824_s17 + $0x48] sm:$0xff] %vm2853_vm5, %v5013_v33  ;;  %v5018_v14 = vpop.xlane.xlu1 %1600  ;;  %vm1772_vm10 = vcmp.eq.f32.partialorder %v4468_v45, %v5013_v33 }
 0x254   : > { %2864 = vst.msk [vmem:[%s3824_s17 + $0x50] sm:$0xff] %vm2853_vm5, %v5018_v14  ;;  %vm1773_vm11 = vcmp.eq.f32.partialorder %v4478_v18, %v5018_v14 }
 0x256   : > { %v5023_v15 = vpop.xlane.xlu0 %1603 }
 0x257   : > { %2865 = vst.msk [vmem:[%s3824_s17 + $0x58] sm:$0xff] %vm2853_vm5, %v5023_v15  ;;  %v5028_v8 = vpop.xlane.xlu1 %1606  ;;  %vm1774_vm12 = vcmp.eq.f32.partialorder %v4488_v50, %v5023_v15 }
 0x258   : > { %2866 = vst.msk [vmem:[%s3824_s17 + $0x60] sm:$0xff] %vm2853_vm5, %v5028_v8  ;;  %vm1775_vm13 = vcmp.eq.f32.partialorder %v4498_v5, %v5028_v8 }
 0x25a   : > { %v5033_v0 = vpop.xlane.xlu0 %1609 }
 0x25b   : > { %2867 = vst.msk [vmem:[%s3824_s17 + $0x68] sm:$0xff] %vm2853_vm5, %v5033_v0  ;;  %v5038_v54 = vpop.xlane.xlu1 %1612  ;;  %vm1776_vm14 = vcmp.eq.f32.partialorder %v4508_v13, %v5033_v0 }
 0x25c   : > { %2868 = vst.msk [vmem:[%s3824_s17 + $0x70] sm:$0xff] %vm2853_vm5, %v5038_v54  ;;  %vm1777_vm15 = vcmp.eq.f32.partialorder %v4518_v7, %v5038_v54 }
 0x25e   : > { %v5043_v48 = vpop.xlane.xlu0 %1615 }
 0x25f   : > { %2869 = vst.msk [vmem:[%s3824_s17 + $0x78] sm:$0xff] %vm2853_vm5, %v5043_v48  ;;  %v5048_v56 = vpop.xlane.xlu1 %1618  ;;  %vm1778_vm0 = vcmp.eq.f32.partialorder %v4528_v29, %v5043_v48 }
 0x260   : > { %2870 = vst.msk [vmem:[%s3824_s17 + $0x80] sm:$0xff] %vm2853_vm5, %v5048_v56  ;;  %vm1779_vm1 = vcmp.eq.f32.partialorder %v4538_v34, %v5048_v56 }
 0x262   : > { %v5053_v19 = vpop.xlane.xlu0 %1621 }
 0x263   : > { %2871 = vst.msk [vmem:[%s3824_s17 + $0x88] sm:$0xff] %vm2853_vm5, %v5053_v19  ;;  %v5058_v60 = vpop.xlane.xlu1 %1624  ;;  %vm1780_vm2 = vcmp.eq.f32.partialorder %v4548_v4, %v5053_v19 }
 0x264   : > { %2872 = vst.msk [vmem:[%s3824_s17 + $0x90] sm:$0xff] %vm2853_vm5, %v5058_v60  ;;  %vm1781_vm3 = vcmp.eq.f32.partialorder %v4558_v59, %v5058_v60 }
 0x266   : > { %v5063_v47 = vpop.xlane.xlu0 %1627 }
 0x267   : > { %2873 = vst.msk [vmem:[%s3824_s17 + $0x98] sm:$0xff] %vm2853_vm5, %v5063_v47  ;;  %v5068_v2 = vpop.xlane.xlu1 %1630 }
 0x268   : > { %2874 = vst.msk [vmem:[%s3824_s17 + $0xa0] sm:$0xff] %vm2853_vm5, %v5068_v2 }
 0x26a   : > { %v5073_v6 = vpop.xlane.xlu0 %1633 }
 0x26b   : > { %2875 = vst.msk [vmem:[%s3824_s17 + $0xa8] sm:$0xff] %vm2853_vm5, %v5073_v6  ;;  %v5078_v51 = vpop.xlane.xlu1 %1636 }
 0x26c   : > { %2876 = vst.msk [vmem:[%s3824_s17 + $0xb0] sm:$0xff] %vm2853_vm5, %v5078_v51 }
 0x26e   : > { %v5083_v46 = vpop.xlane.xlu0 %1639 }
 0x26f   : > { %2877 = vst.msk [vmem:[%s3824_s17 + $0xb8] sm:$0xff] %vm2853_vm5, %v5083_v46  ;;  %v5088_v35 = vpop.xlane.xlu1 %1642 }
 0x270   : > { %2878 = vst.msk [vmem:[%s3824_s17 + $0xc0] sm:$0xff] %vm2853_vm5, %v5088_v35 }
 0x272   : > { %v5093_v58 = vpop.xlane.xlu0 %1645 }
 0x273   : > { %2879 = vst.msk [vmem:[%s3824_s17 + $0xc8] sm:$0xff] %vm2853_vm5, %v5093_v58  ;;  %v5098_v44 = vpop.xlane.xlu1 %1648 }
 0x274   : > { %2880 = vst.msk [vmem:[%s3824_s17 + $0xd0] sm:$0xff] %vm2853_vm5, %v5098_v44 }
 0x276   : > { %v5103_v36 = vpop.xlane.xlu0 %1651 }
 0x277   : > { %6744 = vst [vmem:[#allocation50_spill] sm:$0xff] %v5103_v36  ;;  %2881 = vst.msk [vmem:[%s3824_s17 + $0xd8] sm:$0xff] %vm2853_vm5, %v5103_v36  ;;  %v5108_v37 = vpop.xlane.xlu1 %1654 }
 0x278   : > { %2882 = vst.msk [vmem:[%s3824_s17 + $0xe0] sm:$0xff] %vm2853_vm5, %v5108_v37 }
 0x27a   : > { %v5113_v39 = vpop.xlane.xlu0 %1657 }
 0x27b   : > { %6745 = vst [vmem:[#allocation49_spill] sm:$0xff] %v5113_v39  ;;  %2883 = vst.msk [vmem:[%s3824_s17 + $0xe8] sm:$0xff] %vm2853_vm5, %v5113_v39  ;;  %v5118_v38 = vpop.xlane.xlu1 %1660 }
 0x27c   : > { %2884 = vst.msk [vmem:[%s3824_s17 + $0xf0] sm:$0xff] %vm2853_vm5, %v5118_v38 }
 0x27e   : > { %v5123_v36 = vpop.xlane.xlu0 %1663 }
 0x27f   : > { %6746 = vst [vmem:[#allocation52_spill] sm:$0xff] %v5123_v36  ;;  %2885 = vst.msk [vmem:[%s3824_s17 + $0xf8] sm:$0xff] %vm2853_vm5, %v5123_v36  ;;  %v5128_v61 = vpop.xlane.xlu1 %1666 }
 0x280   : > { %2886 = vst.msk [vmem:[%s3824_s17 + $0x100] sm:$0xff] %vm2853_vm5, %v5128_v61 }
 0x282   : > { %v5133_v39 = vpop.xlane.xlu0 %1669 }
 0x283   : > { %6747 = vst [vmem:[#allocation51_spill] sm:$0xff] %v5133_v39  ;;  %2887 = vst.msk [vmem:[%s3824_s17 + $0x108] sm:$0xff] %vm2853_vm5, %v5133_v39  ;;  %v5138_v23 = vpop.xlane.xlu1 %1672 }
 0x284   : > { %2888 = vst.msk [vmem:[%s3824_s17 + $0x110] sm:$0xff] %vm2853_vm5, %v5138_v23 }
 0x286   : > { %v5143_v36 = vpop.xlane.xlu0 %1675 }
 0x287   : > { %6748 = vst [vmem:[#allocation54_spill] sm:$0xff] %v5143_v36  ;;  %2889 = vst.msk [vmem:[%s3824_s17 + $0x118] sm:$0xff] %vm2853_vm5, %v5143_v36  ;;  %v5148_v17 = vpop.xlane.xlu1 %1678 }
 0x288   : > { %2890 = vst.msk [vmem:[%s3824_s17 + $0x120] sm:$0xff] %vm2853_vm5, %v5148_v17 }
 0x28a   : > { %v5153_v39 = vpop.xlane.xlu0 %1681 }
 0x28b   : > { %6749 = vst [vmem:[#allocation53_spill] sm:$0xff] %v5153_v39  ;;  %2891 = vst.msk [vmem:[%s3824_s17 + $0x128] sm:$0xff] %vm2853_vm5, %v5153_v39  ;;  %v5158_v21 = vpop.xlane.xlu1 %1684 }
 0x28c   : > { %2892 = vst.msk [vmem:[%s3824_s17 + $0x130] sm:$0xff] %vm2853_vm5, %v5158_v21 }
 0x28e   : > { %v5163_v36 = vpop.xlane.xlu0 %1687 }
 0x28f   : > { %6750 = vst [vmem:[#allocation56_spill] sm:$0xff] %v5163_v36  ;;  %2893 = vst.msk [vmem:[%s3824_s17 + $0x138] sm:$0xff] %vm2853_vm5, %v5163_v36  ;;  %v5168_v62 = vpop.xlane.xlu1 %1690 }
 0x290   : > { %2894 = vst.msk [vmem:[%s3824_s17 + $0x140] sm:$0xff] %vm2853_vm5, %v5168_v62 }
 0x292   : > { %v5173_v39 = vpop.xlane.xlu0 %1693 }
 0x293   : > { %6751 = vst [vmem:[#allocation55_spill] sm:$0xff] %v5173_v39  ;;  %2895 = vst.msk [vmem:[%s3824_s17 + $0x148] sm:$0xff] %vm2853_vm5, %v5173_v39  ;;  %v5178_v12 = vpop.xlane.xlu1 %1696 }
 0x294   : > { %2896 = vst.msk [vmem:[%s3824_s17 + $0x150] sm:$0xff] %vm2853_vm5, %v5178_v12 }
 0x296   : > { %v5183_v36 = vpop.xlane.xlu0 %1699 }
 0x297   : > { %6752 = vst [vmem:[#allocation57_spill] sm:$0xff] %v5183_v36  ;;  %2897 = vst.msk [vmem:[%s3824_s17 + $0x158] sm:$0xff] %vm2853_vm5, %v5183_v36  ;;  %v5188_v11 = vpop.xlane.xlu1 %1702 }
 0x298   : > { %2898 = vst.msk [vmem:[%s3824_s17 + $0x160] sm:$0xff] %vm2853_vm5, %v5188_v11 }
 0x29a   : > { %v5193_v39 = vpop.xlane.xlu0 %1705 }
 0x29b   : > { %6753 = vst [vmem:[#allocation59_spill] sm:$0xff] %v5193_v39  ;;  %2899 = vst.msk [vmem:[%s3824_s17 + $0x168] sm:$0xff] %vm2853_vm5, %v5193_v39  ;;  %v5198_v24 = vpop.xlane.xlu1 %1708 }
 0x29c   : > { %2900 = vst.msk [vmem:[%s3824_s17 + $0x170] sm:$0xff] %vm2853_vm5, %v5198_v24 }
 0x29e   : > { %v5203_v36 = vpop.xlane.xlu0 %1711 }
 0x29f   : > { %6754 = vst [vmem:[#allocation58_spill] sm:$0xff] %v5203_v36  ;;  %2901 = vst.msk [vmem:[%s3824_s17 + $0x178] sm:$0xff] %vm2853_vm5, %v5203_v36  ;;  %v5208_v28 = vpop.xlane.xlu1 %1714 }
 0x2a0   : > { %6755 = vst [vmem:[#allocation61_spill] sm:$0xff] %v5208_v28  ;;  %2902 = vst.msk [vmem:[%s3824_s17 + $0x180] sm:$0xff] %vm2853_vm5, %v5208_v28 }
 0x2a2   : > { %v5213_v39 = vpop.xlane.xlu0 %1717 }
 0x2a3   : > { %6756 = vst [vmem:[#allocation60_spill] sm:$0xff] %v5213_v39  ;;  %2903 = vst.msk [vmem:[%s3824_s17 + $0x188] sm:$0xff] %vm2853_vm5, %v5213_v39  ;;  %v5218_v57 = vpop.xlane.xlu1 %1720 }
 0x2a4   : > { %6757 = vst [vmem:[#allocation4_spill] sm:$0xff] %v5218_v57  ;;  %2904 = vst.msk [vmem:[%s3824_s17 + $0x190] sm:$0xff] %vm2853_vm5, %v5218_v57 }
 0x2a6   : > { %v5223_v36 = vpop.xlane.xlu0 %1723 }
 0x2a7   : > { %6758 = vst [vmem:[#allocation3_spill] sm:$0xff] %v5223_v36  ;;  %2905 = vst.msk [vmem:[%s3824_s17 + $0x198] sm:$0xff] %vm2853_vm5, %v5223_v36  ;;  %v5228_v9 = vpop.xlane.xlu1 %1726 }
 0x2a8   : > { %6759 = vst [vmem:[#allocation6_spill] sm:$0xff] %v5228_v9  ;;  %2906 = vst.msk [vmem:[%s3824_s17 + $0x1a0] sm:$0xff] %vm2853_vm5, %v5228_v9 }
 0x2aa   : > { %v5233_v39 = vpop.xlane.xlu0 %1729 }
 0x2ab   : > { %6760 = vst [vmem:[#allocation5_spill] sm:$0xff] %v5233_v39  ;;  %2907 = vst.msk [vmem:[%s3824_s17 + $0x1a8] sm:$0xff] %vm2853_vm5, %v5233_v39  ;;  %v5238_v57 = vpop.xlane.xlu1 %1732 }
 0x2ac   : > { %6761 = vst [vmem:[#allocation62_spill] sm:$0xff] %v5238_v57  ;;  %2908 = vst.msk [vmem:[%s3824_s17 + $0x1b0] sm:$0xff] %vm2853_vm5, %v5238_v57 }
 0x2ae   : > { %v5243_v36 = vpop.xlane.xlu0 %1735 }
 0x2af   : > { %6762 = vst [vmem:[#allocation63_spill] sm:$0xff] %v5243_v36  ;;  %2909 = vst.msk [vmem:[%s3824_s17 + $0x1b8] sm:$0xff] %vm2853_vm5, %v5243_v36  ;;  %v5248_v53 = vpop.xlane.xlu1 %1738 }
 0x2b0   : > { %6763 = vst [vmem:[#allocation64_spill] sm:$0xff] %v5248_v53  ;;  %2910 = vst.msk [vmem:[%s3824_s17 + $0x1c0] sm:$0xff] %vm2853_vm5, %v5248_v53 }
 0x2b2   : > { %v5253_v9 = vpop.xlane.xlu0 %1741 }
 0x2b3   : > { %6764 = vst [vmem:[#allocation65_spill] sm:$0xff] %v5253_v9  ;;  %2911 = vst.msk [vmem:[%s3824_s17 + $0x1c8] sm:$0xff] %vm2853_vm5, %v5253_v9  ;;  %v5258_v39 = vpop.xlane.xlu1 %1744 }
 0x2b4   : > { %6765 = vst [vmem:[#allocation66_spill] sm:$0xff] %v5258_v39  ;;  %2912 = vst.msk [vmem:[%s3824_s17 + $0x1d0] sm:$0xff] %vm2853_vm5, %v5258_v39 }
 0x2b6   : > { %v5263_v57 = vpop.xlane.xlu0 %1747 }
 0x2b7   : > { %6766 = vst [vmem:[#allocation67_spill] sm:$0xff] %v5263_v57  ;;  %2913 = vst.msk [vmem:[%s3824_s17 + $0x1d8] sm:$0xff] %vm2853_vm5, %v5263_v57  ;;  %v5268_v36 = vpop.xlane.xlu1 %1750 }
 0x2b8   : > { %6767 = vst [vmem:[#allocation68_spill] sm:$0xff] %v5268_v36  ;;  %2914 = vst.msk [vmem:[%s3824_s17 + $0x1e0] sm:$0xff] %vm2853_vm5, %v5268_v36 }
 0x2ba   : > { %v5273_v53 = vpop.xlane.xlu0 %1753 }
 0x2bb   : > { %6768 = vst [vmem:[#allocation69_spill] sm:$0xff] %v5273_v53  ;;  %2915 = vst.msk [vmem:[%s3824_s17 + $0x1e8] sm:$0xff] %vm2853_vm5, %v5273_v53  ;;  %v5278_v9 = vpop.xlane.xlu1 %1756 }
 0x2bc   : > { %6769 = vst [vmem:[#allocation70_spill] sm:$0xff] %v5278_v9  ;;  %2916 = vst.msk [vmem:[%s3824_s17 + $0x1f0] sm:$0xff] %vm2853_vm5, %v5278_v9 }
 0x2be   : > { %v5283_v39 = vpop.xlane.xlu0 %1759 }
 0x2bf   : > { %6770 = vst [vmem:[#allocation71_spill] sm:$0xff] %v5283_v39  ;;  %2917 = vst.msk [vmem:[%s3824_s17 + $0x1f8] sm:$0xff] %vm2853_vm5, %v5283_v39  ;;  %v5294_v53 = vpop.permute.xlu1 %1827  ;;  %vm1782_vm5 = vcmp.eq.f32.partialorder %v4568_v3, %v5063_v47 }
 0x2c0   : > { %6771 = vst [vmem:[#allocation72_spill] sm:$0xff] %v5294_v53  ;;  %v1829_v57 = vsel %vm1763_vm6, %v5294_v53, 80  ;;  %v1831_v9 = vsel %vm1765_vm7, %v5294_v53, 80  ;;  %v1836_v36 = vsel %vm1770_vm8, %v5294_v53, 80  ;;  %v1837_v30 = vsel %vm1771_vm9, %v5294_v53, 80 }
 0x2c1   : > { %v5302_v52 = vsel %vm1568_vm4, %v1829_v57, 2147483647  ;;  %v5305_v43 = vsel %vm1568_vm4, %v1831_v9, 2147483647  ;;  %v5308_v40 = vsel %vm1568_vm4, %v1836_v36, 2147483647  ;;  %vm1783_vm6 = vcmp.eq.f32.partialorder %v4578_v20, %v5068_v2 }
 0x2c2   : > { %6772 = vst [vmem:[#allocation73_spill] sm:$0xff] %v5305_v43  ;;  %6773 = vst [vmem:[#allocation74_spill] sm:$0xff] %v5308_v40  ;;  %v1895_v49 = vshra.s32 %v5302_v52, 16  ;;  %v1925_v31 = vshra.s32 %v5305_v43, 16  ;;  %v2000_v25 = vshra.s32 %v5308_v40, 16  ;;  %v1838_v36 = vsel %vm1772_vm10, %v5294_v53, 80 }
 0x2c3   : > { %v5321_v9 = vsel %vm1568_vm4, %v1837_v30, 2147483647  ;;  %v1839_v45 = vsel %vm1773_vm11, %v5294_v53, 80  ;;  %v1840_v18 = vsel %vm1774_vm12, %v5294_v53, 80  ;;  %v1841_v50 = vsel %vm1775_vm13, %v5294_v53, 80  ;;  %v6810_v40 = vld [vmem:[#allocation66_spill] sm:$0xff] }
 0x2c4   : > { %v5313_v39 = vcvt.s32.f32 %v1895_v49  ;;  %v5315_v28 = vcvt.s32.f32 %v1925_v31  ;;  %6775 = vst [vmem:[#allocation76_spill] sm:$0xff] %v5321_v9  ;;  %v5326_v57 = vcvt.s32.f32 %v2000_v25  ;;  %v2015_v41 = vshra.s32 %v5321_v9, 16  ;;  %v6806_v9 = vld [vmem:[#allocation64_spill] sm:$0xff]  ;;  %v6814_v43 = vld [vmem:[#allocation43_spill] sm:$0xff] }
 0x2c5   : > { %v5332_v49 = vsel %vm1568_vm4, %v1838_v36, 2147483647  ;;  %v5342_v30 = vsel %vm1568_vm4, %v1839_v45, 2147483647  ;;  %v5352_v36 = vsel %vm1568_vm4, %v1840_v18, 2147483647  ;;  %vm1784_vm7 = vcmp.eq.f32.partialorder %v4588_v63, %v5073_v6 }
 0x2c6   : > { %6774 = vst [vmem:[#allocation75_spill] sm:$0xff] %v5315_v28  ;;  %1898 = vmin.xlane.f32.xlu0 %v5313_v39  ;;  %1928 = vmin.xlane.f32.xlu1 %v5315_v28  ;;  %6776 = vst [vmem:[#allocation77_spill] sm:$0xff] %v5326_v57  ;;  %v5336_v33 = vcvt.s32.f32 %v2015_v41  ;;  %v2030_v31 = vshra.s32 %v5332_v49, 16  ;;  %v2045_v25 = vshra.s32 %v5342_v30, 16  ;;  %v2060_v41 = vshra.s32 %v5352_v36, 16  ;;  %v6811_v28 = vld [vmem:[#allocation37_spill] sm:$0xff] }
 0x2c7   : > { %6777 = vst [vmem:[#allocation78_spill] sm:$0xff] %v5332_v49  ;;  %6779 = vst [vmem:[#allocation80_spill] sm:$0xff] %v5342_v30  ;;  %v5362_v45 = vsel %vm1568_vm4, %v1841_v50, 2147483647  ;;  %v1842_v5 = vsel %vm1776_vm14, %v5294_v53, 80  ;;  %v1843_v13 = vsel %vm1777_vm15, %v5294_v53, 80  ;;  %vm1785_vm8 = vcmp.eq.f32.partialorder %v4598_v26, %v5078_v51 }
 0x2c8   : > { %6778 = vst [vmem:[#allocation79_spill] sm:$0xff] %v5336_v33  ;;  %v5346_v14 = vcvt.s32.f32 %v2030_v31  ;;  %6781 = vst [vmem:[#allocation82_spill] sm:$0xff] %v5352_v36  ;;  %v5356_v15 = vcvt.s32.f32 %v2045_v25  ;;  %v5366_v8 = vcvt.s32.f32 %v2060_v41  ;;  %v2075_v31 = vshra.s32 %v5362_v45, 16  ;;  %v6798_v36 = vld [vmem:[#allocation4_spill] sm:$0xff]  ;;  %v6800_v30 = vld [vmem:[#allocation6_spill] sm:$0xff] }
 0x2c9   : > { %6783 = vst [vmem:[#allocation84_spill] sm:$0xff] %v5362_v45  ;;  %v5372_v18 = vsel %vm1568_vm4, %v1842_v5, 2147483647  ;;  %v5382_v50 = vsel %vm1568_vm4, %v1843_v13, 2147483647  ;;  %v1844_v7 = vsel %vm1778_vm0, %v5294_v53, 80  ;;  %vm1786_vm9 = vcmp.eq.f32.partialorder %v4608_v32, %v5083_v46 }
 0x2ca   : > { %2003 = vmin.xlane.f32.xlu1 %v5326_v57  ;;  %6780 = vst [vmem:[#allocation81_spill] sm:$0xff] %v5346_v14  ;;  %6782 = vst [vmem:[#allocation83_spill] sm:$0xff] %v5356_v15  ;;  %v5376_v0 = vcvt.s32.f32 %v2075_v31  ;;  %v2090_v25 = vshra.s32 %v5372_v18, 16  ;;  %v2105_v41 = vshra.s32 %v5382_v50, 16  ;;  %v5392_v5 = vsel %vm1568_vm4, %v1844_v7, 2147483647 }
 0x2cb   : > { %6784 = vst [vmem:[#allocation85_spill] sm:$0xff] %v5366_v8  ;;  %6785 = vst [vmem:[#allocation86_spill] sm:$0xff] %v5372_v18  ;;  %v1845_v29 = vsel %vm1779_vm1, %v5294_v53, 80  ;;  %v2120_v31 = vshra.s32 %v5392_v5, 16  ;;  %v1846_v34 = vsel %vm1780_vm2, %v5294_v53, 80  ;;  %v1847_v4 = vsel %vm1781_vm3, %v5294_v53, 80 }
 0x2cc   : > { %6786 = vst [vmem:[#allocation87_spill] sm:$0xff] %v5376_v0  ;;  %6787 = vst [vmem:[#allocation88_spill] sm:$0xff] %v5382_v50  ;;  %v5386_v54 = vcvt.s32.f32 %v2090_v25  ;;  %v5396_v48 = vcvt.s32.f32 %v2105_v41  ;;  %v5402_v13 = vsel %vm1568_vm4, %v1845_v29, 2147483647  ;;  %v5412_v7 = vsel %vm1568_vm4, %v1846_v34, 2147483647 }
 0x2cd   : > { %v5406_v56 = vcvt.s32.f32 %v2120_v31  ;;  %v2135_v25 = vshra.s32 %v5402_v13, 16  ;;  %v2150_v41 = vshra.s32 %v5412_v7, 16  ;;  %v5422_v29 = vsel %vm1568_vm4, %v1847_v4, 2147483647  ;;  %v6792_v50 = vld [vmem:[#allocation18_spill] sm:$0xff]  ;;  %v6796_v45 = vld [vmem:[#allocation61_spill] sm:$0xff] }
 0x2ce   : > { %2018 = vmin.xlane.f32.xlu1 %v5336_v33  ;;  %6788 = vst [vmem:[#allocation89_spill] sm:$0xff] %v5386_v54  ;;  %6789 = vst [vmem:[#allocation90_spill] sm:$0xff] %v5396_v48  ;;  %v1848_v59 = vsel %vm1782_vm5, %v5294_v53, 80  ;;  %v2165_v31 = vshra.s32 %v5422_v29, 16  ;;  %v1849_v3 = vsel %vm1783_vm6, %v5294_v53, 80  ;;  %v1850_v20 = vsel %vm1784_vm7, %v5294_v53, 80 }
 0x2cf   : > { %v5416_v19 = vcvt.s32.f32 %v2135_v25  ;;  %v5426_v60 = vcvt.s32.f32 %v2150_v41  ;;  %v5432_v34 = vsel %vm1568_vm4, %v1848_v59, 2147483647  ;;  %v5442_v4 = vsel %vm1568_vm4, %v1849_v3, 2147483647  ;;  %v6794_v18 = vld [vmem:[#allocation22_spill] sm:$0xff]  ;;  %v6803_v33 = vld [vmem:[#allocation33_spill] sm:$0xff] }
 0x2d0   : > { %v5436_v47 = vcvt.s32.f32 %v2165_v31  ;;  %v2180_v25 = vshra.s32 %v5432_v34, 16  ;;  %v2195_v41 = vshra.s32 %v5442_v4, 16  ;;  %v5452_v59 = vsel %vm1568_vm4, %v1850_v20, 2147483647  ;;  %v6802_v49 = vld [vmem:[#allocation62_spill] sm:$0xff]  ;;  %v6807_v57 = vld [vmem:[#allocation35_spill] sm:$0xff] }
 0x2d1   : > { %v1851_v63 = vsel %vm1785_vm8, %v5294_v53, 80  ;;  %v2210_v31 = vshra.s32 %v5452_v59, 16  ;;  %v1852_v26 = vsel %vm1786_vm9, %v5294_v53, 80  ;;  %vm1787_vm10 = vcmp.eq.f32.partialorder %v4618_v22, %v5088_v35 }
 0x2d2   : > { %2033 = vmin.xlane.f32.xlu1 %v5346_v14  ;;  %v5446_v2 = vcvt.s32.f32 %v2180_v25  ;;  %v5456_v6 = vcvt.s32.f32 %v2195_v41  ;;  %v5462_v3 = vsel %vm1568_vm4, %v1851_v63, 2147483647  ;;  %v5472_v20 = vsel %vm1568_vm4, %v1852_v26, 2147483647  ;;  %v6801_v14 = vld [vmem:[#allocation31_spill] sm:$0xff] }
 0x2d3   : > { %v5466_v51 = vcvt.s32.f32 %v2210_v31  ;;  %v2225_v25 = vshra.s32 %v5462_v3, 16  ;;  %v1853_v32 = vsel %vm1787_vm10, %v5294_v53, 80  ;;  %v2240_v41 = vshra.s32 %v5472_v20, 16 }
 0x2d4   : > { %vm1788_vm11 = vcmp.eq.f32.partialorder %v4628_v1, %v5093_v58  ;;  %v5482_v63 = vsel %vm1568_vm4, %v1853_v32, 2147483647  ;;  %vm1789_vm12 = vcmp.eq.f32.partialorder %v4638_v55, %v5098_v44  ;;  %vm1791_vm13 = vcmp.eq.f32.partialorder %v4658_v10, %v5108_v37 }
 0x2d5   : > { %v5476_v46 = vcvt.s32.f32 %v2225_v25  ;;  %v1854_v22 = vsel %vm1788_vm11, %v5294_v53, 80  ;;  %v5486_v35 = vcvt.s32.f32 %v2240_v41  ;;  %v2255_v31 = vshra.s32 %v5482_v63, 16 }
 0x2d6   : > { %2048 = vmin.xlane.f32.xlu1 %v5356_v15  ;;  %v5492_v26 = vsel %vm1568_vm4, %v1854_v22, 2147483647  ;;  %v1855_v1 = vsel %vm1789_vm12, %v5294_v53, 80  ;;  %v1857_v55 = vsel %vm1791_vm13, %v5294_v53, 80  ;;  %v6790_v22 = vld [vmem:[#allocation14_spill] sm:$0xff]  ;;  %vm1797_vm0 = vcmp.eq.f32.partialorder %v6792_v50, %v5138_v23  ;;  %v6799_v15 = vld [vmem:[#allocation29_spill] sm:$0xff] }
 0x2d7   : > { %v5496_v58 = vcvt.s32.f32 %v2255_v31  ;;  %v2270_v25 = vshra.s32 %v5492_v26, 16  ;;  %v5502_v32 = vsel %vm1568_vm4, %v1855_v1, 2147483647  ;;  %vm1793_vm14 = vcmp.eq.f32.partialorder %v6790_v22, %v5118_v38 }
 0x2d8   : > { %v2285_v41 = vshra.s32 %v5502_v32, 16  ;;  %v5512_v31 = vsel %vm1568_vm4, %v1857_v55, 2147483647  ;;  %v1859_v10 = vsel %vm1793_vm14, %v5294_v53, 80  ;;  %vm1801_vm2 = vcmp.eq.f32.partialorder %v6794_v18, %v5158_v21 }
 0x2d9   : > { %v5506_v44 = vcvt.s32.f32 %v2270_v25  ;;  %v2315_v1 = vshra.s32 %v5512_v31, 16  ;;  %v5522_v25 = vsel %vm1568_vm4, %v1859_v10, 2147483647  ;;  %vm1805_vm5 = vcmp.eq.f32.partialorder %v4798_v42, %v5178_v12 }
 0x2da   : > { %2063 = vmin.xlane.f32.xlu1 %v5366_v8  ;;  %v5516_v37 = vcvt.s32.f32 %v2285_v41  ;;  %v2345_v22 = vshra.s32 %v5522_v25, 16  ;;  %vm1807_vm6 = vcmp.eq.f32.partialorder %v4818_v27, %v5188_v11  ;;  %vm1809_vm7 = vcmp.eq.f32.partialorder %v4838_v16, %v5198_v24  ;;  %v6797_v8 = vld [vmem:[#allocation27_spill] sm:$0xff] }
 0x2db   : > { %v5526_v55 = vcvt.s32.f32 %v2315_v1  ;;  %v1873_v42 = vsel %vm1807_vm6, %v5294_v53, 80  ;;  %v1875_v27 = vsel %vm1809_vm7, %v5294_v53, 80  ;;  %vm1811_vm8 = vcmp.eq.f32.partialorder %v6797_v8, %v6796_v45 }
 0x2dc   : > { %v1877_v16 = vsel %vm1811_vm8, %v5294_v53, 80  ;;  %vm1813_vm9 = vcmp.eq.f32.partialorder %v6799_v15, %v6798_v36  ;;  %vm1815_vm10 = vcmp.eq.f32.partialorder %v6801_v14, %v6800_v30  ;;  %vm1817_vm11 = vcmp.eq.f32.partialorder %v6803_v33, %v6802_v49 }
 0x2dd   : > { %v1879_v45 = vsel %vm1813_vm9, %v5294_v53, 80  ;;  %v1881_v36 = vsel %vm1815_vm10, %v5294_v53, 80  ;;  %v1883_v30 = vsel %vm1817_vm11, %v5294_v53, 80  ;;  %vm1819_vm12 = vcmp.eq.f32.partialorder %v6807_v57, %v6806_v9 }
 0x2de   : > { %2078 = vmin.xlane.f32.xlu1 %v5376_v0  ;;  %v6795_v0 = vld [vmem:[#allocation24_spill] sm:$0xff]  ;;  %v1885_v49 = vsel %vm1819_vm12, %v5294_v53, 80  ;;  %vm1821_vm13 = vcmp.eq.f32.partialorder %v6811_v28, %v6810_v40 }
 0x2df   : > { %vm1803_vm3 = vcmp.eq.f32.partialorder %v6795_v0, %v5168_v62  ;;  %v1871_v62 = vsel %vm1805_vm5, %v5294_v53, 80  ;;  %v1887_v9 = vsel %vm1821_vm13, %v5294_v53, 80 }
 0x2e0   : > { %v1869_v21 = vsel %vm1803_vm3, %v5294_v53, 80 }
 0x2e2   : > { %2093 = vmin.xlane.f32.xlu1 %v5386_v54  ;;  %v6793_v54 = vld [vmem:[#allocation20_spill] sm:$0xff] }
 0x2e3   : > { %vm1799_vm1 = vcmp.eq.f32.partialorder %v6793_v54, %v5148_v17  ;;  %v1867_v17 = vsel %vm1801_vm2, %v5294_v53, 80 }
 0x2e4   : > { %v1865_v23 = vsel %vm1799_vm1, %v5294_v53, 80 }
 0x2e6   : > { %2108 = vmin.xlane.f32.xlu1 %v5396_v48  ;;  %v6791_v48 = vld [vmem:[#allocation16_spill] sm:$0xff] }
 0x2e7   : > { %vm1795_vm15 = vcmp.eq.f32.partialorder %v6791_v48, %v5128_v61  ;;  %v1863_v61 = vsel %vm1797_vm0, %v5294_v53, 80  ;;  %v5536_v48 = vcvt.s32.f32 %v2345_v22  ;;  %v5552_v22 = vsel %vm1568_vm4, %v1865_v23, 2147483647 }
 0x2e8   : > { %v1861_v38 = vsel %vm1795_vm15, %v5294_v53, 80  ;;  %v5542_v1 = vsel %vm1568_vm4, %v1863_v61, 2147483647  ;;  %v2435_v61 = vshra.s32 %v5552_v22, 16 }
 0x2e9   : > { %v5532_v41 = vsel %vm1568_vm4, %v1861_v38, 2147483647  ;;  %v2405_v38 = vshra.s32 %v5542_v1, 16 }
 0x2ea   : > { %2123 = vmin.xlane.f32.xlu1 %v5406_v56  ;;  %v2375_v10 = vshra.s32 %v5532_v41, 16  ;;  %v5566_v18 = vcvt.s32.f32 %v2435_v61  ;;  %v5582_v61 = vsel %vm1568_vm4, %v1871_v62, 2147483647 }
 0x2eb   : > { %v5556_v54 = vcvt.s32.f32 %v2405_v38  ;;  %v5572_v38 = vsel %vm1568_vm4, %v1869_v21, 2147483647  ;;  %v2525_v21 = vshra.s32 %v5582_v61, 16 }
 0x2ec   : > { %v5546_v50 = vcvt.s32.f32 %v2375_v10  ;;  %v5562_v10 = vsel %vm1568_vm4, %v1867_v17, 2147483647  ;;  %v2495_v17 = vshra.s32 %v5572_v38, 16 }
 0x2ed   : > { %v2465_v23 = vshra.s32 %v5562_v10, 16  ;;  %v5596_v11 = vcvt.s32.f32 %v2525_v21  ;;  %v5612_v21 = vsel %vm1568_vm4, %v1877_v16, 2147483647 }
 0x2ee   : > { %2138 = vmin.xlane.f32.xlu1 %v5416_v19  ;;  %v5586_v12 = vcvt.s32.f32 %v2495_v17  ;;  %v5602_v17 = vsel %vm1568_vm4, %v1875_v27, 2147483647  ;;  %v2615_v27 = vshra.s32 %v5612_v21, 16 }
 0x2ef   : > { %v5576_v0 = vcvt.s32.f32 %v2465_v23  ;;  %v5592_v23 = vsel %vm1568_vm4, %v1873_v42, 2147483647  ;;  %v2585_v42 = vshra.s32 %v5602_v17, 16 }
 0x2f0   : > { %v2555_v62 = vshra.s32 %v5592_v23, 16  ;;  %v5626_v15 = vcvt.s32.f32 %v2615_v27  ;;  %v5642_v27 = vsel %vm1568_vm4, %v1883_v30, 2147483647 }
 0x2f1   : > { %v5616_v8 = vcvt.s32.f32 %v2585_v42  ;;  %v5632_v42 = vsel %vm1568_vm4, %v1881_v36, 2147483647  ;;  %6808 = vst [vmem:[#allocation18_spill] sm:$0xff] %v5642_v27  ;;  %v2705_v36 = vshra.s32 %v5642_v27, 16  ;;  %v5664_v27 = vsel %vm1568_vm4, %v1887_v9, 2147483647 }
 0x2f2   : > { %2153 = vmin.xlane.f32.xlu1 %v5426_v60  ;;  %v5606_v24 = vcvt.s32.f32 %v2555_v62  ;;  %v5622_v62 = vsel %vm1568_vm4, %v1879_v45, 2147483647  ;;  %6804 = vst [vmem:[#allocation14_spill] sm:$0xff] %v5632_v42  ;;  %v2675_v45 = vshra.s32 %v5632_v42, 16  ;;  %v6817_v42 = vld [vmem:[#allocation39_spill] sm:$0xff] }
 0x2f3   : > { %v2645_v16 = vshra.s32 %v5622_v62, 16  ;;  %v5656_v57 = vcvt.s32.f32 %v2705_v36 }
 0x2f4   : > { %v5646_v33 = vcvt.s32.f32 %v2675_v45  ;;  %v6816_v45 = vld [vmem:[#allocation68_spill] sm:$0xff] }
 0x2f5   : > { %v5636_v14 = vcvt.s32.f32 %v2645_v16  ;;  %v5652_v16 = vsel %vm1568_vm4, %v1885_v49, 2147483647  ;;  %6813 = vst [vmem:[#allocation24_spill] sm:$0xff] %v5656_v57  ;;  %vm1823_vm15 = vcmp.eq.f32.partialorder %v6817_v42, %v6816_v45  ;;  %v1894_v49 = vand.u32 65535, %v5302_v52 }
 0x2f6   : > { %2168 = vmin.xlane.f32.xlu1 %v5436_v47  ;;  %6809 = vst [vmem:[#allocation20_spill] sm:$0xff] %v5646_v33  ;;  %6812 = vst [vmem:[#allocation22_spill] sm:$0xff] %v5652_v16  ;;  %v2735_v30 = vshra.s32 %v5652_v16, 16  ;;  %v1889_v28 = vsel %vm1823_vm15, %v5294_v53, 80  ;;  %v2765_v16 = vshra.s32 %v5664_v27, 16 }
 0x2f7   : > { %6805 = vst [vmem:[#allocation16_spill] sm:$0xff] %v5636_v14  ;;  %v5676_v42 = vsel %vm1568_vm4, %v1889_v28, 2147483647 }
 0x2f8   : > { %v5670_v36 = vcvt.s32.f32 %v2735_v30  ;;  %v1896_v30 = vcvt.s32.f32 %v1894_v49 }
 0x2fa   : > { %2183 = vmin.xlane.f32.xlu1 %v5446_v2 }
 0x2fe   : > { %2198 = vmin.xlane.f32.xlu1 %v5456_v6 }
 0x302   : > { %2213 = vmin.xlane.f32.xlu1 %v5466_v51 }
 0x306   : > { %2228 = vmin.xlane.f32.xlu1 %v5476_v46 }
 0x30a   : > { %2243 = vmin.xlane.f32.xlu1 %v5486_v35 }
 0x30e   : > { %2258 = vmin.xlane.f32.xlu1 %v5496_v58 }
 0x312   : > { %2273 = vmin.xlane.f32.xlu1 %v5506_v44 }
 0x316   : > { %2288 = vmin.xlane.f32.xlu1 %v5516_v37 }
 0x31a   : > { %2318 = vmin.xlane.f32.xlu1 %v5526_v55 }
 0x31e   : > { %2348 = vmin.xlane.f32.xlu1 %v5536_v48 }
 0x322   : > { %2378 = vmin.xlane.f32.xlu1 %v5546_v50 }
 0x326   : > { %2408 = vmin.xlane.f32.xlu1 %v5556_v54 }
 0x32a   : > { %2438 = vmin.xlane.f32.xlu1 %v5566_v18 }
 0x32e   : > { %2468 = vmin.xlane.f32.xlu1 %v5576_v0 }
 0x332   : > { %2498 = vmin.xlane.f32.xlu1 %v5586_v12 }
 0x336   : > { %2528 = vmin.xlane.f32.xlu1 %v5596_v11 }
 0x33a   : > { %2558 = vmin.xlane.f32.xlu1 %v5606_v24 }
 0x33e   : > { %2588 = vmin.xlane.f32.xlu1 %v5616_v8 }
 0x342   : > { %2618 = vmin.xlane.f32.xlu1 %v5626_v15 }
 0x346   : > { %2648 = vmin.xlane.f32.xlu1 %v5636_v14  ;;  %v6815_v14 = vld [vmem:[#allocation7_spill] sm:$0xff] }
 0x347   : > { %vm1764_vm14 = vcmp.eq.f32.partialorder %v6815_v14, %v6814_v43  ;;  %v6819_v43 = vld [vmem:[#allocation41_spill] sm:$0xff] }
 0x348   : > { %v1830_v40 = vsel %vm1764_vm14, %v5294_v53, 80 }
 0x349   : > { %v5679_v14 = vsel %vm1568_vm4, %v1830_v40, 2147483647 }
 0x34a   : > { %2678 = vmin.xlane.f32.xlu1 %v5646_v33  ;;  %v6818_v33 = vld [vmem:[#allocation70_spill] sm:$0xff]  ;;  %v1910_v28 = vshra.s32 %v5679_v14, 16 }
 0x34b   : > { %vm1825_vm0 = vcmp.eq.f32.partialorder %v6819_v43, %v6818_v33  ;;  %v2795_v33 = vshra.s32 %v5676_v42, 16 }
 0x34c   : > { %v1891_v9 = vsel %vm1825_vm0, %v5294_v53, 80 }
 0x34d   : > { %v5694_v43 = vsel %vm1568_vm4, %v1891_v9, 2147483647  ;;  %v5699_v53 = vcvt.s32.f32 %v2795_v33 }
 0x34e   : > { %2708 = vmin.xlane.f32.xlu1 %v5656_v57  ;;  %v5687_v57 = vcvt.s32.f32 %v2765_v16  ;;  %6821 = vst [vmem:[#allocation27_spill] sm:$0xff] %v5694_v43  ;;  %v5701_v16 = vcvt.s32.f32 %v1910_v28  ;;  %v2825_v49 = vshra.s32 %v5694_v43, 16 }
 0x34f   : > { %6823 = vst [vmem:[#allocation29_spill] sm:$0xff] %v5699_v53 }
 0x350   : > { %6824 = vst [vmem:[#allocation6_spill] sm:$0xff] %v5701_v16 }
 0x352   : > { %2738 = vmin.xlane.f32.xlu1 %v5670_v36 }
 0x353   : > { %v5683_v45 = vpop.xlane.xlu1 %1928  ;;  %v5685_v52 = vpop.xlane.xlu0 %1898 }
 0x354   : > { %6820 = vst [vmem:[#allocation61_spill] sm:$0xff] %v5683_v45  ;;  %vm1900_vm1 = vcmp.eq.f32.partialorder %v5313_v39, %v5685_v52 }
 0x355   : > { %v1901_v40 = vsel %vm1900_vm1, %v1896_v30, inf  ;;  %v5708_v30 = vcvt.s32.f32 %v2825_v49 }
 0x356   : > { %2768 = vmin.xlane.f32.xlu1 %v5687_v57  ;;  %1902 = vmin.xlane.f32.xlu0 %v1901_v40 }
 0x357   : > { %v5697_v45 = vpop.xlane.xlu1 %2003 }
 0x358   : > { %6822 = vst [vmem:[#allocation4_spill] sm:$0xff] %v5697_v45 }
 0x35a   : > { %2798 = vmin.xlane.f32.xlu1 %v5699_v53  ;;  %1913 = vmin.xlane.f32.xlu0 %v5701_v16  ;;  %v2119_v16 = vand.u32 65535, %v5392_v5 }
 0x35b   : > { %v5706_v39 = vpop.xlane.xlu1 %2018 }
 0x35c   : > { %6825 = vst [vmem:[#allocation31_spill] sm:$0xff] %v5706_v39  ;;  %v2121_v49 = vcvt.s32.f32 %v2119_v16  ;;  %v2134_v39 = vand.u32 65535, %v5402_v13  ;;  %v2164_v13 = vand.u32 65535, %v5422_v29  ;;  %v2194_v29 = vand.u32 65535, %v5442_v4 }
 0x35d   : > { %v2224_v4 = vand.u32 65535, %v5462_v3  ;;  %v2254_v3 = vand.u32 65535, %v5482_v63 }
 0x35e   : > { %2828 = vmin.xlane.f32.xlu1 %v5708_v30 }
 0x35f   : > { %v5711_v9 = vpop.xlane.xlu1 %2033 }
 0x360   : > { %6826 = vst [vmem:[#allocation62_spill] sm:$0xff] %v5711_v9 }
 0x363   : > { %v5713_v40 = vpop.xlane.xlu1 %2048 }
 0x364   : > { %6827 = vst [vmem:[#allocation33_spill] sm:$0xff] %v5713_v40 }
 0x367   : > { %v5715_v33 = vpop.xlane.xlu1 %2063 }
 0x368   : > { %6828 = vst [vmem:[#allocation64_spill] sm:$0xff] %v5715_v33  ;;  %v2136_v33 = vcvt.s32.f32 %v2134_v39  ;;  %v2166_v39 = vcvt.s32.f32 %v2164_v13  ;;  %v2196_v13 = vcvt.s32.f32 %v2194_v29  ;;  %v2226_v29 = vcvt.s32.f32 %v2224_v4 }
 0x369   : > { %v2256_v4 = vcvt.s32.f32 %v2254_v3 }
 0x36b   : > { %v5717_v28 = vpop.xlane.xlu1 %2078 }
 0x36c   : > { %6829 = vst [vmem:[#allocation35_spill] sm:$0xff] %v5717_v28  ;;  %v2149_v28 = vand.u32 65535, %v5412_v7  ;;  %v2179_v7 = vand.u32 65535, %v5432_v34  ;;  %v2209_v34 = vand.u32 65535, %v5452_v59  ;;  %v2239_v59 = vand.u32 65535, %v5472_v20 }
 0x36d   : > { %v2269_v20 = vand.u32 65535, %v5492_v26  ;;  %v2314_v26 = vand.u32 65535, %v5512_v31  ;;  %v2374_v31 = vand.u32 65535, %v5532_v41  ;;  %v2434_v41 = vand.u32 65535, %v5552_v22 }
 0x36e   : > { %v2151_v16 = vcvt.s32.f32 %v2149_v28  ;;  %v2181_v28 = vcvt.s32.f32 %v2179_v7  ;;  %v2211_v7 = vcvt.s32.f32 %v2209_v34  ;;  %v2241_v34 = vcvt.s32.f32 %v2239_v59 }
 0x36f   : > { %v5719_v45 = vpop.xlane.xlu1 %2093  ;;  %v2284_v59 = vand.u32 65535, %v5502_v32  ;;  %v2271_v63 = vcvt.s32.f32 %v2269_v20  ;;  %v2344_v32 = vand.u32 65535, %v5522_v25  ;;  %v2404_v25 = vand.u32 65535, %v5542_v1 }
 0x370   : > { %v2464_v1 = vand.u32 65535, %v5562_v10  ;;  %v2494_v22 = vand.u32 65535, %v5572_v38  ;;  %v2524_v10 = vand.u32 65535, %v5582_v61  ;;  %v2554_v38 = vand.u32 65535, %v5592_v23 }
 0x371   : > { %v2286_v3 = vcvt.s32.f32 %v2284_v59  ;;  %v2346_v59 = vcvt.s32.f32 %v2344_v32  ;;  %v2436_v32 = vcvt.s32.f32 %v2434_v41  ;;  %v2584_v61 = vand.u32 65535, %v5602_v17 }
 0x372   : > { %v2614_v23 = vand.u32 65535, %v5612_v21  ;;  %v2644_v17 = vand.u32 65535, %v5622_v62 }
 0x373   : > { %v5721_v43 = vpop.xlane.xlu1 %2108 }
 0x374   : > { %6830 = vst [vmem:[#allocation66_spill] sm:$0xff] %v5721_v43 }
 0x377   : > { %v5724_v53 = vpop.xlane.xlu1 %2123 }
 0x378   : > { %vm2125_vm2 = vcmp.eq.f32.partialorder %v5406_v56, %v5724_v53 }
 0x379   : > { %v5729_v9 = vsel %vm2125_vm2, %v2121_v49, inf }
 0x37b   : > { %v5731_v40 = vpop.xlane.xlu1 %2138 }
 0x37c   : > { %vm2140_vm3 = vcmp.eq.f32.partialorder %v5416_v19, %v5731_v40 }
 0x37d   : > { %v5736_v43 = vsel %vm2140_vm3, %v2136_v33, inf }
 0x37f   : > { %v5738_v5 = vpop.xlane.xlu1 %2153 }
 0x380   : > { %vm2155_vm5 = vcmp.eq.f32.partialorder %v5426_v60, %v5738_v5 }
 0x381   : > { %v5743_v56 = vsel %vm2155_vm5, %v2151_v16, inf }
 0x383   : > { %v5745_v49 = vpop.xlane.xlu1 %2168 }
 0x384   : > { %vm2170_vm6 = vcmp.eq.f32.partialorder %v5436_v47, %v5745_v49 }
 0x385   : > { %v5750_v19 = vsel %vm2170_vm6, %v2166_v39, inf }
 0x387   : > { %v5752_v33 = vpop.xlane.xlu1 %2183 }
 0x388   : > { %vm2185_vm7 = vcmp.eq.f32.partialorder %v5446_v2, %v5752_v33 }
 0x389   : > { %v5757_v60 = vsel %vm2185_vm7, %v2181_v28, inf }
 0x38b   : > { %v5759_v16 = vpop.xlane.xlu1 %2198 }
 0x38c   : > { %vm2200_vm8 = vcmp.eq.f32.partialorder %v5456_v6, %v5759_v16 }
 0x38d   : > { %v5764_v47 = vsel %vm2200_vm8, %v2196_v13, inf }
 0x38f   : > { %v5766_v39 = vpop.xlane.xlu1 %2213 }
 0x390   : > { %vm2215_vm9 = vcmp.eq.f32.partialorder %v5466_v51, %v5766_v39 }
 0x391   : > { %v5771_v2 = vsel %vm2215_vm9, %v2211_v7, inf }
 0x393   : > { %v5773_v28 = vpop.xlane.xlu1 %2228 }
 0x394   : > { %vm2230_vm10 = vcmp.eq.f32.partialorder %v5476_v46, %v5773_v28 }
 0x395   : > { %v5778_v6 = vsel %vm2230_vm10, %v2226_v29, inf }
 0x397   : > { %v5780_v13 = vpop.xlane.xlu1 %2243 }
 0x398   : > { %vm2245_vm11 = vcmp.eq.f32.partialorder %v5486_v35, %v5780_v13 }
 0x399   : > { %v5785_v51 = vsel %vm2245_vm11, %v2241_v34, inf }
 0x39b   : > { %v5787_v7 = vpop.xlane.xlu1 %2258 }
 0x39c   : > { %6831 = vst [vmem:[#allocation37_spill] sm:$0xff] %v5787_v7  ;;  %vm2260_vm12 = vcmp.eq.f32.partialorder %v5496_v58, %v5787_v7  ;;  %v2316_v7 = vcvt.s32.f32 %v2314_v26  ;;  %v2406_v26 = vcvt.s32.f32 %v2404_v25  ;;  %v2526_v25 = vcvt.s32.f32 %v2524_v10 }
 0x39d   : > { %v5792_v46 = vsel %vm2260_vm12, %v2256_v4, inf }
 0x39f   : > { %v5794_v29 = vpop.xlane.xlu1 %2273 }
 0x3a0   : > { %vm2275_vm13 = vcmp.eq.f32.partialorder %v5506_v44, %v5794_v29 }
 0x3a1   : > { %v5799_v35 = vsel %vm2275_vm13, %v2271_v63, inf }
 0x3a3   : > { %v5801_v34 = vpop.xlane.xlu1 %2288 }
 0x3a4   : > { %vm2290_vm14 = vcmp.eq.f32.partialorder %v5516_v37, %v5801_v34 }
 0x3a5   : > { %v2291_v58 = vsel %vm2290_vm14, %v2286_v3, inf  ;;  %v2376_v3 = vcvt.s32.f32 %v2374_v31 }
 0x3a6   : > { %2292 = vmin.xlane.f32.xlu1 %v2291_v58 }
 0x3a7   : > { %v5806_v4 = vpop.xlane.xlu1 %2318 }
 0x3a8   : > { %vm2320_vm15 = vcmp.eq.f32.partialorder %v5526_v55, %v5806_v4 }
 0x3a9   : > { %v2321_v44 = vsel %vm2320_vm15, %v2316_v7, inf }
 0x3aa   : > { %2322 = vmin.xlane.f32.xlu1 %v2321_v44 }
 0x3ab   : > { %v5811_v20 = vpop.xlane.xlu1 %2348 }
 0x3ac   : > { %vm2350_vm0 = vcmp.eq.f32.partialorder %v5536_v48, %v5811_v20 }
 0x3ad   : > { %v2351_v37 = vsel %vm2350_vm0, %v2346_v59, inf  ;;  %v2466_v59 = vcvt.s32.f32 %v2464_v1  ;;  %v2616_v1 = vcvt.s32.f32 %v2614_v23 }
 0x3ae   : > { %2352 = vmin.xlane.f32.xlu1 %v2351_v37  ;;  %v2496_v37 = vcvt.s32.f32 %v2494_v22  ;;  %v6832_v22 = vld [vmem:[#allocation14_spill] sm:$0xff] }
 0x3af   : > { %v5816_v63 = vpop.xlane.xlu1 %2378  ;;  %v2674_v21 = vand.u32 65535, %v6832_v22 }
 0x3b0   : > { %vm2380_vm1 = vcmp.eq.f32.partialorder %v5546_v50, %v5816_v63 }
 0x3b1   : > { %v2381_v55 = vsel %vm2380_vm1, %v2376_v3, inf  ;;  %v2676_v10 = vcvt.s32.f32 %v2674_v21  ;;  %vm2982_vm1 = vcmask 48168  }
 0x3b2   : > { %2382 = vmin.xlane.f32.xlu1 %v2381_v55 }
 0x3b3   : > { %v5821_v7 = vpop.xlane.xlu1 %2408 }
 0x3b4   : > { %vm2410_vm2 = vcmp.eq.f32.partialorder %v5556_v54, %v5821_v7 }
 0x3b5   : > { %v2411_v48 = vsel %vm2410_vm2, %v2406_v26, inf  ;;  %v2556_v26 = vcvt.s32.f32 %v2554_v38 }
 0x3b6   : > { %2412 = vmin.xlane.f32.xlu1 %v2411_v48  ;;  %v2586_v48 = vcvt.s32.f32 %v2584_v61 }
 0x3b7   : > { %v5826_v58 = vpop.xlane.xlu1 %2438 }
 0x3b8   : > { %vm2440_vm3 = vcmp.eq.f32.partialorder %v5566_v18, %v5826_v58 }
 0x3b9   : > { %v2441_v50 = vsel %vm2440_vm3, %v2436_v32, inf }
 0x3ba   : > { %2442 = vmin.xlane.f32.xlu1 %v2441_v50 }
 0x3bb   : > { %v5831_v44 = vpop.xlane.xlu1 %2468 }
 0x3bc   : > { %vm2470_vm5 = vcmp.eq.f32.partialorder %v5576_v0, %v5831_v44 }
 0x3bd   : > { %v2471_v54 = vsel %vm2470_vm5, %v2466_v59, inf  ;;  %v2646_v59 = vcvt.s32.f32 %v2644_v17  ;;  %v1905_v17 = vcvt.f32.s32 %v5685_v52  ;;  %v6838_v52 = vld [vmem:[#allocation46_spill] sm:$0xff] }
 0x3be   : > { %2472 = vmin.xlane.f32.xlu1 %v2471_v54  ;;  %v6833_v54 = vld [vmem:[#allocation16_spill] sm:$0xff] }
 0x3bf   : > { %v5836_v31 = vpop.xlane.xlu1 %2498 }
 0x3c0   : > { %vm2500_vm6 = vcmp.eq.f32.partialorder %v5586_v12, %v5836_v31 }
 0x3c1   : > { %v2501_v18 = vsel %vm2500_vm6, %v2496_v37, inf }
 0x3c2   : > { %2502 = vmin.xlane.f32.xlu1 %v2501_v18  ;;  %v6834_v18 = vld [vmem:[#allocation18_spill] sm:$0xff] }
 0x3c3   : > { %v5841_v3 = vpop.xlane.xlu1 %2528  ;;  %v2704_v62 = vand.u32 65535, %v6834_v18 }
 0x3c4   : > { %vm2530_vm7 = vcmp.eq.f32.partialorder %v5596_v11, %v5841_v3 }
 0x3c5   : > { %v2531_v0 = vsel %vm2530_vm7, %v2526_v25, inf  ;;  %v6835_v25 = vld [vmem:[#allocation20_spill] sm:$0xff] }
 0x3c6   : > { %2532 = vmin.xlane.f32.xlu1 %v2531_v0  ;;  %v2706_v0 = vcvt.s32.f32 %v2704_v62  ;;  %v6839_v62 = vld [vmem:[#allocation8_spill] sm:$0xff] }
 0x3c7   : > { %v5846_v55 = vpop.xlane.xlu1 %2558  ;;  %vm1766_vm0 = vcmp.eq.f32.partialorder %v6839_v62, %v6838_v52 }
 0x3c8   : > { %vm2560_vm8 = vcmp.eq.f32.partialorder %v5606_v24, %v5846_v55 }
 0x3c9   : > { %v2561_v12 = vsel %vm2560_vm8, %v2556_v26, inf  ;;  %v6836_v26 = vld [vmem:[#allocation22_spill] sm:$0xff] }
 0x3ca   : > { %2562 = vmin.xlane.f32.xlu1 %v2561_v12  ;;  %v2734_v61 = vand.u32 65535, %v6836_v26  ;;  %v6837_v12 = vld [vmem:[#allocation24_spill] sm:$0xff] }
 0x3cb   : > { %v5851_v41 = vpop.xlane.xlu1 %2588 }
 0x3cc   : > { %vm2590_vm9 = vcmp.eq.f32.partialorder %v5616_v8, %v5851_v41 }
 0x3cd   : > { %v2591_v11 = vsel %vm2590_vm9, %v2586_v48, inf }
 0x3ce   : > { %2592 = vmin.xlane.f32.xlu1 %v2591_v11  ;;  %v2736_v11 = vcvt.s32.f32 %v2734_v61  ;;  %v6841_v61 = vld [vmem:[#allocation72_spill] sm:$0xff] }
 0x3cf   : > { %v5856_v32 = vpop.xlane.xlu1 %2618 }
 0x3d0   : > { %vm2620_vm10 = vcmp.eq.f32.partialorder %v5626_v15, %v5856_v32 }
 0x3d1   : > { %v2621_v24 = vsel %vm2620_vm10, %v2616_v1, inf  ;;  %v2764_v1 = vand.u32 65535, %v5664_v27  ;;  %v1909_v27 = vand.u32 65535, %v5679_v14  ;;  %v6842_v14 = vld [vmem:[#allocation29_spill] sm:$0xff] }
 0x3d2   : > { %2622 = vmin.xlane.f32.xlu1 %v2621_v24 }
 0x3d3   : > { %v5861_v50 = vpop.xlane.xlu1 %2648  ;;  %v2766_v21 = vcvt.s32.f32 %v2764_v1 }
 0x3d4   : > { %vm2650_vm11 = vcmp.eq.f32.partialorder %v6833_v54, %v5861_v50  ;;  %v2794_v54 = vand.u32 65535, %v5676_v42 }
 0x3d5   : > { %v2651_v8 = vsel %vm2650_vm11, %v2646_v59, inf }
 0x3d6   : > { %2652 = vmin.xlane.f32.xlu1 %v2651_v8  ;;  %v1906_v8 = vshll.u32 %v1905_v17, 16  ;;  %v2796_v42 = vcvt.s32.f32 %v2794_v54 }
 0x3d7   : > { %v5866_v37 = vpop.xlane.xlu1 %2678 }
 0x3d8   : > { %vm2680_vm12 = vcmp.eq.f32.partialorder %v6835_v25, %v5866_v37 }
 0x3d9   : > { %v2681_v15 = vsel %vm2680_vm12, %v2676_v10, inf }
 0x3da   : > { %2682 = vmin.xlane.f32.xlu1 %v2681_v15 }
 0x3db   : > { %v5871_v38 = vpop.xlane.xlu1 %2708 }
 0x3dc   : > { %vm2710_vm13 = vcmp.eq.f32.partialorder %v6837_v12, %v5871_v38 }
 0x3dd   : > { %v2711_v48 = vsel %vm2710_vm13, %v2706_v0, inf  ;;  %v6840_v0 = vld [vmem:[#allocation27_spill] sm:$0xff] }
 0x3de   : > { %2712 = vmin.xlane.f32.xlu1 %v2711_v48  ;;  %v2824_v26 = vand.u32 65535, %v6840_v0  ;;  %v1911_v48 = vcvt.s32.f32 %v1909_v27  ;;  %v2295_v0 = vcvt.f32.s32 %v5801_v34  ;;  %v2385_v34 = vcvt.f32.s32 %v5816_v63 }
 0x3df   : > { %v5876_v23 = vpop.xlane.xlu1 %2738  ;;  %v2445_v63 = vcvt.f32.s32 %v5826_v58  ;;  %v2505_v58 = vcvt.f32.s32 %v5836_v31  ;;  %v2565_v31 = vcvt.f32.s32 %v5846_v55  ;;  %v2625_v55 = vcvt.f32.s32 %v5856_v32 }
 0x3e0   : > { %vm2740_vm14 = vcmp.eq.f32.partialorder %v5670_v36, %v5876_v23  ;;  %v2685_v32 = vcvt.f32.s32 %v5866_v37  ;;  %v2745_v37 = vcvt.f32.s32 %v5876_v23 }
 0x3e1   : > { %v2741_v24 = vsel %vm2740_vm14, %v2736_v11, inf  ;;  %v6843_v11 = vld [vmem:[#allocation73_spill] sm:$0xff] }
 0x3e2   : > { %2742 = vmin.xlane.f32.xlu1 %v2741_v24  ;;  %v1924_v1 = vand.u32 65535, %v6843_v11  ;;  %v6844_v24 = vld [vmem:[#allocation6_spill] sm:$0xff] }
 0x3e3   : > { %v5882_v59 = vpop.xlane.xlu1 %2768  ;;  %v1903_v22 = vpop.xlane.xlu0 %1902 }
 0x3e4   : > { %vm2770_vm15 = vcmp.eq.f32.partialorder %v5687_v57, %v5882_v59  ;;  %v1904_v10 = vcvt.f32.s32 %v1903_v22  ;;  %v1832_v57 = vsel %vm1766_vm0, %v6841_v61, 80  ;;  %v1926_v27 = vcvt.s32.f32 %v1924_v1 }
 0x3e5   : > { %v2771_v18 = vsel %vm2770_vm15, %v2766_v21, inf  ;;  %v5904_v21 = vsel %vm1568_vm4, %v1832_v57, 2147483647  ;;  %v2296_v57 = vshll.u32 %v2295_v0, 16  ;;  %v2355_v1 = vcvt.f32.s32 %v5811_v20 }
 0x3e6   : > { %v1907_v36 = vadd.s32 %v1906_v8, %v1904_v10  ;;  %2772 = vmin.xlane.f32.xlu1 %v2771_v18  ;;  %v2826_v8 = vcvt.s32.f32 %v2824_v26  ;;  %v6845_v10 = vld [vmem:[#allocation61_spill] sm:$0xff]  ;;  %v6846_v18 = vld [vmem:[#allocation75_spill] sm:$0xff]  ;;  %v1940_v62 = vshra.s32 %v5904_v21, 16  ;;  %v2415_v20 = vcvt.f32.s32 %v5821_v7 }
 0x3e7   : > { %v5890_v25 = vpop.xlane.xlu1 %2798  ;;  %v5892_v15 = vpop.xlane.xlu0 %1913  ;;  %vm1930_vm5 = vcmp.eq.f32.partialorder %v6846_v18, %v6845_v10  ;;  %v2356_v18 = vshll.u32 %v2355_v1, 16  ;;  %v2475_v7 = vcvt.f32.s32 %v5831_v44  ;;  %v2535_v44 = vcvt.f32.s32 %v5841_v3 }
 0x3e8   : > { %v2918_v12 = vcvt.s32.f32 %v1907_v36  ;;  %vm2800_vm2 = vcmp.eq.f32.partialorder %v6842_v14, %v5890_v25  ;;  %vm1915_vm3 = vcmp.eq.f32.partialorder %v6844_v24, %v5892_v15  ;;  %v1931_v36 = vsel %vm1930_vm5, %v1926_v27, inf }
 0x3e9   : > { %v2801_v17 = vsel %vm2800_vm2, %v2796_v42, inf  ;;  %v1916_v22 = vsel %vm1915_vm3, %v1911_v48, inf  ;;  %v5913_v42 = vcvt.s32.f32 %v1940_v62  ;;  %v2595_v3 = vcvt.f32.s32 %v5851_v41 }
 0x3ea   : > { %2983 = vst.msk [vmem:[%s3824_s17] sm:$0xff] %vm2982_vm1, %v2918_v12  ;;  %2802 = vmin.xlane.f32.xlu1 %v2801_v17  ;;  %1917 = vmin.xlane.f32.xlu0 %v1916_v22  ;;  %v2325_v12 = vcvt.f32.s32 %v5806_v4  ;;  %v2655_v41 = vcvt.f32.s32 %v5861_v50  ;;  %v2715_v50 = vcvt.f32.s32 %v5871_v38  ;;  %v2775_v38 = vcvt.f32.s32 %v5882_v59 }
 0x3eb   : > { %v5906_v54 = vpop.xlane.xlu1 %2828 }
 0x3ec   : > { %vm2830_vm6 = vcmp.eq.f32.partialorder %v5708_v30, %v5906_v54  ;;  %v2326_v11 = vshll.u32 %v2325_v12, 16  ;;  %v2835_v59 = vcvt.f32.s32 %v5906_v54 }
 0x3ed   : > { %v2831_v52 = vsel %vm2830_vm6, %v2826_v8, inf }
 0x3ee   : > { %2832 = vmin.xlane.f32.xlu1 %v2831_v52  ;;  %1932 = vmin.xlane.f32.xlu0 %v1931_v36  ;;  %v2386_v36 = vshll.u32 %v2385_v34, 16  ;;  %v2476_v34 = vshll.u32 %v2475_v7, 16  ;;  %v2836_v54 = vshll.u32 %v2835_v59, 16 }
 0x3f2   : > { %1943 = vmin.xlane.f32.xlu0 %v5913_v42 }
 0x433   : > { %v2293_v26 = vpop.xlane.xlu1 %2292 }
 0x434   : > { %v2294_v30 = vcvt.f32.s32 %v2293_v26 }
 0x436   : > { %v2297_v14 = vadd.s32 %v2296_v57, %v2294_v30  ;;  %v2416_v30 = vshll.u32 %v2415_v20, 16 }
 0x437   : > { %v2323_v48 = vpop.xlane.xlu1 %2322 }
 0x438   : > { %v2944_v17 = vcvt.s32.f32 %v2297_v14  ;;  %v2324_v24 = vcvt.f32.s32 %v2323_v48 }
 0x43a   : > { %3009 = vst.msk [vmem:[%s3824_s17 + $0xd0] sm:$0xff] %vm2982_vm1, %v2944_v17  ;;  %v2327_v22 = vadd.s32 %v2326_v11, %v2324_v24  ;;  %v2446_v17 = vshll.u32 %v2445_v63, 16 }
 0x43b   : > { %v2353_v8 = vpop.xlane.xlu1 %2352 }
 0x43c   : > { %v2946_v27 = vcvt.s32.f32 %v2327_v22  ;;  %v2354_v52 = vcvt.f32.s32 %v2353_v8 }
 0x43e   : > { %3011 = vst.msk [vmem:[%s3824_s17 + $0xe0] sm:$0xff] %vm2982_vm1, %v2946_v27  ;;  %v2357_v4 = vadd.s32 %v2356_v18, %v2354_v52 }
 0x43f   : > { %v2383_v62 = vpop.xlane.xlu1 %2382 }
 0x440   : > { %v2948_v0 = vcvt.s32.f32 %v2357_v4  ;;  %v2384_v26 = vcvt.f32.s32 %v2383_v62 }
 0x442   : > { %3013 = vst.msk [vmem:[%s3824_s17 + $0xf0] sm:$0xff] %vm2982_vm1, %v2948_v0  ;;  %v2387_v57 = vadd.s32 %v2386_v36, %v2384_v26  ;;  %v2506_v36 = vshll.u32 %v2505_v58, 16 }
 0x443   : > { %v2413_v12 = vpop.xlane.xlu1 %2412 }
 0x444   : > { %v2950_v14 = vcvt.s32.f32 %v2387_v57  ;;  %v2414_v48 = vcvt.f32.s32 %v2413_v12  ;;  %v2536_v12 = vshll.u32 %v2535_v44, 16  ;;  %v2656_v44 = vshll.u32 %v2655_v41, 16 }
 0x446   : > { %3015 = vst.msk [vmem:[%s3824_s17 + $0x100] sm:$0xff] %vm2982_vm1, %v2950_v14  ;;  %v2417_v11 = vadd.s32 %v2416_v30, %v2414_v48 }
 0x447   : > { %v2443_v1 = vpop.xlane.xlu1 %2442 }
 0x448   : > { %v2952_v24 = vcvt.s32.f32 %v2417_v11  ;;  %v2444_v22 = vcvt.f32.s32 %v2443_v1  ;;  %v2566_v11 = vshll.u32 %v2565_v31, 16 }
 0x44a   : > { %3017 = vst.msk [vmem:[%s3824_s17 + $0x110] sm:$0xff] %vm2982_vm1, %v2952_v24  ;;  %v2447_v8 = vadd.s32 %v2446_v17, %v2444_v22  ;;  %v2596_v22 = vshll.u32 %v2595_v3, 16 }
 0x44b   : > { %v2473_v18 = vpop.xlane.xlu1 %2472 }
 0x44c   : > { %v2954_v27 = vcvt.s32.f32 %v2447_v8  ;;  %v2474_v52 = vcvt.f32.s32 %v2473_v18 }
 0x44e   : > { %3019 = vst.msk [vmem:[%s3824_s17 + $0x120] sm:$0xff] %vm2982_vm1, %v2954_v27  ;;  %v2477_v4 = vadd.s32 %v2476_v34, %v2474_v52  ;;  %v2626_v27 = vshll.u32 %v2625_v55, 16 }
 0x44f   : > { %v2503_v62 = vpop.xlane.xlu1 %2502 }
 0x450   : > { %v2956_v20 = vcvt.s32.f32 %v2477_v4  ;;  %v2504_v0 = vcvt.f32.s32 %v2503_v62 }
 0x452   : > { %3021 = vst.msk [vmem:[%s3824_s17 + $0x130] sm:$0xff] %vm2982_vm1, %v2956_v20  ;;  %v2507_v26 = vadd.s32 %v2506_v36, %v2504_v0 }
 0x453   : > { %v2533_v57 = vpop.xlane.xlu1 %2532 }
 0x454   : > { %v2958_v30 = vcvt.s32.f32 %v2507_v26  ;;  %v2534_v63 = vcvt.f32.s32 %v2533_v57 }
 0x456   : > { %3023 = vst.msk [vmem:[%s3824_s17 + $0x140] sm:$0xff] %vm2982_vm1, %v2958_v30  ;;  %v2537_v14 = vadd.s32 %v2536_v12, %v2534_v63  ;;  %v2686_v12 = vshll.u32 %v2685_v32, 16  ;;  %v1935_v32 = vcvt.f32.s32 %v6845_v10  ;;  %v1939_v10 = vand.u32 65535, %v5904_v21 }
 0x457   : > { %v2563_v48 = vpop.xlane.xlu1 %2562 }
 0x458   : > { %v2960_v1 = vcvt.s32.f32 %v2537_v14  ;;  %v2564_v17 = vcvt.f32.s32 %v2563_v48  ;;  %v2716_v48 = vshll.u32 %v2715_v50, 16 }
 0x45a   : > { %3025 = vst.msk [vmem:[%s3824_s17 + $0x150] sm:$0xff] %vm2982_vm1, %v2960_v1  ;;  %v2567_v7 = vadd.s32 %v2566_v11, %v2564_v17 }
 0x45b   : > { %v2593_v24 = vpop.xlane.xlu1 %2592 }
 0x45c   : > { %v2962_v8 = vcvt.s32.f32 %v2567_v7  ;;  %v2594_v18 = vcvt.f32.s32 %v2593_v24  ;;  %v2746_v7 = vshll.u32 %v2745_v37, 16 }
 0x45e   : > { %3027 = vst.msk [vmem:[%s3824_s17 + $0x160] sm:$0xff] %vm2982_vm1, %v2962_v8  ;;  %v2597_v34 = vadd.s32 %v2596_v22, %v2594_v18  ;;  %v2776_v18 = vshll.u32 %v2775_v38, 16  ;;  %v1941_v38 = vcvt.s32.f32 %v1939_v10 }
 0x45f   : > { %v2623_v58 = vpop.xlane.xlu1 %2622 }
 0x460   : > { %v2964_v52 = vcvt.s32.f32 %v2597_v34  ;;  %v2624_v4 = vcvt.f32.s32 %v2623_v58  ;;  %v2805_v34 = vcvt.f32.s32 %v5890_v25 }
 0x462   : > { %3029 = vst.msk [vmem:[%s3824_s17 + $0x170] sm:$0xff] %vm2982_vm1, %v2964_v52  ;;  %v2627_v62 = vadd.s32 %v2626_v27, %v2624_v4  ;;  %v1920_v27 = vcvt.f32.s32 %v5892_v15  ;;  %v2806_v4 = vshll.u32 %v2805_v34, 16  ;;  %v6850_v34 = vld [vmem:[#allocation10_spill] sm:$0xff] }
 0x463   : > { %v2653_v36 = vpop.xlane.xlu1 %2652 }
 0x464   : > { %v2966_v20 = vcvt.s32.f32 %v2627_v62  ;;  %v2654_v0 = vcvt.f32.s32 %v2653_v36 }
 0x466   : > { %3031 = vst.msk [vmem:[%s3824_s17 + $0x180] sm:$0xff] %vm2982_vm1, %v2966_v20  ;;  %v2657_v26 = vadd.s32 %v2656_v44, %v2654_v0  ;;  %v1921_v20 = vshll.u32 %v1920_v27, 16  ;;  %v6847_v0 = vld [vmem:[#allocation45_spill] sm:$0xff] }
 0x467   : > { %v2683_v57 = vpop.xlane.xlu1 %2682 }
 0x468   : > { %v2968_v31 = vcvt.s32.f32 %v2657_v26  ;;  %v2684_v30 = vcvt.f32.s32 %v2683_v57  ;;  %v6848_v26 = vld [vmem:[#allocation9_spill] sm:$0xff] }
 0x469   : > { %vm1767_vm7 = vcmp.eq.f32.partialorder %v6848_v26, %v6847_v0  ;;  %v6851_v0 = vld [vmem:[#allocation47_spill] sm:$0xff]  ;;  %v6852_v26 = vld [vmem:[#allocation2_spill] sm:$0xff] }
 0x46a   : > { %3033 = vst.msk [vmem:[%s3824_s17 + $0x190] sm:$0xff] %vm2982_vm1, %v2968_v31  ;;  %v2687_v63 = vadd.s32 %v2686_v12, %v2684_v30  ;;  %v1833_v50 = vsel %vm1767_vm7, %v6841_v61, 80  ;;  %vm1769_vm11 = vcmp.eq.f32.partialorder %v6852_v26, %v6851_v0  ;;  %v6862_v26 = vld [vmem:[#allocation80_spill] sm:$0xff] }
 0x46b   : > { %v2713_v14 = vpop.xlane.xlu1 %2712 }
 0x46c   : > { %v2970_v11 = vcvt.s32.f32 %v2687_v63  ;;  %v2714_v3 = vcvt.f32.s32 %v2713_v14  ;;  %v1936_v14 = vshll.u32 %v1935_v32, 16 }
 0x46e   : > { %3035 = vst.msk [vmem:[%s3824_s17 + $0x1a0] sm:$0xff] %vm2982_vm1, %v2970_v11  ;;  %v2717_v1 = vadd.s32 %v2716_v48, %v2714_v3  ;;  %v1953_v3 = vsel %vm1568_vm4, %v1833_v50, 2147483647 }
 0x46f   : > { %v2743_v17 = vpop.xlane.xlu1 %2742  ;;  %v1954_v27 = vand.u32 65535, %v1953_v3 }
 0x470   : > { %v2972_v24 = vcvt.s32.f32 %v2717_v1  ;;  %v2744_v22 = vcvt.f32.s32 %v2743_v17 }
 0x472   : > { %3037 = vst.msk [vmem:[%s3824_s17 + $0x1b0] sm:$0xff] %vm2982_vm1, %v2972_v24  ;;  %v2747_v55 = vadd.s32 %v2746_v7, %v2744_v22  ;;  %v1955_v22 = vshra.s32 %v1953_v3, 16 }
 0x473   : > { %v2773_v8 = vpop.xlane.xlu1 %2772 }
 0x474   : > { %v2974_v23 = vcvt.s32.f32 %v2747_v55  ;;  %v2774_v58 = vcvt.f32.s32 %v2773_v8  ;;  %v1957_v55 = vcvt.s32.f32 %v1955_v22 }
 0x476   : > { %3039 = vst.msk [vmem:[%s3824_s17 + $0x1c0] sm:$0xff] %vm2982_vm1, %v2974_v23  ;;  %v2777_v41 = vadd.s32 %v2776_v18, %v2774_v58  ;;  %v6849_v18 = vld [vmem:[#allocation48_spill] sm:$0xff] }
 0x477   : > { %v2803_v52 = vpop.xlane.xlu1 %2802  ;;  %v1918_v44 = vpop.xlane.xlu0 %1917  ;;  %vm1768_vm9 = vcmp.eq.f32.partialorder %v6850_v34, %v6849_v18 }
 0x478   : > { %v2976_v62 = vcvt.s32.f32 %v2777_v41  ;;  %v2804_v36 = vcvt.f32.s32 %v2803_v52  ;;  %v1919_v25 = vcvt.f32.s32 %v1918_v44  ;;  %v1834_v23 = vsel %vm1768_vm9, %v6841_v61, 80 }
 0x479   : > { %v1968_v52 = vsel %vm1568_vm4, %v1834_v23, 2147483647  ;;  %v6854_v23 = vld [vmem:[#allocation4_spill] sm:$0xff] }
 0x47a   : > { %3041 = vst.msk [vmem:[%s3824_s17 + $0x1d0] sm:$0xff] %vm2982_vm1, %v2976_v62  ;;  %v2807_v15 = vadd.s32 %v2806_v4, %v2804_v36  ;;  %v1922_v57 = vadd.s32 %v1921_v20, %v1919_v25  ;;  %v1956_v62 = vcvt.s32.f32 %v1954_v27  ;;  %v1970_v44 = vshra.s32 %v1968_v52, 16 }
 0x47b   : > { %v2833_v12 = vpop.xlane.xlu1 %2832  ;;  %v1933_v63 = vpop.xlane.xlu0 %1932 }
 0x47c   : > { %v2978_v31 = vcvt.s32.f32 %v2807_v15  ;;  %v2834_v30 = vcvt.f32.s32 %v2833_v12  ;;  %v2919_v48 = vcvt.s32.f32 %v1922_v57  ;;  %v1934_v37 = vcvt.f32.s32 %v1933_v63 }
 0x47d   : > { %v1972_v20 = vcvt.s32.f32 %v1970_v44  ;;  %v1835_v15 = vsel %vm1769_vm11, %v6841_v61, 80  ;;  %v1969_v12 = vand.u32 65535, %v1968_v52 }
 0x47e   : > { %3043 = vst.msk [vmem:[%s3824_s17 + $0x1e0] sm:$0xff] %vm2982_vm1, %v2978_v31  ;;  %v2837_v11 = vadd.s32 %v2836_v54, %v2834_v30  ;;  %2984 = vst.msk [vmem:[%s3824_s17 + $0x8] sm:$0xff] %vm2982_vm1, %v2919_v48  ;;  %v1937_v1 = vadd.s32 %v1936_v14, %v1934_v37  ;;  %v1983_v31 = vsel %vm1568_vm4, %v1835_v15, 2147483647  ;;  %v2044_v15 = vand.u32 65535, %v6862_v26 }
 0x47f   : > { %v1944_v7 = vpop.xlane.xlu0 %1943  ;;  %v1971_v10 = vcvt.s32.f32 %v1969_v12  ;;  %v1985_v48 = vshra.s32 %v1983_v31, 16  ;;  %v6863_v12 = vld [vmem:[#allocation33_spill] sm:$0xff] }
 0x480   : > { %v2980_v17 = vcvt.s32.f32 %v2837_v11  ;;  %v2920_v24 = vcvt.s32.f32 %v1937_v1  ;;  %vm1945_vm8 = vcmp.eq.f32.partialorder %v5913_v42, %v1944_v7  ;;  %v1950_v8 = vcvt.f32.s32 %v1944_v7 }
 0x481   : > { %v1946_v21 = vsel %vm1945_vm8, %v1941_v38, inf  ;;  %v1987_v11 = vcvt.s32.f32 %v1985_v48 }
 0x482   : > { %3045 = vst.msk [vmem:[%s3824_s17 + $0x1f0] sm:$0xff] %vm2982_vm1, %v2980_v17  ;;  %2985 = vst.msk [vmem:[%s3824_s17 + $0x10] sm:$0xff] %vm2982_vm1, %v2920_v24  ;;  %1947 = vmin.xlane.f32.xlu0 %v1946_v21  ;;  %v1951_v41 = vshll.u32 %v1950_v8, 16  ;;  %v1984_v17 = vand.u32 65535, %v1983_v31  ;;  %v6865_v31 = vld [vmem:[#allocation82_spill] sm:$0xff] }
 0x484   : > { %v1986_v21 = vcvt.s32.f32 %v1984_v17  ;;  %v6870_v17 = vld [vmem:[#allocation87_spill] sm:$0xff] }
 0x486   : > { %1958 = vmin.xlane.f32.xlu0 %v1957_v55 }
 0x50f   : > { %v1948_v58 = vpop.xlane.xlu0 %1947 }
 0x510   : > { %v1949_v42 = vcvt.f32.s32 %v1948_v58  ;;  %v6855_v58 = vld [vmem:[#allocation77_spill] sm:$0xff] }
 0x511   : > { %vm2005_vm14 = vcmp.eq.f32.partialorder %v6855_v58, %v6854_v23 }
 0x512   : > { %v1952_v4 = vadd.s32 %v1951_v41, %v1949_v42  ;;  %v6856_v41 = vld [vmem:[#allocation76_spill] sm:$0xff] }
 0x513   : > { %v1959_v59 = vpop.xlane.xlu0 %1958  ;;  %v2014_v42 = vand.u32 65535, %v6856_v41  ;;  %v6875_v41 = vld [vmem:[#allocation90_spill] sm:$0xff] }
 0x514   : > { %v2921_v36 = vcvt.s32.f32 %v1952_v4  ;;  %vm1960_vm10 = vcmp.eq.f32.partialorder %v1957_v55, %v1959_v59  ;;  %v1965_v25 = vcvt.f32.s32 %v1959_v59  ;;  %v6853_v55 = vld [vmem:[#allocation74_spill] sm:$0xff]  ;;  %v6857_v4 = vld [vmem:[#allocation31_spill] sm:$0xff] }
 0x515   : > { %v1961_v32 = vsel %vm1960_vm10, %v1956_v62, inf  ;;  %v1999_v8 = vand.u32 65535, %v6853_v55  ;;  %v6858_v59 = vld [vmem:[#allocation79_spill] sm:$0xff]  ;;  %v2016_v62 = vcvt.s32.f32 %v2014_v42  ;;  %v6872_v55 = vld [vmem:[#allocation89_spill] sm:$0xff] }
 0x516   : > { %2986 = vst.msk [vmem:[%s3824_s17 + $0x18] sm:$0xff] %vm2982_vm1, %v2921_v36  ;;  %1962 = vmin.xlane.f32.xlu0 %v1961_v32  ;;  %v1966_v50 = vshll.u32 %v1965_v25, 16  ;;  %vm2020_vm15 = vcmp.eq.f32.partialorder %v6858_v59, %v6857_v4  ;;  %v6859_v36 = vld [vmem:[#allocation78_spill] sm:$0xff]  ;;  %v6861_v25 = vld [vmem:[#allocation81_spill] sm:$0xff]  ;;  %vm2095_vm6 = vcmp.eq.f32.partialorder %v6872_v55, %v5719_v45 }
 0x517   : > { %v2001_v27 = vcvt.s32.f32 %v1999_v8  ;;  %v2029_v44 = vand.u32 65535, %v6859_v36  ;;  %v2021_v32 = vsel %vm2020_vm15, %v2016_v62, inf  ;;  %v6876_v59 = vld [vmem:[#allocation50_spill] sm:$0xff]  ;;  %v6877_v62 = vld [vmem:[#allocation12_spill] sm:$0xff]  ;;  %v6879_v36 = vld [vmem:[#allocation11_spill] sm:$0xff] }
 0x518   : > { %vm1790_vm8 = vcmp.eq.f32.partialorder %v6877_v62, %v6876_v59  ;;  %v6892_v59 = vld [vmem:[#allocation57_spill] sm:$0xff]  ;;  %v6893_v62 = vld [vmem:[#allocation26_spill] sm:$0xff] }
 0x519   : > { %v2006_v52 = vsel %vm2005_vm14, %v2001_v27, inf  ;;  %v2031_v0 = vcvt.s32.f32 %v2029_v44  ;;  %v6874_v27 = vld [vmem:[#allocation66_spill] sm:$0xff] }
 0x51a   : > { %1973 = vmin.xlane.f32.xlu0 %v1972_v20  ;;  %vm2110_vm7 = vcmp.eq.f32.partialorder %v6875_v41, %v6874_v27 }
 0x5a3   : > { %v1963_v57 = vpop.xlane.xlu0 %1962 }
 0x5a4   : > { %v1964_v54 = vcvt.f32.s32 %v1963_v57 }
 0x5a6   : > { %v1967_v30 = vadd.s32 %v1966_v50, %v1964_v54  ;;  %v6864_v50 = vld [vmem:[#allocation83_spill] sm:$0xff]  ;;  %v2046_v54 = vcvt.s32.f32 %v2044_v15 }
 0x5a7   : > { %v1974_v63 = vpop.xlane.xlu0 %1973  ;;  %vm2050_vm2 = vcmp.eq.f32.partialorder %v6864_v50, %v6863_v12  ;;  %v6885_v50 = vld [vmem:[#allocation17_spill] sm:$0xff] }
 0x5a8   : > { %v2922_v14 = vcvt.s32.f32 %v1967_v30  ;;  %vm1975_vm12 = vcmp.eq.f32.partialorder %v1972_v20, %v1974_v63  ;;  %v1980_v3 = vcvt.f32.s32 %v1974_v63  ;;  %v6860_v20 = vld [vmem:[#allocation62_spill] sm:$0xff]  ;;  %v2059_v30 = vand.u32 65535, %v6865_v31 }
 0x5a9   : > { %v1976_v37 = vsel %vm1975_vm12, %v1971_v10, inf  ;;  %vm2035_vm0 = vcmp.eq.f32.partialorder %v6861_v25, %v6860_v20  ;;  %v2051_v63 = vsel %vm2050_vm2, %v2046_v54, inf  ;;  %v6866_v10 = vld [vmem:[#allocation64_spill] sm:$0xff]  ;;  %v6882_v25 = vld [vmem:[#allocation51_spill] sm:$0xff] }
 0x5aa   : > { %2987 = vst.msk [vmem:[%s3824_s17 + $0x20] sm:$0xff] %vm2982_vm1, %v2922_v14  ;;  %1977 = vmin.xlane.f32.xlu0 %v1976_v37  ;;  %v1981_v7 = vshll.u32 %v1980_v3, 16  ;;  %v2036_v57 = vsel %vm2035_vm0, %v2031_v0, inf  ;;  %v6867_v14 = vld [vmem:[#allocation85_spill] sm:$0xff]  ;;  %v2061_v48 = vcvt.s32.f32 %v2059_v30  ;;  %v6868_v37 = vld [vmem:[#allocation84_spill] sm:$0xff]  ;;  %vm1806_vm0 = vcmp.eq.f32.partialorder %v6893_v62, %v6892_v59  ;;  %v6903_v59 = vld [vmem:[#allocation34_spill] sm:$0xff] }
 0x5ab   : > { %vm2065_vm3 = vcmp.eq.f32.partialorder %v6867_v14, %v6866_v10  ;;  %v6886_v14 = vld [vmem:[#allocation53_spill] sm:$0xff] }
 0x5ac   : > { %v2066_v3 = vsel %vm2065_vm3, %v2061_v48, inf  ;;  %v6887_v48 = vld [vmem:[#allocation19_spill] sm:$0xff] }
 0x5ae   : > { %1988 = vmin.xlane.f32.xlu0 %v1987_v11 }
 0x637   : > { %v1978_v1 = vpop.xlane.xlu0 %1977 }
 0x638   : > { %v1979_v38 = vcvt.f32.s32 %v1978_v1  ;;  %v6869_v1 = vld [vmem:[#allocation35_spill] sm:$0xff] }
 0x639   : > { %vm2080_vm5 = vcmp.eq.f32.partialorder %v6870_v17, %v6869_v1 }
 0x63a   : > { %v1982_v24 = vadd.s32 %v1981_v7, %v1979_v38  ;;  %v6871_v38 = vld [vmem:[#allocation86_spill] sm:$0xff] }
 0x63b   : > { %v5997_v22 = vpop.xlane.xlu0 %1988 }
 0x63c   : > { %v2923_v18 = vcvt.s32.f32 %v1982_v24  ;;  %vm1990_vm13 = vcmp.eq.f32.partialorder %v1987_v11, %v5997_v22  ;;  %v2074_v11 = vand.u32 65535, %v6868_v37  ;;  %v2089_v24 = vand.u32 65535, %v6871_v38  ;;  %v6889_v38 = vld [vmem:[#allocation21_spill] sm:$0xff] }
 0x63d   : > { %v1991_v34 = vsel %vm1990_vm13, %v1986_v21, inf  ;;  %vm1800_vm13 = vcmp.eq.f32.partialorder %v6887_v48, %v6886_v14  ;;  %v6899_v14 = vld [vmem:[#allocation30_spill] sm:$0xff] }
 0x63e   : > { %2988 = vst.msk [vmem:[%s3824_s17 + $0x28] sm:$0xff] %vm2982_vm1, %v2923_v18  ;;  %1992 = vmin.xlane.f32.xlu0 %v1991_v34  ;;  %v2076_v7 = vcvt.s32.f32 %v2074_v11  ;;  %v2091_v8 = vcvt.s32.f32 %v2089_v24  ;;  %v6873_v18 = vld [vmem:[#allocation88_spill] sm:$0xff]  ;;  %v1866_v11 = vsel %vm1800_vm13, %v6841_v61, 80 }
 0x63f   : > { %v2104_v34 = vand.u32 65535, %v6873_v18  ;;  %v6089_v24 = vsel %vm1568_vm4, %v1866_v11, 2147483647  ;;  %v6890_v18 = vld [vmem:[#allocation55_spill] sm:$0xff] }
 0x640   : > { %v2081_v21 = vsel %vm2080_vm5, %v2076_v7, inf  ;;  %v2096_v58 = vsel %vm2095_vm6, %v2091_v8, inf  ;;  %v6888_v7 = vld [vmem:[#allocation56_spill] sm:$0xff]  ;;  %v2450_v8 = vshra.s32 %v6089_v24, 16 }
 0x641   : > { %v2106_v42 = vcvt.s32.f32 %v2104_v34  ;;  %vm1802_vm14 = vcmp.eq.f32.partialorder %v6889_v38, %v6888_v7  ;;  %v6891_v34 = vld [vmem:[#allocation23_spill] sm:$0xff] }
 0x642   : > { %2007 = vmin.xlane.f32.xlu0 %v2006_v52  ;;  %vm1804_vm15 = vcmp.eq.f32.partialorder %v6891_v34, %v6890_v18  ;;  %v6900_v38 = vld [vmem:[#allocation3_spill] sm:$0xff] }
 0x643   : > { %v2111_v52 = vsel %vm2110_vm7, %v2106_v42, inf  ;;  %v1870_v41 = vsel %vm1804_vm15, %v6841_v61, 80  ;;  %v6103_v42 = vcvt.s32.f32 %v2450_v8 }
 0x646   : > { %2022 = vmin.xlane.f32.xlu0 %v2021_v32 }
 0x64a   : > { %2037 = vmin.xlane.f32.xlu0 %v2036_v57  ;;  %v6884_v57 = vld [vmem:[#allocation54_spill] sm:$0xff] }
 0x64b   : > { %vm1798_vm12 = vcmp.eq.f32.partialorder %v6885_v50, %v6884_v57 }
 0x64c   : > { %v1864_v31 = vsel %vm1798_vm12, %v6841_v61, 80 }
 0x64d   : > { %v6079_v37 = vsel %vm1568_vm4, %v1864_v31, 2147483647 }
 0x64e   : > { %2052 = vmin.xlane.f32.xlu0 %v2051_v63  ;;  %v2420_v17 = vshra.s32 %v6079_v37, 16 }
 0x650   : > { %v6093_v55 = vcvt.s32.f32 %v2420_v17 }
 0x652   : > { %2067 = vmin.xlane.f32.xlu0 %v2066_v3 }
 0x656   : > { %2082 = vmin.xlane.f32.xlu0 %v2081_v21  ;;  %v1868_v21 = vsel %vm1802_vm14, %v6841_v61, 80 }
 0x65a   : > { %2097 = vmin.xlane.f32.xlu0 %v2096_v58  ;;  %v6099_v58 = vsel %vm1568_vm4, %v1868_v21, 2147483647  ;;  %v6901_v21 = vld [vmem:[#allocation32_spill] sm:$0xff] }
 0x65b   : > { %vm1814_vm6 = vcmp.eq.f32.partialorder %v6901_v21, %v6900_v38  ;;  %v6908_v21 = vld [vmem:[#allocation67_spill] sm:$0xff] }
 0x65c   : > { %v1880_v18 = vsel %vm1814_vm6, %v6841_v61, 80 }
 0x65d   : > { %v6159_v62 = vsel %vm1568_vm4, %v1880_v18, 2147483647  ;;  %v6909_v18 = vld [vmem:[#allocation40_spill] sm:$0xff] }
 0x65e   : > { %2112 = vmin.xlane.f32.xlu0 %v2111_v52  ;;  %v2480_v52 = vshra.s32 %v6099_v58, 16 }
 0x662   : > { %2127 = vmin.xlane.f32.xlu0 %v5729_v9  ;;  %v1856_v9 = vsel %vm1790_vm8, %v6841_v61, 80 }
 0x666   : > { %2142 = vmin.xlane.f32.xlu0 %v5736_v43  ;;  %v6878_v43 = vld [vmem:[#allocation49_spill] sm:$0xff] }
 0x667   : > { %vm1792_vm9 = vcmp.eq.f32.partialorder %v6879_v36, %v6878_v43  ;;  %v1872_v43 = vsel %vm1806_vm0, %v6841_v61, 80  ;;  %v6113_v36 = vcvt.s32.f32 %v2480_v52  ;;  %v6902_v52 = vld [vmem:[#allocation5_spill] sm:$0xff] }
 0x668   : > { %vm1816_vm7 = vcmp.eq.f32.partialorder %v6903_v59, %v6902_v52  ;;  %v6911_v59 = vld [vmem:[#allocation69_spill] sm:$0xff] }
 0x66a   : > { %2157 = vmin.xlane.f32.xlu0 %v5743_v56  ;;  %v6041_v56 = vsel %vm1568_vm4, %v1856_v9, 2147483647  ;;  %v6109_v9 = vsel %vm1568_vm4, %v1870_v41, 2147483647 }
 0x66e   : > { %2172 = vmin.xlane.f32.xlu0 %v5750_v19  ;;  %v1858_v19 = vsel %vm1792_vm9, %v6841_v61, 80 }
 0x672   : > { %2187 = vmin.xlane.f32.xlu0 %v5757_v60  ;;  %v2300_v60 = vshra.s32 %v6041_v56, 16 }
 0x674   : > { %v6053_v44 = vcvt.s32.f32 %v2300_v60  ;;  %v6894_v60 = vld [vmem:[#allocation59_spill] sm:$0xff] }
 0x676   : > { %2202 = vmin.xlane.f32.xlu0 %v5764_v47  ;;  %v6880_v47 = vld [vmem:[#allocation52_spill] sm:$0xff] }
 0x67a   : > { %2217 = vmin.xlane.f32.xlu0 %v5771_v2  ;;  %v6881_v2 = vld [vmem:[#allocation13_spill] sm:$0xff] }
 0x67b   : > { %vm1794_vm10 = vcmp.eq.f32.partialorder %v6881_v2, %v6880_v47  ;;  %v6895_v47 = vld [vmem:[#allocation25_spill] sm:$0xff]  ;;  %v6119_v2 = vsel %vm1568_vm4, %v1872_v43, 2147483647  ;;  %v1882_v43 = vsel %vm1816_vm7, %v6841_v61, 80 }
 0x67c   : > { %vm1808_vm2 = vcmp.eq.f32.partialorder %v6895_v47, %v6894_v60  ;;  %v2660_v60 = vshra.s32 %v6159_v62, 16  ;;  %v6904_v47 = vld [vmem:[#allocation63_spill] sm:$0xff] }
 0x67e   : > { %2232 = vmin.xlane.f32.xlu0 %v5778_v6  ;;  %v6049_v6 = vsel %vm1568_vm4, %v1858_v19, 2147483647  ;;  %v2510_v19 = vshra.s32 %v6109_v9, 16 }
 0x67f   : > { %v2330_v32 = vshra.s32 %v6049_v6, 16 }
 0x681   : > { %v6063_v15 = vcvt.s32.f32 %v2330_v32  ;;  %v6123_v32 = vcvt.s32.f32 %v2510_v19 }
 0x682   : > { %2247 = vmin.xlane.f32.xlu0 %v5785_v51  ;;  %v1860_v51 = vsel %vm1794_vm10, %v6841_v61, 80  ;;  %vm1822_vm10 = vcmp.eq.f32.partialorder %v6909_v18, %v6908_v21 }
 0x683   : > { %v6059_v0 = vsel %vm1568_vm4, %v1860_v51, 2147483647  ;;  %v1874_v51 = vsel %vm1808_vm2, %v6841_v61, 80  ;;  %v1888_v52 = vsel %vm1822_vm10, %v6841_v61, 80 }
 0x686   : > { %2262 = vmin.xlane.f32.xlu0 %v5792_v46  ;;  %v6883_v46 = vld [vmem:[#allocation15_spill] sm:$0xff] }
 0x687   : > { %vm1796_vm11 = vcmp.eq.f32.partialorder %v6883_v46, %v6882_v25  ;;  %v2540_v25 = vshra.s32 %v6119_v2, 16  ;;  %v6896_v46 = vld [vmem:[#allocation58_spill] sm:$0xff] }
 0x688   : > { %v1862_v26 = vsel %vm1796_vm11, %v6841_v61, 80 }
 0x689   : > { %v6069_v54 = vsel %vm1568_vm4, %v1862_v26, 2147483647  ;;  %v6897_v26 = vld [vmem:[#allocation28_spill] sm:$0xff]  ;;  %v6133_v50 = vcvt.s32.f32 %v2540_v25  ;;  %v6169_v25 = vsel %vm1568_vm4, %v1882_v43, 2147483647  ;;  %v6912_v43 = vld [vmem:[#allocation42_spill] sm:$0xff] }
 0x68a   : > { %2277 = vmin.xlane.f32.xlu0 %v5799_v35  ;;  %v2360_v35 = vshra.s32 %v6059_v0, 16  ;;  %v2390_v63 = vshra.s32 %v6069_v54, 16  ;;  %vm1810_vm3 = vcmp.eq.f32.partialorder %v6897_v26, %v6896_v46  ;;  %v6173_v26 = vcvt.s32.f32 %v2660_v60  ;;  %v6913_v60 = vld [vmem:[#allocation71_spill] sm:$0xff] }
 0x68b   : > { %v1876_v57 = vsel %vm1810_vm3, %v6841_v61, 80  ;;  %vm1824_vm11 = vcmp.eq.f32.partialorder %v6912_v43, %v6911_v59 }
 0x68c   : > { %v6073_v30 = vcvt.s32.f32 %v2360_v35  ;;  %v6083_v3 = vcvt.s32.f32 %v2390_v63  ;;  %v6129_v35 = vsel %vm1568_vm4, %v1874_v51, 2147483647  ;;  %v6898_v63 = vld [vmem:[#allocation60_spill] sm:$0xff]  ;;  %v6139_v48 = vsel %vm1568_vm4, %v1876_v57, 2147483647 }
 0x68d   : > { %v2570_v31 = vshra.s32 %v6129_v35, 16  ;;  %vm1812_vm5 = vcmp.eq.f32.partialorder %v6899_v14, %v6898_v63  ;;  %v2600_v7 = vshra.s32 %v6139_v48, 16  ;;  %v6905_v51 = vld [vmem:[#allocation36_spill] sm:$0xff]  ;;  %v2690_v57 = vshra.s32 %v6169_v25, 16  ;;  %v6907_v63 = vld [vmem:[#allocation38_spill] sm:$0xff] }
 0x68e   : > { %2303 = vmin.xlane.f32.xlu0 %v6053_v44  ;;  %v1878_v11 = vsel %vm1812_vm5, %v6841_v61, 80  ;;  %vm1818_vm8 = vcmp.eq.f32.partialorder %v6905_v51, %v6904_v47  ;;  %v6914_v47 = vld [vmem:[#allocation44_spill] sm:$0xff] }
 0x68f   : > { %v6143_v17 = vcvt.s32.f32 %v2570_v31  ;;  %v6149_v8 = vsel %vm1568_vm4, %v1878_v11, 2147483647  ;;  %v6153_v34 = vcvt.s32.f32 %v2600_v7  ;;  %v1884_v46 = vsel %vm1818_vm8, %v6841_v61, 80  ;;  %v6906_v31 = vld [vmem:[#allocation65_spill] sm:$0xff] }
 0x690   : > { %v2630_v41 = vshra.s32 %v6149_v8, 16  ;;  %vm1820_vm9 = vcmp.eq.f32.partialorder %v6907_v63, %v6906_v31  ;;  %v6179_v14 = vsel %vm1568_vm4, %v1884_v46, 2147483647  ;;  %v6183_v7 = vcvt.s32.f32 %v2690_v57 }
 0x691   : > { %v1886_v11 = vsel %vm1820_vm9, %v6841_v61, 80  ;;  %v2720_v38 = vshra.s32 %v6179_v14, 16  ;;  %vm1826_vm12 = vcmp.eq.f32.partialorder %v6914_v47, %v6913_v60  ;;  %v6201_v57 = vsel %vm1568_vm4, %v1888_v52, 2147483647 }
 0x692   : > { %2333 = vmin.xlane.f32.xlu0 %v6063_v15  ;;  %v6163_v19 = vcvt.s32.f32 %v2630_v41  ;;  %v6189_v41 = vsel %vm1568_vm4, %v1886_v11, 2147483647  ;;  %6916 = vst [vmem:[#allocation68_spill] sm:$0xff] %v6201_v57  ;;  %v1890_v31 = vsel %vm1824_vm11, %v6841_v61, 80  ;;  %v1892_v63 = vsel %vm1826_vm12, %v6841_v61, 80 }
 0x693   : > { %6910 = vst [vmem:[#allocation43_spill] sm:$0xff] %v6189_v41  ;;  %v6197_v51 = vcvt.s32.f32 %v2720_v38  ;;  %v2750_v46 = vshra.s32 %v6189_v41, 16  ;;  %v1995_v11 = vcvt.f32.s32 %v5997_v22  ;;  %v2780_v18 = vshra.s32 %v6201_v57, 16 }
 0x694   : > { %v6211_v38 = vsel %vm1568_vm4, %v1890_v31, 2147483647  ;;  %v6216_v43 = vsel %vm1568_vm4, %v1892_v63, 2147483647  ;;  %v2010_v61 = vcvt.f32.s32 %v6854_v23 }
 0x695   : > { %6915 = vst [vmem:[#allocation7_spill] sm:$0xff] %v6197_v51  ;;  %v6207_v21 = vcvt.s32.f32 %v2750_v46  ;;  %6918 = vst [vmem:[#allocation70_spill] sm:$0xff] %v6211_v38  ;;  %v2810_v52 = vshra.s32 %v6211_v38, 16  ;;  %v1996_v60 = vshll.u32 %v1995_v11, 16  ;;  %v6219_v47 = vcvt.s32.f32 %v2780_v18 }
 0x696   : > { %2363 = vmin.xlane.f32.xlu0 %v6073_v30  ;;  %v2025_v38 = vcvt.f32.s32 %v6857_v4 }
 0x697   : > { %6917 = vst [vmem:[#allocation39_spill] sm:$0xff] %v6207_v21  ;;  %v6222_v57 = vcvt.s32.f32 %v2810_v52  ;;  %v2040_v52 = vcvt.f32.s32 %v6860_v20 }
 0x69a   : > { %2393 = vmin.xlane.f32.xlu0 %v6083_v3 }
 0x69e   : > { %2423 = vmin.xlane.f32.xlu0 %v6093_v55 }
 0x6a2   : > { %2453 = vmin.xlane.f32.xlu0 %v6103_v42 }
 0x6a6   : > { %2483 = vmin.xlane.f32.xlu0 %v6113_v36 }
 0x6aa   : > { %2513 = vmin.xlane.f32.xlu0 %v6123_v32 }
 0x6ae   : > { %2543 = vmin.xlane.f32.xlu0 %v6133_v50 }
 0x6b2   : > { %2573 = vmin.xlane.f32.xlu0 %v6143_v17 }
 0x6b6   : > { %2603 = vmin.xlane.f32.xlu0 %v6153_v34 }
 0x6ba   : > { %2633 = vmin.xlane.f32.xlu0 %v6163_v19 }
 0x6be   : > { %2663 = vmin.xlane.f32.xlu0 %v6173_v26 }
 0x6c2   : > { %2693 = vmin.xlane.f32.xlu0 %v6183_v7 }
 0x6c6   : > { %2723 = vmin.xlane.f32.xlu0 %v6197_v51  ;;  %v2011_v51 = vshll.u32 %v2010_v61, 16 }
 0x6ca   : > { %2753 = vmin.xlane.f32.xlu0 %v6207_v21  ;;  %v2840_v21 = vshra.s32 %v6216_v43, 16 }
 0x6cb   : > { %v1993_v59 = vpop.xlane.xlu0 %1992 }
 0x6cc   : > { %v1994_v22 = vcvt.f32.s32 %v1993_v59  ;;  %v6229_v18 = vcvt.s32.f32 %v2840_v21  ;;  %v2026_v59 = vshll.u32 %v2025_v38, 16 }
 0x6ce   : > { %v1997_v46 = vadd.s32 %v1996_v60, %v1994_v22  ;;  %2783 = vmin.xlane.f32.xlu0 %v6219_v47 }
 0x6cf   : > { %v2008_v31 = vpop.xlane.xlu0 %2007 }
 0x6d0   : > { %v2924_v63 = vcvt.s32.f32 %v1997_v46  ;;  %v2009_v41 = vcvt.f32.s32 %v2008_v31  ;;  %v2041_v46 = vshll.u32 %v2040_v52, 16 }
 0x6d2   : > { %2989 = vst.msk [vmem:[%s3824_s17 + $0x30] sm:$0xff] %vm2982_vm1, %v2924_v63  ;;  %v2012_v23 = vadd.s32 %v2011_v51, %v2009_v41  ;;  %2813 = vmin.xlane.f32.xlu0 %v6222_v57  ;;  %v2055_v41 = vcvt.f32.s32 %v6863_v12  ;;  %v2070_v63 = vcvt.f32.s32 %v6866_v10  ;;  %v2085_v12 = vcvt.f32.s32 %v6869_v1 }
 0x6d3   : > { %v2023_v11 = vpop.xlane.xlu0 %2022  ;;  %v2100_v10 = vcvt.f32.s32 %v5719_v45  ;;  %v2115_v1 = vcvt.f32.s32 %v6874_v27  ;;  %v2130_v45 = vcvt.f32.s32 %v5724_v53  ;;  %v2145_v27 = vcvt.f32.s32 %v5731_v40 }
 0x6d4   : > { %v2925_v60 = vcvt.s32.f32 %v2012_v23  ;;  %v2024_v22 = vcvt.f32.s32 %v2023_v11  ;;  %v2056_v20 = vshll.u32 %v2055_v41, 16  ;;  %v2071_v52 = vshll.u32 %v2070_v63, 16 }
 0x6d5   : > { %v2086_v41 = vshll.u32 %v2085_v12, 16  ;;  %v2160_v53 = vcvt.f32.s32 %v5738_v5  ;;  %v2175_v40 = vcvt.f32.s32 %v5745_v49  ;;  %v2190_v5 = vcvt.f32.s32 %v5752_v33 }
 0x6d6   : > { %2990 = vst.msk [vmem:[%s3824_s17 + $0x38] sm:$0xff] %vm2982_vm1, %v2925_v60  ;;  %v2027_v4 = vadd.s32 %v2026_v59, %v2024_v22  ;;  %2843 = vmin.xlane.f32.xlu0 %v6229_v18  ;;  %v2205_v49 = vcvt.f32.s32 %v5759_v16  ;;  %v2220_v33 = vcvt.f32.s32 %v5766_v39  ;;  %v2235_v16 = vcvt.f32.s32 %v5773_v28 }
 0x6d7   : > { %v2038_v61 = vpop.xlane.xlu0 %2037  ;;  %v2250_v39 = vcvt.f32.s32 %v5780_v13  ;;  %v2280_v13 = vcvt.f32.s32 %v5794_v29  ;;  %v2329_v29 = vand.u32 65535, %v6049_v6 }
 0x6d8   : > { %v2926_v51 = vcvt.s32.f32 %v2027_v4  ;;  %v2039_v31 = vcvt.f32.s32 %v2038_v61 }
 0x6da   : > { %2991 = vst.msk [vmem:[%s3824_s17 + $0x40] sm:$0xff] %vm2982_vm1, %v2926_v51  ;;  %v2042_v21 = vadd.s32 %v2041_v46, %v2039_v31 }
 0x6db   : > { %v2053_v38 = vpop.xlane.xlu0 %2052 }
 0x6dc   : > { %v2927_v23 = vcvt.s32.f32 %v2042_v21  ;;  %v2054_v11 = vcvt.f32.s32 %v2053_v38 }
 0x6de   : > { %2992 = vst.msk [vmem:[%s3824_s17 + $0x48] sm:$0xff] %vm2982_vm1, %v2927_v23  ;;  %v2057_v59 = vadd.s32 %v2056_v20, %v2054_v11  ;;  %v2101_v20 = vshll.u32 %v2100_v10, 16 }
 0x6df   : > { %v2068_v60 = vpop.xlane.xlu0 %2067 }
 0x6e0   : > { %v2928_v22 = vcvt.s32.f32 %v2057_v59  ;;  %v2069_v4 = vcvt.f32.s32 %v2068_v60  ;;  %v2116_v60 = vshll.u32 %v2115_v1, 16 }
 0x6e2   : > { %2993 = vst.msk [vmem:[%s3824_s17 + $0x50] sm:$0xff] %vm2982_vm1, %v2928_v22  ;;  %v2072_v61 = vadd.s32 %v2071_v52, %v2069_v4 }
 0x6e3   : > { %v2083_v46 = vpop.xlane.xlu0 %2082 }
 0x6e4   : > { %v2929_v51 = vcvt.s32.f32 %v2072_v61  ;;  %v2084_v31 = vcvt.f32.s32 %v2083_v46  ;;  %v2131_v61 = vshll.u32 %v2130_v45, 16  ;;  %v2176_v45 = vshll.u32 %v2175_v40, 16 }
 0x6e6   : > { %2994 = vst.msk [vmem:[%s3824_s17 + $0x58] sm:$0xff] %vm2982_vm1, %v2929_v51  ;;  %v2087_v21 = vadd.s32 %v2086_v41, %v2084_v31  ;;  %v2146_v31 = vshll.u32 %v2145_v27, 16 }
 0x6e7   : > { %v2098_v38 = vpop.xlane.xlu0 %2097 }
 0x6e8   : > { %v2930_v63 = vcvt.s32.f32 %v2087_v21  ;;  %v2099_v23 = vcvt.f32.s32 %v2098_v38 }
 0x6ea   : > { %2995 = vst.msk [vmem:[%s3824_s17 + $0x60] sm:$0xff] %vm2982_vm1, %v2930_v63  ;;  %v2102_v11 = vadd.s32 %v2101_v20, %v2099_v23  ;;  %v2161_v63 = vshll.u32 %v2160_v53, 16 }
 0x6eb   : > { %v2113_v59 = vpop.xlane.xlu0 %2112 }
 0x6ec   : > { %v2931_v52 = vcvt.s32.f32 %v2102_v11  ;;  %v2114_v12 = vcvt.f32.s32 %v2113_v59 }
 0x6ee   : > { %2996 = vst.msk [vmem:[%s3824_s17 + $0x68] sm:$0xff] %vm2982_vm1, %v2931_v52  ;;  %v2117_v22 = vadd.s32 %v2116_v60, %v2114_v12 }
 0x6ef   : > { %v2128_v4 = vpop.xlane.xlu0 %2127 }
 0x6f0   : > { %v2932_v46 = vcvt.s32.f32 %v2117_v22  ;;  %v2129_v41 = vcvt.f32.s32 %v2128_v4 }
 0x6f2   : > { %2997 = vst.msk [vmem:[%s3824_s17 + $0x70] sm:$0xff] %vm2982_vm1, %v2932_v46  ;;  %v2132_v10 = vadd.s32 %v2131_v61, %v2129_v41  ;;  %v2191_v61 = vshll.u32 %v2190_v5, 16 }
 0x6f3   : > { %v2143_v51 = vpop.xlane.xlu0 %2142 }
 0x6f4   : > { %v2933_v21 = vcvt.s32.f32 %v2132_v10  ;;  %v2144_v38 = vcvt.f32.s32 %v2143_v51  ;;  %v2206_v51 = vshll.u32 %v2205_v49, 16 }
 0x6f6   : > { %2998 = vst.msk [vmem:[%s3824_s17 + $0x78] sm:$0xff] %vm2982_vm1, %v2933_v21  ;;  %v2147_v20 = vadd.s32 %v2146_v31, %v2144_v38 }
 0x6f7   : > { %v2158_v1 = vpop.xlane.xlu0 %2157 }
 0x6f8   : > { %v2934_v23 = vcvt.s32.f32 %v2147_v20  ;;  %v2159_v11 = vcvt.f32.s32 %v2158_v1  ;;  %v2221_v20 = vshll.u32 %v2220_v33, 16  ;;  %v2299_v33 = vand.u32 65535, %v6041_v56 }
 0x6fa   : > { %2999 = vst.msk [vmem:[%s3824_s17 + $0x80] sm:$0xff] %vm2982_vm1, %v2934_v23  ;;  %v2162_v59 = vadd.s32 %v2161_v63, %v2159_v11  ;;  %v2236_v11 = vshll.u32 %v2235_v16, 16  ;;  %v2301_v16 = vcvt.s32.f32 %v2299_v33 }
 0x6fb   : > { %v2173_v60 = vpop.xlane.xlu0 %2172 }
 0x6fc   : > { %v2935_v52 = vcvt.s32.f32 %v2162_v59  ;;  %v2174_v12 = vcvt.f32.s32 %v2173_v60 }
 0x6fe   : > { %3000 = vst.msk [vmem:[%s3824_s17 + $0x88] sm:$0xff] %vm2982_vm1, %v2935_v52  ;;  %v2177_v22 = vadd.s32 %v2176_v45, %v2174_v12  ;;  %v2251_v52 = vshll.u32 %v2250_v39, 16  ;;  %v6919_v12 = vld [vmem:[#allocation37_spill] sm:$0xff] }
 0x6ff   : > { %v2188_v4 = vpop.xlane.xlu0 %2187  ;;  %v2265_v28 = vcvt.f32.s32 %v6919_v12 }
 0x700   : > { %v2936_v27 = vcvt.s32.f32 %v2177_v22  ;;  %v2189_v46 = vcvt.f32.s32 %v2188_v4 }
 0x702   : > { %3001 = vst.msk [vmem:[%s3824_s17 + $0x90] sm:$0xff] %vm2982_vm1, %v2936_v27  ;;  %v2192_v41 = vadd.s32 %v2191_v61, %v2189_v46  ;;  %v2266_v27 = vshll.u32 %v2265_v28, 16 }
 0x703   : > { %v2203_v10 = vpop.xlane.xlu0 %2202 }
 0x704   : > { %v2937_v31 = vcvt.s32.f32 %v2192_v41  ;;  %v2204_v53 = vcvt.f32.s32 %v2203_v10 }
 0x706   : > { %3002 = vst.msk [vmem:[%s3824_s17 + $0x98] sm:$0xff] %vm2982_vm1, %v2937_v31  ;;  %v2207_v21 = vadd.s32 %v2206_v51, %v2204_v53  ;;  %v2281_v31 = vshll.u32 %v2280_v13, 16 }
 0x707   : > { %v2218_v38 = vpop.xlane.xlu0 %2217 }
 0x708   : > { %v2938_v1 = vcvt.s32.f32 %v2207_v21  ;;  %v2219_v63 = vcvt.f32.s32 %v2218_v38 }
 0x70a   : > { %3003 = vst.msk [vmem:[%s3824_s17 + $0xa0] sm:$0xff] %vm2982_vm1, %v2938_v1  ;;  %v2222_v40 = vadd.s32 %v2221_v20, %v2219_v63 }
 0x70b   : > { %v2233_v23 = vpop.xlane.xlu0 %2232 }
 0x70c   : > { %v2939_v59 = vcvt.s32.f32 %v2222_v40  ;;  %v2234_v60 = vcvt.f32.s32 %v2233_v23  ;;  %v2331_v40 = vcvt.s32.f32 %v2329_v29  ;;  %v2359_v23 = vand.u32 65535, %v6059_v0 }
 0x70d   : > { %v2419_v0 = vand.u32 65535, %v6079_v37  ;;  %v2479_v37 = vand.u32 65535, %v6099_v58  ;;  %v2539_v58 = vand.u32 65535, %v6119_v2  ;;  %v2599_v2 = vand.u32 65535, %v6139_v48 }
 0x70e   : > { %3004 = vst.msk [vmem:[%s3824_s17 + $0xa8] sm:$0xff] %vm2982_vm1, %v2939_v59  ;;  %v2237_v45 = vadd.s32 %v2236_v11, %v2234_v60  ;;  %v2361_v6 = vcvt.s32.f32 %v2359_v23  ;;  %v2389_v59 = vand.u32 65535, %v6069_v54  ;;  %v2449_v54 = vand.u32 65535, %v6089_v24 }
 0x70f   : > { %v2248_v5 = vpop.xlane.xlu0 %2247  ;;  %v2509_v24 = vand.u32 65535, %v6109_v9  ;;  %v2541_v13 = vcvt.s32.f32 %v2539_v58  ;;  %v2569_v9 = vand.u32 65535, %v6129_v35  ;;  %v2629_v35 = vand.u32 65535, %v6149_v8 }
 0x710   : > { %v2940_v22 = vcvt.s32.f32 %v2237_v45  ;;  %v2249_v4 = vcvt.f32.s32 %v2248_v5  ;;  %v2391_v45 = vcvt.s32.f32 %v2389_v59  ;;  %v2451_v28 = vcvt.s32.f32 %v2449_v54  ;;  %v6923_v59 = vld [vmem:[#allocation39_spill] sm:$0xff] }
 0x711   : > { %v2659_v48 = vand.u32 65535, %v6159_v62  ;;  %v2689_v8 = vand.u32 65535, %v6169_v25  ;;  %v2719_v62 = vand.u32 65535, %v6179_v14 }
 0x712   : > { %3005 = vst.msk [vmem:[%s3824_s17 + $0xb0] sm:$0xff] %vm2982_vm1, %v2940_v22  ;;  %v2252_v61 = vadd.s32 %v2251_v52, %v2249_v4  ;;  %v2421_v52 = vcvt.s32.f32 %v2419_v0  ;;  %v2481_v4 = vcvt.s32.f32 %v2479_v37  ;;  %v6924_v0 = vld [vmem:[#allocation70_spill] sm:$0xff] }
 0x713   : > { %v2263_v49 = vpop.xlane.xlu0 %2262 }
 0x714   : > { %v2941_v46 = vcvt.s32.f32 %v2252_v61  ;;  %v2264_v41 = vcvt.f32.s32 %v2263_v49  ;;  %v2511_v49 = vcvt.s32.f32 %v2509_v24 }
 0x716   : > { %3006 = vst.msk [vmem:[%s3824_s17 + $0xb8] sm:$0xff] %vm2982_vm1, %v2941_v46  ;;  %v2267_v10 = vadd.s32 %v2266_v27, %v2264_v41  ;;  %v2571_v41 = vcvt.s32.f32 %v2569_v9 }
 0x717   : > { %v2278_v51 = vpop.xlane.xlu0 %2277 }
 0x718   : > { %v2942_v53 = vcvt.s32.f32 %v2267_v10  ;;  %v2279_v21 = vcvt.f32.s32 %v2278_v51  ;;  %v2601_v51 = vcvt.s32.f32 %v2599_v2 }
 0x71a   : > { %3007 = vst.msk [vmem:[%s3824_s17 + $0xc0] sm:$0xff] %vm2982_vm1, %v2942_v53  ;;  %v2282_v38 = vadd.s32 %v2281_v31, %v2279_v21  ;;  %v2631_v31 = vcvt.s32.f32 %v2629_v35  ;;  %v2661_v21 = vcvt.s32.f32 %v2659_v48 }
 0x71b   : > { %v6286_v20 = vpop.xlane.xlu0 %2303 }
 0x71c   : > { %v2943_v1 = vcvt.s32.f32 %v2282_v38  ;;  %vm2305_vm4 = vcmp.eq.f32.partialorder %v6053_v44, %v6286_v20  ;;  %v2310_v24 = vcvt.f32.s32 %v6286_v20 }
 0x71d   : > { %v2306_v63 = vsel %vm2305_vm4, %v2301_v16, inf  ;;  %v2691_v16 = vcvt.s32.f32 %v2689_v8 }
 0x71e   : > { %3008 = vst.msk [vmem:[%s3824_s17 + $0xc8] sm:$0xff] %vm2982_vm1, %v2943_v1  ;;  %2307 = vmin.xlane.f32.xlu0 %v2306_v63  ;;  %v2721_v1 = vcvt.s32.f32 %v2719_v62  ;;  %v6920_v63 = vld [vmem:[#allocation43_spill] sm:$0xff] }
 0x71f   : > { %v6293_v56 = vpop.xlane.xlu0 %2333  ;;  %v2749_v25 = vand.u32 65535, %v6920_v63 }
 0x720   : > { %vm2335_vm13 = vcmp.eq.f32.partialorder %v6063_v15, %v6293_v56 }
 0x721   : > { %v2336_v11 = vsel %vm2335_vm13, %v2331_v40, inf  ;;  %v6921_v40 = vld [vmem:[#allocation7_spill] sm:$0xff] }
 0x722   : > { %2337 = vmin.xlane.f32.xlu0 %v2336_v11  ;;  %v2751_v11 = vcvt.s32.f32 %v2749_v25 }
 0x723   : > { %v6298_v39 = vpop.xlane.xlu0 %2363 }
 0x724   : > { %vm2365_vm14 = vcmp.eq.f32.partialorder %v6073_v30, %v6298_v39  ;;  %v2370_v9 = vcvt.f32.s32 %v6298_v39 }
 0x725   : > { %v2366_v44 = vsel %vm2365_vm14, %v2361_v6, inf  ;;  %v6922_v6 = vld [vmem:[#allocation68_spill] sm:$0xff] }
 0x726   : > { %2367 = vmin.xlane.f32.xlu0 %v2366_v44  ;;  %v2779_v14 = vand.u32 65535, %v6922_v6 }
 0x727   : > { %v6303_v60 = vpop.xlane.xlu0 %2393 }
 0x728   : > { %vm2395_vm15 = vcmp.eq.f32.partialorder %v6083_v3, %v6303_v60  ;;  %v2400_v20 = vcvt.f32.s32 %v6303_v60 }
 0x729   : > { %v2396_v15 = vsel %vm2395_vm15, %v2391_v45, inf  ;;  %v2781_v45 = vcvt.s32.f32 %v2779_v14 }
 0x72a   : > { %2397 = vmin.xlane.f32.xlu0 %v2396_v15  ;;  %v2809_v15 = vand.u32 65535, %v6924_v0 }
 0x72b   : > { %v6308_v5 = vpop.xlane.xlu0 %2423 }
 0x72c   : > { %vm2425_vm0 = vcmp.eq.f32.partialorder %v6093_v55, %v6308_v5  ;;  %v2430_v39 = vcvt.f32.s32 %v6308_v5 }
 0x72d   : > { %v2426_v30 = vsel %vm2425_vm0, %v2421_v52, inf }
 0x72e   : > { %2427 = vmin.xlane.f32.xlu0 %v2426_v30  ;;  %v2811_v30 = vcvt.s32.f32 %v2809_v15 }
 0x72f   : > { %v6313_v12 = vpop.xlane.xlu0 %2453 }
 0x730   : > { %vm2455_vm2 = vcmp.eq.f32.partialorder %v6103_v42, %v6313_v12  ;;  %v2460_v60 = vcvt.f32.s32 %v6313_v12 }
 0x731   : > { %v2456_v3 = vsel %vm2455_vm2, %v2451_v28, inf  ;;  %v2839_v28 = vand.u32 65535, %v6216_v43  ;;  %v2340_v43 = vcvt.f32.s32 %v6293_v56 }
 0x732   : > { %2457 = vmin.xlane.f32.xlu0 %v2456_v3  ;;  %v2461_v63 = vshll.u32 %v2460_v60, 16 }
 0x733   : > { %v6318_v22 = vpop.xlane.xlu0 %2483 }
 0x734   : > { %vm2485_vm3 = vcmp.eq.f32.partialorder %v6113_v36, %v6318_v22  ;;  %v2490_v5 = vcvt.f32.s32 %v6318_v22 }
 0x735   : > { %v2486_v55 = vsel %vm2485_vm3, %v2481_v4, inf  ;;  %v2841_v4 = vcvt.s32.f32 %v2839_v28 }
 0x736   : > { %2487 = vmin.xlane.f32.xlu0 %v2486_v55  ;;  %v2491_v6 = vshll.u32 %v2490_v5, 16 }
 0x737   : > { %v6323_v61 = vpop.xlane.xlu0 %2513 }
 0x738   : > { %vm2515_vm5 = vcmp.eq.f32.partialorder %v6123_v32, %v6323_v61  ;;  %v2520_v12 = vcvt.f32.s32 %v6323_v61 }
 0x739   : > { %v2516_v42 = vsel %vm2515_vm5, %v2511_v49, inf  ;;  %v2311_v49 = vshll.u32 %v2310_v24, 16 }
 0x73a   : > { %2517 = vmin.xlane.f32.xlu0 %v2516_v42  ;;  %v2521_v0 = vshll.u32 %v2520_v12, 16 }
 0x73b   : > { %v6328_v27 = vpop.xlane.xlu0 %2543 }
 0x73c   : > { %vm2545_vm6 = vcmp.eq.f32.partialorder %v6133_v50, %v6328_v27  ;;  %v2550_v22 = vcvt.f32.s32 %v6328_v27 }
 0x73d   : > { %v2546_v36 = vsel %vm2545_vm6, %v2541_v13, inf  ;;  %v2341_v13 = vshll.u32 %v2340_v43, 16 }
 0x73e   : > { %2547 = vmin.xlane.f32.xlu0 %v2546_v36 }
 0x73f   : > { %v6333_v46 = vpop.xlane.xlu0 %2573 }
 0x740   : > { %vm2575_vm7 = vcmp.eq.f32.partialorder %v6143_v17, %v6333_v46  ;;  %v2580_v61 = vcvt.f32.s32 %v6333_v46 }
 0x741   : > { %v2576_v32 = vsel %vm2575_vm7, %v2571_v41, inf }
 0x742   : > { %2577 = vmin.xlane.f32.xlu0 %v2576_v32  ;;  %v2371_v32 = vshll.u32 %v2370_v9, 16 }
 0x743   : > { %v6338_v10 = vpop.xlane.xlu0 %2603 }
 0x744   : > { %vm2605_vm8 = vcmp.eq.f32.partialorder %v6153_v34, %v6338_v10  ;;  %v2610_v27 = vcvt.f32.s32 %v6338_v10 }
 0x745   : > { %v2606_v50 = vsel %vm2605_vm8, %v2601_v51, inf }
 0x746   : > { %2607 = vmin.xlane.f32.xlu0 %v2606_v50 }
 0x747   : > { %v6343_v33 = vpop.xlane.xlu0 %2633 }
 0x748   : > { %vm2635_vm9 = vcmp.eq.f32.partialorder %v6163_v19, %v6343_v33  ;;  %v2640_v46 = vcvt.f32.s32 %v6343_v33 }
 0x749   : > { %v2636_v17 = vsel %vm2635_vm9, %v2631_v31, inf  ;;  %v2401_v31 = vshll.u32 %v2400_v20, 16 }
 0x74a   : > { %2637 = vmin.xlane.f32.xlu0 %v2636_v17 }
 0x74b   : > { %v6348_v53 = vpop.xlane.xlu0 %2663 }
 0x74c   : > { %vm2665_vm10 = vcmp.eq.f32.partialorder %v6173_v26, %v6348_v53  ;;  %v2670_v10 = vcvt.f32.s32 %v6348_v53 }
 0x74d   : > { %v2666_v34 = vsel %vm2665_vm10, %v2661_v21, inf }
 0x74e   : > { %2667 = vmin.xlane.f32.xlu0 %v2666_v34  ;;  %v2431_v34 = vshll.u32 %v2430_v39, 16 }
 0x74f   : > { %v6353_v38 = vpop.xlane.xlu0 %2693 }
 0x750   : > { %vm2695_vm11 = vcmp.eq.f32.partialorder %v6183_v7, %v6353_v38  ;;  %v2700_v33 = vcvt.f32.s32 %v6353_v38 }
 0x751   : > { %v2696_v19 = vsel %vm2695_vm11, %v2691_v16, inf }
 0x752   : > { %2697 = vmin.xlane.f32.xlu0 %v2696_v19 }
 0x753   : > { %v6358_v29 = vpop.xlane.xlu0 %2723 }
 0x754   : > { %vm2725_vm12 = vcmp.eq.f32.partialorder %v6921_v40, %v6358_v29  ;;  %v2730_v53 = vcvt.f32.s32 %v6358_v29 }
 0x755   : > { %v2726_v26 = vsel %vm2725_vm12, %v2721_v1, inf }
 0x756   : > { %2727 = vmin.xlane.f32.xlu0 %v2726_v26 }
 0x757   : > { %v6363_v23 = vpop.xlane.xlu0 %2753 }
 0x758   : > { %vm2755_vm4 = vcmp.eq.f32.partialorder %v6923_v59, %v6363_v23  ;;  %v2760_v38 = vcvt.f32.s32 %v6363_v23 }
 0x759   : > { %v2756_v7 = vsel %vm2755_vm4, %v2751_v11, inf }
 0x75a   : > { %2757 = vmin.xlane.f32.xlu0 %v2756_v7  ;;  %v2761_v5 = vshll.u32 %v2760_v38, 16 }
 0x75b   : > { %v6368_v44 = vpop.xlane.xlu0 %2783 }
 0x75c   : > { %vm2785_vm13 = vcmp.eq.f32.partialorder %v6219_v47, %v6368_v44  ;;  %v2790_v29 = vcvt.f32.s32 %v6368_v44 }
 0x75d   : > { %v2786_v52 = vsel %vm2785_vm13, %v2781_v45, inf }
 0x75e   : > { %2787 = vmin.xlane.f32.xlu0 %v2786_v52 }
 0x75f   : > { %v6373_v54 = vpop.xlane.xlu0 %2813 }
 0x760   : > { %vm2815_vm14 = vcmp.eq.f32.partialorder %v6222_v57, %v6373_v54  ;;  %v2820_v23 = vcvt.f32.s32 %v6373_v54 }
 0x761   : > { %v2816_v37 = vsel %vm2815_vm14, %v2811_v30, inf }
 0x762   : > { %2817 = vmin.xlane.f32.xlu0 %v2816_v37  ;;  %v2551_v37 = vshll.u32 %v2550_v22, 16 }
 0x763   : > { %v6378_v3 = vpop.xlane.xlu0 %2843 }
 0x764   : > { %vm2845_vm15 = vcmp.eq.f32.partialorder %v6229_v18, %v6378_v3  ;;  %v2850_v44 = vcvt.f32.s32 %v6378_v3 }
 0x765   : > { %v2846_v47 = vsel %vm2845_vm15, %v2841_v4, inf }
 0x766   : > { %2847 = vmin.xlane.f32.xlu0 %v2846_v47 }
 0x7ab   : > { %v2308_v55 = vpop.xlane.xlu0 %2307 }
 0x7ac   : > { %v2309_v58 = vcvt.f32.s32 %v2308_v55 }
 0x7ae   : > { %v2312_v57 = vadd.s32 %v2311_v49, %v2309_v58  ;;  %v2581_v49 = vshll.u32 %v2580_v61, 16 }
 0x7af   : > { %v2338_v42 = vpop.xlane.xlu0 %2337 }
 0x7b0   : > { %v2945_v36 = vcvt.s32.f32 %v2312_v57  ;;  %v2339_v41 = vcvt.f32.s32 %v2338_v42 }
 0x7b2   : > { %3010 = vst.msk [vmem:[%s3824_s17 + $0xd8] sm:$0xff] %vm2982_vm1, %v2945_v36  ;;  %v2342_v18 = vadd.s32 %v2341_v13, %v2339_v41  ;;  %v2611_v13 = vshll.u32 %v2610_v27, 16 }
 0x7b3   : > { %v2368_v2 = vpop.xlane.xlu0 %2367 }
 0x7b4   : > { %v2947_v51 = vcvt.s32.f32 %v2342_v18  ;;  %v2369_v35 = vcvt.f32.s32 %v2368_v2  ;;  %v2641_v2 = vshll.u32 %v2640_v46, 16 }
 0x7b6   : > { %3012 = vst.msk [vmem:[%s3824_s17 + $0xe8] sm:$0xff] %vm2982_vm1, %v2947_v51  ;;  %v2372_v56 = vadd.s32 %v2371_v32, %v2369_v35 }
 0x7b7   : > { %v2398_v50 = vpop.xlane.xlu0 %2397 }
 0x7b8   : > { %v2949_v48 = vcvt.s32.f32 %v2372_v56  ;;  %v2399_v17 = vcvt.f32.s32 %v2398_v50  ;;  %v2671_v56 = vshll.u32 %v2670_v10, 16 }
 0x7ba   : > { %3014 = vst.msk [vmem:[%s3824_s17 + $0xf8] sm:$0xff] %vm2982_vm1, %v2949_v48  ;;  %v2402_v21 = vadd.s32 %v2401_v31, %v2399_v17  ;;  %v2701_v17 = vshll.u32 %v2700_v33, 16 }
 0x7bb   : > { %v2428_v8 = vpop.xlane.xlu0 %2427 }
 0x7bc   : > { %v2951_v16 = vcvt.s32.f32 %v2402_v21  ;;  %v2429_v62 = vcvt.f32.s32 %v2428_v8 }
 0x7be   : > { %3016 = vst.msk [vmem:[%s3824_s17 + $0x108] sm:$0xff] %vm2982_vm1, %v2951_v16  ;;  %v2432_v19 = vadd.s32 %v2431_v34, %v2429_v62  ;;  %v2731_v16 = vshll.u32 %v2730_v53, 16 }
 0x7bf   : > { %v2458_v1 = vpop.xlane.xlu0 %2457 }
 0x7c0   : > { %v2953_v25 = vcvt.s32.f32 %v2432_v19  ;;  %v2459_v40 = vcvt.f32.s32 %v2458_v1 }
 0x7c2   : > { %3018 = vst.msk [vmem:[%s3824_s17 + $0x118] sm:$0xff] %vm2982_vm1, %v2953_v25  ;;  %v2462_v26 = vadd.s32 %v2461_v63, %v2459_v40 }
 0x7c3   : > { %v2488_v11 = vpop.xlane.xlu0 %2487 }
 0x7c4   : > { %v2955_v14 = vcvt.s32.f32 %v2462_v26  ;;  %v2489_v59 = vcvt.f32.s32 %v2488_v11 }
 0x7c6   : > { %3020 = vst.msk [vmem:[%s3824_s17 + $0x128] sm:$0xff] %vm2982_vm1, %v2955_v14  ;;  %v2492_v7 = vadd.s32 %v2491_v6, %v2489_v59  ;;  %v2791_v6 = vshll.u32 %v2790_v29, 16 }
 0x7c7   : > { %v2518_v45 = vpop.xlane.xlu0 %2517 }
 0x7c8   : > { %v2957_v15 = vcvt.s32.f32 %v2492_v7  ;;  %v2519_v52 = vcvt.f32.s32 %v2518_v45  ;;  %v2821_v45 = vshll.u32 %v2820_v23, 16 }
 0x7ca   : > { %3022 = vst.msk [vmem:[%s3824_s17 + $0x138] sm:$0xff] %vm2982_vm1, %v2957_v15  ;;  %v2522_v30 = vadd.s32 %v2521_v0, %v2519_v52 }
 0x7cb   : > { %v2548_v28 = vpop.xlane.xlu0 %2547 }
 0x7cc   : > { %v2959_v4 = vcvt.s32.f32 %v2522_v30  ;;  %v2549_v47 = vcvt.f32.s32 %v2548_v28  ;;  %v2851_v30 = vshll.u32 %v2850_v44, 16 }
 0x7ce   : > { %3024 = vst.msk [vmem:[%s3824_s17 + $0x148] sm:$0xff] %vm2982_vm1, %v2959_v4  ;;  %v2552_v24 = vadd.s32 %v2551_v37, %v2549_v47 }
 0x7cf   : > { %v2578_v55 = vpop.xlane.xlu0 %2577 }
 0x7d0   : > { %v2961_v43 = vcvt.s32.f32 %v2552_v24  ;;  %v2579_v58 = vcvt.f32.s32 %v2578_v55 }
 0x7d2   : > { %3026 = vst.msk [vmem:[%s3824_s17 + $0x158] sm:$0xff] %vm2982_vm1, %v2961_v43  ;;  %v2582_v57 = vadd.s32 %v2581_v49, %v2579_v58 }
 0x7d3   : > { %v2608_v42 = vpop.xlane.xlu0 %2607 }
 0x7d4   : > { %v2963_v9 = vcvt.s32.f32 %v2582_v57  ;;  %v2609_v36 = vcvt.f32.s32 %v2608_v42 }
 0x7d6   : > { %3028 = vst.msk [vmem:[%s3824_s17 + $0x168] sm:$0xff] %vm2982_vm1, %v2963_v9  ;;  %v2612_v41 = vadd.s32 %v2611_v13, %v2609_v36 }
 0x7d7   : > { %v2638_v18 = vpop.xlane.xlu0 %2637 }
 0x7d8   : > { %v2965_v32 = vcvt.s32.f32 %v2612_v41  ;;  %v2639_v20 = vcvt.f32.s32 %v2638_v18 }
 0x7da   : > { %3030 = vst.msk [vmem:[%s3824_s17 + $0x178] sm:$0xff] %vm2982_vm1, %v2965_v32  ;;  %v2642_v51 = vadd.s32 %v2641_v2, %v2639_v20 }
 0x7db   : > { %v2668_v35 = vpop.xlane.xlu0 %2667 }
 0x7dc   : > { %v2967_v50 = vcvt.s32.f32 %v2642_v51  ;;  %v2669_v31 = vcvt.f32.s32 %v2668_v35 }
 0x7de   : > { %3032 = vst.msk [vmem:[%s3824_s17 + $0x188] sm:$0xff] %vm2982_vm1, %v2967_v50  ;;  %v2672_v39 = vadd.s32 %v2671_v56, %v2669_v31 }
 0x7df   : > { %v2698_v48 = vpop.xlane.xlu0 %2697 }
 0x7e0   : > { %v2969_v21 = vcvt.s32.f32 %v2672_v39  ;;  %v2699_v8 = vcvt.f32.s32 %v2698_v48 }
 0x7e2   : > { %3034 = vst.msk [vmem:[%s3824_s17 + $0x198] sm:$0xff] %vm2982_vm1, %v2969_v21  ;;  %v2702_v34 = vadd.s32 %v2701_v17, %v2699_v8 }
 0x7e3   : > { %v2728_v60 = vpop.xlane.xlu0 %2727 }
 0x7e4   : > { %v2971_v62 = vcvt.s32.f32 %v2702_v34  ;;  %v2729_v19 = vcvt.f32.s32 %v2728_v60 }
 0x7e6   : > { %3036 = vst.msk [vmem:[%s3824_s17 + $0x1a8] sm:$0xff] %vm2982_vm1, %v2971_v62  ;;  %v2732_v1 = vadd.s32 %v2731_v16, %v2729_v19 }
 0x7e7   : > { %v2758_v63 = vpop.xlane.xlu0 %2757 }
 0x7e8   : > { %v2973_v25 = vcvt.s32.f32 %v2732_v1  ;;  %v2759_v40 = vcvt.f32.s32 %v2758_v63 }
 0x7ea   : > { %3038 = vst.msk [vmem:[%s3824_s17 + $0x1b8] sm:$0xff] %vm2982_vm1, %v2973_v25  ;;  %v2762_v26 = vadd.s32 %v2761_v5, %v2759_v40 }
 0x7eb   : > { %v2788_v11 = vpop.xlane.xlu0 %2787 }
 0x7ec   : > { %v2975_v12 = vcvt.s32.f32 %v2762_v26  ;;  %v2789_v14 = vcvt.f32.s32 %v2788_v11 }
 0x7ee   : > { %3040 = vst.msk [vmem:[%s3824_s17 + $0x1c8] sm:$0xff] %vm2982_vm1, %v2975_v12  ;;  %v2792_v59 = vadd.s32 %v2791_v6, %v2789_v14 }
 0x7ef   : > { %v2818_v7 = vpop.xlane.xlu0 %2817 }
 0x7f0   : > { %v2977_v0 = vcvt.s32.f32 %v2792_v59  ;;  %v2819_v22 = vcvt.f32.s32 %v2818_v7 }
 0x7f2   : > { %3042 = vst.msk [vmem:[%s3824_s17 + $0x1d8] sm:$0xff] %vm2982_vm1, %v2977_v0  ;;  %v2822_v15 = vadd.s32 %v2821_v45, %v2819_v22 }
 0x7f3   : > { %v2848_v52 = vpop.xlane.xlu0 %2847 }
 0x7f4   : > { %v2979_v28 = vcvt.s32.f32 %v2822_v15  ;;  %v2849_v54 = vcvt.f32.s32 %v2848_v52 }
 0x7f6   : > { %3044 = vst.msk [vmem:[%s3824_s17 + $0x1e8] sm:$0xff] %vm2982_vm1, %v2979_v28  ;;  %v2852_v37 = vadd.s32 %v2851_v30, %v2849_v54 }
 0x7f8   : > { %v2981_v61 = vcvt.s32.f32 %v2852_v37 }
 0x7fa   : > { %3046 = vst.msk [vmem:[%s3824_s17 + $0x1f8] sm:$0xff] %vm2982_vm1, %v2981_v61 }
 0x7fb PF: > { %s11_s8 = sadd.s32 1, %s3263_s8   ;;  %s6925_s6 = smov %s3259_s7 }
 0x7fc   : > { %p8_p5 = scmp.ge.s32.totalorder %s11_s8, 4   ;;  %s6926_s7 = smov %s6928_s9 }
 0x7fe   :  { %10 = sbr.rel (!%p8_p5) target bundleno = 2 (0x2), region = 54 }

// kernel: end2end_forward.3
= control target key start
LH: loop header
LB: loop body
LE: loop exit
PB: predicated region body
PF: predicated region fallthrough
CT: control target
= control target key end

     0   :  { %s2216_s15 = smov 0   ;;  %s4542_s0 = inlined_call_operand.vmem [shape: f32[2,56,32], index: 0, kind: input, shape index: {}]   ;;  %s4543_s1 = inlined_call_operand.vmem [shape: f32[2,32,1024], index: 1, kind: input, shape index: {}]   ;;  %s4544_s2 = inlined_call_operand.vmem [shape: f32[2,56,4], index: 2, kind: input, shape index: {}]   ;;  %s4545_s3 = inlined_call_operand.vmem [shape: f32[2,1024], index: 3, kind: input, shape index: {}]   ;;  %s4546_s4 = inlined_call_operand.vmem [shape: f32[2,56,1024], index: 4, kind: output, shape index: {}]  }
   0x1 LB: > { %s1857_s16 = sadd.s32 4294967295, %s2184_s15   ;;  %p1861_p0 = scmp.ge.s32.totalorder %s2184_s15, 1  ;;  %s2184_s15 = sphi %s2216_s15, %s14_s15  }
   0x2   : > { %p182_p1 = scmp.lt.s32.totalorder %s2184_s15, 3 }
   0x4   : > { %p183_p2 = pnand %p1861_p0, %p182_p1 }
   0x6   : > { %186 = sbr.rel (%p183_p2) target bundleno = 427 (0x1ab), region = 36 }
   0xd   : > { %p218_p3 = scmp.lt.s32.totalorder %s1857_s16, 1  ;;  %v2186_v0 = vmov 0.0   ;;  %v2187_v1 = vmov 0   ;;  %vm277_vm0 = vcmask 261120   ;;  %v2188_v62 = vmov 2  }
   0xe   : > { %363 = vmatprep.mubr.f32.mxu0 %v2186_v0  ;;  %470 = vmatprep.mubr.f32.mxu1 %v2186_v0 }
   0xf   : > { %s5175_s16 = smov (!%p218_p3, %s1857_s16), 1  ;;  %1947 = vset.pattern.permute.xlu1 %v2187_v1  ;;  %1946 = vset.pattern.permute.xlu0 %v2187_v1 }
  0x10   : > { %s1898_s17 = sshll.u32 %s5175_s16, 8  ;;  %s1931_s21 = smul.u32 56, %s5175_s16 }
  0x11   : > { %s2232_s20 = scalar_lea.vmem %s4543_s1, %s1898_s17  ;;  %s1932_s6 = smul.u32 448, %s5175_s16 }
  0x12   : > { %v246_v2 = vld [vmem:[%s2232_s20 + $0x8] sm:$0xff]  ;;  %v248_v4 = vld [vmem:[%s2232_s20 + $0x18] sm:$0xff]  ;;  %v245_v7 = vld [vmem:[%s2232_s20] sm:$0xff]  ;;  %s2256_s24 = scalar_lea.vmem %s4542_s0, %s1931_s21  ;;  %s2289_s27 = scalar_lea.vmem %s4544_s2, %s1931_s21 }
  0x13   : > { %v254_v3 = vld [vmem:[%s2232_s20 + $0x48] sm:$0xff]  ;;  %v256_v6 = vld [vmem:[%s2232_s20 + $0x58] sm:$0xff]  ;;  %v253_v8 = vld [vmem:[%s2232_s20 + $0x40] sm:$0xff]  ;;  %s3115_s9 = scalar_lea.vmem %s4546_s4, %s1932_s6 }
  0x14   : > { %v1899_v5 = vpack.c.bf16 %v254_v3, %v246_v2  ;;  %v1907_v9 = vpack.c.bf16 %v256_v6, %v248_v4  ;;  %v1901_v10 = vpack.c.bf16 %v253_v8, %v245_v7  ;;  %v247_v11 = vld [vmem:[%s2232_s20 + $0x10] sm:$0xff]  ;;  %v262_v13 = vld [vmem:[%s2232_s20 + $0x88] sm:$0xff]  ;;  %v264_v16 = vld [vmem:[%s2232_s20 + $0x98] sm:$0xff]  ;;  %v2189_v2 = vmov 1  }
  0x15   : > { %v255_v12 = vld [vmem:[%s2232_s20 + $0x50] sm:$0xff]  ;;  %v270_v15 = vld [vmem:[%s2232_s20 + $0xc8] sm:$0xff]  ;;  %v272_v17 = vld [vmem:[%s2232_s20 + $0xd8] sm:$0xff]  ;;  %v2190_v3 = vmov 3  }
  0x16   : > { %1900 = vmatprep.subr.bf16.mxu0 %v1899_v5  ;;  %v1909_v14 = vpack.c.bf16 %v255_v12, %v247_v11  ;;  %1908 = vmatprep.subr.bf16.mxu1 %v1907_v9  ;;  %v1903_v18 = vpack.c.bf16 %v270_v15, %v262_v13  ;;  %v1911_v19 = vpack.c.bf16 %v272_v17, %v264_v16  ;;  %v261_v20 = vld [vmem:[%s2232_s20 + $0x80] sm:$0xff]  ;;  %v263_v22 = vld [vmem:[%s2232_s20 + $0x90] sm:$0xff]  ;;  %v250_v25 = vld [vmem:[%s2232_s20 + $0x28] sm:$0xff] }
  0x17   : > { %1902 = vmatpush1.bf16.msra.mxu0 %v1901_v10  ;;  %v269_v21 = vld [vmem:[%s2232_s20 + $0xc0] sm:$0xff]  ;;  %v271_v24 = vld [vmem:[%s2232_s20 + $0xd0] sm:$0xff]  ;;  %v258_v27 = vld [vmem:[%s2232_s20 + $0x68] sm:$0xff] }
  0x18   : > { %1910 = vmatpush1.bf16.msra.mxu1 %v1909_v14  ;;  %v1905_v23 = vpack.c.bf16 %v269_v21, %v261_v20  ;;  %1904 = vmatprep.subr.bf16.mxu0 %v1903_v18  ;;  %v1913_v26 = vpack.c.bf16 %v271_v24, %v263_v22  ;;  %v252_v28 = vld [vmem:[%s2232_s20 + $0x38] sm:$0xff]  ;;  %v1915_v30 = vpack.c.bf16 %v258_v27, %v250_v25  ;;  %v249_v32 = vld [vmem:[%s2232_s20 + $0x20] sm:$0xff]  ;;  %v251_v34 = vld [vmem:[%s2232_s20 + $0x30] sm:$0xff]  ;;  %v1074_v14 = vlaneseq }
  0x19   : > { %1912 = vmatprep.subr.bf16.mxu1 %v1911_v19  ;;  %v260_v29 = vld [vmem:[%s2232_s20 + $0x78] sm:$0xff]  ;;  %v257_v33 = vld [vmem:[%s2232_s20 + $0x60] sm:$0xff]  ;;  %v259_v37 = vld [vmem:[%s2232_s20 + $0x70] sm:$0xff] }
  0x1a   : > { %v1923_v31 = vpack.c.bf16 %v260_v29, %v252_v28  ;;  %v2266_v35 = vld [vmem:[%s2256_s24] sm:$0xff]  ;;  %v1917_v36 = vpack.c.bf16 %v257_v33, %v249_v32  ;;  %v1925_v38 = vpack.c.bf16 %v259_v37, %v251_v34  ;;  %v266_v39 = vld [vmem:[%s2232_s20 + $0xa8] sm:$0xff]  ;;  %v268_v42 = vld [vmem:[%s2232_s20 + $0xb8] sm:$0xff]  ;;  %v1075_v15 = vshrl.u32 %v1074_v14, 7 }
  0x1b   : > { %1906 = vmatpush1.bf16.msra.mxu0 %v1905_v23  ;;  %v274_v40 = vld [vmem:[%s2232_s20 + $0xe8] sm:$0xff]  ;;  %v276_v43 = vld [vmem:[%s2232_s20 + $0xf8] sm:$0xff]  ;;  %v265_v44 = vld [vmem:[%s2232_s20 + $0xa0] sm:$0xff] }
  0x1c   : > { %1914 = vmatpush1.bf16.msra.mxu1 %v1913_v26  ;;  %1916 = vmatprep.subr.bf16.mxu0 %v1915_v30  ;;  %v1919_v41 = vpack.c.bf16 %v274_v40, %v266_v39  ;;  %v1927_v45 = vpack.c.bf16 %v276_v43, %v268_v42  ;;  %v273_v46 = vld [vmem:[%s2232_s20 + $0xe0] sm:$0xff]  ;;  %v267_v47 = vld [vmem:[%s2232_s20 + $0xb0] sm:$0xff]  ;;  %v2282_v49 = vld [vmem:[%s2256_s24 + $0x8] sm:$0xff]  ;;  %v1092_v18 = vsub.s32 4, %v1075_v15  ;;  %v1096_v20 = vsub.s32 5, %v1075_v15 }
  0x1d   : > { %1924 = vmatprep.subr.bf16.mxu1 %v1923_v31  ;;  %v275_v48 = vld [vmem:[%s2232_s20 + $0xf0] sm:$0xff]  ;;  %v1921_v50 = vpack.c.bf16 %v273_v46, %v265_v44  ;;  %v2305_v54 = vld [vmem:[%s2289_s27] sm:$0xff]  ;;  %v2309_v55 = vld [vmem:[%s2289_s27 + $0x18] sm:$0xff]  ;;  %v1100_v21 = vsub.s32 6, %v1075_v15  ;;  %v1104_v24 = vsub.s32 7, %v1075_v15  ;;  %v1076_v27 = vsub.s32 0, %v1075_v15 }
  0x1e   : > { %1867 = vmatmul.mubr.msk.f32.vlgmr.msra.gmra.mrb[0].mxu0 %vm277_vm0, %v2266_v35  ;;  %v1929_v51 = vpack.c.bf16 %v275_v48, %v267_v47  ;;  %v2296_v52 = vld [vmem:[%s2289_s27 + $0x10] sm:$0xff]  ;;  %1116 = vperm.xlu0 %1946, %v2305_v54   ;;  %v241_v56 = vld [vmem:[%s2256_s24 + $0x18] sm:$0xff]  ;;  %v2316_v57 = vld [vmem:[%s2289_s27 + $0x8] sm:$0xff]  ;;  %v1080_v29 = vsub.s32 1, %v1075_v15  ;;  %v1084_v31 = vsub.s32 2, %v1075_v15  ;;  %v1088_v32 = vsub.s32 3, %v1075_v15 }
  0x1f   : > { %1874 = vmatmul.mubr.msk.f32.vlgmr.msra.gmra.mrb[0].mxu1 %vm277_vm0, %v2266_v35  ;;  %1918 = vmatpush1.bf16.msra.mxu0 %v1917_v36  ;;  %v240_v53 = vld [vmem:[%s2256_s24 + $0x10] sm:$0xff]  ;;  %v2322_v58 = vld [vmem:[%s2289_s27 + $0x28] sm:$0xff]  ;;  %v242_v59 = vld [vmem:[%s2256_s24 + $0x20] sm:$0xff] }
  0x20   : > { %1926 = vmatpush1.bf16.msra.mxu1 %v1925_v38  ;;  %369 = vmatprep.mubr.f32.mxu0 %v2186_v0  ;;  %v2329_v60 = vld [vmem:[%s2289_s27 + $0x20] sm:$0xff]  ;;  %v243_v61 = vld [vmem:[%s2256_s24 + $0x28] sm:$0xff]  ;;  %v1069_v63 = vld [vmem:[%s2289_s27 + $0x30] sm:$0xff] }
  0x21   : > { %476 = vmatprep.mubr.f32.mxu1 %v2186_v0  ;;  %1920 = vmatprep.subr.bf16.mxu0 %v1919_v41  ;;  %v244_v1 = vld [vmem:[%s2256_s24 + $0x30] sm:$0xff]  ;;  %v1070_v19 = vld [vmem:[%s4545_s3] ss:$2 sm:$0xff]  ;;  %v1895_v33 = vld [vmem:[%s4545_s3 + $0x1] ss:$2 sm:$0xff] }
  0x22   : > { %1868 = vmatmul.mubr.msk.f32.gmra.mrb[2].mxu0 %vm277_vm0, %v2282_v49  ;;  %1928 = vmatprep.subr.bf16.mxu1 %v1927_v45  ;;  %v2430_v25 = vrot.slane %v1070_v19, %v1092_v18  ;;  %v2432_v26 = vrot.slane %v1070_v19, %v1096_v20  ;;  %v2434_v28 = vrot.slane %v1070_v19, %v1100_v21 }
  0x23   : > { %1875 = vmatmul.mubr.msk.f32.gmra.mrb[2].mxu1 %vm277_vm0, %v2282_v49  ;;  %375 = vmatprep.mubr.f32.mxu0 %v2186_v0  ;;  %v2436_v30 = vrot.slane %v1070_v19, %v1104_v24  ;;  %v2453_v36 = vrot.slane %v1070_v19, %v1076_v27  ;;  %v2459_v37 = vrot.slane %v1070_v19, %v1080_v29 }
  0x24   : > { %482 = vmatprep.mubr.f32.mxu1 %v2186_v0  ;;  %1922 = vmatpush1.bf16.msra.mxu0 %v1921_v50  ;;  %4609 = vst [vmem:[#allocation11_spill] sm:$0xff] %v2430_v25  ;;  %4610 = vst [vmem:[#allocation12_spill] sm:$0xff] %v2432_v26  ;;  %v2469_v39 = vrot.slane %v1070_v19, %v1084_v31  ;;  %v2471_v40 = vrot.slane %v1070_v19, %v1088_v32 }
  0x25   : > { %1930 = vmatpush1.bf16.msra.mxu1 %v1929_v51  ;;  %1126 = vperm.xlu1 %1947, %v2296_v52   ;;  %v2477_v42 = vrot.slane %v1895_v33, %v1092_v18  ;;  %v2479_v43 = vrot.slane %v1895_v33, %v1076_v27  ;;  %v2481_v44 = vrot.slane %v1895_v33, %v1080_v29 }
  0x26   : > { %1869 = vmatmul.mubr.msk.f32.gmra.mrb[4].mxu0 %vm277_vm0, %v240_v53  ;;  %1121 = vperm.xlu0 %1946, %v2316_v57   ;;  %v2483_v45 = vrot.slane %v1895_v33, %v1084_v31  ;;  %v2489_v47 = vrot.slane %v1895_v33, %v1096_v20  ;;  %v2493_v48 = vrot.slane %v1895_v33, %v1088_v32  ;;  %v4641_v32 = vmov 0 }
  0x27   : > { %1876 = vmatmul.mubr.msk.f32.gmra.mrb[4].mxu1 %vm277_vm0, %v240_v53  ;;  %381 = vmatprep.mubr.f32.mxu0 %v2186_v0  ;;  %4615 = vst [vmem:[#allocation13_spill] sm:$0xff] %v2477_v42  ;;  %v2499_v50 = vrot.slane %v1895_v33, %v1100_v21  ;;  %v2501_v51 = vrot.slane %v1895_v33, %v1104_v24  ;;  %v4637_v21 = vmov 0 }
  0x28   : > { %488 = vmatprep.mubr.f32.mxu1 %v2186_v0 }
  0x29   : > { %1131 = vperm.xlu1 %1947, %v2309_v55   ;;  %4620 = vst [vmem:[#allocation14_spill] sm:$0xff] %v2499_v50 }
  0x2a   : > { %1870 = vmatmul.mubr.msk.f32.gmra.mrb[6].mxu0 %vm277_vm0, %v241_v56  ;;  %1136 = vperm.xlu0 %1946, %v2329_v60  }
  0x2b   : > { %1877 = vmatmul.mubr.msk.f32.gmra.mrb[6].mxu1 %vm277_vm0, %v241_v56  ;;  %387 = vmatprep.mubr.f32.mxu0 %v2186_v0 }
  0x2c   : > { %494 = vmatprep.mubr.f32.mxu1 %v2186_v0 }
  0x2d   : > { %1141 = vperm.xlu1 %1947, %v2322_v58  }
  0x2e   : > { %1871 = vmatmul.mubr.msk.f32.gmra.mrb[8].mxu0 %vm277_vm0, %v242_v59  ;;  %1146 = vperm.xlu0 %1946, %v1069_v63  }
  0x2f   : > { %1878 = vmatmul.mubr.msk.f32.gmra.mrb[8].mxu1 %vm277_vm0, %v242_v59  ;;  %393 = vmatprep.mubr.f32.mxu0 %v2186_v0 }
  0x30   : > { %500 = vmatprep.mubr.f32.mxu1 %v2186_v0 }
  0x31   : > { %1948 = vset.pattern.permute.xlu1 %v2188_v62 }
  0x32   : > { %1872 = vmatmul.mubr.msk.f32.gmra.mrb[10].mxu0 %vm277_vm0, %v243_v61  ;;  %1206 = vperm.xlu1 %1948, %v2305_v54  }
  0x33   : > { %1879 = vmatmul.mubr.msk.f32.gmra.mrb[10].mxu1 %vm277_vm0, %v243_v61  ;;  %399 = vmatprep.mubr.f32.mxu0 %v2186_v0 }
  0x34   : > { %506 = vmatprep.mubr.f32.mxu1 %v2186_v0  ;;  %1949 = vset.pattern.permute.xlu0 %v2188_v62  ;;  %v4625_v62 = vmov 0 }
  0x35   : > { %1210 = vperm.xlu0 %1949, %v2316_v57  }
  0x36   : > { %1873 = vmatmul.mubr.msk.f32.gmra.mrb[12].mxu0 %vm277_vm0, %v244_v1  ;;  %1214 = vperm.xlu1 %1948, %v2296_v52  }
  0x37   : > { %1880 = vmatmul.mubr.msk.f32.gmra.mrb[12].mxu1 %vm277_vm0, %v244_v1  ;;  %577 = vmatprep.mubr.f32.mxu0 %v2186_v0 }
  0x38   : > { %684 = vmatprep.mubr.f32.mxu1 %v2186_v0 }
  0x39   : > { %1222 = vperm.xlu0 %1949, %v2329_v60  }
  0x3a   : > { %1881 = vmatmul.mubr.msk.f32.vlgmr.msra.gmra.mrb[14].mxu0 %vm277_vm0, %v2266_v35  ;;  %1218 = vperm.xlu1 %1948, %v2309_v55  }
  0x3b   : > { %1888 = vmatmul.mubr.msk.f32.vlgmr.msra.gmra.mrb[14].mxu1 %vm277_vm0, %v2266_v35  ;;  %583 = vmatprep.mubr.f32.mxu0 %v2186_v0 }
  0x3c   : > { %690 = vmatprep.mubr.f32.mxu1 %v2186_v0 }
  0x3d   : > { %1230 = vperm.xlu0 %1949, %v1069_v63  }
  0x3e   : > { %1882 = vmatmul.mubr.msk.f32.gmra.mrb[16].mxu0 %vm277_vm0, %v2282_v49  ;;  %1226 = vperm.xlu1 %1948, %v2322_v58  }
  0x3f   : > { %1889 = vmatmul.mubr.msk.f32.gmra.mrb[16].mxu1 %vm277_vm0, %v2282_v49  ;;  %589 = vmatprep.mubr.f32.mxu0 %v2186_v0  ;;  %v4756_v49 = vmov 0 }
  0x40   : > { %696 = vmatprep.mubr.f32.mxu1 %v2186_v0 }
  0x41   : > { %1951 = vset.pattern.permute.xlu0 %v2189_v2 }
  0x42   : > { %1883 = vmatmul.mubr.msk.f32.gmra.mrb[18].mxu0 %vm277_vm0, %v240_v53  ;;  %1950 = vset.pattern.permute.xlu1 %v2189_v2 }
  0x43   : > { %1890 = vmatmul.mubr.msk.f32.gmra.mrb[18].mxu1 %vm277_vm0, %v240_v53  ;;  %595 = vmatprep.mubr.f32.mxu0 %v2186_v0 }
  0x44   : > { %702 = vmatprep.mubr.f32.mxu1 %v2186_v0  ;;  %1387 = vperm.xlu1 %1950, %v2305_v54  }
  0x45   : > { %1391 = vperm.xlu0 %1951, %v2316_v57  }
  0x46   : > { %1884 = vmatmul.mubr.msk.f32.gmra.mrb[20].mxu0 %vm277_vm0, %v241_v56 }
  0x47   : > { %1891 = vmatmul.mubr.msk.f32.gmra.mrb[20].mxu1 %vm277_vm0, %v241_v56  ;;  %601 = vmatprep.mubr.f32.mxu0 %v2186_v0 }
  0x48   : > { %708 = vmatprep.mubr.f32.mxu1 %v2186_v0  ;;  %1395 = vperm.xlu1 %1950, %v2296_v52  }
  0x49   : > { %1403 = vperm.xlu0 %1951, %v2329_v60  }
  0x4a   : > { %1885 = vmatmul.mubr.msk.f32.gmra.mrb[22].mxu0 %vm277_vm0, %v242_v59 }
  0x4b   : > { %1892 = vmatmul.mubr.msk.f32.gmra.mrb[22].mxu1 %vm277_vm0, %v242_v59  ;;  %607 = vmatprep.mubr.f32.mxu0 %v2186_v0 }
  0x4c   : > { %714 = vmatprep.mubr.f32.mxu1 %v2186_v0  ;;  %1399 = vperm.xlu1 %1950, %v2309_v55  }
  0x4d   : > { %1411 = vperm.xlu0 %1951, %v1069_v63  }
  0x4e   : > { %1886 = vmatmul.mubr.msk.f32.gmra.mrb[24].mxu0 %vm277_vm0, %v243_v61 }
  0x4f   : > { %1893 = vmatmul.mubr.msk.f32.gmra.mrb[24].mxu1 %vm277_vm0, %v243_v61  ;;  %613 = vmatprep.mubr.f32.mxu0 %v2186_v0 }
  0x50   : > { %720 = vmatprep.mubr.f32.mxu1 %v2186_v0  ;;  %1407 = vperm.xlu1 %1950, %v2322_v58  }
  0x51   : > { %1953 = vset.pattern.permute.xlu0 %v2190_v3 }
  0x52   : > { %1887 = vmatmul.mubr.msk.f32.gmra.mrb[26].mxu0 %vm277_vm0, %v244_v1  ;;  %1531 = vperm.xlu0 %1953, %v2316_v57  }
  0x53   : > { %1894 = vmatmul.mubr.msk.f32.gmra.mrb[26].mxu1 %vm277_vm0, %v244_v1 }
  0x54   : > { %1952 = vset.pattern.permute.xlu1 %v2190_v3  ;;  %v4630_v3 = vmov 0 }
  0x55   : > { %1527 = vperm.xlu1 %1952, %v2305_v54  }
  0x56   : > { %1543 = vperm.xlu0 %1953, %v2329_v60  }
  0x59   : > { %1535 = vperm.xlu1 %1952, %v2296_v52  }
  0x5a   : > { %1551 = vperm.xlu0 %1953, %v1069_v63  }
  0x5d   : > { %1539 = vperm.xlu1 %1952, %v2309_v55  }
  0x61   : > { %1547 = vperm.xlu1 %1952, %v2322_v58   ;;  %v4684_v58 = vmov 0 }
  0x9d   : > { %v2405_v7 = vpop.permute.xlu0 %1116 }
  0x9e   : > { %vm1149_vm15 = vcmp.ge.f32.partialorder %v2453_v36, %v2405_v7  ;;  %vm1150_vm0 = vcmp.ge.f32.partialorder %v2459_v37, %v2405_v7 }
  0xa4   : > { %v2397_v0 = vpop.permute.xlu1 %1126 }
  0xa5   : > { %4600 = vst [vmem:[#allocation2_spill] sm:$0xff] %v2397_v0  ;;  %v2409_v9 = vpop.permute.xlu0 %1121 }
  0xa6   : > { %4603 = vst [vmem:[#allocation5_spill] sm:$0xff] %v2409_v9 }
  0xa8   : > { %v2399_v4 = vpop.permute.xlu1 %1131 }
  0xa9   : > { %4601 = vst [vmem:[#allocation3_spill] sm:$0xff] %v2399_v4  ;;  %v2413_v11 = vpop.permute.xlu0 %1136 }
  0xaa   : > { %4605 = vst [vmem:[#allocation7_spill] sm:$0xff] %v2413_v11 }
  0xac   : > { %v2401_v5 = vpop.permute.xlu1 %1141 }
  0xad   : > { %v2417_v13 = vpop.permute.xlu0 %1146  ;;  %vm1193_vm1 = vcmp.ge.f32.partialorder %v2430_v25, %v2401_v5  ;;  %vm1194_vm3 = vcmp.ge.f32.partialorder %v2432_v26, %v2401_v5  ;;  %vm1195_vm5 = vcmp.ge.f32.partialorder %v2434_v28, %v2401_v5  ;;  %vm1196_vm7 = vcmp.ge.f32.partialorder %v2436_v30, %v2401_v5 }
  0xb1   : > { %v2403_v6 = vpop.permute.xlu1 %1206 }
  0xb4   : > { %v2421_v17 = vpop.permute.xlu0 %1210 }
  0xb5   : > { %v2407_v8 = vpop.permute.xlu1 %1214  ;;  %4606 = vst [vmem:[#allocation8_spill] sm:$0xff] %v2421_v17 }
  0xb6   : > { %4602 = vst [vmem:[#allocation4_spill] sm:$0xff] %v2407_v8 }
  0xb8   : > { %v2428_v23 = vpop.permute.xlu0 %1222 }
  0xb9   : > { %v2411_v10 = vpop.permute.xlu1 %1218  ;;  %4608 = vst [vmem:[#allocation10_spill] sm:$0xff] %v2428_v23 }
  0xba   : > { %4604 = vst [vmem:[#allocation6_spill] sm:$0xff] %v2411_v10 }
  0xbc   : > { %v2447_v35 = vpop.permute.xlu0 %1230 }
  0xbd   : > { %v2415_v12 = vpop.permute.xlu1 %1226 }
  0xbe   : > { %vm1277_vm2 = vcmp.lt.f32.partialorder %v2430_v25, %v2415_v12  ;;  %vm1278_vm4 = vcmp.lt.f32.partialorder %v2432_v26, %v2415_v12  ;;  %vm1279_vm6 = vcmp.lt.f32.partialorder %v2434_v28, %v2415_v12  ;;  %vm1280_vm8 = vcmp.lt.f32.partialorder %v2436_v30, %v2415_v12 }
  0xbf   : > { %vm2465_vm9 = vmand %vm1193_vm1, %vm1277_vm2  ;;  %vm1233_vm2 = vcmp.lt.f32.partialorder %v2453_v36, %v2403_v6  ;;  %vm1250_vm1 = vcmp.lt.f32.partialorder %v2459_v37, %v2407_v8 }
  0xc0   : > { %vm2473_vm10 = vmand %vm1194_vm3, %vm1278_vm4  ;;  %vm1235_vm4 = vcmp.lt.f32.partialorder %v2469_v39, %v2403_v6 }
  0xc1   : > { %vm2485_vm11 = vmand %vm1195_vm5, %vm1279_vm6  ;;  %vm1234_vm6 = vcmp.lt.f32.partialorder %v2459_v37, %v2403_v6 }
  0xc2   : > { %vm2495_vm13 = vmand %vm1196_vm7, %vm1280_vm8 }
  0xc3   : > { %v2419_v16 = vpop.permute.xlu1 %1387  ;;  %vm2549_vm12 = vmand %vm1149_vm15, %vm1233_vm2  ;;  %vm1249_vm2 = vcmp.lt.f32.partialorder %v2453_v36, %v2407_v8 }
  0xc4   : > { %v2513_v53 = vpop.permute.xlu0 %1391  ;;  %vm2576_vm3 = vmand %vm1150_vm0, %vm1234_vm6  ;;  %vm4633_vm6 = vcmp.ge.f32.partialorder %v2469_v39, %v2405_v7 }
  0xc5   : > { %4622 = vst [vmem:[#allocation16_spill] sm:$0xff] %v2513_v53  ;;  %vm2599_vm15 = vmand %vm4633_vm6, %vm1235_vm4 }
  0xc7   : > { %v2426_v22 = vpop.permute.xlu1 %1395 }
  0xc8   : > { %4607 = vst [vmem:[#allocation9_spill] sm:$0xff] %v2426_v22  ;;  %v2603_v20 = vpop.permute.xlu0 %1403 }
  0xc9   : > { %4636 = vst [vmem:[#allocation19_spill] sm:$0xff] %v2603_v20 }
  0xcb   : > { %v2445_v34 = vpop.permute.xlu1 %1399 }
  0xcf   : > { %v2511_v52 = vpop.permute.xlu1 %1407 }
  0xd0   : > { %4621 = vst [vmem:[#allocation15_spill] sm:$0xff] %v2511_v52  ;;  %vm1458_vm5 = vcmp.ge.f32.partialorder %v2477_v42, %v2511_v52  ;;  %vm1459_vm14 = vcmp.ge.f32.partialorder %v2489_v47, %v2511_v52  ;;  %vm1460_vm7 = vcmp.ge.f32.partialorder %v2499_v50, %v2511_v52  ;;  %vm4640_vm4 = vcmp.ge.f32.partialorder %v2501_v51, %v2511_v52 }
  0xd1   : > { %vm2560_vm8 = vmand %vm2465_vm9, %vm1458_vm5  ;;  %v4733_v52 = vmov 0 }
  0xd2   : > { %v4626_v62 = vsel %vm2560_vm8, 4294967295, %v4625_v62  ;;  %vm2585_vm9 = vmand %vm2473_vm10, %vm1459_vm14  ;;  %vm1241_vm14 = vcmp.lt.f32.partialorder %v2453_v36, %v2421_v17  ;;  %vm4670_vm8 = vcmp.lt.f32.partialorder %v2471_v40, %v2421_v17 }
  0xd3   : > { %4627 = vst [vmem:[#allocation17_spill] sm:$0xff] %v4626_v62  ;;  %v4631_v3 = vsel %vm2585_vm9, 4294967295, %v4630_v3  ;;  %vm2610_vm10 = vmand %vm2485_vm11, %vm1460_vm7  ;;  %vm4644_vm11 = vcmp.lt.f32.partialorder %v2471_v40, %v2403_v6  ;;  %vm4645_vm7 = vcmp.ge.f32.partialorder %v2471_v40, %v2405_v7 }
  0xd4   : > { %4632 = vst [vmem:[#allocation18_spill] sm:$0xff] %v4631_v3  ;;  %v4638_v21 = vsel %vm2610_vm10, 4294967295, %v4637_v21  ;;  %vm2621_vm6 = vmand %vm2495_vm13, %vm4640_vm4  ;;  %vm4648_vm13 = vcmp.ge.f32.partialorder %v2453_v36, %v2397_v0  ;;  %vm4676_vm10 = vcmp.ge.f32.partialorder %v2471_v40, %v2397_v0 }
  0xd5   : > { %4639 = vst [vmem:[#allocation20_spill] sm:$0xff] %v4638_v21  ;;  %v4642_v32 = vsel %vm2621_vm6, 4294967295, %v4641_v32  ;;  %vm2631_vm0 = vmand %vm4645_vm7, %vm4644_vm11  ;;  %vm4651_vm7 = vcmp.ge.f32.partialorder %v2459_v37, %v2397_v0  ;;  %vm4654_vm11 = vcmp.ge.f32.partialorder %v2453_v36, %v2409_v9 }
  0xd6   : > { %4643 = vst [vmem:[#allocation21_spill] sm:$0xff] %v4642_v32  ;;  %vm2643_vm4 = vmand %vm4648_vm13, %vm1249_vm2  ;;  %vm4657_vm13 = vcmp.lt.f32.partialorder %v2459_v37, %v2421_v17  ;;  %vm4658_vm2 = vcmp.ge.f32.partialorder %v2459_v37, %v2409_v9 }
  0xd7   : > { %vm2655_vm5 = vmand %vm4651_vm7, %vm1250_vm1  ;;  %vm4662_vm7 = vcmp.ge.f32.partialorder %v2469_v39, %v2409_v9 }
  0xd8   : > { %vm2669_vm1 = vmand %vm4654_vm11, %vm1241_vm14  ;;  %vm4661_vm11 = vcmp.lt.f32.partialorder %v2469_v39, %v2421_v17  ;;  %vm4666_vm14 = vcmp.lt.f32.partialorder %v2469_v39, %v2407_v8 }
  0xd9   : > { %vm2681_vm6 = vmand %vm4658_vm2, %vm4657_vm13  ;;  %vm4671_vm2 = vcmp.ge.f32.partialorder %v2471_v40, %v2409_v9 }
  0xda   : > { %vm2693_vm9 = vmand %vm4662_vm7, %vm4661_vm11  ;;  %vm4667_vm7 = vcmp.ge.f32.partialorder %v2469_v39, %v2397_v0  ;;  %v4792_v0 = vmov 0 }
  0xdb   : > { %vm2709_vm11 = vmand %vm4667_vm7, %vm4666_vm14  ;;  %vm4675_vm7 = vcmp.lt.f32.partialorder %v2471_v40, %v2407_v8 }
  0xdc   : > { %vm2721_vm13 = vmand %vm4671_vm2, %vm4670_vm8  ;;  %vm4682_vm8 = vcmp.lt.f32.partialorder %v2453_v36, %v2411_v10  ;;  %vm4686_vm2 = vcmp.ge.f32.partialorder %v2481_v44, %v2419_v16 }
  0xf1   : > { %v365_v54 = vpop.f32.mrb[0].mxu0 }
  0xf2   : > { %v727_v55 = vsub.f32 0.0, %v365_v54  ;;  %v472_v56 = vpop.f32.mrb[0].mxu1  ;;  %v367_v57 = vpop.f32.mrb[1].mxu0 }
  0xf3   : > { %v729_v59 = vsub.f32 0.0, %v472_v56  ;;  %v728_v60 = vsub.f32 0.0, %v367_v57  ;;  %v474_v61 = vpop.f32.mrb[1].mxu1 }
  0xf4   : > { %v783_v1 = vmul.f32 1.442695, %v727_v55  ;;  %v730_v2 = vsub.f32 0.0, %v474_v61 }
  0xf5   : > { %v787_v15 = vmul.f32 1.442695, %v729_v59  ;;  %v785_v18 = vmul.f32 1.442695, %v728_v60  ;;  %v371_v19 = vpop.f32.mrb[2].mxu0 }
  0xf6   : > { %1954 = vpow2.f32 %v783_v1  ;;  %v789_v24 = vmul.f32 1.442695, %v730_v2  ;;  %v735_v27 = vsub.f32 0.0, %v371_v19  ;;  %v478_v29 = vpop.f32.mrb[2].mxu1  ;;  %v373_v31 = vpop.f32.mrb[3].mxu0 }
  0xf7   : > { %1956 = vpow2.f32 %v787_v15  ;;  %v737_v38 = vsub.f32 0.0, %v478_v29  ;;  %v736_v41 = vsub.f32 0.0, %v373_v31  ;;  %v480_v46 = vpop.f32.mrb[3].mxu1 }
  0xf8   : > { %1958 = vpow2.f32 %v785_v18  ;;  %v799_v54 = vmul.f32 1.442695, %v735_v27  ;;  %v738_v55 = vsub.f32 0.0, %v480_v46  ;;  %v2697_v46 = vpop.permute.xlu0 %1411 }
  0xf9   : > { %1960 = vpow2.f32 %v789_v24  ;;  %v803_v57 = vmul.f32 1.442695, %v737_v38  ;;  %v801_v59 = vmul.f32 1.442695, %v736_v41  ;;  %v377_v60 = vpop.f32.mrb[4].mxu0  ;;  %4665 = vst [vmem:[#allocation22_spill] sm:$0xff] %v2697_v46 }
  0xfa   : > { %1962 = vpow2.f32 %v799_v54  ;;  %v805_v1 = vmul.f32 1.442695, %v738_v55  ;;  %v743_v2 = vsub.f32 0.0, %v377_v60  ;;  %v484_v15 = vpop.f32.mrb[4].mxu1  ;;  %v379_v18 = vpop.f32.mrb[5].mxu0  ;;  %v4668_v54 = vmov 0 }
  0xfb   : > { %1964 = vpow2.f32 %v803_v57  ;;  %v745_v24 = vsub.f32 0.0, %v484_v15  ;;  %v744_v27 = vsub.f32 0.0, %v379_v18  ;;  %v486_v29 = vpop.f32.mrb[5].mxu1  ;;  %v4669_v54 = vsel %vm2709_vm11, 4294967295, %v4668_v54  ;;  %v2725_v60 = vpop.permute.xlu1 %1527  ;;  %vm2735_vm11 = vmand %vm4676_vm10, %vm4675_vm7 }
  0xfc   : > { %1966 = vpow2.f32 %v801_v59  ;;  %v815_v38 = vmul.f32 1.442695, %v743_v2  ;;  %v746_v41 = vsub.f32 0.0, %v486_v29  ;;  %v4672_v55 = vmov 0  ;;  %4674 = vst [vmem:[#allocation23_spill] sm:$0xff] %v2725_v60 }
  0xfd   : > { %v4673_v55 = vsel %vm2721_vm13, 4294967295, %v4672_v55  ;;  %1968 = vpow2.f32 %v805_v1  ;;  %v819_v57 = vmul.f32 1.442695, %v745_v24  ;;  %v817_v59 = vmul.f32 1.442695, %v744_v27  ;;  %v383_v2 = vpop.f32.mrb[6].mxu0 }
  0xfe   : > { %v4677_v15 = vmov 0  ;;  %vm4679_vm13 = vcmp.ge.f32.partialorder %v2479_v43, %v2419_v16  ;;  %1970 = vpow2.f32 %v815_v38  ;;  %v821_v18 = vmul.f32 1.442695, %v746_v41  ;;  %v2752_v27 = vpop.f32.mrb[6].mxu1  ;;  %v2754_v29 = vpop.f32.mrb[7].mxu0 }
  0xff   : > { %v4678_v15 = vsel %vm2735_vm11, 4294967295, %v4677_v15  ;;  %vm2748_vm14 = vmand %vm2549_vm12, %vm4679_vm13  ;;  %v751_v24 = vsub.f32 0.0, %v383_v2  ;;  %vm4683_vm12 = vcmp.ge.f32.partialorder %v2453_v36, %v2399_v4  ;;  %1972 = vpow2.f32 %v819_v57  ;;  %v2783_v41 = vpop.f32.mrb[7].mxu1 }
 0x100   : > { %vm2766_vm13 = vmand %vm4683_vm12, %vm4682_vm8  ;;  %v1955_v63 = vpop.eup %1954  ;;  %vm4689_vm7 = vcmp.ge.f32.partialorder %v2483_v45, %v2419_v16  ;;  %1974 = vpow2.f32 %v817_v59  ;;  %vm1555_vm10 = vcmp.lt.f32.partialorder %v2481_v44, %v2725_v60  ;;  %v4719_v57 = vmov 0 }
 0x101   : > { %v4685_v58 = vsel %vm2766_vm13, 4294967295, %v4684_v58  ;;  %vm2775_vm11 = vmand %vm2576_vm3, %vm4686_vm2  ;;  %v831_v2 = vmul.f32 1.442695, %v751_v24  ;;  %v1957_v32 = vpop.eup %1956  ;;  %v895_v59 = vadd.f32 1.0, %v1955_v63  ;;  %1976 = vpow2.f32 %v821_v18  ;;  %v2827_v24 = vpop.f32.mrb[8].mxu0 }
 0x102   : > { %vm2800_vm13 = vmand %vm2599_vm15, %vm4689_vm7  ;;  %vm4692_vm15 = vcmp.ge.f32.partialorder %v2493_v48, %v2419_v16  ;;  %v1959_v3 = vpop.eup %1958  ;;  %v897_v63 = vadd.f32 1.0, %v1957_v32  ;;  %v2855_v32 = vpop.f32.mrb[8].mxu1  ;;  %vm4707_vm2 = vcmp.lt.f32.partialorder %v2479_v43, %v2725_v60  ;;  %vm4727_vm8 = vcmp.ge.f32.partialorder %v2430_v25, %v2405_v7 }
 0x103   : > { %vm2817_vm7 = vmand %vm2631_vm0, %vm4692_vm15  ;;  %vm4695_vm15 = vcmp.ge.f32.partialorder %v2479_v43, %v2426_v22  ;;  %vm4698_vm0 = vcmp.ge.f32.partialorder %v2479_v43, %v2513_v53  ;;  %1978 = vpow2.f32 %v831_v2  ;;  %v2857_v18 = vpop.f32.mrb[9].mxu0  ;;  %v1961_v21 = vpop.eup %1960  ;;  %v896_v61 = vadd.f32 1.0, %v1959_v3 }
 0x104   : > { %vm2836_vm3 = vmand %vm2643_vm4, %vm4695_vm15  ;;  %1980 = vrcp.f32 %v895_v59  ;;  %vm4701_vm4 = vcmp.ge.f32.partialorder %v2481_v44, %v2513_v53  ;;  %v2880_v59 = vpop.permute.xlu1 %1535  ;;  %v2882_v3 = vpop.f32.mrb[9].mxu1  ;;  %v898_v8 = vadd.f32 1.0, %v1961_v21 }
 0x105   : > { %vm2851_vm12 = vmand %vm2669_vm1, %vm4698_vm0  ;;  %v1963_v62 = vpop.eup %1962  ;;  %1982 = vrcp.f32 %v897_v63  ;;  %v2921_v21 = vpop.permute.xlu0 %1531  ;;  %vm4740_vm1 = vcmp.ge.f32.partialorder %v2493_v48, %v2426_v22 }
 0x106   : > { %vm2876_vm15 = vmand %vm2681_vm6, %vm4701_vm4  ;;  %vm4704_vm4 = vcmp.ge.f32.partialorder %v2481_v44, %v2426_v22  ;;  %v1965_v63 = vpop.eup %1964  ;;  %1984 = vrcp.f32 %v896_v61  ;;  %v903_v1 = vadd.f32 1.0, %v1963_v62  ;;  %v2943_v61 = vpop.f32.mrb[10].mxu0 }
 0x107   : > { %vm2897_vm0 = vmand %vm2655_vm5, %vm4704_vm4  ;;  %vm4710_vm5 = vcmp.ge.f32.partialorder %v2483_v45, %v2513_v53  ;;  %v1967_v62 = vpop.eup %1966  ;;  %1986 = vrcp.f32 %v898_v8  ;;  %v905_v38 = vadd.f32 1.0, %v1965_v63  ;;  %v2960_v9 = vpop.f32.mrb[10].mxu1  ;;  %v4723_v63 = vmov 0 }
 0x108   : > { %vm2908_vm6 = vmand %vm2748_vm14, %vm4707_vm2  ;;  %v2962_v46 = vpop.f32.mrb[11].mxu0  ;;  %v1969_v8 = vpop.eup %1968  ;;  %1988 = vrcp.f32 %v903_v1  ;;  %v904_v14 = vadd.f32 1.0, %v1967_v62  ;;  %v4730_v1 = vmov 0 }
 0x109   : > { %vm2917_vm4 = vmand %vm2693_vm9, %vm4710_vm5  ;;  %vm4715_vm9 = vcmp.lt.f32.partialorder %v2483_v45, %v2725_v60  ;;  %1990 = vrcp.f32 %v905_v38  ;;  %v906_v62 = vadd.f32 1.0, %v1969_v8  ;;  %v752_v8 = vsub.f32 0.0, %v2754_v29 }
 0x10a   : > { %vm2930_vm14 = vmand %vm2775_vm11, %vm1555_vm10  ;;  %vm4726_vm10 = vcmp.lt.f32.partialorder %v2430_v25, %v2403_v6  ;;  %1992 = vrcp.f32 %v904_v14  ;;  %v4751_v29 = vmov 0 }
 0x10b   : > { %vm2939_vm2 = vmand %vm2800_vm13, %vm4715_vm9  ;;  %vm4718_vm13 = vcmp.lt.f32.partialorder %v2493_v48, %v2725_v60  ;;  %v2981_v60 = vpop.f32.mrb[11].mxu1  ;;  %1994 = vrcp.f32 %v906_v62  ;;  %v759_v62 = vsub.f32 0.0, %v2827_v24  ;;  %v4772_v24 = vmov 0 }
 0x10c   : > { %vm2956_vm9 = vmand %vm2817_vm7, %vm4718_vm13  ;;  %vm4721_vm7 = vcmp.ge.f32.partialorder %v2493_v48, %v2513_v53  ;;  %vm4722_vm13 = vnez %v4673_v55  ;;  %v1971_v55 = vpop.eup %1970  ;;  %v753_v53 = vsub.f32 0.0, %v2752_v27  ;;  %v4742_v27 = vmov 0 }
 0x10d   : > { %v4720_v57 = vsel %vm2956_vm9, 4294967295, %v4719_v57  ;;  %vm2975_vm5 = vmand %vm4722_vm13, %vm4721_vm7  ;;  %vm4728_vm7 = vcmp.ge.f32.partialorder %v2483_v45, %v2426_v22  ;;  %vm4729_vm13 = vnez %v4669_v54  ;;  %v4738_v54 = vmov 0  ;;  %v3046_v22 = vpop.f32.mrb[12].mxu0 }
 0x10e   : > { %v4724_v63 = vsel %vm2975_vm5, 4294967295, %v4723_v63  ;;  %vm1293_vm9 = vmand %vm4727_vm8, %vm4726_vm10  ;;  %vm4732_vm8 = vcmp.ge.f32.partialorder %v2477_v42, %v2419_v16  ;;  %vm4741_vm5 = vnez %v4678_v15  ;;  %v911_v38 = vadd.f32 1.0, %v1971_v55 }
 0x10f   : > { %4725 = vst [vmem:[#allocation24_spill] sm:$0xff] %v4724_v63  ;;  %vm2997_vm11 = vmand %vm4729_vm13, %vm4728_vm7  ;;  %v1973_v63 = vpop.eup %1972  ;;  %vm4736_vm7 = vcmp.lt.f32.partialorder %v2469_v39, %v2411_v10  ;;  %vm4737_vm13 = vcmp.ge.f32.partialorder %v2469_v39, %v2399_v4  ;;  %v754_v42 = vsub.f32 0.0, %v2783_v41 }
 0x110   : > { %v4731_v1 = vsel %vm2997_vm11, 4294967295, %v4730_v1  ;;  %vm3007_vm10 = vmand %vm1293_vm9, %vm4732_vm8  ;;  %v1975_v14 = vpop.eup %1974  ;;  %vm4750_vm8 = vcmp.ge.f32.partialorder %v2459_v37, %v2399_v4  ;;  %v913_v55 = vadd.f32 1.0, %v1973_v63  ;;  %1996 = vrcp.f32 %v911_v38 }
 0x111   : > { %v4734_v52 = vsel %vm3007_vm10, 4294967295, %v4733_v52  ;;  %vm3017_vm11 = vmand %vm4737_vm13, %vm4736_vm7  ;;  %vm4746_vm13 = vcmp.lt.f32.partialorder %v2479_v43, %v2921_v21  ;;  %vm4761_vm10 = vcmp.lt.f32.partialorder %v2471_v40, %v2411_v10  ;;  %v912_v63 = vadd.f32 1.0, %v1975_v14 }
 0x112   : > { %4735 = vst [vmem:[#allocation25_spill] sm:$0xff] %v4734_v52  ;;  %v4739_v54 = vsel %vm3017_vm11, 4294967295, %v4738_v54  ;;  %vm3026_vm9 = vmand %vm4741_vm5, %vm4740_vm1  ;;  %v3035_v52 = vpop.permute.xlu1 %1539  ;;  %vm4749_vm5 = vcmp.lt.f32.partialorder %v2459_v37, %v2411_v10  ;;  %vm4771_vm11 = vcmp.ge.f32.partialorder %v2453_v36, %v2413_v11  ;;  %1998 = vrcp.f32 %v913_v55 }
 0x113   : > { %v4743_v27 = vsel %vm3026_vm9, 4294967295, %v4742_v27  ;;  %4745 = vst [vmem:[#allocation27_spill] sm:$0xff] %v3035_v52  ;;  %vm3042_vm1 = vmand %vm2851_vm12, %vm4746_vm13  ;;  %vm4754_vm12 = vcmp.ge.f32.partialorder %v2479_v43, %v2445_v34  ;;  %vm4755_vm13 = vnez %v4685_v58  ;;  %v1977_v58 = vpop.eup %1976  ;;  %2000 = vrcp.f32 %v912_v63 }
 0x114   : > { %4744 = vst [vmem:[#allocation26_spill] sm:$0xff] %v4743_v27  ;;  %vm3054_vm7 = vmand %vm4750_vm8, %vm4749_vm5  ;;  %v3074_v27 = vpop.f32.mrb[13].mxu0  ;;  %vm4759_vm5 = vcmp.lt.f32.partialorder %v2434_v28, %v2403_v6  ;;  %v1979_v38 = vpop.eup %1978  ;;  %v914_v14 = vadd.f32 1.0, %v1977_v58  ;;  %v833_v55 = vmul.f32 1.442695, %v752_v8  ;;  %v4782_v58 = vmov 0 }
 0x115   : > { %v4752_v29 = vsel %vm3054_vm7, 4294967295, %v4751_v29  ;;  %vm3065_vm9 = vmand %vm4755_vm13, %vm4754_vm12  ;;  %4758 = vst [vmem:[#allocation29_spill] sm:$0xff] %v3074_v27  ;;  %vm4760_vm12 = vcmp.ge.f32.partialorder %v2434_v28, %v2405_v7  ;;  %v919_v2 = vadd.f32 1.0, %v1979_v38  ;;  %v3163_v25 = vpop.f32.mrb[14].mxu0  ;;  %v837_v63 = vmul.f32 1.442695, %v754_v42 }
 0x116   : > { %4753 = vst [vmem:[#allocation28_spill] sm:$0xff] %v4752_v29  ;;  %v4757_v49 = vsel %vm3065_vm9, 4294967295, %v4756_v49  ;;  %v3072_v29 = vpop.f32.mrb[12].mxu1  ;;  %vm1295_vm13 = vmand %vm4760_vm12, %vm4759_vm5  ;;  %vm4762_vm9 = vcmp.ge.f32.partialorder %v2471_v40, %v2399_v4  ;;  %v4767_v4 = vmov 0  ;;  %vm4770_vm12 = vcmp.lt.f32.partialorder %v2453_v36, %v2428_v23  ;;  %v4884_v27 = vld [vmem:[#allocation8_spill] sm:$0xff] }
 0x117   : > { %vm3088_vm8 = vmand %vm4762_vm9, %vm4761_vm10  ;;  %v3101_v10 = vpop.f32.mrb[13].mxu1  ;;  %vm4766_vm10 = vcmp.ge.f32.partialorder %v2499_v50, %v2419_v16  ;;  %v760_v50 = vsub.f32 0.0, %v2857_v18  ;;  %4784 = vst [vmem:[#allocation32_spill] sm:$0xff] %v3163_v25  ;;  %2002 = vrcp.f32 %v914_v14  ;;  %v762_v38 = vsub.f32 0.0, %v2882_v3  ;;  %v4881_v3 = vld [vmem:[#allocation22_spill] sm:$0xff] }
 0x118   : > { %4765 = vst [vmem:[#allocation30_spill] sm:$0xff] %v3101_v10  ;;  %vm3106_vm9 = vmand %vm1295_vm13, %vm4766_vm10  ;;  %v761_v10 = vsub.f32 0.0, %v2855_v32  ;;  %vm4774_vm10 = vcmp.lt.f32.partialorder %v2481_v44, %v2921_v21  ;;  %vm4777_vm13 = vcmp.lt.f32.partialorder %v2469_v39, %v2428_v23  ;;  %v4779_v32 = vmov 0  ;;  %v3192_v25 = vpop.f32.mrb[14].mxu1 }
 0x119   : > { %v4768_v4 = vsel %vm3106_vm9, 4294967295, %v4767_v4  ;;  %vm3123_vm7 = vmand %vm4771_vm11, %vm4770_vm12  ;;  %vm4778_vm9 = vcmp.ge.f32.partialorder %v2469_v39, %v2413_v11  ;;  %2004 = vrcp.f32 %v919_v2  ;;  %v3239_v31 = vpop.f32.mrb[15].mxu1 }
 0x11a   : > { %4769 = vst [vmem:[#allocation31_spill] sm:$0xff] %v4768_v4  ;;  %v4773_v24 = vsel %vm3123_vm7, 4294967295, %v4772_v24  ;;  %v835_v4 = vmul.f32 1.442695, %v753_v53  ;;  %vm3135_vm5 = vmand %vm2876_vm15, %vm4774_vm10  ;;  %v1981_v53 = vpop.eup %1980  ;;  %vm4781_vm15 = vcmp.lt.f32.partialorder %v2479_v43, %v2880_v59  ;;  %v851_v2 = vmul.f32 1.442695, %v761_v10 }
 0x11b   : > { %vm3149_vm7 = vmand %vm4778_vm9, %vm4777_vm13  ;;  %vm4785_vm9 = vcmp.lt.f32.partialorder %v2432_v26, %v2403_v6  ;;  %vm4786_vm13 = vcmp.ge.f32.partialorder %v2432_v26, %v2405_v7  ;;  %v1983_v33 = vpop.eup %1982  ;;  %v1666_v8 = vsel %vm2908_vm6, %v1981_v53, 0.0  ;;  %v3194_v26 = vpop.f32.mrb[15].mxu0  ;;  %vm4795_vm6 = vcmp.lt.f32.partialorder %v2471_v40, %v2428_v23 }
 0x11c   : > { %v4780_v32 = vsel %vm3149_vm7, 4294967295, %v4779_v32  ;;  %vm3158_vm10 = vmand %vm2836_vm3, %vm4781_vm15  ;;  %vm4787_vm15 = vcmp.lt.f32.partialorder %v2459_v37, %v2428_v23  ;;  %vm4788_vm7 = vcmp.ge.f32.partialorder %v2459_v37, %v2413_v11  ;;  %v1985_v42 = vpop.eup %1984  ;;  %v1668_v14 = vsel %vm2939_vm2, %v1983_v33, 0.0  ;;  %1722 = vst [vmem:[%s3115_s9] sm:$0xff] %v1666_v8 }
 0x11d   : > { %v4783_v58 = vsel %vm3158_vm10, 4294967295, %v4782_v58  ;;  %vm1294_vm11 = vmand %vm4786_vm13, %vm4785_vm9  ;;  %vm4796_vm9 = vcmp.ge.f32.partialorder %v2471_v40, %v2413_v11  ;;  %v847_v23 = vmul.f32 1.442695, %v759_v62  ;;  %v767_v11 = vsub.f32 0.0, %v2943_v61  ;;  %v1987_v62 = vpop.eup %1986  ;;  %1724 = vst [vmem:[%s3115_s9 + $0x10] sm:$0xff] %v1668_v14 }
 0x11e   : > { %vm3181_vm10 = vmand %vm4788_vm7, %vm4787_vm15  ;;  %vm4791_vm7 = vcmp.ge.f32.partialorder %v2489_v47, %v2419_v16  ;;  %v1667_v61 = vsel %vm2930_vm14, %v1985_v42, 0.0  ;;  %2006 = vpow2.f32 %v835_v4  ;;  %v769_v33 = vsub.f32 0.0, %v2960_v9  ;;  %v1989_v56 = vpop.eup %1988 }
 0x11f   : > { %vm3199_vm15 = vmand %vm1294_vm11, %vm4791_vm7  ;;  %vm4799_vm11 = vcmp.lt.f32.partialorder %v2481_v44, %v2880_v59  ;;  %1723 = vst [vmem:[%s3115_s9 + $0x8] sm:$0xff] %v1667_v61  ;;  %2008 = vpow2.f32 %v833_v55  ;;  %v849_v4 = vmul.f32 1.442695, %v760_v50  ;;  %v768_v10 = vsub.f32 0.0, %v2962_v46  ;;  %v4813_v50 = vld [vmem:[#allocation24_spill] sm:$0xff]  ;;  %v3279_v55 = vpop.f32.mrb[16].mxu1 }
 0x120   : > { %v4793_v0 = vsel %vm3199_vm15, 4294967295, %v4792_v0  ;;  %vm3209_vm13 = vmand %vm4796_vm9, %vm4795_vm6  ;;  %vm4802_vm6 = vcmp.lt.f32.partialorder %v2483_v45, %v2921_v21  ;;  %vm4807_vm9 = vnez %v4720_v57  ;;  %vm4808_vm14 = vcmp.ge.f32.partialorder %v2501_v51, %v2419_v16 }
 0x121   : > { %4794 = vst [vmem:[#allocation33_spill] sm:$0xff] %v4793_v0  ;;  %vm3221_vm7 = vmand %vm2897_vm0, %vm4799_vm11  ;;  %vm4806_vm11 = vcmp.ge.f32.partialorder %v2436_v30, %v2405_v7  ;;  %v1669_v17 = vsel %vm4807_vm9, %v1987_v62, 0.0  ;;  %v4809_v9 = vmov 0  ;;  %v1991_v7 = vpop.eup %1990  ;;  %2010 = vpow2.f32 %v837_v63  ;;  %v3296_v62 = vpop.f32.mrb[17].mxu1 }
 0x122   : > { %vm3235_vm12 = vmand %vm2917_vm4, %vm4802_vm6  ;;  %vm4805_vm4 = vcmp.lt.f32.partialorder %v2436_v30, %v2403_v6  ;;  %v3264_v6 = vpop.f32.mrb[16].mxu0  ;;  %1725 = vst [vmem:[%s3115_s9 + $0x18] sm:$0xff] %v1669_v17  ;;  %v853_v57 = vmul.f32 1.442695, %v762_v38  ;;  %v770_v8 = vsub.f32 0.0, %v2981_v60  ;;  %vm4812_vm9 = vcmp.lt.f32.partialorder %v2493_v48, %v2921_v21  ;;  %v1993_v63 = vpop.eup %1992  ;;  %v4831_v17 = vld [vmem:[#allocation28_spill] sm:$0xff] }
 0x123   : > { %vm1296_vm6 = vmand %vm4806_vm11, %vm4805_vm4  ;;  %vm4814_vm4 = vnez %v4813_v50  ;;  %v1674_v46 = vsel %vm3042_vm1, %v1989_v56, 0.0  ;;  %v3281_v42 = vpop.f32.mrb[17].mxu0  ;;  %2012 = vpow2.f32 %v847_v23  ;;  %v863_v38 = vmul.f32 1.442695, %v767_v11  ;;  %v1995_v61 = vpop.eup %1994  ;;  %v4826_v11 = vld [vmem:[#allocation26_spill] sm:$0xff]  ;;  %v4852_v60 = vld [vmem:[#allocation11_spill] sm:$0xff] }
 0x124   : > { %vm3260_vm0 = vmand %vm1296_vm6, %vm4808_vm14  ;;  %vm4817_vm6 = vcmp.lt.f32.partialorder %v2483_v45, %v2880_v59  ;;  %vm4818_vm14 = vnez %v4731_v1  ;;  %v1676_v15 = vsel %vm3235_vm12, %v1991_v7, 0.0  ;;  %1730 = vst [vmem:[%s3115_s9 + $0x40] sm:$0xff] %v1674_v46  ;;  %v775_v14 = vsub.f32 0.0, %v3046_v22  ;;  %v1997_v56 = vpop.eup %1996  ;;  %v3369_v16 = vpop.f32.mrb[18].mxu1  ;;  %v4918_v7 = vld [vmem:[#allocation12_spill] sm:$0xff] }
 0x125   : > { %v4810_v9 = vsel %vm3260_vm0, 4294967295, %v4809_v9  ;;  %vm3273_vm11 = vmand %vm4814_vm4, %vm4812_vm9  ;;  %vm4821_vm1 = vcmp.ge.f32.partialorder %v2483_v45, %v2445_v34  ;;  %vm4822_vm9 = vnez %v4739_v54  ;;  %vm4827_vm12 = vnez %v4826_v11  ;;  %1732 = vst [vmem:[%s3115_s9 + $0x50] sm:$0xff] %v1676_v15  ;;  %v1999_v50 = vpop.eup %1998  ;;  %v3387_v15 = vpop.permute.xlu0 %1543 }
 0x126   : > { %4811 = vst [vmem:[#allocation34_spill] sm:$0xff] %v4810_v9  ;;  %vm3288_vm2 = vmand %vm4818_vm14, %vm4817_vm6  ;;  %vm4825_vm6 = vcmp.lt.f32.partialorder %v2493_v48, %v2880_v59  ;;  %2014 = vpow2.f32 %v851_v2  ;;  %v867_v23 = vmul.f32 1.442695, %v769_v33  ;;  %v1675_v19 = vsel %vm3135_vm5, %v1993_v63, 0.0  ;;  %v3343_v33 = vpop.f32.mrb[18].mxu0  ;;  %v2001_v46 = vpop.eup %2000 }
 0x127   : > { %vm3303_vm4 = vmand %vm4822_vm9, %vm4821_vm1  ;;  %v777_v54 = vsub.f32 0.0, %v3072_v29  ;;  %vm4830_vm1 = vcmp.ge.f32.partialorder %v2481_v44, %v2445_v34  ;;  %vm4832_vm9 = vnez %v4831_v17  ;;  %2016 = vpow2.f32 %v849_v4  ;;  %1731 = vst [vmem:[%s3115_s9 + $0x48] sm:$0xff] %v1675_v19 }
 0x128   : > { %vm3312_vm14 = vmand %vm4827_vm12, %vm4825_vm6  ;;  %vm4835_vm5 = vcmp.lt.f32.partialorder %v2479_v43, %v3035_v52  ;;  %vm4836_vm12 = vnez %v4757_v49  ;;  %v865_v29 = vmul.f32 1.442695, %v768_v10  ;;  %v1677_v2 = vsel %vm3273_vm11, %v1995_v61, 0.0  ;;  %4851 = vst [vmem:[#allocation24_spill] sm:$0xff] %v3387_v15  ;;  %v3401_v61 = vpop.f32.mrb[19].mxu1 }
 0x129   : > { %vm3325_vm3 = vmand %vm4832_vm9, %vm4830_vm1  ;;  %vm4839_vm1 = vcmp.ge.f32.partialorder %v2493_v48, %v2445_v34  ;;  %v4840_v49 = vmov 0  ;;  %2018 = vpow2.f32 %v853_v57  ;;  %v869_v10 = vmul.f32 1.442695, %v770_v8  ;;  %1733 = vst [vmem:[%s3115_s9 + $0x58] sm:$0xff] %v1677_v2 }
 0x12a   : > { %vm3336_vm0 = vmand %vm4836_vm12, %vm4835_vm5  ;;  %vm4842_vm5 = vnez %v4783_v58  ;;  %vm4843_vm11 = vcmp.lt.f32.partialorder %v2453_v36, %v2415_v12  ;;  %vm4844_vm6 = vcmp.ge.f32.partialorder %v2453_v36, %v2401_v5  ;;  %v3371_v58 = vpop.f32.mrb[19].mxu0  ;;  %v1684_v57 = vsel %vm3288_vm2, %v1999_v50, 0.0 }
 0x12b   : > { %vm3350_vm9 = vmand %vm3088_vm8, %vm4839_vm1  ;;  %v1682_v4 = vsel %vm4842_vm5, %v1997_v56, 0.0  ;;  %vm4848_vm1 = vnez %v4773_v24  ;;  %v4849_v8 = vmov 0  ;;  %2020 = vpow2.f32 %v863_v38  ;;  %v2003_v38 = vpop.eup %2002  ;;  %1740 = vst [vmem:[%s3115_s9 + $0x90] sm:$0xff] %v1684_v57  ;;  %v4872_v56 = vld [vmem:[#allocation15_spill] sm:$0xff]  ;;  %v3455_v18 = vpop.f32.mrb[20].mxu0 }
 0x12c   : > { %v4841_v49 = vsel %vm3350_vm9, 4294967295, %v4840_v49  ;;  %vm3364_vm15 = vmand %vm4844_vm6, %vm4843_vm11  ;;  %1738 = vst [vmem:[%s3115_s9 + $0x80] sm:$0xff] %v1682_v4  ;;  %vm4847_vm6 = vcmp.ge.f32.partialorder %v2479_v43, %v2603_v20  ;;  %v879_v63 = vmul.f32 1.442695, %v775_v14  ;;  %vm4853_vm11 = vcmp.lt.f32.partialorder %v4852_v60, %v2447_v35  ;;  %v2005_v53 = vpop.eup %2004  ;;  %v4882_v4 = vld [vmem:[#allocation13_spill] sm:$0xff]  ;;  %v3489_v57 = vpop.f32.mrb[21].mxu0 }
 0x12d   : > { %vm3383_vm5 = vmand %vm4848_vm1, %vm4847_vm6  ;;  %vm4854_vm8 = vcmp.ge.f32.partialorder %v4852_v60, %v2417_v13  ;;  %v1683_v14 = vsel %vm3221_vm7, %v2001_v46, 0.0  ;;  %vm4857_vm6 = vcmp.ge.f32.partialorder %v2483_v45, %v2603_v20  ;;  %vm4858_vm1 = vnez %v4780_v32  ;;  %4873 = vst [vmem:[#allocation26_spill] sm:$0xff] %v3455_v18  ;;  %v2007_v17 = vpop.eup %2006  ;;  %v4883_v46 = vld [vmem:[#allocation5_spill] sm:$0xff]  ;;  %v4938_v18 = vld [vmem:[#allocation30_spill] sm:$0xff] }
 0x12e   : > { %v4850_v8 = vsel %vm3383_vm5, 4294967295, %v4849_v8  ;;  %vm3397_vm12 = vmand %vm4854_vm8, %vm4853_vm11  ;;  %2022 = vpow2.f32 %v867_v23  ;;  %v883_v19 = vmul.f32 1.442695, %v777_v54  ;;  %vm4861_vm7 = vcmp.lt.f32.partialorder %v2434_v28, %v2447_v35  ;;  %1739 = vst [vmem:[%s3115_s9 + $0x88] sm:$0xff] %v1683_v14 }
 0x12f   : > { %vm3411_vm2 = vmand %vm4858_vm1, %vm4857_vm6  ;;  %vm4862_vm5 = vcmp.ge.f32.partialorder %v2434_v28, %v2417_v13  ;;  %v1685_v23 = vsel %vm3312_vm14, %v2003_v38, 0.0  ;;  %vm4865_vm6 = vcmp.ge.f32.partialorder %v2481_v44, %v2603_v20  ;;  %2024 = vpow2.f32 %v865_v29  ;;  %4886 = vst [vmem:[#allocation11_spill] sm:$0xff] %v3489_v57  ;;  %v2009_v38 = vpop.eup %2008 }
 0x130   : > { %vm3425_vm9 = vmand %vm4862_vm5, %vm4861_vm7  ;;  %vm4868_vm5 = vcmp.lt.f32.partialorder %v2459_v37, %v2415_v12  ;;  %vm4869_vm7 = vcmp.ge.f32.partialorder %v2459_v37, %v2401_v5  ;;  %1741 = vst [vmem:[%s3115_s9 + $0x98] sm:$0xff] %v1685_v23  ;;  %v4875_v29 = vmov 0  ;;  %v1690_v2 = vsel %vm3336_vm0, %v2005_v53, 0.0  ;;  %v4891_v23 = vld [vmem:[#allocation14_spill] sm:$0xff]  ;;  %v4927_v53 = vld [vmem:[#allocation29_spill] sm:$0xff] }
 0x131   : > { %vm3437_vm1 = vmand %vm3181_vm10, %vm4865_vm6  ;;  %vm4874_vm6 = vcmp.ge.f32.partialorder %v2493_v48, %v2603_v20  ;;  %2026 = vpow2.f32 %v869_v10  ;;  %vm4878_vm10 = vcmp.ge.f32.partialorder %v2469_v39, %v2401_v5  ;;  %v3487_v10 = vpop.f32.mrb[20].mxu1  ;;  %v921_v14 = vadd.f32 1.0, %v2007_v17  ;;  %1746 = vst [vmem:[%s3115_s9 + $0xc0] sm:$0xff] %v1690_v2  ;;  %v4892_v20 = vld [vmem:[#allocation16_spill] sm:$0xff]  ;;  %v2011_v17 = vpop.eup %2010 }
 0x132   : > { %vm3447_vm11 = vmand %vm4869_vm7, %vm4868_vm5  ;;  %vm4877_vm7 = vcmp.lt.f32.partialorder %v2469_v39, %v2415_v12  ;;  %4885 = vst [vmem:[#allocation28_spill] sm:$0xff] %v3487_v10  ;;  %2028 = vpow2.f32 %v879_v63  ;;  %v3506_v57 = vpop.f32.mrb[21].mxu1  ;;  %v920_v2 = vadd.f32 1.0, %v2009_v38  ;;  %v922_v63 = vadd.f32 1.0, %v2011_v17  ;;  %v3544_v38 = vpop.f32.mrb[22].mxu0 }
 0x133   : > { %vm3463_vm5 = vmand %vm3209_vm13, %vm4874_vm6  ;;  %4893 = vst [vmem:[#allocation15_spill] sm:$0xff] %v3506_v57  ;;  %2030 = vpow2.f32 %v883_v19  ;;  %v3538_v19 = vpop.permute.xlu0 %1551  ;;  %vm4920_vm0 = vnez %v4841_v49  ;;  %v4930_v9 = vmov 0  ;;  %v778_v0 = vsub.f32 0.0, %v4938_v18 }
 0x134   : > { %v4876_v29 = vsel %vm3463_vm5, 4294967295, %v4875_v29  ;;  %vm3475_vm14 = vmand %vm4878_vm10, %vm4877_vm7  ;;  %vm4887_vm10 = vcmp.lt.f32.partialorder %v2471_v40, %v2415_v12  ;;  %vm4888_vm7 = vcmp.ge.f32.partialorder %v2471_v40, %v2401_v5  ;;  %v2013_v12 = vpop.eup %2012  ;;  %2032 = vrcp.f32 %v921_v14  ;;  %4900 = vst [vmem:[#allocation22_spill] sm:$0xff] %v3544_v38 }
 0x135   : > { %vm3498_vm13 = vmand %vm4888_vm7, %vm4887_vm10  ;;  %vm4894_vm7 = vcmp.ge.f32.partialorder %v2479_v43, %v4872_v56  ;;  %vm1579_vm10 = vcmp.lt.f32.partialorder %v2481_v44, %v3035_v52  ;;  %v2015_v14 = vpop.eup %2014  ;;  %2034 = vrcp.f32 %v920_v2  ;;  %v927_v17 = vadd.f32 1.0, %v2013_v12  ;;  %v3561_v2 = vpop.f32.mrb[22].mxu1 }
 0x136   : > { %vm3517_vm5 = vmand %vm3364_vm15, %vm4894_vm7  ;;  %vm4897_vm15 = vcmp.ge.f32.partialorder %v4882_v4, %v4881_v3  ;;  %4904 = vst [vmem:[#allocation13_spill] sm:$0xff] %v3561_v2  ;;  %v3563_v12 = vpop.f32.mrb[23].mxu0  ;;  %v2017_v38 = vpop.eup %2016  ;;  %2036 = vrcp.f32 %v922_v63  ;;  %v929_v57 = vadd.f32 1.0, %v2015_v14  ;;  %v4947_v11 = vmov 0 }
 0x137   : > { %vm3534_vm7 = vmand %vm3397_vm12, %vm4897_vm15  ;;  %vm4901_vm15 = vcmp.ge.f32.partialorder %v4891_v23, %v4881_v3  ;;  %4905 = vst [vmem:[#allocation5_spill] sm:$0xff] %v3563_v12  ;;  %vm4906_vm12 = vcmp.lt.f32.partialorder %v2483_v45, %v3035_v52  ;;  %v3583_v63 = vpop.permute.xlu1 %1547  ;;  %v3591_v1 = vpop.f32.mrb[23].mxu1  ;;  %2038 = vrcp.f32 %v927_v17  ;;  %v928_v22 = vadd.f32 1.0, %v2017_v38 }
 0x138   : > { %vm3555_vm8 = vmand %vm3425_vm9, %vm4901_vm15  ;;  %vm4909_vm9 = vcmp.ge.f32.partialorder %v2481_v44, %v4872_v56  ;;  %4912 = vst [vmem:[#allocation8_spill] sm:$0xff] %v3591_v1  ;;  %v2019_v14 = vpop.eup %2018  ;;  %v4913_v12 = vmov 0  ;;  %2040 = vrcp.f32 %v929_v57  ;;  %v4921_v17 = vmov 0  ;;  %v3647_v49 = vpop.f32.mrb[24].mxu0 }
 0x139   : > { %vm3570_vm6 = vmand %vm3303_vm4, %vm4906_vm12  ;;  %v2021_v50 = vpop.eup %2020  ;;  %v930_v38 = vadd.f32 1.0, %v2019_v14  ;;  %4926 = vst [vmem:[#allocation14_spill] sm:$0xff] %v3647_v49  ;;  %2042 = vrcp.f32 %v928_v22  ;;  %v776_v14 = vsub.f32 0.0, %v4927_v53  ;;  %v4934_v22 = vmov 0 }
 0x13a   : > { %vm3579_vm15 = vmand %vm3447_vm11, %vm4909_vm9  ;;  %vm4915_vm9 = vcmp.ge.f32.partialorder %v2483_v45, %v4872_v56  ;;  %v2023_v57 = vpop.eup %2022 }
 0x13b   : > { %vm3598_vm11 = vmand %vm3325_vm3, %vm1579_vm10  ;;  %vm4923_vm3 = vcmp.ge.f32.partialorder %v2493_v48, %v4872_v56  ;;  %v935_v56 = vadd.f32 1.0, %v2021_v50  ;;  %vm4933_vm10 = vcmp.ge.f32.partialorder %v2453_v36, %v2417_v13  ;;  %v3673_v50 = vpop.f32.mrb[24].mxu1  ;;  %v2025_v53 = vpop.eup %2024  ;;  %2044 = vrcp.f32 %v930_v38 }
 0x13c   : > { %v4914_v12 = vsel %vm3598_vm11, 4294967295, %v4913_v12  ;;  %vm3607_vm12 = vmand %vm3475_vm14, %vm4915_vm9  ;;  %vm4919_vm9 = vcmp.lt.f32.partialorder %v2493_v48, %v3035_v52  ;;  %4936 = vst [vmem:[#allocation16_spill] sm:$0xff] %v3673_v50  ;;  %v937_v49 = vadd.f32 1.0, %v2023_v57  ;;  %v2027_v18 = vpop.eup %2026  ;;  %v936_v57 = vadd.f32 1.0, %v2025_v53 }
 0x13d   : > { %vm3628_vm4 = vmand %vm4920_vm0, %vm4919_vm9  ;;  %vm4929_vm9 = vnez %v4850_v8  ;;  %vm4932_vm0 = vcmp.lt.f32.partialorder %v2453_v36, %v2447_v35  ;;  %v3675_v8 = vpop.f32.mrb[25].mxu0  ;;  %2046 = vrcp.f32 %v935_v56  ;;  %v4956_v56 = vmov 0  ;;  %v2029_v53 = vpop.eup %2028 }
 0x13e   : > { %v4922_v17 = vsel %vm3628_vm4, 4294967295, %v4921_v17  ;;  %vm3637_vm11 = vmand %vm3498_vm13, %vm4923_vm3  ;;  %vm4928_vm3 = vcmp.lt.f32.partialorder %v2479_v43, %v3387_v15  ;;  %4937 = vst [vmem:[#allocation12_spill] sm:$0xff] %v3675_v8  ;;  %vm4943_vm13 = vcmp.ge.f32.partialorder %v2459_v37, %v2417_v13  ;;  %2048 = vrcp.f32 %v937_v49  ;;  %v3759_v49 = vpop.f32.mrb[26].mxu0 }
 0x13f   : > { %vm3657_vm14 = vmand %vm4929_vm9, %vm4928_vm3  ;;  %vm4942_vm9 = vcmp.lt.f32.partialorder %v2459_v37, %v2447_v35  ;;  %v3714_v37 = vpop.f32.mrb[25].mxu1  ;;  %v938_v54 = vadd.f32 1.0, %v2027_v18  ;;  %vm4964_vm3 = vcmp.ge.f32.partialorder %v4852_v60, %v4883_v46  ;;  %4965 = vst [vmem:[#allocation35_spill] sm:$0xff] %v3759_v49  ;;  %v2031_v18 = vpop.eup %2030  ;;  %2050 = vrcp.f32 %v936_v57  ;;  %v4973_v57 = vld [vmem:[#allocation2_spill] sm:$0xff] }
 0x140   : > { %v4931_v9 = vsel %vm3657_vm14, 4294967295, %v4930_v9  ;;  %vm3667_vm4 = vmand %vm4933_vm10, %vm4932_vm0  ;;  %vm4939_vm10 = vcmp.lt.f32.partialorder %v2483_v45, %v3387_v15  ;;  %4950 = vst [vmem:[#allocation30_spill] sm:$0xff] %v3714_v37  ;;  %v4970_v49 = vmov 0  ;;  %v4974_v37 = vld [vmem:[#allocation4_spill] sm:$0xff]  ;;  %v3782_v5 = vpop.f32.mrb[26].mxu1  ;;  %v3784_v50 = vpop.f32.mrb[27].mxu0 }
 0x141   : > { %v4935_v22 = vsel %vm3667_vm4, 4294967295, %v4934_v22  ;;  %vm3685_vm0 = vmand %vm3411_vm2, %vm4939_vm10  ;;  %vm4946_vm4 = vcmp.lt.f32.partialorder %v4882_v4, %v3538_v19  ;;  %vm4955_vm10 = vcmp.lt.f32.partialorder %v4891_v23, %v3538_v19  ;;  %4975 = vst [vmem:[#allocation2_spill] sm:$0xff] %v3782_v5  ;;  %2052 = vrcp.f32 %v938_v54  ;;  %v3806_v10 = vpop.f32.mrb[27].mxu1 }
 0x142   : > { %vm3695_vm14 = vmand %vm4943_vm13, %vm4942_vm9  ;;  %vm4960_vm9 = vnez %v4876_v29  ;;  %v943_v29 = vadd.f32 1.0, %v2029_v53  ;;  %4976 = vst [vmem:[#allocation4_spill] sm:$0xff] %v3784_v50  ;;  %v945_v53 = vadd.f32 1.0, %v2031_v18  ;;  %v734_v52 = vsub.f32 0.0, %v3239_v31 }
 0x143   : > { %vm3706_vm2 = vmand %vm3534_vm7, %vm4946_vm4  ;;  %vm4951_vm7 = vcmp.lt.f32.partialorder %v2481_v44, %v3387_v15  ;;  %v739_v31 = vsub.f32 0.0, %v3264_v6  ;;  %v4991_v6 = vmov 0  ;;  %v741_v18 = vsub.f32 0.0, %v3279_v55 }
 0x144   : > { %v4948_v11 = vsel %vm3706_vm2, 4294967295, %v4947_v11  ;;  %vm3723_vm4 = vmand %vm3437_vm1, %vm4951_vm7  ;;  %vm4959_vm7 = vcmp.lt.f32.partialorder %v2493_v48, %v3387_v15  ;;  %v732_v15 = vsub.f32 0.0, %v3194_v26  ;;  %2054 = vrcp.f32 %v943_v29 }
 0x145   : > { %4949 = vst [vmem:[#allocation29_spill] sm:$0xff] %v4948_v11  ;;  %v4954_v11 = vld [vmem:[#allocation32_spill] sm:$0xff]  ;;  %vm3733_vm13 = vmand %vm3555_vm8, %vm4955_vm10  ;;  %vm4963_vm10 = vcmp.lt.f32.partialorder %v4852_v60, %v4884_v27  ;;  %vm4981_vm8 = vcmp.ge.f32.partialorder %v2469_v39, %v2417_v13  ;;  %2056 = vrcp.f32 %v945_v53  ;;  %v740_v29 = vsub.f32 0.0, %v3281_v42 }
 0x146   : > { %v731_v8 = vsub.f32 0.0, %v4954_v11  ;;  %v4957_v56 = vsel %vm3733_vm13, 4294967295, %v4956_v56  ;;  %vm3746_vm2 = vmand %vm4960_vm9, %vm4959_vm7  ;;  %v733_v11 = vsub.f32 0.0, %v3192_v25  ;;  %vm4966_vm9 = vcmp.lt.f32.partialorder %v2479_v43, %v3583_v63 }
 0x147   : > { %4958 = vst [vmem:[#allocation32_spill] sm:$0xff] %v4957_v56  ;;  %vm1301_vm1 = vmand %vm4964_vm3, %vm4963_vm10  ;;  %v881_v56 = vmul.f32 1.442695, %v776_v14  ;;  %vm4969_vm3 = vcmp.ge.f32.partialorder %v4882_v4, %v4892_v20  ;;  %v2033_v14 = vpop.eup %2032  ;;  %vm4989_vm13 = vnez %v4914_v12  ;;  %v4994_v12 = vmov 0 }
 0x148   : > { %vm3766_vm7 = vmand %vm3517_vm5, %vm4966_vm9  ;;  %vm4977_vm9 = vcmp.lt.f32.partialorder %v2483_v45, %v3583_v63  ;;  %v2035_v50 = vpop.eup %2034  ;;  %v1692_v5 = vsel %vm3570_vm6, %v2033_v14, 0.0  ;;  %vm4988_vm6 = vcmp.ge.f32.partialorder %v2434_v28, %v4883_v46  ;;  %v793_v55 = vmul.f32 1.442695, %v732_v15 }
 0x149   : > { %vm3774_vm10 = vmand %vm1301_vm1, %vm4969_vm3  ;;  %vm4980_vm3 = vcmp.lt.f32.partialorder %v2469_v39, %v2447_v35  ;;  %v791_v39 = vmul.f32 1.442695, %v731_v8  ;;  %v2037_v32 = vpop.eup %2036  ;;  %v1691_v2 = vsel %vm4989_vm13, %v2035_v50, 0.0  ;;  %1748 = vst [vmem:[%s3115_s9 + $0xd0] sm:$0xff] %v1692_v5  ;;  %v795_v8 = vmul.f32 1.442695, %v733_v11 }
 0x14a   : > { %v4971_v49 = vsel %vm3774_vm10, 4294967295, %v4970_v49  ;;  %vm3791_vm1 = vmand %vm3607_vm12, %vm4977_vm9  ;;  %vm4984_vm12 = vcmp.lt.f32.partialorder %v2481_v44, %v3583_v63  ;;  %v2039_v1 = vpop.eup %2038  ;;  %1747 = vst [vmem:[%s3115_s9 + $0xc8] sm:$0xff] %v1691_v2  ;;  %2058 = vpow2.f32 %v881_v56  ;;  %v797_v56 = vmul.f32 1.442695, %v734_v52 }
 0x14b   : > { %4972 = vst [vmem:[#allocation36_spill] sm:$0xff] %v4971_v49  ;;  %v885_v49 = vmul.f32 1.442695, %v778_v0  ;;  %vm3802_vm5 = vmand %vm4981_vm8, %vm4980_vm3  ;;  %vm4987_vm8 = vcmp.lt.f32.partialorder %v2434_v28, %v4884_v27  ;;  %v2041_v5 = vpop.eup %2040  ;;  %vm5002_vm13 = vcmp.lt.f32.partialorder %v2471_v40, %v2447_v35  ;;  %vm5007_vm10 = vcmp.ge.f32.partialorder %v4918_v7, %v4883_v46 }
 0x14c   : > { %vm3815_vm9 = vmand %vm3579_vm15, %vm4984_vm12  ;;  %vm4990_vm15 = vcmp.lt.f32.partialorder %v2493_v48, %v3583_v63  ;;  %v2043_v52 = vpop.eup %2042  ;;  %v1700_v42 = vsel %vm3685_vm0, %v2041_v5, 0.0  ;;  %vm5011_vm0 = vcmp.ge.f32.partialorder %v2483_v45, %v4881_v3  ;;  %v811_v14 = vmul.f32 1.442695, %v741_v18 }
 0x14d   : > { %vm1303_vm3 = vmand %vm4988_vm6, %vm4987_vm8  ;;  %vm4993_vm8 = vcmp.ge.f32.partialorder %v4891_v23, %v4892_v20  ;;  %2060 = vpow2.f32 %v885_v49  ;;  %v747_v49 = vsub.f32 0.0, %v3343_v33  ;;  %v1699_v36 = vsel %vm3723_vm4, %v2043_v52, 0.0  ;;  %1756 = vst [vmem:[%s3115_s9 + $0x110] sm:$0xff] %v1700_v42 }
 0x14e   : > { %vm3834_vm12 = vmand %vm3637_vm11, %vm4990_vm15  ;;  %vm4996_vm15 = vnez %v4922_v17  ;;  %vm5003_vm11 = vcmp.ge.f32.partialorder %v2471_v40, %v2417_v13  ;;  %2062 = vpow2.f32 %v791_v39  ;;  %v807_v40 = vmul.f32 1.442695, %v739_v31  ;;  %1755 = vst [vmem:[%s3115_s9 + $0x108] sm:$0xff] %v1699_v36  ;;  %v5040_v36 = vld [vmem:[#allocation23_spill] sm:$0xff] }
 0x14f   : > { %v4992_v6 = vsel %vm3834_vm12, 4294967295, %v4991_v6  ;;  %vm3842_vm6 = vmand %vm1303_vm3, %vm4993_vm8  ;;  %v1693_v50 = vsel %vm4996_vm15, %v2037_v32, 0.0  ;;  %vm4997_vm3 = vcmp.ge.f32.partialorder %v2479_v43, %v4881_v3  ;;  %vm4998_vm8 = vnez %v4935_v22 }
 0x150   : > { %v4995_v12 = vsel %vm3842_vm6, 4294967295, %v4994_v12  ;;  %vm3858_vm6 = vmand %vm4998_vm8, %vm4997_vm3  ;;  %1749 = vst [vmem:[%s3115_s9 + $0xd8] sm:$0xff] %v1693_v50  ;;  %vm5001_vm15 = vnez %v4931_v9  ;;  %vm5006_vm8 = vcmp.lt.f32.partialorder %v4918_v7, %v4884_v27  ;;  %v742_v9 = vsub.f32 0.0, %v3296_v62  ;;  %v2045_v62 = vpop.eup %2044 }
 0x151   : > { %v1698_v17 = vsel %vm5001_vm15, %v2039_v1, 0.0  ;;  %vm3872_vm3 = vmand %vm5003_vm11, %vm5002_vm13  ;;  %vm5008_vm13 = vcmp.ge.f32.partialorder %v2489_v47, %v4892_v20  ;;  %vm1254_vm15 = vcmp.lt.f32.partialorder %v4918_v7, %v4974_v37  ;;  %2064 = vpow2.f32 %v795_v8  ;;  %v2047_v39 = vpop.eup %2046 }
 0x152   : > { %vm1302_vm12 = vmand %vm5007_vm10, %vm5006_vm8  ;;  %1754 = vst [vmem:[%s3115_s9 + $0x100] sm:$0xff] %v1698_v17  ;;  %v749_v53 = vsub.f32 0.0, %v3369_v16  ;;  %v1701_v41 = vsel %vm3746_vm2, %v2045_v62, 0.0  ;;  %2066 = vpow2.f32 %v793_v55  ;;  %vm5014_vm4 = vcmp.ge.f32.partialorder %v2481_v44, %v4881_v3  ;;  %v2049_v24 = vpop.eup %2048  ;;  %v5031_v55 = vld [vmem:[#allocation3_spill] sm:$0xff] }
 0x153   : > { %vm3889_vm11 = vmand %vm1302_vm12, %vm5008_vm13  ;;  %v809_v31 = vmul.f32 1.442695, %v740_v29  ;;  %vm5018_vm13 = vcmp.ge.f32.partialorder %v2436_v30, %v4883_v46  ;;  %v748_v16 = vsub.f32 0.0, %v3371_v58  ;;  %v1706_v32 = vsel %vm3766_vm7, %v2047_v39, 0.0  ;;  %1757 = vst [vmem:[%s3115_s9 + $0x118] sm:$0xff] %v1701_v41  ;;  %v2051_v58 = vpop.eup %2050  ;;  %v5032_v29 = vld [vmem:[#allocation6_spill] sm:$0xff] }
 0x154   : > { %vm3906_vm12 = vmand %vm3802_vm5, %vm5011_vm0  ;;  %vm5017_vm5 = vcmp.lt.f32.partialorder %v2436_v30, %v4884_v27  ;;  %2068 = vpow2.f32 %v797_v56  ;;  %v813_v38 = vmul.f32 1.442695, %v742_v9  ;;  %v5022_v27 = vld [vmem:[#allocation9_spill] sm:$0xff]  ;;  %v1708_v46 = vsel %vm3791_vm1, %v2049_v24, 0.0  ;;  %1762 = vst [vmem:[%s3115_s9 + $0x140] sm:$0xff] %v1706_v32  ;;  %v2053_v8 = vpop.eup %2052 }
 0x155   : > { %vm3919_vm8 = vmand %vm3695_vm14, %vm5014_vm4  ;;  %vm5019_vm14 = vcmp.ge.f32.partialorder %v2501_v51, %v4892_v20  ;;  %vm1434_vm4 = vcmp.ge.f32.partialorder %v4882_v4, %v5022_v27  ;;  %vm1604_vm7 = vcmp.lt.f32.partialorder %v2483_v45, %v3538_v19  ;;  %2070 = vpow2.f32 %v807_v40  ;;  %1764 = vst [vmem:[%s3115_s9 + $0x150] sm:$0xff] %v1708_v46  ;;  %v2055_v18 = vpop.eup %2054  ;;  %v5049_v24 = vld [vmem:[#allocation25_spill] sm:$0xff]  ;;  %v5062_v20 = vld [vmem:[#allocation27_spill] sm:$0xff] }
 0x156   : > { %vm1304_vm2 = vmand %vm5018_vm13, %vm5017_vm5  ;;  %vm5023_vm13 = vcmp.lt.f32.partialorder %v2479_v43, %v3538_v19  ;;  %v823_v25 = vmul.f32 1.442695, %v747_v49  ;;  %v1707_v26 = vsel %vm3815_vm9, %v2051_v58, 0.0  ;;  %2072 = vpow2.f32 %v811_v14  ;;  %v2057_v11 = vpop.eup %2056  ;;  %v5108_v41 = vld [vmem:[#allocation13_spill] sm:$0xff] }
 0x157   : > { %vm3936_vm0 = vmand %vm1304_vm2, %vm5019_vm14  ;;  %vm5026_vm1 = vcmp.lt.f32.partialorder %v4852_v60, %v4974_v37  ;;  %vm5027_vm14 = vcmp.ge.f32.partialorder %v4852_v60, %v4973_v57  ;;  %v827_v43 = vmul.f32 1.442695, %v749_v53  ;;  %1763 = vst [vmem:[%s3115_s9 + $0x148] sm:$0xff] %v1707_v26  ;;  %2074 = vpow2.f32 %v809_v31  ;;  %v2059_v5 = vpop.eup %2058 }
 0x158   : > { %vm3954_vm2 = vmand %vm3858_vm6, %vm5023_vm13  ;;  %vm5028_vm13 = vnez %v4992_v6  ;;  %v825_v50 = vmul.f32 1.442695, %v748_v16  ;;  %2076 = vpow2.f32 %v813_v38  ;;  %vm5034_vm6 = vcmp.ge.f32.partialorder %v2434_v28, %v4973_v57  ;;  %v2061_v45 = vpop.eup %2060 }
 0x159   : > { %vm1309_vm5 = vmand %vm5027_vm14, %vm5026_vm1  ;;  %v1709_v1 = vsel %vm5028_vm13, %v2053_v8, 0.0  ;;  %vm1436_vm1 = vcmp.ge.f32.partialorder %v4891_v23, %v5022_v27  ;;  %vm1465_vm13 = vcmp.ge.f32.partialorder %v2493_v48, %v4881_v3  ;;  %v1714_v6 = vsel %vm3954_vm2, %v2055_v18, 0.0  ;;  %v2063_v52 = vpop.eup %2062  ;;  %v5064_v8 = vld [vmem:[#allocation33_spill] sm:$0xff] }
 0x15a   : > { %vm3975_vm9 = vmand %vm1309_vm5, %vm1434_vm4  ;;  %1765 = vst [vmem:[%s3115_s9 + $0x158] sm:$0xff] %v1709_v1  ;;  %2078 = vpow2.f32 %v823_v25  ;;  %vm5033_vm14 = vcmp.lt.f32.partialorder %v2434_v28, %v4974_v37  ;;  %v944_v56 = vadd.f32 1.0, %v2059_v5  ;;  %v946_v42 = vadd.f32 1.0, %v2061_v45  ;;  %v5077_v5 = vld [vmem:[#allocation28_spill] sm:$0xff]  ;;  %v5078_v45 = vld [vmem:[#allocation7_spill] sm:$0xff] }
 0x15b   : > { %vm1660_vm4 = vmand %vm3906_vm12, %vm1604_vm7  ;;  %1770 = vst [vmem:[%s3115_s9 + $0x180] sm:$0xff] %v1714_v6  ;;  %vm1435_vm12 = vcmp.ge.f32.partialorder %v2489_v47, %v5022_v27  ;;  %2080 = vpow2.f32 %v827_v43  ;;  %v2065_v49 = vpop.eup %2064  ;;  %v899_v62 = vadd.f32 1.0, %v2063_v52  ;;  %vm1605_vm2 = vcmp.lt.f32.partialorder %v2493_v48, %v3538_v19  ;;  %v5068_v43 = vld [vmem:[#allocation26_spill] sm:$0xff] }
 0x15c   : > { %v1716_v17 = vsel %vm1660_vm4, %v2057_v11, 0.0  ;;  %vm1311_vm10 = vmand %vm5034_vm6, %vm5033_vm14  ;;  %2082 = vpow2.f32 %v825_v50  ;;  %v2067_v15 = vpop.eup %2066  ;;  %vm1558_vm5 = vcmp.lt.f32.partialorder %v4882_v4, %v5040_v36  ;;  %v901_v33 = vadd.f32 1.0, %v2065_v49  ;;  %v5072_v50 = vld [vmem:[#allocation34_spill] sm:$0xff] }
 0x15d   : > { %1772 = vst [vmem:[%s3115_s9 + $0x190] sm:$0xff] %v1716_v17  ;;  %vm4012_vm4 = vmand %vm1311_vm10, %vm1436_vm1  ;;  %vm1603_vm1 = vcmp.lt.f32.partialorder %v2481_v44, %v3538_v19  ;;  %2084 = vrcp.f32 %v944_v56  ;;  %v5041_v14 = vmov 0  ;;  %v900_v39 = vadd.f32 1.0, %v2067_v15  ;;  %v5079_v56 = vld [vmem:[#allocation10_spill] sm:$0xff]  ;;  %v5088_v15 = vld [vmem:[#allocation11_spill] sm:$0xff] }
 0x15e   : > { %vm4027_vm10 = vmand %vm3872_vm3, %vm1465_vm13  ;;  %vm5039_vm13 = vcmp.ge.f32.partialorder %v4918_v7, %v4973_v57  ;;  %2086 = vrcp.f32 %v946_v42  ;;  %v2069_v53 = vpop.eup %2068  ;;  %vm5048_vm7 = vcmp.ge.f32.partialorder %v2436_v30, %v4973_v57  ;;  %vm5050_vm6 = vnez %v5049_v24  ;;  %v5055_v57 = vld [vmem:[#allocation31_spill] sm:$0xff]  ;;  %v5081_v42 = vld [vmem:[#allocation36_spill] sm:$0xff] }
 0x15f   : > { %vm1310_vm14 = vmand %vm5039_vm13, %vm1254_vm15  ;;  %2088 = vrcp.f32 %v899_v62  ;;  %v2071_v31 = vpop.eup %2070  ;;  %v902_v16 = vadd.f32 1.0, %v2069_v53  ;;  %v5057_v38 = vmov 0  ;;  %v5060_v46 = vmov 0  ;;  %v5114_v44 = vld [vmem:[#allocation5_spill] sm:$0xff] }
 0x160   : > { %vm4054_vm3 = vmand %vm1310_vm14, %vm1435_vm12  ;;  %2090 = vrcp.f32 %v901_v33  ;;  %v2073_v54 = vpop.eup %2072  ;;  %v907_v32 = vadd.f32 1.0, %v2071_v31  ;;  %v755_v18 = vsub.f32 0.0, %v5068_v43  ;;  %v5074_v11 = vmov 0  ;;  %v5089_v33 = vld [vmem:[#allocation19_spill] sm:$0xff] }
 0x161   : > { %v5042_v14 = vsel %vm4054_vm3, 4294967295, %v5041_v14  ;;  %vm4069_vm12 = vmand %vm3919_vm8, %vm1603_vm1  ;;  %vm5047_vm1 = vcmp.lt.f32.partialorder %v2436_v30, %v4974_v37  ;;  %2092 = vrcp.f32 %v900_v39  ;;  %v2075_v37 = vpop.eup %2074  ;;  %vm5056_vm3 = vnez %v5055_v57 }
 0x162   : > { %vm4086_vm8 = vmand %vm4027_vm10, %vm1605_vm2  ;;  %2094 = vrcp.f32 %v902_v16  ;;  %v909_v58 = vadd.f32 1.0, %v2073_v54  ;;  %v2077_v25 = vpop.eup %2076  ;;  %v908_v26 = vadd.f32 1.0, %v2075_v37  ;;  %v757_v17 = vsub.f32 0.0, %v5077_v5  ;;  %v5096_v54 = vld [vmem:[#allocation15_spill] sm:$0xff] }
 0x163   : > { %vm1312_vm15 = vmand %vm5048_vm7, %vm5047_vm1  ;;  %vm5053_vm7 = vcmp.ge.f32.partialorder %v2501_v51, %v5022_v27  ;;  %v750_v27 = vsub.f32 0.0, %v3401_v61  ;;  %v5066_v61 = vmov 0  ;;  %2096 = vrcp.f32 %v907_v32 }
 0x164   : > { %vm4101_vm14 = vmand %vm5050_vm6, %vm1558_vm5  ;;  %vm5054_vm6 = vcmp.lt.f32.partialorder %v4891_v23, %v5040_v36  ;;  %vm5065_vm5 = vnez %v5064_v8  ;;  %v2079_v1 = vpop.eup %2078  ;;  %2098 = vrcp.f32 %v909_v58  ;;  %v910_v6 = vadd.f32 1.0, %v2077_v25  ;;  %v5101_v58 = vld [vmem:[#allocation22_spill] sm:$0xff] }
 0x165   : > { %vm1493_vm1 = vmand %vm1312_vm15, %vm5053_vm7  ;;  %vm5059_vm15 = vcmp.lt.f32.partialorder %v2501_v51, %v2880_v59  ;;  %v2081_v52 = vpop.eup %2080  ;;  %vm5082_vm13 = vnez %v5081_v42  ;;  %2100 = vrcp.f32 %v908_v26  ;;  %v915_v49 = vadd.f32 1.0, %v2079_v1  ;;  %v5119_v42 = vld [vmem:[#allocation8_spill] sm:$0xff] }
 0x166   : > { %vm4121_vm2 = vmand %vm5056_vm3, %vm5054_vm6  ;;  %vm5063_vm6 = vcmp.lt.f32.partialorder %v2489_v47, %v5040_v36  ;;  %v2083_v53 = vpop.eup %2082  ;;  %2102 = vrcp.f32 %v910_v6  ;;  %v917_v31 = vadd.f32 1.0, %v2081_v52  ;;  %v829_v16 = vmul.f32 1.442695, %v750_v27 }
 0x167   : > { %v5058_v38 = vsel %vm4121_vm2, 4294967295, %v5057_v38  ;;  %vm4129_vm7 = vmand %vm1493_vm1, %vm5059_vm15  ;;  %vm5069_vm1 = vcmp.lt.f32.partialorder %v4852_v60, %v5032_v29  ;;  %vm5070_vm15 = vcmp.ge.f32.partialorder %v4852_v60, %v5031_v55  ;;  %v758_v24 = vsub.f32 0.0, %v5096_v54 }
 0x168   : > { %v5061_v46 = vsel %vm4129_vm7, 4294967295, %v5060_v46  ;;  %vm4142_vm10 = vmand %vm5065_vm5, %vm5063_vm6  ;;  %vm5071_vm5 = vcmp.lt.f32.partialorder %v2501_v51, %v5040_v36  ;;  %vm5073_vm6 = vnez %v5072_v50  ;;  %v756_v36 = vsub.f32 0.0, %v5088_v15 }
 0x169   : > { %v5067_v61 = vsel %vm4142_vm10, 4294967295, %v5066_v61  ;;  %vm1317_vm3 = vmand %vm5070_vm15, %vm5069_vm1  ;;  %vm5076_vm10 = vcmp.ge.f32.partialorder %v4882_v4, %v2445_v34  ;;  %2104 = vrcp.f32 %v915_v49  ;;  %v916_v37 = vadd.f32 1.0, %v2083_v53  ;;  %v5124_v53 = vld [vmem:[#allocation14_spill] sm:$0xff] }
 0x16a   : > { %vm4160_vm7 = vmand %vm5073_vm6, %vm5071_vm5  ;;  %vm5080_vm6 = vcmp.lt.f32.partialorder %v4882_v4, %v2921_v21  ;;  %vm5091_vm5 = vnez %v4995_v12  ;;  %v2085_v12 = vpop.eup %2084  ;;  %v839_v57 = vmul.f32 1.442695, %v755_v18  ;;  %v763_v27 = vsub.f32 0.0, %v5101_v58 }
 0x16b   : > { %v5075_v11 = vsel %vm4160_vm7, 4294967295, %v5074_v11  ;;  %vm1498_vm2 = vmand %vm1317_vm3, %vm5076_vm10  ;;  %vm5085_vm10 = vcmp.lt.f32.partialorder %v4882_v4, %v5062_v20  ;;  %v2087_v25 = vpop.eup %2086  ;;  %v1715_v22 = vsel %vm4069_vm12, %v2085_v12, 0.0  ;;  %2106 = vrcp.f32 %v917_v31 }
 0x16c   : > { %vm4179_vm7 = vmand %vm5082_vm13, %vm5080_vm6  ;;  %vm5090_vm6 = vcmp.lt.f32.partialorder %v4891_v23, %v2921_v21  ;;  %vm5095_vm13 = vcmp.ge.f32.partialorder %v2434_v28, %v5031_v55  ;;  %v843_v26 = vmul.f32 1.442695, %v757_v17  ;;  %v765_v18 = vsub.f32 0.0, %v5108_v41  ;;  %v2089_v1 = vpop.eup %2088  ;;  %1771 = vst [vmem:[%s3115_s9 + $0x188] sm:$0xff] %v1715_v22 }
 0x16d   : > { %vm4186_vm3 = vmand %vm1498_vm2, %vm5085_vm10  ;;  %vm5094_vm10 = vcmp.lt.f32.partialorder %v2434_v28, %v5032_v29  ;;  %vm5100_vm2 = vcmp.ge.f32.partialorder %v4891_v23, %v2445_v34  ;;  %2108 = vrcp.f32 %v916_v37  ;;  %v841_v50 = vmul.f32 1.442695, %v756_v36  ;;  %v2091_v5 = vpop.eup %2090 }
 0x16e   : > { %vm4200_vm1 = vmand %vm5091_vm5, %vm5090_vm6  ;;  %vm5097_vm5 = vcmp.lt.f32.partialorder %v2489_v47, %v2921_v21  ;;  %v764_v6 = vsub.f32 0.0, %v5114_v44  ;;  %v1670_v0 = vsel %vm4101_vm14, %v2089_v1, 0.0  ;;  %2110 = vpow2.f32 %v829_v16  ;;  %v2093_v49 = vpop.eup %2092 }
 0x16f   : > { %vm1319_vm15 = vmand %vm5095_vm13, %vm5094_vm10  ;;  %vm1187_vm10 = vcmp.ge.f32.partialorder %v2434_v28, %v5078_v45  ;;  %v845_v52 = vmul.f32 1.442695, %v758_v24  ;;  %v766_v48 = vsub.f32 0.0, %v5119_v42  ;;  %1726 = vst [vmem:[%s3115_s9 + $0x20] sm:$0xff] %v1670_v0  ;;  %vm5120_vm14 = vnez %v5058_v38  ;;  %v2095_v16 = vpop.eup %2094  ;;  %v5128_v24 = vld [vmem:[#allocation16_spill] sm:$0xff] }
 0x170   : > { %vm4218_vm6 = vmand %vm3889_vm11, %vm5097_vm5  ;;  %vm5102_vm11 = vcmp.lt.f32.partialorder %v2501_v51, %v2921_v21  ;;  %v1717_v21 = vsel %vm4086_vm8, %v2087_v25, 0.0  ;;  %v1672_v15 = vsel %vm5120_vm14, %v2091_v5, 0.0  ;;  %2112 = vpow2.f32 %v839_v57  ;;  %v2097_v37 = vpop.eup %2096 }
 0x171   : > { %vm1500_vm13 = vmand %vm1319_vm15, %vm5100_vm2  ;;  %vm5105_vm15 = vcmp.lt.f32.partialorder %v4891_v23, %v5062_v20  ;;  %1773 = vst [vmem:[%s3115_s9 + $0x198] sm:$0xff] %v1717_v21  ;;  %v855_v36 = vmul.f32 1.442695, %v763_v27  ;;  %v771_v31 = vsub.f32 0.0, %v5124_v53  ;;  %2114 = vpow2.f32 %v843_v26 }
 0x172   : > { %vm4235_vm5 = vmand %vm3936_vm0, %vm5102_vm11  ;;  %vm5109_vm0 = vcmp.lt.f32.partialorder %v4882_v4, %v2880_v59  ;;  %vm5113_vm11 = vcmp.ge.f32.partialorder %v4918_v7, %v5031_v55  ;;  %1728 = vst [vmem:[%s3115_s9 + $0x30] sm:$0xff] %v1672_v15  ;;  %v859_v38 = vmul.f32 1.442695, %v765_v18  ;;  %v773_v12 = vsub.f32 0.0, %v5128_v24 }
 0x173   : > { %vm4242_vm2 = vmand %vm1500_vm13, %vm5105_vm15  ;;  %vm5112_vm13 = vcmp.lt.f32.partialorder %v4918_v7, %v5032_v29  ;;  %vm5129_vm14 = vnez %v5075_v11  ;;  %2116 = vpow2.f32 %v841_v50  ;;  %v1678_v27 = vsel %vm4179_vm7, %v2097_v37, 0.0 }
 0x174   : > { %vm4255_vm12 = vmand %vm3975_vm9, %vm5109_vm0  ;;  %vm5115_vm9 = vcmp.lt.f32.partialorder %v4891_v23, %v2880_v59  ;;  %vm5118_vm0 = vcmp.ge.f32.partialorder %v2489_v47, %v2445_v34  ;;  %v1673_v57 = vsel %vm5129_vm14, %v2095_v16, 0.0  ;;  %2118 = vpow2.f32 %v845_v52  ;;  %1734 = vst [vmem:[%s3115_s9 + $0x60] sm:$0xff] %v1678_v27 }
 0x175   : > { %vm1318_vm8 = vmand %vm5113_vm11, %vm5112_vm13  ;;  %1729 = vst [vmem:[%s3115_s9 + $0x38] sm:$0xff] %v1673_v57  ;;  %v861_v25 = vmul.f32 1.442695, %v766_v48  ;;  %2120 = vpow2.f32 %v855_v36  ;;  %vm5136_vm7 = vcmp.lt.f32.partialorder %v4852_v60, %v5079_v56  ;;  %v5166_v48 = vld [vmem:[#allocation18_spill] sm:$0xff] }
 0x176   : > { %vm4274_vm15 = vmand %vm4012_vm4, %vm5115_vm9  ;;  %vm5121_vm4 = vcmp.lt.f32.partialorder %v2489_v47, %v5062_v20  ;;  %vm5126_vm9 = vcmp.lt.f32.partialorder %v2436_v30, %v5032_v29  ;;  %v5131_v29 = vld [vmem:[#allocation12_spill] sm:$0xff]  ;;  %2122 = vpow2.f32 %v859_v38 }
 0x177   : > { %vm1499_vm13 = vmand %vm1318_vm8, %vm5118_vm0  ;;  %vm5125_vm8 = vnez %v5067_v61  ;;  %vm5127_vm0 = vcmp.ge.f32.partialorder %v2436_v30, %v5031_v55  ;;  %v857_v61 = vmul.f32 1.442695, %v764_v6  ;;  %v772_v58 = vsub.f32 0.0, %v5131_v29  ;;  %v2099_v55 = vpop.eup %2098  ;;  %v5152_v29 = vld [vmem:[#allocation2_spill] sm:$0xff] }
 0x178   : > { %vm4288_vm11 = vmand %vm1499_vm13, %vm5121_vm4  ;;  %v1671_v54 = vsel %vm5125_vm8, %v2093_v49, 0.0  ;;  %vm5130_vm4 = vcmp.ge.f32.partialorder %v2501_v51, %v2445_v34  ;;  %v5135_v34 = vld [vmem:[#allocation30_spill] sm:$0xff]  ;;  %v2101_v26 = vpop.eup %2100  ;;  %v1680_v41 = vsel %vm4200_vm1, %v2099_v55, 0.0  ;;  %vm5138_vm1 = vcmp.ge.f32.partialorder %v4882_v4, %v5089_v33 }
 0x179   : > { %vm1320_vm13 = vmand %vm5127_vm0, %vm5126_vm9  ;;  %1727 = vst [vmem:[%s3115_s9 + $0x28] sm:$0xff] %v1671_v54  ;;  %vm5132_vm9 = vcmp.lt.f32.partialorder %v2501_v51, %v5062_v20  ;;  %v774_v22 = vsub.f32 0.0, %v5135_v34  ;;  %v871_v20 = vmul.f32 1.442695, %v771_v31  ;;  %v2103_v40 = vpop.eup %2102  ;;  %v1679_v18 = vsel %vm4218_vm6, %v2101_v26, 0.0  ;;  %v5156_v34 = vld [vmem:[#allocation4_spill] sm:$0xff] }
 0x17a   : > { %vm1501_vm8 = vmand %vm1320_vm13, %vm5130_vm4  ;;  %vm5137_vm13 = vcmp.ge.f32.partialorder %v4852_v60, %v5078_v45  ;;  %vm1271_vm4 = vcmp.lt.f32.partialorder %v2434_v28, %v5079_v56  ;;  %1736 = vst [vmem:[%s3115_s9 + $0x70] sm:$0xff] %v1680_v41  ;;  %v875_v60 = vmul.f32 1.442695, %v773_v12  ;;  %v2105_v1 = vpop.eup %2104  ;;  %v1681_v21 = vsel %vm4235_vm5, %v2103_v40, 0.0  ;;  %v5151_v12 = vld [vmem:[#allocation35_spill] sm:$0xff] }
 0x17b   : > { %vm4316_vm0 = vmand %vm1501_vm8, %vm5132_vm9  ;;  %vm1452_vm9 = vcmp.ge.f32.partialorder %v4891_v23, %v5089_v33  ;;  %1735 = vst [vmem:[%s3115_s9 + $0x68] sm:$0xff] %v1679_v18  ;;  %vm5141_vm6 = vcmp.lt.f32.partialorder %v2489_v47, %v2880_v59  ;;  %2124 = vpow2.f32 %v857_v61  ;;  %v873_v50 = vmul.f32 1.442695, %v772_v58  ;;  %v2107_v44 = vpop.eup %2106 }
 0x17c   : > { %vm1325_vm14 = vmand %vm5137_vm13, %vm5136_vm7  ;;  %vm5142_vm7 = vnez %v5042_v14  ;;  %1737 = vst [vmem:[%s3115_s9 + $0x78] sm:$0xff] %v1681_v21  ;;  %v1686_v8 = vsel %vm4255_vm12, %v2105_v1, 0.0  ;;  %2126 = vpow2.f32 %v861_v25  ;;  %v877_v59 = vmul.f32 1.442695, %v774_v22  ;;  %v2109_v14 = vpop.eup %2108 }
 0x17d   : > { %vm4338_vm8 = vmand %vm1325_vm14, %vm5138_vm1  ;;  %vm1186_vm14 = vcmp.ge.f32.partialorder %v4918_v7, %v5078_v45  ;;  %vm1270_vm1 = vcmp.lt.f32.partialorder %v4918_v7, %v5079_v56  ;;  %1742 = vst [vmem:[%s3115_s9 + $0xa0] sm:$0xff] %v1686_v8  ;;  %v1688_v6 = vsel %vm4274_vm15, %v2107_v44, 0.0  ;;  %2128 = vpow2.f32 %v871_v20  ;;  %v2111_v28 = vpop.eup %2110 }
 0x17e   : > { %vm4352_vm13 = vmand %vm5142_vm7, %vm5141_vm6  ;;  %1744 = vst [vmem:[%s3115_s9 + $0xb0] sm:$0xff] %v1688_v6  ;;  %2130 = vpow2.f32 %v875_v60  ;;  %v2113_v0 = vpop.eup %2112  ;;  %v918_v17 = vadd.f32 1.0, %v2111_v28  ;;  %vm1453_vm7 = vcmp.ge.f32.partialorder %v2501_v51, %v5089_v33  ;;  %v779_v37 = vsub.f32 0.0, %v5151_v12 }
 0x17f   : > { %vm1327_vm5 = vmand %vm1187_vm10, %vm1271_vm4  ;;  %vm1451_vm10 = vcmp.ge.f32.partialorder %v2489_v47, %v5089_v33  ;;  %v1687_v5 = vsel %vm4352_vm13, %v2109_v14, 0.0  ;;  %vm1188_vm4 = vcmp.ge.f32.partialorder %v2436_v30, %v5078_v45  ;;  %2132 = vpow2.f32 %v873_v50  ;;  %v2115_v52 = vpop.eup %2114  ;;  %v5161_v50 = vld [vmem:[#allocation24_spill] sm:$0xff] }
 0x180   : > { %vm4375_vm12 = vmand %vm1327_vm5, %vm1452_vm9  ;;  %1743 = vst [vmem:[%s3115_s9 + $0xa8] sm:$0xff] %v1687_v5  ;;  %vm1272_vm9 = vcmp.lt.f32.partialorder %v2436_v30, %v5079_v56  ;;  %v923_v42 = vadd.f32 1.0, %v2113_v0  ;;  %2134 = vpow2.f32 %v877_v59  ;;  %v2117_v49 = vpop.eup %2116  ;;  %v925_v45 = vadd.f32 1.0, %v2115_v52  ;;  %v5162_v0 = vld [vmem:[#allocation17_spill] sm:$0xff]  ;;  %v5164_v52 = vld [vmem:[#allocation20_spill] sm:$0xff] }
 0x181   : > { %vm1326_vm15 = vmand %vm1186_vm14, %vm1270_vm1  ;;  %2136 = vrcp.f32 %v918_v17  ;;  %v2119_v15 = vpop.eup %2118  ;;  %v924_v56 = vadd.f32 1.0, %v2117_v49  ;;  %vm1202_vm14 = vcmp.ge.f32.partialorder %v4918_v7, %v2417_v13  ;;  %vm1286_vm5 = vcmp.lt.f32.partialorder %v4918_v7, %v2447_v35 }
 0x182   : > { %vm4398_vm6 = vmand %vm1326_vm15, %vm1451_vm10  ;;  %2138 = vrcp.f32 %v923_v42  ;;  %v2121_v36 = vpop.eup %2120  ;;  %v926_v53 = vadd.f32 1.0, %v2119_v15  ;;  %vm1467_vm10 = vcmp.ge.f32.partialorder %v2489_v47, %v4881_v3  ;;  %vm1469_vm15 = vcmp.ge.f32.partialorder %v2501_v51, %v4881_v3 }
 0x183   : > { %vm1328_vm13 = vmand %vm1188_vm4, %vm1272_vm9  ;;  %2140 = vrcp.f32 %v925_v45  ;;  %v2123_v33 = vpop.eup %2122  ;;  %v931_v16 = vadd.f32 1.0, %v2121_v36  ;;  %v781_v58 = vsub.f32 0.0, %v5152_v29  ;;  %v780_v22 = vsub.f32 0.0, %v5156_v34  ;;  %v5168_v45 = vld [vmem:[#allocation21_spill] sm:$0xff] }
 0x184   : > { %vm4408_vm1 = vmand %vm1328_vm13, %vm1453_vm7  ;;  %2142 = vrcp.f32 %v924_v56  ;;  %v933_v38 = vadd.f32 1.0, %v2123_v33  ;;  %vm1288_vm7 = vcmp.lt.f32.partialorder %v2436_v30, %v2447_v35  ;;  %v782_v20 = vsub.f32 0.0, %v3806_v10 }
 0x185   : > { %v2125_v54 = vpop.eup %2124  ;;  %2144 = vrcp.f32 %v926_v53  ;;  %vm1342_vm4 = vmand %vm1202_vm14, %vm1286_vm5  ;;  %vm1609_vm14 = vcmp.lt.f32.partialorder %v2501_v51, %v3538_v19  ;;  %vm5153_vm5 = vcmp.lt.f32.partialorder %v2489_v47, %v3538_v19  ;;  %v887_v60 = vmul.f32 1.442695, %v779_v37 }
 0x186   : > { %v2127_v7 = vpop.eup %2126  ;;  %2146 = vrcp.f32 %v931_v16  ;;  %v932_v24 = vadd.f32 1.0, %v2125_v54  ;;  %vm1523_vm13 = vmand %vm1342_vm4, %vm1467_vm10  ;;  %vm5157_vm10 = vcmp.ge.f32.partialorder %v2436_v30, %v2417_v13  ;;  %v891_v10 = vmul.f32 1.442695, %v781_v58 }
 0x187   : > { %v2129_v57 = vpop.eup %2128  ;;  %2148 = vrcp.f32 %v933_v38  ;;  %v934_v61 = vadd.f32 1.0, %v2127_v7  ;;  %vm4432_vm9 = vmand %vm1523_vm13, %vm5153_vm5  ;;  %v889_v21 = vmul.f32 1.442695, %v780_v22  ;;  %v893_v44 = vmul.f32 1.442695, %v782_v20 }
 0x188   : > { %v2131_v27 = vpop.eup %2130  ;;  %2150 = vrcp.f32 %v932_v24  ;;  %v939_v25 = vadd.f32 1.0, %v2129_v57  ;;  %vm1344_vm4 = vmand %vm5157_vm10, %vm1288_vm7  ;;  %vm5160_vm7 = vnez %v5061_v46  ;;  %vm1598_vm10 = vcmp.lt.f32.partialorder %v4882_v4, %v3583_v63  ;;  %v5170_v24 = vld [vmem:[#allocation29_spill] sm:$0xff]  ;;  %v5172_v57 = vld [vmem:[#allocation32_spill] sm:$0xff] }
 0x189   : > { %v2133_v26 = vpop.eup %2132  ;;  %2152 = vrcp.f32 %v934_v61  ;;  %v941_v41 = vadd.f32 1.0, %v2131_v27  ;;  %vm1525_vm13 = vmand %vm1344_vm4, %vm1469_vm15  ;;  %vm1590_vm15 = vcmp.lt.f32.partialorder %v4882_v4, %v5161_v50 }
 0x18a   : > { %v2135_v40 = vpop.eup %2134  ;;  %2154 = vrcp.f32 %v939_v25  ;;  %v940_v18 = vadd.f32 1.0, %v2133_v26  ;;  %vm4450_vm5 = vmand %vm1525_vm13, %vm1609_vm14  ;;  %vm1592_vm14 = vcmp.lt.f32.partialorder %v4891_v23, %v5161_v50  ;;  %vm1599_vm13 = vcmp.lt.f32.partialorder %v2489_v47, %v3583_v63 }
 0x18b   : > { %v2137_v30 = vpop.eup %2136  ;;  %2156 = vrcp.f32 %v941_v41  ;;  %v942_v35 = vadd.f32 1.0, %v2135_v40 }
 0x18c   : > { %v2139_v1 = vpop.eup %2138  ;;  %v1689_v3 = vsel %vm5160_vm7, %v2137_v30, 0.0  ;;  %2158 = vrcp.f32 %v940_v18  ;;  %vm1601_vm7 = vcmp.lt.f32.partialorder %v2501_v51, %v3583_v63 }
 0x18d   : > { %v2141_v32 = vpop.eup %2140  ;;  %1745 = vst [vmem:[%s3115_s9 + $0xb8] sm:$0xff] %v1689_v3  ;;  %v1694_v19 = vsel %vm4186_vm3, %v2139_v1, 0.0  ;;  %2160 = vrcp.f32 %v942_v35  ;;  %vm1591_vm3 = vcmp.lt.f32.partialorder %v2489_v47, %v5161_v50 }
 0x18e   : > { %v2143_v8 = vpop.eup %2142  ;;  %1750 = vst [vmem:[%s3115_s9 + $0xe0] sm:$0xff] %v1694_v19  ;;  %v1696_v46 = vsel %vm4242_vm2, %v2141_v32, 0.0  ;;  %2162 = vpow2.f32 %v887_v60  ;;  %vm1646_vm2 = vmand %vm4338_vm8, %vm1590_vm15  ;;  %vm1600_vm8 = vcmp.lt.f32.partialorder %v4891_v23, %v3583_v63 }
 0x18f   : > { %v2145_v59 = vpop.eup %2144  ;;  %1752 = vst [vmem:[%s3115_s9 + $0xf0] sm:$0xff] %v1696_v46  ;;  %v1695_v62 = vsel %vm4288_vm11, %v2143_v8, 0.0  ;;  %2164 = vpow2.f32 %v891_v10  ;;  %vm1593_vm11 = vcmp.lt.f32.partialorder %v2501_v51, %v5161_v50  ;;  %vm1647_vm4 = vmand %vm4398_vm6, %vm1591_vm3  ;;  %vm5163_vm6 = vnez %v5162_v0 }
 0x190   : > { %v2147_v14 = vpop.eup %2146  ;;  %1751 = vst [vmem:[%s3115_s9 + $0xe8] sm:$0xff] %v1695_v62  ;;  %v1697_v43 = vsel %vm4316_vm0, %v2145_v59, 0.0  ;;  %2166 = vpow2.f32 %v889_v21  ;;  %vm1648_vm0 = vmand %vm4375_vm12, %vm1592_vm14  ;;  %vm5167_vm3 = vnez %v5166_v48 }
 0x191   : > { %v2149_v9 = vpop.eup %2148  ;;  %1753 = vst [vmem:[%s3115_s9 + $0xf8] sm:$0xff] %v1697_v43  ;;  %v1702_v6 = vsel %vm1646_vm2, %v2147_v14, 0.0  ;;  %2168 = vpow2.f32 %v893_v44  ;;  %vm1649_vm12 = vmand %vm4408_vm1, %vm1593_vm11  ;;  %vm5165_vm1 = vnez %v5164_v52  ;;  %vm5169_vm11 = vnez %v5168_v45 }
 0x192   : > { %v2151_v11 = vpop.eup %2150  ;;  %1758 = vst [vmem:[%s3115_s9 + $0x120] sm:$0xff] %v1702_v6  ;;  %v1704_v39 = vsel %vm1648_vm0, %v2149_v9, 0.0  ;;  %vm1654_vm15 = vmand %vm5163_vm6, %vm1598_vm10  ;;  %vm5171_vm0 = vnez %v5170_v24 }
 0x193   : > { %v2153_v28 = vpop.eup %2152  ;;  %1760 = vst [vmem:[%s3115_s9 + $0x130] sm:$0xff] %v1704_v39  ;;  %v1703_v2 = vsel %vm1647_vm4, %v2151_v11, 0.0  ;;  %vm1656_vm14 = vmand %vm5165_vm1, %vm1600_vm8  ;;  %vm5173_vm8 = vnez %v5172_v57 }
 0x194   : > { %v2155_v5 = vpop.eup %2154  ;;  %1759 = vst [vmem:[%s3115_s9 + $0x128] sm:$0xff] %v1703_v2  ;;  %v1705_v47 = vsel %vm1649_vm12, %v2153_v28, 0.0  ;;  %vm1655_vm2 = vmand %vm5167_vm3, %vm1599_vm13 }
 0x195   : > { %v2157_v17 = vpop.eup %2156  ;;  %1761 = vst [vmem:[%s3115_s9 + $0x138] sm:$0xff] %v1705_v47  ;;  %v1710_v42 = vsel %vm1654_vm15, %v2155_v5, 0.0  ;;  %vm1657_vm10 = vmand %vm5169_vm11, %vm1601_vm7 }
 0x196   : > { %v2159_v51 = vpop.eup %2158  ;;  %1766 = vst [vmem:[%s3115_s9 + $0x160] sm:$0xff] %v1710_v42  ;;  %v1712_v4 = vsel %vm1656_vm14, %v2157_v17, 0.0 }
 0x197   : > { %v2161_v49 = vpop.eup %2160  ;;  %1768 = vst [vmem:[%s3115_s9 + $0x170] sm:$0xff] %v1712_v4  ;;  %v1711_v15 = vsel %vm1655_vm2, %v2159_v51, 0.0 }
 0x198   : > { %v2163_v56 = vpop.eup %2162  ;;  %1767 = vst [vmem:[%s3115_s9 + $0x168] sm:$0xff] %v1711_v15  ;;  %v1713_v23 = vsel %vm1657_vm10, %v2161_v49, 0.0 }
 0x199   : > { %v2165_v63 = vpop.eup %2164  ;;  %1769 = vst [vmem:[%s3115_s9 + $0x178] sm:$0xff] %v1713_v23  ;;  %v947_v36 = vadd.f32 1.0, %v2163_v56 }
 0x19a   : > { %v2167_v53 = vpop.eup %2166  ;;  %v949_v31 = vadd.f32 1.0, %v2165_v63 }
 0x19b   : > { %v2169_v33 = vpop.eup %2168  ;;  %2170 = vrcp.f32 %v947_v36  ;;  %v948_v16 = vadd.f32 1.0, %v2167_v53 }
 0x19c   : > { %2172 = vrcp.f32 %v949_v31  ;;  %v950_v54 = vadd.f32 1.0, %v2169_v33 }
 0x19d   : > { %2174 = vrcp.f32 %v948_v16 }
 0x19e   : > { %2176 = vrcp.f32 %v950_v54 }
 0x1a5   : > { %v2171_v38 = vpop.eup %2170 }
 0x1a6   : > { %v2173_v7 = vpop.eup %2172  ;;  %v1718_v12 = vsel %vm5171_vm0, %v2171_v38, 0.0 }
 0x1a7   : > { %v2175_v37 = vpop.eup %2174  ;;  %1774 = vst [vmem:[%s3115_s9 + $0x1a0] sm:$0xff] %v1718_v12  ;;  %v1720_v61 = vsel %vm5173_vm8, %v2173_v7, 0.0 }
 0x1a8   : > { %v2177_v29 = vpop.eup %2176  ;;  %1776 = vst [vmem:[%s3115_s9 + $0x1b0] sm:$0xff] %v1720_v61  ;;  %v1719_v58 = vsel %vm4432_vm9, %v2175_v37, 0.0 }
 0x1a9   : > { %1775 = vst [vmem:[%s3115_s9 + $0x1a8] sm:$0xff] %v1719_v58  ;;  %v1721_v27 = vsel %vm4450_vm5, %v2177_v29, 0.0 }
 0x1aa   : > { %1777 = vst [vmem:[%s3115_s9 + $0x1b8] sm:$0xff] %v1721_v27 }
 0x1ab PF: > { %s14_s15 = sadd.s32 1, %s2184_s15  }
 0x1ac   : > { %p11_p4 = scmp.ge.s32.totalorder %s14_s15, 4  }
 0x1ae   :  { %13 = sbr.rel (!%p11_p4) target bundleno = 1 (0x1), region = 73 }

</bundles_post_ra>
